<compile_context>
chip_gen: v7x
topology: tpu7x:2x2x1
jax: 0.10.0
libtpu: 0.0.40
codegen_flags: <defaults>
</compile_context>

<pallas_src>
import functools
import math

import jax
import jax.numpy as jnp
from jax.experimental import pallas as pl
from jax.experimental.pallas import tpu as pltpu

_INV_SQRT2 = 1.0 / math.sqrt(2.0)


def _erf(x):
    # Abramowitz & Stegun 7.1.26 rational approximation (|err| <= ~1.5e-7 in f32),
    # matching torch.nn.GELU()'s exact (erf-based) definition.
    # Perf: the divide goes to the EUP via pl.reciprocal (free slot next to exp);
    # sign/abs multiply is replaced by a single select using odd symmetry.
    a1, a2, a3, a4, a5 = 0.254829592, -0.284496736, 1.421413741, -1.453152027, 1.061405429
    p = 0.3275911
    ax = jnp.abs(x)
    t = pl.reciprocal(1.0 + p * ax, approx=True)
    poly = ((((a5 * t + a4) * t + a3) * t + a2) * t + a1) * t
    e = 1.0 - poly * jnp.exp(-ax * ax)
    return jnp.where(x < 0, -e, e)


def _gelu_exact(x):
    return 0.5 * x * (1.0 + _erf(x * _INV_SQRT2))


def _ffn_kernel(x_ref, w1_ref, b1_ref, w2_ref, b2_ref, o_ref, acc_ref):
    # Grid: (row tiles [parallel], hidden tiles [arbitrary / reduction]).
    # x: (row_tile, D); w1: (D, h_tile); b1: (1, h_tile); w2: (h_tile, D); b2: (1, D)
    h_idx = pl.program_id(1)

    @pl.when(h_idx == 0)
    def _():
        acc_ref[...] = jnp.zeros_like(acc_ref)

    # First projection (this hidden chunk): native-dtype MXU operands, f32 accumulation.
    h = jnp.dot(x_ref[...], w1_ref[...], preferred_element_type=jnp.float32)
    h = h + b1_ref[...].astype(jnp.float32)

    # Exact GELU (erf-based), f32 on VPU/EUP; only a (row_tile, h_tile) chunk is live.
    h = _gelu_exact(h)

    # Second projection: feed the MXU in the weight's native dtype, accumulate in f32.
    acc_ref[...] += jnp.dot(h.astype(w2_ref.dtype), w2_ref[...],
                            preferred_element_type=jnp.float32)

    @pl.when(h_idx == pl.num_programs(1) - 1)
    def _():
        y = acc_ref[...] + b2_ref[...].astype(jnp.float32)
        o_ref[...] = y.astype(o_ref.dtype)


def _vmem_capacity_bytes():
    try:
        cap = getattr(pltpu.get_tpu_info(), "vmem_capacity_bytes", None)
        if cap:
            return int(cap)
    except Exception:
        pass
    return 64 * 2**20  # conservative default (v7x per-TC physical VMEM)


def feedforward(x, w1, b1, w2, b2, *, row_tile=None, h_tile=None,
                single_buffer_resident=True):
    """x: (..., D) -> (..., D). Fused Linear -> GELU -> Linear Pallas kernel."""
    orig_shape = x.shape
    D = orig_shape[-1]
    H = w1.shape[1]
    assert w1.shape == (D, H) and w2.shape == (H, D)
    assert b1.shape[-1] == H and b2.shape[-1] == D
    assert D % 128 == 0 and H % 128 == 0, "feature dims must be lane-dense (multiple of 128)"

    x2d = x.reshape(-1, D)
    R = x2d.shape[0]
    act_size = jnp.dtype(x.dtype).itemsize
    w_size = jnp.dtype(w1.dtype).itemsize

    cap = _vmem_capacity_bytes()
    vmem_limit = max(int(0.80 * cap), 32 * 2**20)
    budget = int(0.85 * vmem_limit)  # headroom for compiler temporaries / spills

    def need(rt, ht, wbuf):
        io = 2 * rt * D * act_size * 2                    # x + out, double-buffered
        wts = wbuf * (D * ht + ht + ht * D + D) * w_size  # w1 + b1 + w2 + b2
        acc = rt * D * 4                                  # f32 accumulator scratch
        hid = rt * ht * 4                                 # live f32 hidden chunk
        return io + wts + acc + hid

    # --- hidden-dim path: weight-resident fast path vs. H-streaming --------------
    if h_tile is None:
        probe_rt = min(row_tile or 256, R)
        if need(probe_rt, H, 1 if single_buffer_resident else 2) <= budget:
            h_tile = H                                    # resident fast path
        else:
            probe_rt = min(row_tile or 512, R)
            h_tile = H
            while h_tile > 128 and (H % h_tile != 0
                                    or need(probe_rt, h_tile, 2) > budget):
                h_tile -= 128
    assert h_tile % 128 == 0 and H % h_tile == 0, "h_tile must be a x128 divisor of H"
    streaming = h_tile < H

    # --- row tile: larger when streaming so weight re-reads stay below roofline --
    if row_tile is None:
        row_tile = 512 if streaming else 256
    row_tile = min(row_tile, R)
    if row_tile < R:
        row_tile = max(8, (row_tile // 8) * 8)            # block rows: multiple of 8
    wbuf = 1 if (not streaming and single_buffer_resident) else 2
    while row_tile > 128 and need(row_tile, h_tile, wbuf) > budget:
        row_tile -= 128

    nh = H // h_tile
    grid = (pl.cdiv(R, row_tile), nh)                     # reduction axis last

    invariant_mode = {}
    if nh == 1 and single_buffer_resident:
        # Grid-invariant weights/biases: keep a single resident VMEM copy.
        invariant_mode = dict(pipeline_mode=pl.Buffered(1))

    in_specs = [
        pl.BlockSpec((row_tile, D), lambda i, h: (i, 0)),                   # x rows
        pl.BlockSpec((D, h_tile), lambda i, h: (0, h), **invariant_mode),   # W1 cols
        pl.BlockSpec((1, h_tile), lambda i, h: (0, h), **invariant_mode),   # b1
        pl.BlockSpec((h_tile, D), lambda i, h: (h, 0), **invariant_mode),   # W2 rows
        pl.BlockSpec((1, D), lambda i, h: (0, 0), **invariant_mode),        # b2
    ]
    out_specs = pl.BlockSpec((row_tile, D), lambda i, h: (i, 0))

    cost = pl.CostEstimate(
        flops=4 * R * D * H,                 # two matmuls
        transcendentals=2 * R * H,           # exp + approx reciprocal (EUP)
        bytes_accessed=int(2 * R * D * act_size + (D * H + H * D + H + D) * w_size),
    )

    out2d = pl.pallas_call(
        _ffn_kernel,
        out_shape=jax.ShapeDtypeStruct((R, D), x.dtype),
        grid_spec=pltpu.PrefetchScalarGridSpec(
            num_scalar_prefetch=0,
            grid=grid,
            in_specs=in_specs,
            out_specs=out_specs,
            scratch_shapes=[pltpu.VMEM((row_tile, D), jnp.float32)],
        ),
        compiler_params=pltpu.CompilerParams(
            dimension_semantics=("parallel", "arbitrary"),
            vmem_limit_bytes=vmem_limit,
        ),
        cost_estimate=cost,
    )(x2d, w1, b1.reshape(1, H), w2, b2.reshape(1, D))

    return out2d.reshape(orig_shape)


def _reference(x, w1, b1, w2, b2):
    xf = x.astype(jnp.float32)
    h = xf @ w1.astype(jnp.float32) + b1.astype(jnp.float32)
    h = jax.nn.gelu(h, approximate=False)   # exact erf GELU, like torch.nn.GELU()
    return h @ w2.astype(jnp.float32) + b2.astype(jnp.float32)


if __name__ == "__main__":
    # Small, lane-dense shapes: batch=2, seq=256, dim=128, hidden_dim=256.
    B, S, D, H = 2, 256, 128, 256

    key = jax.random.PRNGKey(0)
    kx, kw1, kb1, kw2, kb2 = jax.random.split(key, 5)

    # Production-style bf16 operands: all three MXU generations are bf16 engines.
    x = jax.random.normal(kx, (B, S, D), dtype=jnp.float32).astype(jnp.bfloat16)
    w1 = (jax.random.normal(kw1, (D, H), dtype=jnp.float32) * 0.02).astype(jnp.bfloat16)
    b1 = (jax.random.normal(kb1, (H,), dtype=jnp.float32) * 0.01).astype(jnp.bfloat16)
    w2 = (jax.random.normal(kw2, (H, D), dtype=jnp.float32) * 0.02).astype(jnp.bfloat16)
    b2 = (jax.random.normal(kb2, (D,), dtype=jnp.float32) * 0.01).astype(jnp.bfloat16)

    ref = _reference(x, w1, b1, w2, b2)

    def run(**kw):
        fn = jax.jit(functools.partial(feedforward, **kw))
        return jax.block_until_ready(fn(x, w1, b1, w2, b2))

    # 1) Weight-resident fast path (weights fit in VMEM; single-buffered invariants).
    try:
        out = run()
    except Exception:
        # Fallback if this JAX build rejects pipeline_mode=pl.Buffered(1).
        out = run(single_buffer_resident=False)

    assert out.shape == (B, S, D) and out.dtype == x.dtype
    err = float(jnp.max(jnp.abs(out.astype(jnp.float32) - ref)))
    assert jnp.allclose(out.astype(jnp.float32), ref, atol=2e-2, rtol=2e-2), err

    # 2) Force the hidden-dim streaming path (f32 accumulator across 2 H-steps).
    out_s = run(row_tile=128, h_tile=128, single_buffer_resident=False)
    err_s = float(jnp.max(jnp.abs(out_s.astype(jnp.float32) - ref)))
    assert jnp.allclose(out_s.astype(jnp.float32), ref, atol=2e-2, rtol=2e-2), err_s

    print("KERNEL_OK")
</pallas_src>

<mosaic_0001>
module attributes {stable_mosaic.version = 11 : i64} {
  func.func @_ffn_kernel(%arg0: i32, %arg1: i32, %arg2: memref<256x128xbf16, #tpu.memory_space<vmem>>, %arg3: memref<128x256xbf16, #tpu.memory_space<vmem>>, %arg4: memref<1x256xbf16, #tpu.memory_space<vmem>>, %arg5: memref<256x128xbf16, #tpu.memory_space<vmem>>, %arg6: memref<1x128xbf16, #tpu.memory_space<vmem>>, %arg7: memref<256x128xbf16, #tpu.memory_space<vmem>>, %arg8: memref<256x128xf32, #tpu.memory_space<vmem>>) attributes {dimension_semantics = [#tpu.dimension_semantics<parallel>, #tpu.dimension_semantics<arbitrary>], iteration_bounds = array<i64: 2, 1>, scalar_prefetch = 0 : i64, scratch_operands = 1 : i64, tpu.core_type = #tpu.core_type<tc>, window_params = [{transform_indices = @transform_0, window_bounds = array<i64: 256, 128>}, {pipeline_mode = #tpu.pipeline_mode<synchronous>, transform_indices = @transform_1, window_bounds = array<i64: 128, 256>}, {pipeline_mode = #tpu.pipeline_mode<synchronous>, transform_indices = @transform_2, window_bounds = array<i64: 1, 256>}, {pipeline_mode = #tpu.pipeline_mode<synchronous>, transform_indices = @transform_3, window_bounds = array<i64: 256, 128>}, {pipeline_mode = #tpu.pipeline_mode<synchronous>, transform_indices = @transform_4, window_bounds = array<i64: 1, 128>}, {transform_indices = @transform_5, window_bounds = array<i64: 256, 128>}]} {
    %c0_i32 = arith.constant 0 : i32
    %0 = arith.cmpi eq, %arg1, %c0_i32 : i32
    %1 = arith.extui %0 : i1 to i32
    %c0_i32_0 = arith.constant 0 : i32
    %2 = arith.cmpi ne, %1, %c0_i32_0 : i32
    scf.if %2 {
      %cst_29 = arith.constant 0.000000e+00 : f32
      %58 = vector.broadcast %cst_29 : f32 to vector<256x128xf32>
      %c0_30 = arith.constant 0 : index
      %c0_31 = arith.constant 0 : index
      %59 = vector.load %arg8[%c0_30, %c0_31] : memref<256x128xf32, #tpu.memory_space<vmem>>, vector<256x128xf32>
      tpu.vector_store %arg8[%c0_30, %c0_31], %58 {strides = array<i32>} : memref<256x128xf32, #tpu.memory_space<vmem>>, vector<256x128xf32>,
    } else {
    }
    %c0 = arith.constant 0 : index
    %c0_1 = arith.constant 0 : index
    %3 = vector.load %arg2[%c0, %c0_1] : memref<256x128xbf16, #tpu.memory_space<vmem>>, vector<256x128xbf16>
    %c0_2 = arith.constant 0 : index
    %c0_3 = arith.constant 0 : index
    %4 = vector.load %arg3[%c0_2, %c0_3] : memref<128x256xbf16, #tpu.memory_space<vmem>>, vector<128x256xbf16>
    %cst = arith.constant dense<0.000000e+00> : vector<256x256xf32>
    %5 = tpu.matmul %3, %4, %cst {dimension_numbers = #tpu.dot_dimension_numbers<[1], [0], [0], [1], [0, 0, 1, 1], [], []>} : vector<256x128xbf16>, vector<128x256xbf16>, vector<256x256xf32> -> vector<256x256xf32>
    %c0_4 = arith.constant 0 : index
    %c0_5 = arith.constant 0 : index
    %6 = vector.load %arg4[%c0_4, %c0_5] : memref<1x256xbf16, #tpu.memory_space<vmem>>, vector<1x256xbf16>
    %7 = arith.extf %6 : vector<1x256xbf16> to vector<1x256xf32>
    %8 = vector.broadcast %7 : vector<1x256xf32> to vector<256x256xf32>
    %9 = arith.addf %5, %8 : vector<256x256xf32>
    %cst_6 = arith.constant 5.000000e-01 : f32
    %10 = vector.broadcast %cst_6 : f32 to vector<256x256xf32>
    %11 = arith.mulf %10, %9 : vector<256x256xf32>
    %cst_7 = arith.constant 0.707106769 : f32
    %12 = vector.broadcast %cst_7 : f32 to vector<256x256xf32>
    %13 = arith.mulf %9, %12 : vector<256x256xf32>
    %14 = math.absf %13 : vector<256x256xf32>
    %cst_8 = arith.constant 0.327591091 : f32
    %15 = vector.broadcast %cst_8 : f32 to vector<256x256xf32>
    %16 = arith.mulf %15, %14 : vector<256x256xf32>
    %cst_9 = arith.constant 1.000000e+00 : f32
    %17 = vector.broadcast %cst_9 : f32 to vector<256x256xf32>
    %18 = arith.addf %17, %16 : vector<256x256xf32>
    %19 = tpu.reciprocal %18 {approx = true} : vector<256x256xf32> -> vector<256x256xf32>
    %cst_10 = arith.constant 1.06140542 : f32
    %20 = vector.broadcast %cst_10 : f32 to vector<256x256xf32>
    %21 = arith.mulf %20, %19 : vector<256x256xf32>
    %cst_11 = arith.constant -1.45315206 : f32
    %22 = vector.broadcast %cst_11 : f32 to vector<256x256xf32>
    %23 = arith.addf %21, %22 : vector<256x256xf32>
    %24 = arith.mulf %23, %19 : vector<256x256xf32>
    %cst_12 = arith.constant 1.42141378 : f32
    %25 = vector.broadcast %cst_12 : f32 to vector<256x256xf32>
    %26 = arith.addf %24, %25 : vector<256x256xf32>
    %27 = arith.mulf %26, %19 : vector<256x256xf32>
    %cst_13 = arith.constant -0.284496725 : f32
    %28 = vector.broadcast %cst_13 : f32 to vector<256x256xf32>
    %29 = arith.addf %27, %28 : vector<256x256xf32>
    %30 = arith.mulf %29, %19 : vector<256x256xf32>
    %cst_14 = arith.constant 0.254829586 : f32
    %31 = vector.broadcast %cst_14 : f32 to vector<256x256xf32>
    %32 = arith.addf %30, %31 : vector<256x256xf32>
    %33 = arith.mulf %32, %19 : vector<256x256xf32>
    %cst_15 = arith.constant 0.000000e+00 : f32
    %34 = vector.broadcast %cst_15 : f32 to vector<256x256xf32>
    %35 = arith.subf %34, %14 : vector<256x256xf32>
    %36 = arith.mulf %35, %14 : vector<256x256xf32>
    %37 = math.exp %36 : vector<256x256xf32>
    %38 = arith.mulf %33, %37 : vector<256x256xf32>
    %cst_16 = arith.constant 1.000000e+00 : f32
    %39 = vector.broadcast %cst_16 : f32 to vector<256x256xf32>
    %40 = arith.subf %39, %38 : vector<256x256xf32>
    %cst_17 = arith.constant 0.000000e+00 : f32
    %41 = vector.broadcast %cst_17 : f32 to vector<256x256xf32>
    %42 = arith.cmpf olt, %13, %41 : vector<256x256xf32>
    %cst_18 = arith.constant 0.000000e+00 : f32
    %43 = vector.broadcast %cst_18 : f32 to vector<256x256xf32>
    %44 = arith.subf %43, %40 : vector<256x256xf32>
    %45 = arith.select %42, %44, %40 : vector<256x256xi1>, vector<256x256xf32>
    %cst_19 = arith.constant 1.000000e+00 : f32
    %46 = vector.broadcast %cst_19 : f32 to vector<256x256xf32>
    %47 = arith.addf %46, %45 : vector<256x256xf32>
    %48 = arith.mulf %11, %47 : vector<256x256xf32>
    %c0_20 = arith.constant 0 : index
    %c0_21 = arith.constant 0 : index
    %49 = vector.load %arg8[%c0_20, %c0_21] : memref<256x128xf32, #tpu.memory_space<vmem>>, vector<256x128xf32>
    %50 = arith.truncf %48 : vector<256x256xf32> to vector<256x256xbf16>
    %c0_22 = arith.constant 0 : index
    %c0_23 = arith.constant 0 : index
    %51 = vector.load %arg5[%c0_22, %c0_23] : memref<256x128xbf16, #tpu.memory_space<vmem>>, vector<256x128xbf16>
    %cst_24 = arith.constant dense<0.000000e+00> : vector<256x128xf32>
    %52 = tpu.matmul %50, %51, %cst_24 {dimension_numbers = #tpu.dot_dimension_numbers<[1], [0], [0], [1], [0, 0, 1, 1], [], []>} : vector<256x256xbf16>, vector<256x128xbf16>, vector<256x128xf32> -> vector<256x128xf32>
    %53 = arith.addf %49, %52 : vector<256x128xf32>
    %c0_25 = arith.constant 0 : index
    %c0_26 = arith.constant 0 : index
    %54 = vector.load %arg8[%c0_25, %c0_26] : memref<256x128xf32, #tpu.memory_space<vmem>>, vector<256x128xf32>
    tpu.vector_store %arg8[%c0_25, %c0_26], %53 {strides = array<i32>} : memref<256x128xf32, #tpu.memory_space<vmem>>, vector<256x128xf32>,
    %c0_i32_27 = arith.constant 0 : i32
    %55 = arith.cmpi eq, %arg1, %c0_i32_27 : i32
    %56 = arith.extui %55 : i1 to i32
    %c0_i32_28 = arith.constant 0 : i32
    %57 = arith.cmpi ne, %56, %c0_i32_28 : i32
    scf.if %57 {
      %c0_29 = arith.constant 0 : index
      %c0_30 = arith.constant 0 : index
      %58 = vector.load %arg8[%c0_29, %c0_30] : memref<256x128xf32, #tpu.memory_space<vmem>>, vector<256x128xf32>
      %c0_31 = arith.constant 0 : index
      %c0_32 = arith.constant 0 : index
      %59 = vector.load %arg6[%c0_31, %c0_32] : memref<1x128xbf16, #tpu.memory_space<vmem>>, vector<1x128xbf16>
      %60 = arith.extf %59 : vector<1x128xbf16> to vector<1x128xf32>
      %61 = vector.broadcast %60 : vector<1x128xf32> to vector<256x128xf32>
      %62 = arith.addf %58, %61 : vector<256x128xf32>
      %63 = arith.truncf %62 : vector<256x128xf32> to vector<256x128xbf16>
      %c0_33 = arith.constant 0 : index
      %c0_34 = arith.constant 0 : index
      %64 = vector.load %arg7[%c0_33, %c0_34] : memref<256x128xbf16, #tpu.memory_space<vmem>>, vector<256x128xbf16>
      tpu.vector_store %arg7[%c0_33, %c0_34], %63 {strides = array<i32>} : memref<256x128xbf16, #tpu.memory_space<vmem>>, vector<256x128xbf16>,
    } else {
    }
    return
  }
  func.func @transform_0(%arg0: i32, %arg1: i32) -> (i32, i32) {
    %c0_i32 = arith.constant 0 : i32
    %c0_i32_0 = arith.constant 0 : i32
    return %arg0, %c0_i32 : i32, i32
  }
  func.func @transform_1(%arg0: i32, %arg1: i32) -> (i32, i32) {
    %c0_i32 = arith.constant 0 : i32
    %c0_i32_0 = arith.constant 0 : i32
    return %c0_i32, %arg1 : i32, i32
  }
  func.func @transform_2(%arg0: i32, %arg1: i32) -> (i32, i32) {
    %c0_i32 = arith.constant 0 : i32
    %c0_i32_0 = arith.constant 0 : i32
    return %c0_i32, %arg1 : i32, i32
  }
  func.func @transform_3(%arg0: i32, %arg1: i32) -> (i32, i32) {
    %c0_i32 = arith.constant 0 : i32
    %c0_i32_0 = arith.constant 0 : i32
    return %arg1, %c0_i32 : i32, i32
  }
  func.func @transform_4(%arg0: i32, %arg1: i32) -> (i32, i32) {
    %c0_i32 = arith.constant 0 : i32
    %c0_i32_0 = arith.constant 0 : i32
    %c0_i32_1 = arith.constant 0 : i32
    return %c0_i32, %c0_i32_0 : i32, i32
  }
  func.func @transform_5(%arg0: i32, %arg1: i32) -> (i32, i32) {
    %c0_i32 = arith.constant 0 : i32
    %c0_i32_0 = arith.constant 0 : i32
    return %arg0, %c0_i32 : i32, i32
  }
}

module attributes {stable_mosaic.version = 11 : i64} {
  func.func @_ffn_kernel(%arg0: i32, %arg1: i32, %arg2: memref<256x128xbf16, #tpu.memory_space<vmem>>, %arg3: memref<128x256xbf16, #tpu.memory_space<vmem>>, %arg4: memref<1x256xbf16, #tpu.memory_space<vmem>>, %arg5: memref<256x128xbf16, #tpu.memory_space<vmem>>, %arg6: memref<1x128xbf16, #tpu.memory_space<vmem>>, %arg7: memref<256x128xbf16, #tpu.memory_space<vmem>>, %arg8: memref<256x128xf32, #tpu.memory_space<vmem>>) attributes {dimension_semantics = [#tpu.dimension_semantics<parallel>, #tpu.dimension_semantics<arbitrary>], iteration_bounds = array<i64: 2, 1>, scalar_prefetch = 0 : i64, scratch_operands = 1 : i64, tpu.core_type = #tpu.core_type<tc>, window_params = [{transform_indices = @transform_0, window_bounds = array<i64: 256, 128>}, {transform_indices = @transform_1, window_bounds = array<i64: 128, 256>}, {transform_indices = @transform_2, window_bounds = array<i64: 1, 256>}, {transform_indices = @transform_3, window_bounds = array<i64: 256, 128>}, {pipeline_mode = #tpu.pipeline_mode<synchronous>, transform_indices = @transform_4, window_bounds = array<i64: 1, 128>}, {transform_indices = @transform_5, window_bounds = array<i64: 256, 128>}]} {
    %c0_i32 = arith.constant 0 : i32
    %0 = arith.cmpi eq, %arg1, %c0_i32 : i32
    %1 = arith.extui %0 : i1 to i32
    %c0_i32_0 = arith.constant 0 : i32
    %2 = arith.cmpi ne, %1, %c0_i32_0 : i32
    scf.if %2 {
      %cst_29 = arith.constant 0.000000e+00 : f32
      %58 = vector.broadcast %cst_29 : f32 to vector<256x128xf32>
      %c0_30 = arith.constant 0 : index
      %c0_31 = arith.constant 0 : index
      %59 = vector.load %arg8[%c0_30, %c0_31] : memref<256x128xf32, #tpu.memory_space<vmem>>, vector<256x128xf32>
      tpu.vector_store %arg8[%c0_30, %c0_31], %58 {strides = array<i32>} : memref<256x128xf32, #tpu.memory_space<vmem>>, vector<256x128xf32>,
    } else {
    }
    %c0 = arith.constant 0 : index
    %c0_1 = arith.constant 0 : index
    %3 = vector.load %arg2[%c0, %c0_1] : memref<256x128xbf16, #tpu.memory_space<vmem>>, vector<256x128xbf16>
    %c0_2 = arith.constant 0 : index
    %c0_3 = arith.constant 0 : index
    %4 = vector.load %arg3[%c0_2, %c0_3] : memref<128x256xbf16, #tpu.memory_space<vmem>>, vector<128x256xbf16>
    %cst = arith.constant dense<0.000000e+00> : vector<256x256xf32>
    %5 = tpu.matmul %3, %4, %cst {dimension_numbers = #tpu.dot_dimension_numbers<[1], [0], [0], [1], [0, 0, 1, 1], [], []>} : vector<256x128xbf16>, vector<128x256xbf16>, vector<256x256xf32> -> vector<256x256xf32>
    %c0_4 = arith.constant 0 : index
    %c0_5 = arith.constant 0 : index
    %6 = vector.load %arg4[%c0_4, %c0_5] : memref<1x256xbf16, #tpu.memory_space<vmem>>, vector<1x256xbf16>
    %7 = arith.extf %6 : vector<1x256xbf16> to vector<1x256xf32>
    %8 = vector.broadcast %7 : vector<1x256xf32> to vector<256x256xf32>
    %9 = arith.addf %5, %8 : vector<256x256xf32>
    %cst_6 = arith.constant 5.000000e-01 : f32
    %10 = vector.broadcast %cst_6 : f32 to vector<256x256xf32>
    %11 = arith.mulf %10, %9 : vector<256x256xf32>
    %cst_7 = arith.constant 0.707106769 : f32
    %12 = vector.broadcast %cst_7 : f32 to vector<256x256xf32>
    %13 = arith.mulf %9, %12 : vector<256x256xf32>
    %14 = math.absf %13 : vector<256x256xf32>
    %cst_8 = arith.constant 0.327591091 : f32
    %15 = vector.broadcast %cst_8 : f32 to vector<256x256xf32>
    %16 = arith.mulf %15, %14 : vector<256x256xf32>
    %cst_9 = arith.constant 1.000000e+00 : f32
    %17 = vector.broadcast %cst_9 : f32 to vector<256x256xf32>
    %18 = arith.addf %17, %16 : vector<256x256xf32>
    %19 = tpu.reciprocal %18 {approx = true} : vector<256x256xf32> -> vector<256x256xf32>
    %cst_10 = arith.constant 1.06140542 : f32
    %20 = vector.broadcast %cst_10 : f32 to vector<256x256xf32>
    %21 = arith.mulf %20, %19 : vector<256x256xf32>
    %cst_11 = arith.constant -1.45315206 : f32
    %22 = vector.broadcast %cst_11 : f32 to vector<256x256xf32>
    %23 = arith.addf %21, %22 : vector<256x256xf32>
    %24 = arith.mulf %23, %19 : vector<256x256xf32>
    %cst_12 = arith.constant 1.42141378 : f32
    %25 = vector.broadcast %cst_12 : f32 to vector<256x256xf32>
    %26 = arith.addf %24, %25 : vector<256x256xf32>
    %27 = arith.mulf %26, %19 : vector<256x256xf32>
    %cst_13 = arith.constant -0.284496725 : f32
    %28 = vector.broadcast %cst_13 : f32 to vector<256x256xf32>
    %29 = arith.addf %27, %28 : vector<256x256xf32>
    %30 = arith.mulf %29, %19 : vector<256x256xf32>
    %cst_14 = arith.constant 0.254829586 : f32
    %31 = vector.broadcast %cst_14 : f32 to vector<256x256xf32>
    %32 = arith.addf %30, %31 : vector<256x256xf32>
    %33 = arith.mulf %32, %19 : vector<256x256xf32>
    %cst_15 = arith.constant 0.000000e+00 : f32
    %34 = vector.broadcast %cst_15 : f32 to vector<256x256xf32>
    %35 = arith.subf %34, %14 : vector<256x256xf32>
    %36 = arith.mulf %35, %14 : vector<256x256xf32>
    %37 = math.exp %36 : vector<256x256xf32>
    %38 = arith.mulf %33, %37 : vector<256x256xf32>
    %cst_16 = arith.constant 1.000000e+00 : f32
    %39 = vector.broadcast %cst_16 : f32 to vector<256x256xf32>
    %40 = arith.subf %39, %38 : vector<256x256xf32>
    %cst_17 = arith.constant 0.000000e+00 : f32
    %41 = vector.broadcast %cst_17 : f32 to vector<256x256xf32>
    %42 = arith.cmpf olt, %13, %41 : vector<256x256xf32>
    %cst_18 = arith.constant 0.000000e+00 : f32
    %43 = vector.broadcast %cst_18 : f32 to vector<256x256xf32>
    %44 = arith.subf %43, %40 : vector<256x256xf32>
    %45 = arith.select %42, %44, %40 : vector<256x256xi1>, vector<256x256xf32>
    %cst_19 = arith.constant 1.000000e+00 : f32
    %46 = vector.broadcast %cst_19 : f32 to vector<256x256xf32>
    %47 = arith.addf %46, %45 : vector<256x256xf32>
    %48 = arith.mulf %11, %47 : vector<256x256xf32>
    %c0_20 = arith.constant 0 : index
    %c0_21 = arith.constant 0 : index
    %49 = vector.load %arg8[%c0_20, %c0_21] : memref<256x128xf32, #tpu.memory_space<vmem>>, vector<256x128xf32>
    %50 = arith.truncf %48 : vector<256x256xf32> to vector<256x256xbf16>
    %c0_22 = arith.constant 0 : index
    %c0_23 = arith.constant 0 : index
    %51 = vector.load %arg5[%c0_22, %c0_23] : memref<256x128xbf16, #tpu.memory_space<vmem>>, vector<256x128xbf16>
    %cst_24 = arith.constant dense<0.000000e+00> : vector<256x128xf32>
    %52 = tpu.matmul %50, %51, %cst_24 {dimension_numbers = #tpu.dot_dimension_numbers<[1], [0], [0], [1], [0, 0, 1, 1], [], []>} : vector<256x256xbf16>, vector<256x128xbf16>, vector<256x128xf32> -> vector<256x128xf32>
    %53 = arith.addf %49, %52 : vector<256x128xf32>
    %c0_25 = arith.constant 0 : index
    %c0_26 = arith.constant 0 : index
    %54 = vector.load %arg8[%c0_25, %c0_26] : memref<256x128xf32, #tpu.memory_space<vmem>>, vector<256x128xf32>
    tpu.vector_store %arg8[%c0_25, %c0_26], %53 {strides = array<i32>} : memref<256x128xf32, #tpu.memory_space<vmem>>, vector<256x128xf32>,
    %c0_i32_27 = arith.constant 0 : i32
    %55 = arith.cmpi eq, %arg1, %c0_i32_27 : i32
    %56 = arith.extui %55 : i1 to i32
    %c0_i32_28 = arith.constant 0 : i32
    %57 = arith.cmpi ne, %56, %c0_i32_28 : i32
    scf.if %57 {
      %c0_29 = arith.constant 0 : index
      %c0_30 = arith.constant 0 : index
      %58 = vector.load %arg8[%c0_29, %c0_30] : memref<256x128xf32, #tpu.memory_space<vmem>>, vector<256x128xf32>
      %c0_31 = arith.constant 0 : index
      %c0_32 = arith.constant 0 : index
      %59 = vector.load %arg6[%c0_31, %c0_32] : memref<1x128xbf16, #tpu.memory_space<vmem>>, vector<1x128xbf16>
      %60 = arith.extf %59 : vector<1x128xbf16> to vector<1x128xf32>
      %61 = vector.broadcast %60 : vector<1x128xf32> to vector<256x128xf32>
      %62 = arith.addf %58, %61 : vector<256x128xf32>
      %63 = arith.truncf %62 : vector<256x128xf32> to vector<256x128xbf16>
      %c0_33 = arith.constant 0 : index
      %c0_34 = arith.constant 0 : index
      %64 = vector.load %arg7[%c0_33, %c0_34] : memref<256x128xbf16, #tpu.memory_space<vmem>>, vector<256x128xbf16>
      tpu.vector_store %arg7[%c0_33, %c0_34], %63 {strides = array<i32>} : memref<256x128xbf16, #tpu.memory_space<vmem>>, vector<256x128xbf16>,
    } else {
    }
    return
  }
  func.func @transform_0(%arg0: i32, %arg1: i32) -> (i32, i32) {
    %c0_i32 = arith.constant 0 : i32
    %c0_i32_0 = arith.constant 0 : i32
    return %arg0, %c0_i32 : i32, i32
  }
  func.func @transform_1(%arg0: i32, %arg1: i32) -> (i32, i32) {
    %c0_i32 = arith.constant 0 : i32
    %c0_i32_0 = arith.constant 0 : i32
    return %c0_i32, %arg1 : i32, i32
  }
  func.func @transform_2(%arg0: i32, %arg1: i32) -> (i32, i32) {
    %c0_i32 = arith.constant 0 : i32
    %c0_i32_0 = arith.constant 0 : i32
    return %c0_i32, %arg1 : i32, i32
  }
  func.func @transform_3(%arg0: i32, %arg1: i32) -> (i32, i32) {
    %c0_i32 = arith.constant 0 : i32
    %c0_i32_0 = arith.constant 0 : i32
    return %arg1, %c0_i32 : i32, i32
  }
  func.func @transform_4(%arg0: i32, %arg1: i32) -> (i32, i32) {
    %c0_i32 = arith.constant 0 : i32
    %c0_i32_0 = arith.constant 0 : i32
    %c0_i32_1 = arith.constant 0 : i32
    return %c0_i32, %c0_i32_0 : i32, i32
  }
  func.func @transform_5(%arg0: i32, %arg1: i32) -> (i32, i32) {
    %c0_i32 = arith.constant 0 : i32
    %c0_i32_0 = arith.constant 0 : i32
    return %arg0, %c0_i32 : i32, i32
  }
}

</mosaic_0001>

<bundles_post_ra>
// kernel: feedforward.1
= control target key start
LH: loop header
LB: loop body
LE: loop exit
PB: predicated region body
PF: predicated region fallthrough
CT: control target
= control target key end

     0   :  { %10 = vsyncpa [#allocation4], 0  ;;  %s6520_s0 = inlined_call_operand.hbm [shape: bf16[512,128], index: 0, kind: input, shape index: {}]   ;;  %s6521_s1 = inlined_call_operand.hbm [shape: bf16[128,256], index: 1, kind: input, shape index: {}]   ;;  %s6522_s2 = inlined_call_operand.vmem [shape: bf16[1,256], index: 2, kind: input, shape index: {}]   ;;  %s6523_s3 = inlined_call_operand.hbm [shape: bf16[256,128], index: 3, kind: input, shape index: {}]   ;;  %s6524_s4 = inlined_call_operand.vmem [shape: bf16[1,128], index: 4, kind: input, shape index: {}]   ;;  %s6525_s5 = inlined_call_operand.hbm [shape: bf16[512,128], index: 5, kind: output, shape index: {}]  }
   0x1   :  { %12 = vsyncpa [#allocation4 + $0x1], 0 }
   0x2   :  { %13 = vsyncpa [#allocation7], 0 }
   0x3   :  { %14 = vsyncpa [#allocation5], 0 }
   0x4   :  { %16 = vsyncpa [#allocation5 + $0x1], 0  ;;  %s4200_s18 = smov 0   ;;  %s4202_s19 = smov 0  }
   0x5   :  { %s4204_s20 = smov 0   ;;  %s4206_s21 = smov 0  }
   0x6   :  { %s4208_s22 = smov 0   ;;  %s4210_s23 = smov 0  }
   0x7 LB: > { %s3242_s24 = sadd.s32 4294967295, %s4157_s23   ;;  %s3243_s25 = sadd.s32 4294967294, %s4157_s23   ;;  %s4157_s23 = sphi %s4210_s23, %s22_s23   ;;  %s4153_s22 = sphi %s4208_s22, %s6729_s22   ;;  %s4149_s21 = sphi %s4206_s21, %s6728_s21   ;;  %s4145_s20 = sphi %s4204_s20, %s6727_s20   ;;  %s4141_s19 = sphi %s4202_s19, %s6726_s19   ;;  %s4137_s18 = sphi %s4200_s18, %s6725_s18  }
   0x8   : > { %p54_p0 = scmp.ne.s32.totalorder %s4141_s19, %s4137_s18  ;;  %p4234_p1 = scmp.eq.s32.totalorder %s3242_s24, 0 }
   0x9   : > { %p4238_p2 = scmp.eq.s32.totalorder %s3242_s24, 1  ;;  %p183_p3 = scmp.eq.s32.totalorder %s3243_s25, 1 }
   0xa   : > { %s6550_s26 = scalar_select %p4234_p1, 1, 0 }
   0xb   : > { %p4244_p4 = por %p4234_p1, %p54_p0  ;;  %p3244_p5 = scmp.ge.s32.totalorder %s4157_s23, 1 }
   0xc   : > { %p4249_p6 = por %p183_p3, %p54_p0  ;;  %p190_p7 = scmp.lt.s32.totalorder %s4157_s23, 3 }
   0xd   : > { %s6552_s28 = scalar_select %p4244_p4, 1, 0 }
   0xe   : > { %s6553_s29 = scalar_select %p4249_p6, 1, 0 }
   0xf   : > { %p4254_p8 = pnand %p3244_p5, %p190_p7  ;;  %s4159_s6 = smov [#allocation6]  }
  0x10   : > { %s205_s7 = sshll.u32 %s4159_s6, 4  ;;  %s4160_s9 = smov [#allocation8]   ;;  %s4258_s7 = int_to_ptr.vmem [resolvable:$true] %s205_s7 }
  0x11   : > { %p3595_p9 = pneg %p4254_p8  ;;  %s229_s10 = sshll.u32 %s4160_s9, 4  ;;  %s4269_s10 = int_to_ptr.vmem [resolvable:$true] %s229_s10 }
  0x12   : > { %s3985_s13 = scalar_lea.hbm %s6521_s1, 2048 }
  0x13   : > { %p4265_p11 = pnand %p3595_p9, %p4234_p1  ;;  %p3986_p12 = scmp.ne.s32.totalorder %s6521_s1, %s3985_s13 }
  0x14   : > { %p3992_p5 = scmp.lt.u32.totalorder %s3985_s13, %s6521_s1 }
  0x15   : > { %p3987_p13 = pneg %p4265_p11 }
  0x17   : > { %p3988_p0 = pnand %p3987_p13, %p3986_p12 }
  0x19   : > { %p3989_p3 = pneg %p3988_p0 }
  0x1b   : > { %p3994_p7 = pnand %p3992_p5, %p3989_p3 }
  0x1d   : > { %3997 = shalt.err (!%p3994_p7)
}
  0x1e   : > { %s3998_s24 = scalar_lea.vmem %s4258_s7, 2048  ;;  %p4006_p1 = scmp.lt.s32.totalorder %s4258_s7, %s4258_s7 }
  0x1f   : > { %p3999_p9 = scmp.ne.s32.totalorder %s4258_s7, %s3998_s24  ;;  %p4007_p12 = scmp.lt.s32.totalorder %s3998_s24, %s3998_s24 }
  0x21   : > { %p4001_p10 = pnand %p3999_p9, %p3987_p13  ;;  %p4008_p0 = por %p4007_p12, %p4006_p1 }
  0x23   : > { %p4002_p6 = pneg %p4001_p10 }
  0x25   : > { %p4009_p4 = pnand %p4008_p0, %p4002_p6 }
  0x27   : > { %4012 = shalt.err (!%p4009_p4)
}
  0x28   : > { %s4161_s25 = smov 128   ;;  %s4162_s6 = smov 8  }
  0x29   : > { %3598 = dma.hbm_to_vmem [thread:$0]  (!%p4265_p11), %s6521_s1, 2048, %s4258_s7, [#allocation7], %s4161_s25, %s4161_s25, %s4162_s6  }
  0x2a   : > { %s4013_s14 = scalar_lea.hbm %s6523_s3, 2048 }
  0x2b   : > { %p4014_p1 = scmp.ne.s32.totalorder %s6523_s3, %s4013_s14  ;;  %p4020_p10 = scmp.lt.u32.totalorder %s4013_s14, %s6523_s3 }
  0x2d   : > { %p4016_p4 = pnand %p4014_p1, %p3987_p13 }
  0x2f   : > { %p4017_p6 = pneg %p4016_p4 }
  0x31   : > { %p4022_p3 = pnand %p4020_p10, %p4017_p6 }
  0x33   : > { %4025 = shalt.err (!%p4022_p3)
}
  0x34   : > { %s4026_s7 = scalar_lea.vmem %s4269_s10, 2048  ;;  %p4034_p12 = scmp.lt.s32.totalorder %s4269_s10, %s4269_s10 }
  0x35   : > { %p4027_p5 = scmp.ne.s32.totalorder %s4269_s10, %s4026_s7  ;;  %p4035_p0 = scmp.lt.s32.totalorder %s4026_s7, %s4026_s7 }
  0x37   : > { %p4029_p7 = pnand %p4027_p5, %p3987_p13  ;;  %p4036_p1 = por %p4035_p0, %p4034_p12 }
  0x39   : > { %p4030_p9 = pneg %p4029_p7 }
  0x3b   : > { %p4037_p4 = pnand %p4036_p1, %p4030_p9 }
  0x3d   : > { %4040 = shalt.err (!%p4037_p4)
}
  0x3e   : > { %s6529_s25 = smov 64   ;;  %s4164_s6 = smov 4  }
  0x3f   : > { %3601 = dma.hbm_to_vmem [thread:$0]  (!%p4265_p11), %s6523_s3, 2048, %s4269_s10, [#allocation7], %s6529_s25, %s6529_s25, %s4164_s6  }
  0x40   : > { %s34_s12 = sadd.s32 1, %s4153_s22  ;;  %s41_s13 = sadd.s32 1, %s4145_s20 }
  0x41   : > { %p36_p13 = scmp.ge.s32.totalorder %s34_s12, 2  ;;  %p48_p6 = scmp.ne.s32.totalorder %s4145_s20, %s4141_s19 }
  0x42   : > { %p49_p10 = scmp.eq.s32.totalorder %s4157_s23, 0  ;;  %p3612_p3 = scmp.lt.s32.totalorder %s4157_s23, 2 }
  0x43   : > { %s6731_s12 = smov (%p36_p13, %s34_s12), 0  ;;  %p4336_p7 = por %p4238_p2, %p48_p6 }
  0x44   : > { %p50_p5 = por %p49_p10, %p48_p6  ;;  %s38_s14 = ssub.s32 %s4153_s22, %s6731_s12 }
  0x45   : > { %s6556_s8 = scalar_select %p4336_p7, 1, 0 }
  0x46   : > { %s246_s15 = sand.u32 1, %s4145_s20   ;;  %p39_p9 = scmp.eq.s32.totalorder %s38_s14, 0 }
  0x47   : > { %s3249_s10 = sshll.u32 %s246_s15, 7  ;;  %s3342_s16 = sshll.u32 %s4153_s22, 11 }
  0x48   : > { %s4345_s17 = scalar_select %p39_p9, %s4145_s20, %s41_s13  }
  0x49   : > { %s4350_s9 = scalar_lea.hbm %s6520_s0, %s3342_s16  ;;  %s250_s27 = scalar_lea.vmem [#allocation3], %s3249_s10 }
  0x4a   : > { %s257_s11 = sshll.u32 %s250_s27, 4  ;;  %p4354_p2 = pnand %p3612_p3, %p50_p5  ;;  %s4358_s11 = int_to_ptr.vmem [resolvable:$true] %s257_s11 }
  0x4b   : > { %s4360_s13 = scalar_lea.sflag [#allocation4], %s246_s15  ;;  %s4041_s14 = scalar_lea.hbm %s4350_s9, 2048 }
  0x4c   : > { %p4042_p11 = scmp.ne.s32.totalorder %s4350_s9, %s4041_s14  ;;  %p4043_p12 = pneg %p4354_p2 }
  0x4d   : > { %s4046_s24 = scalar_lea.hbm %s6520_s0, 4096  ;;  %p4047_p4 = scmp.lt.u32.totalorder %s4350_s9, %s6520_s0 }
  0x4e   : > { %p4044_p0 = pnand %p4043_p12, %p4042_p11  ;;  %p4048_p13 = scmp.lt.u32.totalorder %s4046_s24, %s4041_s14 }
  0x4f   : > { %p4050_p10 = scmp.lt.u32.totalorder %s4041_s14, %s4350_s9 }
  0x50   : > { %p4045_p1 = pneg %p4044_p0  ;;  %p4049_p6 = por %p4048_p13, %p4047_p4 }
  0x52   : > { %p4051_p3 = por %p4050_p10, %p4049_p6 }
  0x54   : > { %p4052_p5 = pnand %p4051_p3, %p4045_p1 }
  0x56   : > { %4055 = shalt.err (!%p4052_p5)
}
  0x57   : > { %s4056_s15 = scalar_lea.vmem %s4358_s11, 2048  ;;  %s4165_s10 = smov [#allocation3]  }
  0x58   : > { %p4057_p9 = scmp.ne.s32.totalorder %s4358_s11, %s4056_s15  ;;  %s4061_s16 = sshll.u32 %s4165_s10, 4  ;;  %s4062_s16 = int_to_ptr.vmem [resolvable:$false] %s4061_s16 }
  0x59   : > { %s4063_s7 = scalar_lea.vmem %s4062_s16, 4096  ;;  %p4064_p7 = scmp.lt.s32.totalorder %s4358_s11, %s4062_s16 }
  0x5a   : > { %p4059_p11 = pnand %p4057_p9, %p4043_p12  ;;  %p4065_p4 = scmp.lt.s32.totalorder %s4063_s7, %s4056_s15 }
  0x5c   : > { %p4060_p0 = pneg %p4059_p11  ;;  %p4066_p13 = por %p4065_p4, %p4064_p7 }
  0x5e   : > { %p4067_p6 = pnand %p4066_p13, %p4060_p0 }
  0x60   : > { %4070 = shalt.err (!%p4067_p6)
}
  0x61   : > { %s6558_s14 = smov 64   ;;  %269 = sbr.rel (%p4254_p8) target bundleno = 1064 (0x428), region = 40 }
  0x62   : > { %3605 = dma.hbm_to_vmem [thread:$0]  (!%p4354_p2), %s4350_s9, 2048, %s4358_s11, %s4360_s13, %s6558_s14, %s6558_s14, %s4164_s6  }
  0x68   : > { %s4394_s24 = sand.u32 1, %s4141_s19   ;;  %p6559_p7 = scmp.ne.s32.totalorder %s6552_s28, 0 }
  0x69   : > { %s3253_s27 = sshll.u32 %s4394_s24, 7  ;;  %s272_s15 = scalar_lea.sflag [#allocation4], %s4394_s24 }
  0x6a   : > { %s4400_s25 = scalar_lea.vmem [#allocation3], %s3253_s27 }
  0x6b   : > { %4124 = dma.done.wait (%p6559_p7), %s272_s15, 2048  }
  0x6c   : > { %4126 = vsyncadd (%p6559_p7), %s272_s15, 4294965248  ;;  %p6560_p2 = scmp.ne.s32.totalorder %s6550_s26, 0 }
  0x6e   : > { %4128 = dma.done.wait (%p6560_p2), [#allocation7], 4096  }
  0x6f   : > { %4130 = vsyncadd (%p6560_p2), [#allocation7], 4294963200  ;;  %v4166_v0 = vmov 0   ;;  %v3673_v1 = vld [vmem:[#allocation6 + $0x4] ss:$8 sps:$4 sm:$0xff]   ;;  %v3699_v19 = vld [vmem:[%s4400_s25 + $0x10] sm:$0xff]   ;;  %v411_v40 = vlaneseq }
  0x70   : > { %637 = vmatprep.mubr.bf16.mxu0 %v4166_v0  ;;  %v3675_v2 = vld [vmem:[#allocation6] ss:$8 sps:$4 sm:$0xff]   ;;  %605 = vmatprep.subr.bf16.mxu0 %v3673_v1  ;;  %v3676_v3 = vld [vmem:[#allocation6 + $0x14] ss:$8 sps:$4 sm:$0xff]   ;;  %v3678_v4 = vld [vmem:[#allocation6 + $0x10] ss:$8 sps:$4 sm:$0xff]  }
  0x71   : > { %606 = vmatpush1.bf16.msra.mxu0 %v3675_v2  ;;  %v3679_v5 = vld [vmem:[#allocation6 + $0x24] ss:$8 sps:$4 sm:$0xff]   ;;  %v3681_v6 = vld [vmem:[#allocation6 + $0x20] ss:$8 sps:$4 sm:$0xff]   ;;  %v3682_v7 = vld [vmem:[#allocation6 + $0x34] ss:$8 sps:$4 sm:$0xff]  }
  0x72   : > { %607 = vmatprep.subr.bf16.mxu0 %v3676_v3  ;;  %v3684_v8 = vld [vmem:[#allocation6 + $0x30] ss:$8 sps:$4 sm:$0xff]   ;;  %v3685_v9 = vld [vmem:[#allocation6 + $0x44] ss:$8 sps:$4 sm:$0xff]   ;;  %v3687_v10 = vld [vmem:[#allocation6 + $0x40] ss:$8 sps:$4 sm:$0xff]  }
  0x73   : > { %v3688_v11 = vld [vmem:[#allocation6 + $0x54] ss:$8 sps:$4 sm:$0xff]   ;;  %v3690_v12 = vld [vmem:[#allocation6 + $0x50] ss:$8 sps:$4 sm:$0xff]   ;;  %v3691_v13 = vld [vmem:[#allocation6 + $0x64] ss:$8 sps:$4 sm:$0xff]  }
  0x74   : > { %v3693_v14 = vld [vmem:[#allocation6 + $0x60] ss:$8 sps:$4 sm:$0xff]   ;;  %v3694_v15 = vld [vmem:[#allocation6 + $0x74] ss:$8 sps:$4 sm:$0xff]   ;;  %v3696_v16 = vld [vmem:[#allocation6 + $0x70] ss:$8 sps:$4 sm:$0xff]  }
  0x75   : > { %608 = vmatpush1.bf16.msra.mxu0 %v3678_v4  ;;  %v3697_v17 = vld [vmem:[%s4400_s25] sm:$0xff]   ;;  %v3698_v18 = vld [vmem:[%s4400_s25 + $0x8] sm:$0xff]   ;;  %v3700_v20 = vld [vmem:[%s4400_s25 + $0x18] sm:$0xff]   ;;  %v412_v42 = vshrl.u32 %v411_v40, 7  ;;  %s6391_s9 = scalar_lea.vmem [#allocation9], %s3253_s27  ;;  %s3375_s11 = sshll.u32 %s4149_s21, 11 }
  0x76   : > { %609 = vmatprep.subr.bf16.mxu0 %v3679_v5  ;;  %v3701_v21 = vld [vmem:[%s4400_s25 + $0x20] sm:$0xff]   ;;  %v3702_v22 = vld [vmem:[%s4400_s25 + $0x28] sm:$0xff]   ;;  %v3703_v23 = vld [vmem:[%s4400_s25 + $0x30] sm:$0xff]   ;;  %s3126_s13 = sshll.u32 %s6391_s9, 4  ;;  %s6468_s7 = scalar_lea.hbm %s6525_s5, %s3375_s11  ;;  %s6470_s13 = int_to_ptr.vmem [resolvable:$true] %s3126_s13 }
  0x77   : > { %v3704_v24 = vld [vmem:[%s4400_s25 + $0x38] sm:$0xff]   ;;  %v3705_v25 = vld [vmem:[%s4400_s25 + $0x40] sm:$0xff]   ;;  %v3706_v26 = vld [vmem:[%s4400_s25 + $0x48] sm:$0xff]   ;;  %v4445_v45 = vsub.s32 0, %v412_v42  ;;  %v417_v55 = vsub.s32 2, %v412_v42  ;;  %s3113_s14 = scalar_lea.sflag [#allocation5], %s4394_s24 }
  0x78   : > { %v3707_v27 = vld [vmem:[%s4400_s25 + $0x50] sm:$0xff]   ;;  %v3708_v28 = vld [vmem:[%s4400_s25 + $0x58] sm:$0xff]   ;;  %v3709_v29 = vld [vmem:[%s4400_s25 + $0x60] sm:$0xff]   ;;  %s4071_s27 = scalar_lea.vmem %s6470_s13, 2048  ;;  %p6722_p12 = scmp.ne.s32.totalorder %s6556_s8, 0 }
  0x79   : > { %610 = vmatpush1.bf16.msra.mxu0 %v3681_v6  ;;  %v3710_v30 = vld [vmem:[%s4400_s25 + $0x68] sm:$0xff]   ;;  %v3711_v31 = vld [vmem:[%s4400_s25 + $0x70] sm:$0xff]   ;;  %v3712_v32 = vld [vmem:[%s4400_s25 + $0x78] sm:$0xff]   ;;  %6561 = vst [vmem:[#allocation13_spill] sm:$0xff] %v4445_v45  ;;  %p4072_p8 = scmp.ne.s32.totalorder %s6470_s13, %s4071_s27  ;;  %s4167_s21 = smov [#allocation9]  }
  0x7a   : > { %611 = vmatprep.subr.bf16.mxu0 %v3682_v7  ;;  %v3713_v33 = vld [vmem:[#allocation8 + $0x40] sm:$0xff]   ;;  %v3715_v35 = vld [vmem:[#allocation8 + $0x48] sm:$0xff]   ;;  %v3717_v37 = vld [vmem:[#allocation8 + $0x50] sm:$0xff]   ;;  %s4075_s15 = sshll.u32 %s4167_s21, 4  ;;  %s4076_s15 = int_to_ptr.vmem [resolvable:$false] %s4075_s15 }
  0x7b   : > { %3471 = vmatprep.subr.bf16.mxu1 %v3713_v33  ;;  %v3714_v34 = vld [vmem:[#allocation8] sm:$0xff]   ;;  %v3716_v36 = vld [vmem:[#allocation8 + $0x8] sm:$0xff]   ;;  %v3718_v38 = vld [vmem:[#allocation8 + $0x10] sm:$0xff]   ;;  %p4073_p1 = pnand %p4072_p8, %p6722_p12  ;;  %s4077_s25 = scalar_lea.vmem %s4076_s15, 4096 }
  0x7c   : > { %3472 = vmatpush3.bf16.msra.mxu1 %v3714_v34  ;;  %v3719_v39 = vld [vmem:[#allocation8 + $0x58] sm:$0xff]   ;;  %v408_v43 = vld [vmem:[%s6522_s2] sm:$0x3]  ;;  %v3723_v2 = vld [vmem:[#allocation8 + $0x68] sm:$0xff]   ;;  %p4078_p3 = scmp.lt.s32.totalorder %s6470_s13, %s4076_s15  ;;  %p4079_p5 = scmp.lt.s32.totalorder %s4077_s25, %s4071_s27 }
  0x7d   : > { %612 = vmatpush1.bf16.msra.mxu0 %v3684_v8  ;;  %3473 = vmatprep.subr.bf16.mxu1 %v3715_v35  ;;  %v3720_v41 = vld [vmem:[#allocation8 + $0x18] sm:$0xff]   ;;  %v409_v44 = vunpack.c.l.bf16 %v408_v43  ;;  %v3721_v47 = vld [vmem:[#allocation8 + $0x60] sm:$0xff]   ;;  %v3724_v4 = vld [vmem:[#allocation8 + $0x28] sm:$0xff]   ;;  %p4074_p10 = pneg %p4073_p1 }
  0x7e   : > { %613 = vmatprep.subr.bf16.mxu0 %v3685_v9  ;;  %v3722_v49 = vld [vmem:[#allocation8 + $0x20] sm:$0xff]   ;;  %p4080_p9 = por %p4079_p5, %p4078_p3 }
  0x7f   : > { %v414_v46 = vrot.slane %v409_v44, %v4445_v45  ;;  %v418_v61 = vrot.slane %v409_v44, %v417_v55 }
  0x80   : > { %3474 = vmatpush3.bf16.msra.mxu1 %v3716_v36  ;;  %p4081_p11 = pnand %p4080_p9, %p4074_p10 }
  0x81   : > { %614 = vmatpush1.bf16.msra.mxu0 %v3687_v10  ;;  %3475 = vmatprep.subr.bf16.mxu1 %v3717_v37  ;;  %v4449_v48 = vrot.slane %v414_v46, %v4445_v45  ;;  %v4474_v5 = vrot.slane %v418_v61, %v4445_v45  ;;  %v3728_v61 = vld [vmem:[#allocation8 + $0x38] sm:$0xff]  }
  0x82   : > { %615 = vmatprep.subr.bf16.mxu0 %v3688_v11  ;;  %v3725_v11 = vld [vmem:[#allocation8 + $0x70] sm:$0xff]  }
  0x84   : > { %3476 = vmatpush3.bf16.msra.mxu1 %v3718_v38 }
  0x85   : > { %616 = vmatpush1.bf16.msra.mxu0 %v3690_v12  ;;  %3477 = vmatprep.subr.bf16.mxu1 %v3719_v39 }
  0x86   : > { %617 = vmatprep.subr.bf16.mxu0 %v3691_v13 }
  0x88   : > { %3478 = vmatpush3.bf16.msra.mxu1 %v3720_v41 }
  0x89   : > { %618 = vmatpush1.bf16.msra.mxu0 %v3693_v14  ;;  %3479 = vmatprep.subr.bf16.mxu1 %v3721_v47 }
  0x8a   : > { %619 = vmatprep.subr.bf16.mxu0 %v3694_v15 }
  0x8c   : > { %3480 = vmatpush3.bf16.msra.mxu1 %v3722_v49 }
  0x8d   : > { %620 = vmatpush1.bf16.msra.mxu0 %v3696_v16  ;;  %3481 = vmatprep.subr.bf16.mxu1 %v3723_v2 }
  0x90   : > { %638 = vmatmul.mubr.bf16.vlgmr.msra.gmra.mrb[0].mxu0 %v3697_v17  ;;  %3482 = vmatpush3.bf16.msra.mxu1 %v3724_v4 }
  0x91   : > { %647 = vmatprep.mubr.bf16.mxu0 %v4166_v0  ;;  %3483 = vmatprep.subr.bf16.mxu1 %v3725_v11 }
  0x98   : > { %648 = vmatmul.mubr.bf16.gmra.mrb[4].mxu0 %v3698_v18 }
  0x99   : > { %657 = vmatprep.mubr.bf16.mxu0 %v4166_v0 }
  0xa0   : > { %658 = vmatmul.mubr.bf16.gmra.mrb[8].mxu0 %v3699_v19 }
  0xa1   : > { %667 = vmatprep.mubr.bf16.mxu0 %v4166_v0 }
  0xa8   : > { %668 = vmatmul.mubr.bf16.gmra.mrb[12].mxu0 %v3700_v20 }
  0xa9   : > { %677 = vmatprep.mubr.bf16.mxu0 %v4166_v0 }
  0xb0   : > { %678 = vmatmul.mubr.bf16.gmra.mrb[16].mxu0 %v3701_v21 }
  0xb1   : > { %687 = vmatprep.mubr.bf16.mxu0 %v4166_v0 }
  0xb8   : > { %688 = vmatmul.mubr.bf16.gmra.mrb[20].mxu0 %v3702_v22 }
  0xb9   : > { %697 = vmatprep.mubr.bf16.mxu0 %v4166_v0 }
  0xc0   : > { %698 = vmatmul.mubr.bf16.gmra.mrb[24].mxu0 %v3703_v23 }
  0xc1   : > { %707 = vmatprep.mubr.bf16.mxu0 %v4166_v0 }
  0xc8   : > { %708 = vmatmul.mubr.bf16.gmra.mrb[28].mxu0 %v3704_v24 }
  0xc9   : > { %717 = vmatprep.mubr.bf16.mxu0 %v4166_v0 }
  0xd0   : > { %718 = vmatmul.mubr.bf16.gmra.mrb[32].mxu0 %v3705_v25 }
  0xd1   : > { %727 = vmatprep.mubr.bf16.mxu0 %v4166_v0 }
  0xd8   : > { %728 = vmatmul.mubr.bf16.gmra.mrb[36].mxu0 %v3706_v26 }
  0xd9   : > { %737 = vmatprep.mubr.bf16.mxu0 %v4166_v0 }
  0xe0   : > { %738 = vmatmul.mubr.bf16.gmra.mrb[40].mxu0 %v3707_v27 }
  0xe1   : > { %747 = vmatprep.mubr.bf16.mxu0 %v4166_v0 }
  0xe8   : > { %748 = vmatmul.mubr.bf16.gmra.mrb[44].mxu0 %v3708_v28 }
  0xe9   : > { %757 = vmatprep.mubr.bf16.mxu0 %v4166_v0 }
  0xf0   : > { %758 = vmatmul.mubr.bf16.gmra.mrb[48].mxu0 %v3709_v29 }
  0xf1   : > { %767 = vmatprep.mubr.bf16.mxu0 %v4166_v0 }
  0xf8   : > { %768 = vmatmul.mubr.bf16.gmra.mrb[52].mxu0 %v3710_v30 }
  0xf9   : > { %777 = vmatprep.mubr.bf16.mxu0 %v4166_v0 }
 0x100   : > { %778 = vmatmul.mubr.bf16.gmra.mrb[56].mxu0 %v3711_v31  ;;  %v3726_v31 = vld [vmem:[#allocation8 + $0x30] sm:$0xff]  }
 0x101   : > { %787 = vmatprep.mubr.bf16.mxu0 %v4166_v0  ;;  %3484 = vmatpush3.bf16.msra.mxu1 %v3726_v31 }
 0x108   : > { %788 = vmatmul.mubr.bf16.gmra.mrb[60].mxu0 %v3712_v32 }
 0x163   : > { %v639_v50 = vpop.f32.mrb[0].mxu0 }
 0x164   : > { %v4452_v51 = vadd.f32 %v639_v50, %v4449_v48  ;;  %v641_v52 = vpop.f32.mrb[1].mxu0  ;;  %v3727_v50 = vld [vmem:[#allocation8 + $0x78] sm:$0xff]  }
 0x165   : > { %v643_v53 = vpop.f32.mrb[2].mxu0  ;;  %v642_v36 = vadd.f32 %v641_v52, %v4474_v5  ;;  %3485 = vmatprep.subr.bf16.mxu1 %v3727_v50 }
 0x166   : > { %v4455_v54 = vmul.f32 0.70710677, %v4452_v51  ;;  %v4458_v56 = vadd.f32 %v643_v53, %v4449_v48  ;;  %v4460_v57 = vpop.f32.mrb[3].mxu0  ;;  %3486 = vmatpush3.bf16.msra.mxu1 %v3728_v61 }
 0x167   : > { %v4542_v52 = vmul.f32 0.70710677, %v642_v36  ;;  %v4585_v50 = vmul.f32 0.5, %v642_v36 }
 0x168   : > { %v4463_v58 = vand.u32 2147483647, %v4455_v54  ;;  %v4466_v59 = vmul.f32 0.70710677, %v4458_v56  ;;  %vm2142_vm0 = vcmp.lt.f32.partialorder %v4455_v54, 0.0 }
 0x169   : > { %6563 = vst [vmem:[#allocation15_spill] sm:$0xff] %v4542_v52  ;;  %6567 = vst [vmem:[#allocation19_spill] sm:$0xff] %v4585_v50 }
 0x16a   : > { %v990_v60 = vmul.f32 0.3275911, %v4463_v58  ;;  %v4470_v62 = vand.u32 2147483647, %v4466_v59  ;;  %vm2144_vm1 = vcmp.lt.f32.partialorder %v4466_v59, 0.0 }
 0x16b   : > { %v649_v1 = vpop.f32.mrb[4].mxu0 }
 0x16c   : > { %v1054_v63 = vadd.f32 1.0, %v990_v60  ;;  %v992_v0 = vmul.f32 0.3275911, %v4470_v62  ;;  %v651_v3 = vpop.f32.mrb[5].mxu0  ;;  %v4477_v9 = vadd.f32 %v649_v1, %v4449_v48 }
 0x16d   : > { %v653_v7 = vpop.f32.mrb[6].mxu0  ;;  %v4480_v10 = vadd.f32 %v651_v3, %v4474_v5  ;;  %v927_v3 = vand.u32 2147483647, %v4542_v52 }
 0x16e   : > { %3729 = vrcp.f32 %v1054_v63  ;;  %v1056_v6 = vadd.f32 1.0, %v992_v0  ;;  %v655_v8 = vpop.f32.mrb[7].mxu0  ;;  %v4483_v12 = vadd.f32 %v653_v7, %v4449_v48  ;;  %v4486_v13 = vmul.f32 0.70710677, %v4477_v9 }
 0x16f   : > { %v4489_v14 = vadd.f32 %v655_v8, %v4474_v5  ;;  %v4492_v15 = vmul.f32 0.70710677, %v4480_v10  ;;  %v646_v0 = vadd.f32 %v4460_v57, %v4474_v5  ;;  %v1758_v57 = vsub.f32 0.0, %v4463_v58 }
 0x170   : > { %3731 = vrcp.f32 %v1056_v6  ;;  %v4495_v16 = vmul.f32 0.70710677, %v4483_v12  ;;  %v4498_v18 = vand.u32 2147483647, %v4486_v13  ;;  %vm2146_vm2 = vcmp.lt.f32.partialorder %v4486_v13, 0.0 }
 0x171   : > { %v4501_v20 = vand.u32 2147483647, %v4492_v15  ;;  %v4508_v24 = vmul.f32 0.70710677, %v4489_v14  ;;  %v4593_v61 = vmul.f32 0.5, %v646_v0  ;;  %vm2147_vm3 = vcmp.lt.f32.partialorder %v4492_v15, 0.0 }
 0x172   : > { %v4504_v21 = vand.u32 2147483647, %v4495_v16  ;;  %v994_v23 = vmul.f32 0.3275911, %v4498_v18  ;;  %vm2148_vm4 = vcmp.lt.f32.partialorder %v4495_v16, 0.0 }
 0x173   : > { %v659_v17 = vpop.f32.mrb[8].mxu0  ;;  %v995_v25 = vmul.f32 0.3275911, %v4501_v20  ;;  %v4515_v29 = vand.u32 2147483647, %v4508_v24  ;;  %6569 = vst [vmem:[#allocation21_spill] sm:$0xff] %v4593_v61 }
 0x174   : > { %v661_v19 = vpop.f32.mrb[9].mxu0  ;;  %v996_v26 = vmul.f32 0.3275911, %v4504_v21  ;;  %v1058_v28 = vadd.f32 1.0, %v994_v23  ;;  %v4527_v41 = vadd.f32 %v659_v17, %v4449_v48  ;;  %v4566_v23 = vmul.f32 0.70710677, %v646_v0 }
 0x175   : > { %v663_v22 = vpop.f32.mrb[10].mxu0  ;;  %v1059_v33 = vadd.f32 1.0, %v995_v25  ;;  %v997_v35 = vmul.f32 0.3275911, %v4515_v29  ;;  %v4538_v47 = vadd.f32 %v661_v19, %v4474_v5  ;;  %vm2149_vm5 = vcmp.lt.f32.partialorder %v4508_v24, 0.0 }
 0x176   : > { %v4517_v30 = vpop.f32.mrb[11].mxu0  ;;  %3733 = vrcp.f32 %v1058_v28  ;;  %v1060_v34 = vadd.f32 1.0, %v996_v26  ;;  %v4535_v46 = vmul.f32 0.70710677, %v4527_v41  ;;  %6565 = vst [vmem:[#allocation17_spill] sm:$0xff] %v4566_v23  ;;  %v4573_v31 = vadd.f32 %v663_v22, %v4449_v48 }
 0x177   : > { %3735 = vrcp.f32 %v1059_v33  ;;  %v1061_v40 = vadd.f32 1.0, %v997_v35  ;;  %v4552_v1 = vmul.f32 0.70710677, %v4538_v47  ;;  %v4578_v33 = vmul.f32 0.5, %v4452_v51 }
 0x178   : > { %v4512_v27 = vpop.eup %3729  ;;  %3737 = vrcp.f32 %v1060_v34  ;;  %6562 = vst [vmem:[#allocation14_spill] sm:$0xff] %v4535_v46  ;;  %v4546_v60 = vand.u32 2147483647, %v4535_v46  ;;  %v991_v34 = vmul.f32 0.3275911, %v927_v3  ;;  %v1760_v35 = vsub.f32 0.0, %v4470_v62 }
 0x179   : > { %v1182_v32 = vmul.f32 1.0614054, %v4512_v27  ;;  %3739 = vrcp.f32 %v1061_v40  ;;  %6564 = vst [vmem:[#allocation16_spill] sm:$0xff] %v4552_v1  ;;  %v4557_v4 = vand.u32 2147483647, %v4552_v1  ;;  %v1822_v51 = vmul.f32 %v1758_v57, %v4463_v58 }
 0x17a   : > { %v4524_v38 = vpop.eup %3731  ;;  %v998_v2 = vmul.f32 0.3275911, %v4546_v60  ;;  %v4600_v50 = vmul.f32 0.70710677, %v4573_v31 }
 0x17b   : > { %v4522_v37 = vpop.f32.mrb[12].mxu0  ;;  %v1246_v39 = vadd.f32 -1.4531521, %v1182_v32  ;;  %v1184_v43 = vmul.f32 1.0614054, %v4524_v38 }
 0x17c   : > { %v4529_v42 = vpop.f32.mrb[13].mxu0  ;;  %v1062_v8 = vadd.f32 1.0, %v998_v2  ;;  %v999_v28 = vmul.f32 0.3275911, %v4557_v4  ;;  %6570 = vst [vmem:[#allocation22_spill] sm:$0xff] %v4600_v50 }
 0x17d   : > { %v4532_v44 = vpop.f32.mrb[14].mxu0  ;;  %v1248_v53 = vadd.f32 -1.4531521, %v1184_v43  ;;  %v1310_v55 = vmul.f32 %v4512_v27, %v1246_v39  ;;  %v4606_v61 = vand.u32 2147483647, %v4600_v50 }
 0x17e   : > { %v4540_v49 = vpop.f32.mrb[15].mxu0  ;;  %3741 = vrcp.f32 %v1062_v8  ;;  %v1063_v36 = vadd.f32 1.0, %v999_v28  ;;  %v1824_v8 = vmul.f32 %v1760_v35, %v4470_v62 }
 0x17f   : > { %v1312_v63 = vmul.f32 %v4524_v38, %v1248_v53  ;;  %v1374_v7 = vadd.f32 1.4214138, %v1310_v55  ;;  %v4588_v53 = vmul.f32 0.5, %v4458_v56  ;;  %v1759_v55 = vsub.f32 0.0, %v927_v3 }
 0x180   : > { %v4559_v6 = vpop.eup %3733  ;;  %v1055_v56 = vadd.f32 1.0, %v991_v34  ;;  %3743 = vrcp.f32 %v1063_v36  ;;  %v1000_v62 = vmul.f32 0.3275911, %v4606_v61 }
 0x181   : > { %v4563_v17 = vpop.eup %3735  ;;  %v1376_v19 = vadd.f32 1.4214138, %v1312_v63  ;;  %v1186_v26 = vmul.f32 1.0614054, %v4559_v6  ;;  %v1438_v43 = vmul.f32 %v4512_v27, %v1374_v7  ;;  %v929_v63 = vand.u32 2147483647, %v4566_v23 }
 0x182   : > { %v1187_v39 = vmul.f32 1.0614054, %v4563_v17  ;;  %v4582_v40 = vpop.eup %3737  ;;  %v1886_v23 = vmul.f32 1.442695, %v1822_v51  ;;  %v1823_v1 = vmul.f32 %v1759_v55, %v927_v3  ;;  %3745 = vrcp.f32 %v1055_v56 }
 0x183   : > { %v4561_v11 = vpop.f32.mrb[16].mxu0  ;;  %v4596_v2 = vpop.eup %3739  ;;  %v1440_v45 = vmul.f32 %v4524_v38, %v1376_v19  ;;  %v1250_v7 = vadd.f32 -1.4531521, %v1186_v26  ;;  %v1188_v58 = vmul.f32 1.0614054, %v4582_v40  ;;  %v1761_v26 = vsub.f32 0.0, %v929_v63 }
 0x184   : > { %v4568_v25 = vpop.f32.mrb[17].mxu0  ;;  %v1251_v52 = vadd.f32 -1.4531521, %v1187_v39  ;;  %v1502_v57 = vadd.f32 -0.28449672, %v1438_v43  ;;  %v1762_v43 = vsub.f32 0.0, %v4498_v18  ;;  %3747 = vpow2.f32 %v1886_v23 }
 0x185   : > { %v4575_v32 = vpop.f32.mrb[18].mxu0  ;;  %v1189_v0 = vmul.f32 1.0614054, %v4596_v2  ;;  %v993_v19 = vmul.f32 0.3275911, %v929_v63  ;;  %v1314_v34 = vmul.f32 %v4559_v6, %v1250_v7  ;;  %v1825_v36 = vmul.f32 %v1761_v26, %v929_v63 }
 0x186   : > { %6566 = vst [vmem:[#allocation18_spill] sm:$0xff] %v4575_v32  ;;  %v4590_v22 = vpop.f32.mrb[19].mxu0  ;;  %v1890_v39 = vmul.f32 1.442695, %v1824_v8  ;;  %v1315_v50 = vmul.f32 %v4563_v17, %v1251_v52  ;;  %v1252_v32 = vadd.f32 -1.4531521, %v1188_v58  ;;  %v1566_v3 = vmul.f32 %v4512_v27, %v1502_v57 }
 0x187   : > { %6568 = vst [vmem:[#allocation20_spill] sm:$0xff] %v4590_v22  ;;  %v1504_v22 = vadd.f32 -0.28449672, %v1440_v45  ;;  %v1253_v55 = vadd.f32 -1.4531521, %v1189_v0  ;;  %v1064_v45 = vadd.f32 1.0, %v1000_v62  ;;  %v1826_v56 = vmul.f32 %v1762_v43, %v4498_v18 }
 0x188   : > { %v1888_v7 = vmul.f32 1.442695, %v1823_v1  ;;  %v4622_v8 = vpop.eup %3741  ;;  %v1057_v52 = vadd.f32 1.0, %v993_v19  ;;  %v1378_v58 = vadd.f32 1.4214138, %v1314_v34  ;;  %3749 = vpow2.f32 %v1890_v39 }
 0x189   : > { %v1568_v46 = vmul.f32 %v4524_v38, %v1504_v22  ;;  %v1379_v57 = vadd.f32 1.4214138, %v1315_v50  ;;  %v1316_v0 = vmul.f32 %v4582_v40, %v1252_v32  ;;  %v1630_v1 = vadd.f32 0.2548296, %v1566_v3 }
 0x18a   : > { %v1317_v23 = vmul.f32 %v4596_v2, %v1253_v55  ;;  %v1765_v63 = vsub.f32 0.0, %v4515_v29  ;;  %3751 = vrcp.f32 %v1064_v45  ;;  %v1892_v22 = vmul.f32 1.442695, %v1825_v36 }
 0x18b   : > { %v4608_v28 = vpop.f32.mrb[20].mxu0  ;;  %3753 = vpow2.f32 %v1888_v7  ;;  %v1190_v34 = vmul.f32 1.0614054, %v4622_v8  ;;  %v1632_v50 = vadd.f32 0.2548296, %v1568_v46  ;;  %v4639_v32 = vmul.f32 0.5, %v4477_v9  ;;  %v4649_v7 = vpop.eup %3743 }
 0x18c   : > { %6571 = vst [vmem:[#allocation23_spill] sm:$0xff] %v4608_v28  ;;  %v4612_v35 = vpop.f32.mrb[21].mxu0  ;;  %v1442_v39 = vmul.f32 %v4559_v6, %v1378_v58  ;;  %v1894_v55 = vmul.f32 1.442695, %v1826_v56  ;;  %v4646_v45 = vmul.f32 0.5, %v4480_v10  ;;  %v1694_v46 = vmul.f32 %v4512_v27, %v1630_v1  ;;  %v4660_v56 = vpop.eup %3745 }
 0x18d   : > { %6572 = vst [vmem:[#allocation24_spill] sm:$0xff] %v4612_v35  ;;  %v4616_v51 = vpop.f32.mrb[22].mxu0  ;;  %v1763_v35 = vsub.f32 0.0, %v4501_v20  ;;  %v1381_v36 = vadd.f32 1.4214138, %v1317_v23  ;;  %v1829_v9 = vmul.f32 %v1765_v63, %v4515_v29  ;;  %v4655_v58 = vadd.f32 %v4517_v30, %v4474_v5  ;;  %6577 = vst [vmem:[#allocation29_spill] sm:$0xff] %v4660_v56 }
 0x18e   : > { %6573 = vst [vmem:[#allocation25_spill] sm:$0xff] %v4616_v51  ;;  %v4619_v28 = vpop.f32.mrb[23].mxu0  ;;  %v1764_v51 = vsub.f32 0.0, %v4504_v21  ;;  %3755 = vrcp.f32 %v1057_v52  ;;  %v1254_v10 = vadd.f32 -1.4531521, %v1190_v34  ;;  %v3748_v1 = vpop.eup %3747 }
 0x18f   : > { %v1827_v19 = vmul.f32 %v1763_v35, %v4501_v20  ;;  %v1443_v20 = vmul.f32 %v4563_v17, %v1379_v57  ;;  %v1380_v35 = vadd.f32 1.4214138, %v1316_v0  ;;  %v1696_v57 = vmul.f32 %v4524_v38, %v1632_v50 }
 0x190   : > { %v1828_v43 = vmul.f32 %v1764_v51, %v4504_v21  ;;  %v4658_v51 = vmul.f32 0.5, %v4483_v12  ;;  %3757 = vpow2.f32 %v1892_v22  ;;  %v1506_v0 = vadd.f32 -0.28449672, %v1442_v39 }
 0x191   : > { %v1896_v21 = vmul.f32 1.442695, %v1827_v19  ;;  %3759 = vpow2.f32 %v1894_v55  ;;  %v1507_v29 = vadd.f32 -0.28449672, %v1443_v20  ;;  %v1444_v23 = vmul.f32 %v4582_v40, %v1380_v35 }
 0x192   : > { %v1898_v27 = vmul.f32 1.442695, %v1828_v43  ;;  %v1191_v30 = vmul.f32 1.0614054, %v4649_v7  ;;  %v2014_v63 = vmul.f32 %v3748_v1, %v1694_v46  ;;  %v1445_v12 = vmul.f32 %v4596_v2, %v1381_v36  ;;  %v3750_v38 = vpop.eup %3749 }
 0x193   : > { %v4628_v62 = vpop.f32.mrb[24].mxu0  ;;  %v1900_v19 = vmul.f32 1.442695, %v1829_v9  ;;  %v4669_v34 = vmul.f32 0.70710677, %v4655_v58  ;;  %3761 = vpow2.f32 %v1896_v21  ;;  %v4672_v22 = vmul.f32 0.5, %v4489_v14 }
 0x194   : > { %v4632_v26 = vpop.f32.mrb[25].mxu0  ;;  %v4675_v50 = vmul.f32 0.5, %v4527_v41  ;;  %v1318_v39 = vmul.f32 %v4622_v8, %v1254_v10  ;;  %v4678_v43 = vpop.eup %3751  ;;  %v2016_v55 = vmul.f32 %v3750_v38, %v1696_v57  ;;  %v1570_v20 = vmul.f32 %v4559_v6, %v1506_v0 }
 0x195   : > { %6574 = vst [vmem:[#allocation26_spill] sm:$0xff] %v4632_v26  ;;  %v4636_v18 = vpop.f32.mrb[26].mxu0  ;;  %3763 = vpow2.f32 %v1898_v27  ;;  %v1766_v35 = vsub.f32 0.0, %v4546_v60  ;;  %v4682_v46 = vpop.eup %3753  ;;  %v1571_v14 = vmul.f32 %v4563_v17, %v1507_v29  ;;  %v1508_v36 = vadd.f32 -0.28449672, %v1444_v23 }
 0x196   : > { %6575 = vst [vmem:[#allocation27_spill] sm:$0xff] %v4636_v18  ;;  %v4643_v3 = vpop.f32.mrb[27].mxu0  ;;  %6579 = vst [vmem:[#allocation31_spill] sm:$0xff] %v4682_v46  ;;  %v4687_v41 = vmul.f32 0.5, %v4538_v47  ;;  %v1255_v9 = vadd.f32 -1.4531521, %v1191_v30  ;;  %3765 = vpow2.f32 %v1900_v19  ;;  %v4697_v29 = vadd.f32 %v4522_v37, %v4449_v48 }
 0x197   : > { %6576 = vst [vmem:[#allocation28_spill] sm:$0xff] %v4643_v3  ;;  %v2078_v21 = vsub.f32 1.0, %v2014_v63  ;;  %v1509_v10 = vadd.f32 -0.28449672, %v1445_v12  ;;  %v4690_v57 = vand.u32 2147483647, %v4669_v34  ;;  %v1830_v30 = vmul.f32 %v1766_v35, %v4546_v60 }
 0x198   : > { %v1382_v0 = vadd.f32 1.4214138, %v1318_v39  ;;  %v1767_v27 = vsub.f32 0.0, %v4557_v4  ;;  %v1192_v1 = vmul.f32 1.0614054, %v4678_v43  ;;  %v2080_v47 = vsub.f32 1.0, %v2016_v55  ;;  %v4701_v12 = vpop.eup %3755 }
 0x199   : > { %v1634_v23 = vadd.f32 0.2548296, %v1570_v20  ;;  %v1001_v63 = vmul.f32 0.3275911, %v4690_v57  ;;  %6580 = vst [vmem:[#allocation32_spill] sm:$0xff] %v4701_v12  ;;  %v1572_v38 = vmul.f32 %v4582_v40, %v1508_v36  ;;  %v1319_v39 = vmul.f32 %v4649_v7, %v1255_v9 }
 0x19a   : > { %v1635_v19 = vadd.f32 0.2548296, %v1571_v14  ;;  %v4706_v46 = vmul.f32 0.5, %v4573_v31  ;;  %v4708_v56 = vpop.eup %3757  ;;  %v2206_v37 = vsub.f32 0.0, %v2078_v21  ;;  %v1573_v55 = vmul.f32 %v4596_v2, %v1509_v10 }
 0x19b   : > { %v4665_v52 = vpop.f32.mrb[28].mxu0  ;;  %6581 = vst [vmem:[#allocation33_spill] sm:$0xff] %v4708_v56  ;;  %v1065_v20 = vadd.f32 1.0, %v1001_v63  ;;  %v4713_v60 = vadd.f32 %v4529_v42, %v4474_v5  ;;  %v3760_v35 = vpop.eup %3759  ;;  %v1446_v14 = vmul.f32 %v4622_v8, %v1382_v0  ;;  %v1831_v36 = vmul.f32 %v1767_v27, %v4557_v4 }
 0x19c   : > { %6578 = vst [vmem:[#allocation30_spill] sm:$0xff] %v4665_v52  ;;  %v1256_v12 = vadd.f32 -1.4531521, %v1192_v1  ;;  %v1768_v9 = vsub.f32 0.0, %v4606_v61  ;;  %v2208_v31 = vsub.f32 0.0, %v2080_v47  ;;  %v1698_v52 = vmul.f32 %v4559_v6, %v1634_v23 }
 0x19d   : > { %3767 = vrcp.f32 %v1065_v20  ;;  %v4720_v56 = vmul.f32 0.70710677, %v4697_v29  ;;  %v3762_v10 = vpop.eup %3761  ;;  %v1699_v63 = vmul.f32 %v4563_v17, %v1635_v19  ;;  %v1636_v42 = vadd.f32 0.2548296, %v1572_v38 }
 0x19e   : > { %v1902_v3 = vmul.f32 1.442695, %v1830_v30  ;;  %v1383_v18 = vadd.f32 1.4214138, %v1319_v39  ;;  %v2270_v4 = vsel %vm2142_vm0, %v2206_v37, %v2078_v21  ;;  %v1637_v0 = vadd.f32 0.2548296, %v1573_v55 }
 0x19f   : > { %v3764_v26 = vpop.eup %3763  ;;  %v4726_v27 = vand.u32 2147483647, %v4720_v56  ;;  %v4729_v6 = vmul.f32 0.70710677, %v4713_v60  ;;  %v1510_v1 = vadd.f32 -0.28449672, %v1446_v14  ;;  %v1320_v20 = vmul.f32 %v4678_v43, %v1256_v12 }
 0x1a0   : > { %v1904_v23 = vmul.f32 1.442695, %v1831_v36  ;;  %v1832_v17 = vmul.f32 %v1768_v9, %v4606_v61  ;;  %v3766_v19 = vpop.eup %3765  ;;  %v2272_v30 = vsel %vm2144_vm1, %v2208_v31, %v2080_v47  ;;  %v2018_v38 = vmul.f32 %v3760_v35, %v1698_v52 }
 0x1a1   : > { %v1002_v54 = vmul.f32 0.3275911, %v4726_v27  ;;  %v4737_v21 = vand.u32 2147483647, %v4729_v6  ;;  %v2334_v39 = vadd.f32 1.0, %v2270_v4  ;;  %v2019_v37 = vmul.f32 %v3762_v10, %v1699_v63 }
 0x1a2   : > { %v1447_v55 = vmul.f32 %v4649_v7, %v1383_v18  ;;  %v4742_v14 = vadd.f32 %v4532_v44, %v4449_v48  ;;  %v1700_v61 = vmul.f32 %v4582_v40, %v1636_v42  ;;  %v1701_v12 = vmul.f32 %v4596_v2, %v1637_v0 }
 0x1a3   : > { %v1066_v59 = vadd.f32 1.0, %v1002_v54  ;;  %v1003_v52 = vmul.f32 0.3275911, %v4737_v21  ;;  %v2336_v47 = vadd.f32 1.0, %v2272_v30  ;;  %v1574_v35 = vmul.f32 %v4622_v8, %v1510_v1 }
 0x1a4   : > { %3769 = vpow2.f32 %v1902_v3  ;;  %v1384_v36 = vadd.f32 1.4214138, %v1320_v20  ;;  %v2082_v9 = vsub.f32 1.0, %v2018_v38  ;;  %v1906_v18 = vmul.f32 1.442695, %v1832_v17 }
 0x1a5   : > { %3771 = vrcp.f32 %v1066_v59  ;;  %v1067_v44 = vadd.f32 1.0, %v1003_v52  ;;  %v2083_v31 = vsub.f32 1.0, %v2019_v37  ;;  %v1511_v40 = vadd.f32 -0.28449672, %v1447_v55 }
 0x1a6   : > { %v4751_v2 = vmul.f32 0.70710677, %v4742_v14  ;;  %v4755_v10 = vadd.f32 %v4540_v49, %v4474_v5  ;;  %v4760_v3 = vmul.f32 %v2334_v39, %v4578_v33  ;;  %v2020_v42 = vmul.f32 %v3764_v26, %v1700_v61 }
 0x1a7   : > { %v4757_v63 = vpop.eup %3767  ;;  %v2021_v4 = vmul.f32 %v3766_v19, %v1701_v12  ;;  %3773 = vpow2.f32 %v1904_v23  ;;  %v1638_v0 = vadd.f32 0.2548296, %v1574_v35  ;;  %v1448_v1 = vmul.f32 %v4678_v43, %v1384_v36  ;;  %v4796_v35 = vpop.f32.mrb[29].mxu0 }
 0x1a8   : > { %6582 = vst [vmem:[#allocation34_spill] sm:$0xff] %v4760_v3  ;;  %3775 = vrcp.f32 %v1067_v44  ;;  %v4765_v20 = vadd.f32 %v4561_v11, %v4449_v48  ;;  %v4768_v17 = vmul.f32 %v2336_v47, %v4588_v53  ;;  %v1193_v49 = vmul.f32 1.0614054, %v4757_v63  ;;  %6584 = vst [vmem:[#allocation36_spill] sm:$0xff] %v4796_v35 }
 0x1a9   : > { %v4772_v30 = vand.u32 2147483647, %v4751_v2  ;;  %v4775_v33 = vmul.f32 0.70710677, %v4755_v10  ;;  %v2210_v26 = vsub.f32 0.0, %v2082_v9  ;;  %v2211_v23 = vsub.f32 0.0, %v2083_v31 }
 0x1aa   : > { %6583 = vst [vmem:[#allocation35_spill] sm:$0xff] %v4768_v17  ;;  %v1575_v19 = vmul.f32 %v4649_v7, %v1511_v40  ;;  %3777 = vpow2.f32 %v1906_v18  ;;  %v2084_v11 = vsub.f32 1.0, %v2020_v42  ;;  %v2085_v38 = vsub.f32 1.0, %v2021_v4  ;;  %v4805_v40 = vpop.f32.mrb[30].mxu0 }
 0x1ab   : > { %v1004_v53 = vmul.f32 0.3275911, %v4772_v30  ;;  %v4782_v54 = vand.u32 2147483647, %v4775_v33  ;;  %v1702_v39 = vmul.f32 %v4622_v8, %v1638_v0  ;;  %v1512_v37 = vadd.f32 -0.28449672, %v1448_v1 }
 0x1ac   : > { %v4786_v55 = vmul.f32 0.5, %v4655_v58  ;;  %v4789_v61 = vmul.f32 0.70710677, %v4765_v20  ;;  %v1257_v12 = vadd.f32 -1.4531521, %v1193_v49  ;;  %v4794_v47 = vadd.f32 %v4568_v25, %v4474_v5  ;;  %6585 = vst [vmem:[#allocation37_spill] sm:$0xff] %v4805_v40 }
 0x1ad   : > { %v1068_v59 = vadd.f32 1.0, %v1004_v53  ;;  %v1005_v52 = vmul.f32 0.3275911, %v4782_v54  ;;  %v2274_v8 = vsel %vm2146_vm2, %v2210_v26, %v2082_v9  ;;  %v2275_v58 = vsel %vm2147_vm3, %v2211_v23, %v2083_v31  ;;  %v4809_v1 = vpop.f32.mrb[31].mxu0 }
 0x1ae   : > { %v3770_v36 = vpop.eup %3769  ;;  %v1639_v18 = vadd.f32 0.2548296, %v1575_v19  ;;  %v4803_v44 = vand.u32 2147483647, %v4789_v61  ;;  %v2212_v4 = vsub.f32 0.0, %v2084_v11  ;;  %v2213_v25 = vsub.f32 0.0, %v2085_v38 }
 0x1af   : > { %v4807_v42 = vpop.eup %3771  ;;  %3779 = vrcp.f32 %v1068_v59  ;;  %v1069_v0 = vadd.f32 1.0, %v1005_v52  ;;  %6586 = vst [vmem:[#allocation38_spill] sm:$0xff] %v4809_v1  ;;  %v4811_v49 = vmul.f32 %v3770_v36, %v1702_v39  ;;  %v1576_v13 = vmul.f32 %v4678_v43, %v1512_v37 }
 0x1b0   : > { %v1194_v15 = vmul.f32 1.0614054, %v4807_v42  ;;  %v1006_v9 = vmul.f32 0.3275911, %v4803_v44  ;;  %v2338_v26 = vadd.f32 1.0, %v2274_v8  ;;  %v1321_v23 = vmul.f32 %v4757_v63, %v1257_v12 }
 0x1b1   : > { %v3774_v31 = vpop.eup %3773  ;;  %v4818_v19 = vmul.f32 0.5, %v4697_v29  ;;  %v4821_v53 = vmul.f32 0.70710677, %v4794_v47  ;;  %v2339_v39 = vadd.f32 1.0, %v2275_v58  ;;  %v1703_v52 = vmul.f32 %v4649_v7, %v1639_v18  ;;  %v4836_v18 = vpop.f32.mrb[32].mxu0 }
 0x1b2   : > { %v4823_v59 = vpop.eup %3775  ;;  %v1258_v37 = vadd.f32 -1.4531521, %v1194_v15  ;;  %3781 = vrcp.f32 %v1069_v0  ;;  %v2276_v36 = vsel %vm2148_vm4, %v2212_v4, %v2084_v11  ;;  %v1070_v1 = vadd.f32 1.0, %v1006_v9  ;;  %6587 = vst [vmem:[#allocation39_spill] sm:$0xff] %v4836_v18  ;;  %v6588_v0 = vld [vmem:[#allocation14_spill] sm:$0xff] }
 0x1b3   : > { %v1195_v8 = vmul.f32 1.0614054, %v4823_v59  ;;  %v4830_v12 = vand.u32 2147483647, %v4821_v53  ;;  %v2277_v40 = vsel %vm2149_vm5, %v2213_v25, %v2085_v38  ;;  %v2086_v17 = vsub.f32 1.0, %v4811_v49  ;;  %v6590_v25 = vld [vmem:[#allocation18_spill] sm:$0xff] }
 0x1b4   : > { %v3778_v29 = vpop.eup %3777  ;;  %v1640_v58 = vadd.f32 0.2548296, %v1576_v13  ;;  %v1769_v7 = vsub.f32 0.0, %v4690_v57  ;;  %vm2150_vm6 = vcmp.lt.f32.partialorder %v6588_v0, 0.0  ;;  %v1385_v16 = vadd.f32 1.4214138, %v1321_v23 }
 0x1b5   : > { %v1322_v11 = vmul.f32 %v4807_v42, %v1258_v37  ;;  %3783 = vrcp.f32 %v1070_v1  ;;  %v1007_v4 = vmul.f32 0.3275911, %v4830_v12  ;;  %v4842_v15 = vmul.f32 %v2338_v26, %v4639_v32  ;;  %v4848_v13 = vpop.f32.mrb[33].mxu0  ;;  %v6593_v1 = vld [vmem:[#allocation20_spill] sm:$0xff] }
 0x1b6   : > { %v2023_v24 = vmul.f32 %v3774_v31, %v1703_v52  ;;  %v1259_v38 = vadd.f32 -1.4531521, %v1195_v8  ;;  %v4846_v49 = vadd.f32 %v6590_v25, %v4449_v48  ;;  %6591 = vst [vmem:[#allocation18_spill] sm:$0xff] %v4848_v13  ;;  %v4851_v9 = vmul.f32 %v2339_v39, %v4646_v45  ;;  %v4857_v3 = vpop.f32.mrb[34].mxu0  ;;  %v6596_v45 = vld [vmem:[#allocation16_spill] sm:$0xff] }
 0x1b7   : > { %6589 = vst [vmem:[#allocation14_spill] sm:$0xff] %v4842_v15  ;;  %v2340_v23 = vadd.f32 1.0, %v2276_v36  ;;  %v1071_v18 = vadd.f32 1.0, %v1007_v4  ;;  %v4855_v37 = vadd.f32 %v6593_v1, %v4474_v5  ;;  %6594 = vst [vmem:[#allocation20_spill] sm:$0xff] %v4857_v3  ;;  %v2341_v32 = vadd.f32 1.0, %v2277_v40  ;;  %v4861_v8 = vpop.f32.mrb[35].mxu0 }
 0x1b8   : > { %6592 = vst [vmem:[#allocation40_spill] sm:$0xff] %v4851_v9  ;;  %v2214_v31 = vsub.f32 0.0, %v2086_v17  ;;  %v1704_v26 = vmul.f32 %v4678_v43, %v1640_v58  ;;  %v1833_v52 = vmul.f32 %v1769_v7, %v4690_v57  ;;  %6595 = vst [vmem:[#allocation41_spill] sm:$0xff] %v4861_v8  ;;  %vm2151_vm7 = vcmp.lt.f32.partialorder %v6596_v45, 0.0  ;;  %v4890_v15 = vpop.f32.mrb[36].mxu0 }
 0x1b9   : > { %v4863_v25 = vpop.eup %3779  ;;  %v1449_v39 = vmul.f32 %v4757_v63, %v1385_v16  ;;  %v1386_v36 = vadd.f32 1.4214138, %v1322_v11  ;;  %3785 = vrcp.f32 %v1071_v18  ;;  %v4868_v4 = vmul.f32 0.70710677, %v4846_v49  ;;  %6601 = vst [vmem:[#allocation45_spill] sm:$0xff] %v4890_v15 }
 0x1ba   : > { %v2087_v1 = vsub.f32 1.0, %v2023_v24  ;;  %v1770_v40 = vsub.f32 0.0, %v4726_v27  ;;  %v1323_v43 = vmul.f32 %v4823_v59, %v1259_v38  ;;  %v1196_v57 = vmul.f32 1.0614054, %v4863_v25 }
 0x1bb   : > { %6597 = vst [vmem:[#allocation16_spill] sm:$0xff] %v4868_v4  ;;  %v4874_v58 = vmul.f32 %v2340_v23, %v4658_v51  ;;  %v4877_v7 = vmul.f32 0.5, %v4713_v60  ;;  %v4880_v16 = vand.u32 2147483647, %v4868_v4  ;;  %v4883_v18 = vmul.f32 0.70710677, %v4855_v37 }
 0x1bc   : > { %v4885_v11 = vpop.eup %3781  ;;  %v4888_v24 = vmul.f32 %v2341_v32, %v4672_v22  ;;  %v2024_v38 = vmul.f32 %v3778_v29, %v1704_v26  ;;  %v1908_v8 = vmul.f32 1.442695, %v1833_v52  ;;  %v1260_v3 = vadd.f32 -1.4531521, %v1196_v57  ;;  %v6602_v29 = vld [vmem:[#allocation22_spill] sm:$0xff]  ;;  %v4906_v57 = vpop.f32.mrb[37].mxu0 }
 0x1bd   : > { %6598 = vst [vmem:[#allocation42_spill] sm:$0xff] %v4874_v58  ;;  %6599 = vst [vmem:[#allocation43_spill] sm:$0xff] %v4883_v18  ;;  %v1513_v51 = vadd.f32 -0.28449672, %v1449_v39  ;;  %v1450_v60 = vmul.f32 %v4807_v42, %v1386_v36  ;;  %v1197_v23 = vmul.f32 1.0614054, %v4885_v11  ;;  %v2278_v13 = vsel %vm2150_vm6, %v2214_v31, %v2086_v17 }
 0x1be   : > { %6600 = vst [vmem:[#allocation44_spill] sm:$0xff] %v4888_v24  ;;  %v1008_v58 = vmul.f32 0.3275911, %v4880_v16  ;;  %v2215_v9 = vsub.f32 0.0, %v2087_v1  ;;  %v1834_v35 = vmul.f32 %v1770_v40, %v4726_v27  ;;  %v1387_v22 = vadd.f32 1.4214138, %v1323_v43 }
 0x1bf   : > { %v4898_v32 = vpop.eup %3783  ;;  %vm2152_vm8 = vcmp.lt.f32.partialorder %v6602_v29, 0.0  ;;  %v1771_v26 = vsub.f32 0.0, %v4737_v21  ;;  %v1324_v52 = vmul.f32 %v4863_v25, %v1260_v3  ;;  %v4904_v36 = vand.u32 2147483647, %v4883_v18  ;;  %6603 = vst [vmem:[#allocation22_spill] sm:$0xff] %v4906_v57 }
 0x1c0   : > { %v1072_v39 = vadd.f32 1.0, %v1008_v58  ;;  %v2088_v0 = vsub.f32 1.0, %v2024_v38  ;;  %3787 = vpow2.f32 %v1908_v8  ;;  %v1261_v17 = vadd.f32 -1.4531521, %v1197_v23 }
 0x1c1   : > { %v1198_v27 = vmul.f32 1.0614054, %v4898_v32  ;;  %v2342_v31 = vadd.f32 1.0, %v2278_v13  ;;  %v1577_v40 = vmul.f32 %v4757_v63, %v1513_v51  ;;  %v1514_v43 = vadd.f32 -0.28449672, %v1450_v60 }
 0x1c2   : > { %3789 = vrcp.f32 %v1072_v39  ;;  %v2279_v15 = vsel %vm2151_vm7, %v2215_v9, %v2087_v1  ;;  %v1910_v3 = vmul.f32 1.442695, %v1834_v35  ;;  %v1451_v58 = vmul.f32 %v4823_v59, %v1387_v22 }
 0x1c3   : > { %v1772_v24 = vsub.f32 0.0, %v4772_v30  ;;  %v4914_v18 = vpop.eup %3785  ;;  %v1835_v8 = vmul.f32 %v1771_v26, %v4737_v21  ;;  %v1388_v38 = vadd.f32 1.4214138, %v1324_v52  ;;  %v1262_v23 = vadd.f32 -1.4531521, %v1198_v27 }
 0x1c4   : > { %v1009_v13 = vmul.f32 0.3275911, %v4904_v36  ;;  %v2216_v57 = vsub.f32 0.0, %v2088_v0  ;;  %v1325_v51 = vmul.f32 %v4885_v11, %v1261_v17  ;;  %v1773_v60 = vsub.f32 0.0, %v4782_v54 }
 0x1c5   : > { %v1199_v9 = vmul.f32 1.0614054, %v4914_v18  ;;  %v4922_v35 = vmul.f32 %v2342_v31, %v4675_v50  ;;  %v1641_v45 = vadd.f32 0.2548296, %v1577_v40  ;;  %v1578_v1 = vmul.f32 %v4807_v42, %v1514_v43 }
 0x1c6   : > { %v1073_v22 = vadd.f32 1.0, %v1009_v13  ;;  %v2343_v39 = vadd.f32 1.0, %v2279_v15  ;;  %3791 = vpow2.f32 %v1910_v3  ;;  %v1515_v21 = vadd.f32 -0.28449672, %v1451_v58 }
 0x1c7   : > { %v1263_v26 = vadd.f32 -1.4531521, %v1199_v9  ;;  %v1912_v52 = vmul.f32 1.442695, %v1835_v8  ;;  %v4926_v27 = vmul.f32 0.5, %v4742_v14  ;;  %v1452_v17 = vmul.f32 %v4863_v25, %v1388_v38 }
 0x1c8   : > { %v1326_v4 = vmul.f32 %v4898_v32, %v1262_v23  ;;  %v2280_v50 = vsel %vm2152_vm8, %v2216_v57, %v2088_v0  ;;  %v1836_v31 = vmul.f32 %v1772_v24, %v4772_v30  ;;  %v1389_v40 = vadd.f32 1.4214138, %v1325_v51  ;;  %v6604_v57 = vld [vmem:[#allocation23_spill] sm:$0xff]  ;;  %v4950_v23 = vpop.f32.mrb[38].mxu0 }
 0x1c9   : > { %v1837_v43 = vmul.f32 %v1773_v60, %v4782_v54  ;;  %v1705_v15 = vmul.f32 %v4757_v63, %v1641_v45  ;;  %v1642_v3 = vadd.f32 0.2548296, %v1578_v1  ;;  %v1774_v58 = vsub.f32 0.0, %v4803_v44 }
 0x1ca   : > { %3793 = vrcp.f32 %v1073_v22  ;;  %v3788_v14 = vpop.eup %3787  ;;  %v4937_v8 = vmul.f32 %v2343_v39, %v4687_v41  ;;  %v1579_v38 = vmul.f32 %v4823_v59, %v1515_v21  ;;  %v4941_v29 = vmul.f32 0.5, %v4755_v10 }
 0x1cb   : > { %v1327_v30 = vmul.f32 %v4914_v18, %v1263_v26  ;;  %3795 = vpow2.f32 %v1912_v52  ;;  %v1516_v54 = vadd.f32 -0.28449672, %v1452_v17  ;;  %v1390_v63 = vadd.f32 1.4214138, %v1326_v4 }
 0x1cc   : > { %v4944_v24 = vpop.eup %3789  ;;  %v4948_v0 = vadd.f32 %v6604_v57, %v4449_v48  ;;  %v2344_v41 = vadd.f32 1.0, %v2280_v50  ;;  %v1914_v13 = vmul.f32 1.442695, %v1836_v31  ;;  %v1453_v51 = vmul.f32 %v4885_v11, %v1389_v40  ;;  %v6606_v57 = vld [vmem:[#allocation24_spill] sm:$0xff] }
 0x1cd   : > { %v1916_v60 = vmul.f32 1.442695, %v1837_v43  ;;  %v2025_v10 = vmul.f32 %v3788_v14, %v1705_v15  ;;  %v1706_v9 = vmul.f32 %v4807_v42, %v1642_v3  ;;  %v1838_v45 = vmul.f32 %v1774_v58, %v4803_v44 }
 0x1ce   : > { %v1200_v1 = vmul.f32 1.0614054, %v4944_v24  ;;  %v1643_v22 = vadd.f32 0.2548296, %v1579_v38  ;;  %v4957_v4 = vmul.f32 0.5, %v4765_v20  ;;  %v1775_v21 = vsub.f32 0.0, %v4830_v12 }
 0x1cf   : > { %v1391_v39 = vadd.f32 1.4214138, %v1327_v30  ;;  %v1580_v26 = vmul.f32 %v4863_v25, %v1516_v54  ;;  %v1454_v52 = vmul.f32 %v4898_v32, %v1390_v63  ;;  %v4963_v17 = vmul.f32 0.5, %v4794_v47  ;;  %v4975_v47 = vpop.f32.mrb[39].mxu0 }
 0x1d0   : > { %v4966_v42 = vmul.f32 0.70710677, %v4948_v0  ;;  %v3792_v44 = vpop.eup %3791  ;;  %v4969_v50 = vmul.f32 %v2344_v41, %v4706_v46  ;;  %vm2153_vm9 = vcmp.lt.f32.partialorder %v4669_v34, 0.0  ;;  %3797 = vpow2.f32 %v1914_v13  ;;  %6605 = vst [vmem:[#allocation23_spill] sm:$0xff] %v4975_v47 }
 0x1d1   : > { %v1517_v20 = vadd.f32 -0.28449672, %v1453_v51  ;;  %v1264_v31 = vadd.f32 -1.4531521, %v1200_v1  ;;  %v2089_v40 = vsub.f32 1.0, %v2025_v10  ;;  %v2026_v43 = vmul.f32 %v3792_v44, %v1706_v9 }
 0x1d2   : > { %v1918_v15 = vmul.f32 1.442695, %v1838_v45  ;;  %v4973_v3 = vand.u32 2147483647, %v4966_v42  ;;  %v1707_v58 = vmul.f32 %v4823_v59, %v1643_v22  ;;  %3799 = vpow2.f32 %v1916_v60 }
 0x1d3   : > { %v1455_v14 = vmul.f32 %v4914_v18, %v1391_v39  ;;  %v1839_v46 = vmul.f32 %v1775_v21, %v4830_v12  ;;  %v1644_v30 = vadd.f32 0.2548296, %v1580_v26  ;;  %v1518_v54 = vadd.f32 -0.28449672, %v1454_v52 }
 0x1d4   : > { %v4980_v38 = vpop.eup %3793  ;;  %v1010_v63 = vmul.f32 0.3275911, %v4973_v3  ;;  %v4985_v41 = vadd.f32 %v6606_v57, %v4474_v5  ;;  %vm2154_vm10 = vcmp.lt.f32.partialorder %v4720_v56, 0.0  ;;  %v1581_v13 = vmul.f32 %v4885_v11, %v1517_v20 }
 0x1d5   : > { %v1328_v59 = vmul.f32 %v4944_v24, %v1264_v31  ;;  %v1776_v51 = vsub.f32 0.0, %v4880_v16  ;;  %v1201_v12 = vmul.f32 1.0614054, %v4980_v38  ;;  %v3796_v60 = vpop.eup %3795  ;;  %v2217_v10 = vsub.f32 0.0, %v2089_v40 }
 0x1d6   : > { %v2090_v9 = vsub.f32 1.0, %v2026_v43  ;;  %3801 = vpow2.f32 %v1918_v15  ;;  %v1074_v45 = vadd.f32 1.0, %v1010_v63  ;;  %v2027_v1 = vmul.f32 %v3796_v60, %v1707_v58 }
 0x1d7   : > { %v1519_v22 = vadd.f32 -0.28449672, %v1455_v14  ;;  %v1920_v39 = vmul.f32 1.442695, %v1839_v46  ;;  %v1265_v21 = vadd.f32 -1.4531521, %v1201_v12  ;;  %v1708_v26 = vmul.f32 %v4863_v25, %v1644_v30 }
 0x1d8   : > { %v1582_v52 = vmul.f32 %v4898_v32, %v1518_v54  ;;  %3803 = vrcp.f32 %v1074_v45  ;;  %v4995_v44 = vmul.f32 0.70710677, %v4985_v41  ;;  %v1645_v20 = vadd.f32 0.2548296, %v1581_v13 }
 0x1d9   : > { %v4998_v31 = vmul.f32 0.5, %v4846_v49  ;;  %v1392_v57 = vadd.f32 1.4214138, %v1328_v59  ;;  %v1840_v43 = vmul.f32 %v1776_v51, %v4880_v16  ;;  %v2281_v15 = vsel %vm2153_vm9, %v2217_v10, %v2089_v40  ;;  %v6607_v16 = vld [vmem:[#allocation25_spill] sm:$0xff] }
 0x1da   : > { %v2218_v58 = vsub.f32 0.0, %v2090_v9  ;;  %vm2155_vm11 = vcmp.lt.f32.partialorder %v4729_v6, 0.0  ;;  %v5005_v25 = vmul.f32 0.5, %v4855_v37  ;;  %v5008_v14 = vand.u32 2147483647, %v4995_v44  ;;  %v3798_v46 = vpop.eup %3797 }
 0x1db   : > { %v2091_v30 = vsub.f32 1.0, %v2027_v1  ;;  %v1583_v49 = vmul.f32 %v4914_v18, %v1519_v22  ;;  %v1329_v54 = vmul.f32 %v4980_v38, %v1265_v21  ;;  %v5014_v63 = vadd.f32 %v6607_v16, %v4449_v48  ;;  %v5027_v21 = vpop.f32.mrb[40].mxu0 }
 0x1dc   : > { %v5016_v34 = vmul.f32 %v3798_v46, %v1708_v26  ;;  %v1646_v40 = vadd.f32 0.2548296, %v1582_v52  ;;  %3805 = vpow2.f32 %v1920_v39  ;;  %v1011_v37 = vmul.f32 0.3275911, %v5008_v14  ;;  %v3800_v13 = vpop.eup %3799  ;;  %6608 = vst [vmem:[#allocation24_spill] sm:$0xff] %v5027_v21 }
 0x1dd   : > { %v2345_v59 = vadd.f32 1.0, %v2281_v15  ;;  %v1709_v51 = vmul.f32 %v4885_v11, %v1645_v20  ;;  %v1456_v12 = vmul.f32 %v4944_v24, %v1392_v57  ;;  %v1922_v60 = vmul.f32 1.442695, %v1840_v43 }
 0x1de   : > { %v2282_v10 = vsel %vm2154_vm10, %v2218_v58, %v2090_v9  ;;  %v1777_v45 = vsub.f32 0.0, %v4904_v36  ;;  %v1075_v1 = vadd.f32 1.0, %v1011_v37  ;;  %v5025_v22 = vmul.f32 0.70710677, %v5014_v63  ;;  %v5057_v37 = vpop.f32.mrb[41].mxu0 }
 0x1df   : > { %v2219_v39 = vsub.f32 0.0, %v2091_v30  ;;  %v1647_v26 = vadd.f32 0.2548296, %v1583_v49  ;;  %v1393_v52 = vadd.f32 1.4214138, %v1329_v54  ;;  %v5031_v11 = vadd.f32 %v4619_v28, %v4474_v5  ;;  %6609 = vst [vmem:[#allocation25_spill] sm:$0xff] %v5057_v37 }
 0x1e0   : > { %v3802_v20 = vpop.eup %3801  ;;  %v2092_v57 = vsub.f32 1.0, %v5016_v34  ;;  %vm2156_vm12 = vcmp.lt.f32.partialorder %v4751_v2, 0.0  ;;  %v1710_v56 = vmul.f32 %v4898_v32, %v1646_v40  ;;  %3807 = vrcp.f32 %v1075_v1 }
 0x1e1   : > { %v5037_v9 = vand.u32 2147483647, %v5025_v22  ;;  %v5039_v43 = vmul.f32 %v3800_v13, %v1709_v51  ;;  %v1520_v15 = vadd.f32 -0.28449672, %v1456_v12  ;;  %3809 = vpow2.f32 %v1922_v60 }
 0x1e2   : > { %v5043_v58 = vadd.f32 %v4628_v62, %v4449_v48  ;;  %v5045_v28 = vpop.eup %3803  ;;  %v2346_v46 = vadd.f32 1.0, %v2282_v10  ;;  %v1841_v49 = vmul.f32 %v1777_v45, %v4904_v36  ;;  %v5050_v32 = vmul.f32 0.70710677, %v5031_v11 }
 0x1e3   : > { %v1012_v54 = vmul.f32 0.3275911, %v5037_v9  ;;  %v2283_v16 = vsel %vm2155_vm11, %v2219_v39, %v2091_v30  ;;  %v1711_v34 = vmul.f32 %v4914_v18, %v1647_v26  ;;  %v1457_v40 = vmul.f32 %v4980_v38, %v1393_v52 }
 0x1e4   : > { %v1202_v62 = vmul.f32 1.0614054, %v5045_v28  ;;  %v2220_v13 = vsub.f32 0.0, %v2092_v57  ;;  %v2030_v51 = vmul.f32 %v3802_v20, %v1710_v56  ;;  %v5060_v36 = vand.u32 2147483647, %v5050_v32 }
 0x1e5   : > { %v1076_v12 = vadd.f32 1.0, %v1012_v54  ;;  %v2093_v60 = vsub.f32 1.0, %v5039_v43  ;;  %vm2157_vm13 = vcmp.lt.f32.partialorder %v4775_v33, 0.0  ;;  %v1584_v6 = vmul.f32 %v4944_v24, %v1520_v15 }
 0x1e6   : > { %v1266_v30 = vadd.f32 -1.4531521, %v1202_v62  ;;  %v5066_v18 = vmul.f32 0.70710677, %v5043_v58  ;;  %v3806_v10 = vpop.eup %3805  ;;  %v5069_v45 = vmul.f32 %v2345_v59, %v4786_v55  ;;  %v5072_v1 = vmul.f32 %v2346_v46, %v4818_v19  ;;  %v5080_v55 = vpop.f32.mrb[42].mxu0 }
 0x1e7   : > { %3811 = vrcp.f32 %v1076_v12  ;;  %v1013_v39 = vmul.f32 0.3275911, %v5060_v36  ;;  %vm2158_vm14 = vcmp.lt.f32.partialorder %v4789_v61, 0.0  ;;  %v2031_v26 = vmul.f32 %v3806_v10, %v1711_v34  ;;  %6611 = vst [vmem:[#allocation47_spill] sm:$0xff] %v5080_v55  ;;  %v5087_v34 = vpop.f32.mrb[43].mxu0 }
 0x1e8   : > { %6610 = vst [vmem:[#allocation46_spill] sm:$0xff] %v5072_v1  ;;  %v1521_v52 = vadd.f32 -0.28449672, %v1457_v40  ;;  %v1924_v20 = vmul.f32 1.442695, %v1841_v49  ;;  %v1330_v56 = vmul.f32 %v5045_v28, %v1266_v30  ;;  %v2347_v43 = vadd.f32 1.0, %v2283_v16 }
 0x1e9   : > { %v2094_v15 = vsub.f32 1.0, %v2030_v51  ;;  %v1077_v54 = vadd.f32 1.0, %v1013_v39  ;;  %v5078_v62 = vand.u32 2147483647, %v5066_v18  ;;  %v2284_v19 = vsel %vm2156_vm12, %v2220_v13, %v2092_v57  ;;  %6612 = vst [vmem:[#allocation48_spill] sm:$0xff] %v5087_v34  ;;  %v6613_v51 = vld [vmem:[#allocation26_spill] sm:$0xff] }
 0x1ea   : > { %v2221_v59 = vsub.f32 0.0, %v2093_v60  ;;  %v1648_v46 = vadd.f32 0.2548296, %v1584_v6  ;;  %v5085_v12 = vmul.f32 0.5, %v4948_v0  ;;  %v5089_v49 = vpop.eup %3807  ;;  %vm2159_vm15 = vcmp.lt.f32.partialorder %v4821_v53, 0.0 }
 0x1eb   : > { %v1394_v16 = vadd.f32 1.4214138, %v1330_v56  ;;  %3813 = vrcp.f32 %v1077_v54  ;;  %v1014_v40 = vmul.f32 0.3275911, %v5078_v62  ;;  %v5095_v30 = vadd.f32 %v6613_v51, %v4474_v5  ;;  %v3810_v2 = vpop.eup %3809 }
 0x1ec   : > { %v2095_v57 = vsub.f32 1.0, %v2031_v26  ;;  %v1585_v13 = vmul.f32 %v4980_v38, %v1521_v52  ;;  %v1778_v0 = vsub.f32 0.0, %v4973_v3  ;;  %v1203_v6 = vmul.f32 1.0614054, %v5089_v49 }
 0x1ed   : > { %v2222_v10 = vsub.f32 0.0, %v2094_v15  ;;  %3815 = vpow2.f32 %v1924_v20  ;;  %v1078_v39 = vadd.f32 1.0, %v1014_v40  ;;  %v5101_v56 = vmul.f32 0.70710677, %v5095_v30 }
 0x1ee   : > { %v5104_v54 = vmul.f32 %v2347_v43, %v4877_v7  ;;  %v2348_v34 = vadd.f32 1.0, %v2284_v19  ;;  %v1712_v51 = vmul.f32 %v4944_v24, %v1648_v46  ;;  %v1267_v55 = vadd.f32 -1.4531521, %v1203_v6  ;;  %v6615_v7 = vld [vmem:[#allocation27_spill] sm:$0xff]  ;;  %v5127_v46 = vpop.f32.mrb[44].mxu0 }
 0x1ef   : > { %v2285_v26 = vsel %vm2157_vm13, %v2221_v59, %v2093_v60  ;;  %v1458_v52 = vmul.f32 %v5045_v28, %v1394_v16  ;;  %3817 = vrcp.f32 %v1078_v39  ;;  %v5111_v1 = vand.u32 2147483647, %v5101_v56  ;;  %6616 = vst [vmem:[#allocation27_spill] sm:$0xff] %v5127_v46 }
 0x1f0   : > { %6614 = vst [vmem:[#allocation26_spill] sm:$0xff] %v5104_v54  ;;  %v2223_v20 = vsub.f32 0.0, %v2095_v57  ;;  %v1649_v40 = vadd.f32 0.2548296, %v1585_v13  ;;  %v1842_v37 = vmul.f32 %v1778_v0, %v4973_v3  ;;  %v5116_v43 = vadd.f32 %v6615_v7, %v4449_v48 }
 0x1f1   : > { %v5118_v19 = vpop.eup %3811  ;;  %v2286_v33 = vsel %vm2158_vm14, %v2222_v10, %v2094_v15  ;;  %v5123_v24 = vmul.f32 0.5, %v4985_v41  ;;  %v1331_v60 = vmul.f32 %v5089_v49, %v1267_v55  ;;  %v1015_v59 = vmul.f32 0.3275911, %v5111_v1  ;;  %v6618_v41 = vld [vmem:[#allocation28_spill] sm:$0xff] }
 0x1f2   : > { %v5130_v3 = vmul.f32 %v2348_v34, %v4926_v27  ;;  %v2349_v16 = vadd.f32 1.0, %v2285_v26  ;;  %v2032_v13 = vmul.f32 %v3810_v2, %v1712_v51  ;;  %v1204_v0 = vmul.f32 1.0614054, %v5118_v19  ;;  %v6619_v2 = vld [vmem:[#allocation16_spill] sm:$0xff] }
 0x1f3   : > { %v1522_v6 = vadd.f32 -0.28449672, %v1458_v52  ;;  %v1079_v39 = vadd.f32 1.0, %v1015_v59  ;;  %v5134_v61 = vmul.f32 0.70710677, %v5116_v43  ;;  %v5138_v15 = vadd.f32 %v6618_v41, %v4474_v5 }
 0x1f4   : > { %6617 = vst [vmem:[#allocation49_spill] sm:$0xff] %v5130_v3  ;;  %v2350_v55 = vadd.f32 1.0, %v2286_v33  ;;  %v2287_v10 = vsel %vm2159_vm15, %v2223_v20, %v2095_v57  ;;  %v1713_v27 = vmul.f32 %v4980_v38, %v1649_v40  ;;  %v1926_v34 = vmul.f32 1.442695, %v1842_v37  ;;  %v5170_v3 = vpop.f32.mrb[45].mxu0 }
 0x1f5   : > { %v5143_v26 = vpop.eup %3813  ;;  %vm2160_vm0 = vcmp.lt.f32.partialorder %v6619_v2, 0.0  ;;  %v1395_v51 = vadd.f32 1.4214138, %v1331_v60  ;;  %v1779_v52 = vsub.f32 0.0, %v5008_v14  ;;  %3819 = vrcp.f32 %v1079_v39  ;;  %6622 = vst [vmem:[#allocation50_spill] sm:$0xff] %v5170_v3 }
 0x1f6   : > { %v5148_v7 = vand.u32 2147483647, %v5134_v61  ;;  %v2096_v59 = vsub.f32 1.0, %v2032_v13  ;;  %v1268_v41 = vadd.f32 -1.4531521, %v1204_v0  ;;  %v1780_v33 = vsub.f32 0.0, %v5037_v9 }
 0x1f7   : > { %v1205_v53 = vmul.f32 1.0614054, %v5143_v26  ;;  %v3816_v57 = vpop.eup %3815  ;;  %v5153_v38 = vmul.f32 %v2349_v16, %v4941_v29  ;;  %v1586_v37 = vmul.f32 %v5045_v28, %v1522_v6  ;;  %v5158_v40 = vmul.f32 0.70710677, %v5138_v15 }
 0x1f8   : > { %v1016_v20 = vmul.f32 0.3275911, %v5148_v7  ;;  %v5161_v60 = vmul.f32 %v2350_v55, %v4957_v4  ;;  %v2351_v13 = vadd.f32 1.0, %v2287_v10  ;;  %v2033_v0 = vmul.f32 %v3816_v57, %v1713_v27  ;;  %v6623_v10 = vld [vmem:[#allocation43_spill] sm:$0xff] }
 0x1f9   : > { %6620 = vst [vmem:[#allocation28_spill] sm:$0xff] %v5153_v38  ;;  %3821 = vpow2.f32 %v1926_v34  ;;  %v5163_v39 = vpop.eup %3817  ;;  %v1459_v46 = vmul.f32 %v5089_v49, %v1395_v51  ;;  %v1843_v29 = vmul.f32 %v1779_v52, %v5008_v14  ;;  %v5168_v6 = vand.u32 2147483647, %v5158_v40 }
 0x1fa   : > { %6621 = vst [vmem:[#allocation16_spill] sm:$0xff] %v5161_v60  ;;  %v1080_v16 = vadd.f32 1.0, %v1016_v20  ;;  %v2224_v38 = vsub.f32 0.0, %v2096_v59  ;;  %v1332_v54 = vmul.f32 %v5118_v19, %v1268_v41  ;;  %v1844_v4 = vmul.f32 %v1780_v33, %v5037_v9 }
 0x1fb   : > { %v1269_v55 = vadd.f32 -1.4531521, %v1205_v53  ;;  %vm2161_vm1 = vcmp.lt.f32.partialorder %v6623_v10, 0.0  ;;  %v1650_v27 = vadd.f32 0.2548296, %v1586_v37  ;;  %v1781_v34 = vsub.f32 0.0, %v5060_v36 }
 0x1fc   : > { %3823 = vrcp.f32 %v1080_v16  ;;  %v1017_v14 = vmul.f32 0.3275911, %v5168_v6  ;;  %v2097_v51 = vsub.f32 1.0, %v2033_v0  ;;  %v5178_v52 = vmul.f32 0.5, %v5014_v63 }
 0x1fd   : > { %v1206_v57 = vmul.f32 1.0614054, %v5163_v39  ;;  %v1782_v20 = vsub.f32 0.0, %v5078_v62  ;;  %v5183_v41 = vmul.f32 %v2351_v13, %v4963_v17  ;;  %v1523_v9 = vadd.f32 -0.28449672, %v1459_v46  ;;  %v6625_v17 = vld [vmem:[#allocation30_spill] sm:$0xff] }
 0x1fe   : > { %v1928_v33 = vmul.f32 1.442695, %v1843_v29  ;;  %v1081_v53 = vadd.f32 1.0, %v1017_v14  ;;  %v2288_v37 = vsel %vm2160_vm0, %v2224_v38, %v2096_v59  ;;  %v1396_v16 = vadd.f32 1.4214138, %v1332_v54 }
 0x1ff   : > { %6624 = vst [vmem:[#allocation43_spill] sm:$0xff] %v5183_v41  ;;  %v1930_v60 = vmul.f32 1.442695, %v1844_v4  ;;  %v1333_v0 = vmul.f32 %v5143_v26, %v1269_v55  ;;  %v5188_v3 = vpop.eup %3819  ;;  %v1714_v63 = vmul.f32 %v5045_v28, %v1650_v27  ;;  %v1845_v21 = vmul.f32 %v1781_v34, %v5060_v36  ;;  %v5202_v4 = vpop.f32.mrb[46].mxu0 }
 0x200   : > { %3825 = vrcp.f32 %v1081_v53  ;;  %v5194_v13 = vadd.f32 %v6625_v17, %v4449_v48  ;;  %v2225_v46 = vsub.f32 0.0, %v2097_v51  ;;  %v5197_v29 = vmul.f32 0.5, %v5031_v11  ;;  %6626 = vst [vmem:[#allocation30_spill] sm:$0xff] %v5202_v4 }
 0x201   : > { %v1270_v2 = vadd.f32 -1.4531521, %v1206_v57  ;;  %v1846_v54 = vmul.f32 %v1782_v20, %v5078_v62  ;;  %v2352_v59 = vadd.f32 1.0, %v2288_v37  ;;  %v1587_v38 = vmul.f32 %v5089_v49, %v1523_v9 }
 0x202   : > { %3827 = vpow2.f32 %v1928_v33  ;;  %v1207_v28 = vmul.f32 1.0614054, %v5188_v3  ;;  %v1460_v55 = vmul.f32 %v5118_v19, %v1396_v16  ;;  %v1397_v27 = vadd.f32 1.4214138, %v1333_v0 }
 0x203   : > { %v3822_v36 = vpop.eup %3821  ;;  %3829 = vpow2.f32 %v1930_v60  ;;  %v5206_v34 = vmul.f32 0.5, %v5043_v58  ;;  %v1932_v14 = vmul.f32 1.442695, %v1845_v21  ;;  %v5209_v62 = vmul.f32 0.70710677, %v5194_v13 }
 0x204   : > { %v2034_v11 = vmul.f32 %v3822_v36, %v1714_v63  ;;  %v1271_v57 = vadd.f32 -1.4531521, %v1207_v28  ;;  %v2289_v20 = vsel %vm2161_vm1, %v2225_v46, %v2097_v51  ;;  %v1334_v9 = vmul.f32 %v5163_v39, %v1270_v2 }
 0x205   : > { %v1934_v33 = vmul.f32 1.442695, %v1846_v54  ;;  %v1783_v53 = vsub.f32 0.0, %v5111_v1  ;;  %v5218_v60 = vmul.f32 %v2352_v59, %v4998_v31  ;;  %v1651_v58 = vadd.f32 0.2548296, %v1587_v38 }
 0x206   : > { %v5215_v37 = vpop.eup %3823  ;;  %v5221_v21 = vmul.f32 0.5, %v5095_v30  ;;  %v5224_v16 = vand.u32 2147483647, %v5209_v62  ;;  %vm2162_vm2 = vcmp.lt.f32.partialorder %v4966_v42, 0.0  ;;  %v1524_v10 = vadd.f32 -0.28449672, %v1460_v55 }
 0x207   : > { %6627 = vst [vmem:[#allocation51_spill] sm:$0xff] %v5218_v60  ;;  %v1461_v51 = vmul.f32 %v5143_v26, %v1397_v27  ;;  %v1335_v0 = vmul.f32 %v5188_v3, %v1271_v57  ;;  %v1208_v63 = vmul.f32 1.0614054, %v5215_v37  ;;  %v2353_v17 = vadd.f32 1.0, %v2289_v20  ;;  %v6628_v55 = vld [vmem:[#allocation29_spill] sm:$0xff] }
 0x208   : > { %v2098_v46 = vsub.f32 1.0, %v2034_v11  ;;  %3831 = vpow2.f32 %v1932_v14  ;;  %v1018_v31 = vmul.f32 0.3275911, %v5224_v16  ;;  %v1398_v2 = vadd.f32 1.4214138, %v1334_v9 }
 0x209   : > { %3833 = vpow2.f32 %v1934_v33  ;;  %v1847_v30 = vmul.f32 %v1783_v53, %v5111_v1  ;;  %v1272_v54 = vadd.f32 -1.4531521, %v1208_v63  ;;  %v1715_v38 = vmul.f32 %v5089_v49, %v1651_v58  ;;  %v6630_v53 = vld [vmem:[#allocation32_spill] sm:$0xff] }
 0x20a   : > { %v5232_v59 = vpop.eup %3825  ;;  %v1784_v28 = vsub.f32 0.0, %v5148_v7  ;;  %v1082_v36 = vadd.f32 1.0, %v1018_v31  ;;  %v1183_v27 = vmul.f32 1.0614054, %v6628_v55  ;;  %v1588_v57 = vmul.f32 %v5118_v19, %v1524_v10 }
 0x20b   : > { %v1525_v11 = vadd.f32 -0.28449672, %v1461_v51  ;;  %v1399_v14 = vadd.f32 1.4214138, %v1335_v0  ;;  %v1209_v20 = vmul.f32 1.0614054, %v5232_v59  ;;  %v5240_v33 = vmul.f32 %v2353_v17, %v5005_v25 }
 0x20c   : > { %v3828_v9 = vpop.eup %3827  ;;  %v2226_v1 = vsub.f32 0.0, %v2098_v46  ;;  %3835 = vrcp.f32 %v1082_v36  ;;  %v1185_v63 = vmul.f32 1.0614054, %v6630_v53  ;;  %v1462_v58 = vmul.f32 %v5163_v39, %v1398_v2  ;;  %v5248_v0 = vpop.f32.mrb[47].mxu0 }
 0x20d   : > { %6629 = vst [vmem:[#allocation29_spill] sm:$0xff] %v5240_v33  ;;  %v3830_v49 = vpop.eup %3829  ;;  %v5245_v31 = vmul.f32 0.5, %v5116_v43  ;;  %v1336_v10 = vmul.f32 %v5215_v37, %v1272_v54  ;;  %v1273_v51 = vadd.f32 -1.4531521, %v1209_v20  ;;  %6631 = vst [vmem:[#allocation32_spill] sm:$0xff] %v5248_v0  ;;  %v2035_v4 = vmul.f32 %v3828_v9, %v1715_v38  ;;  %v6632_v38 = vld [vmem:[#allocation36_spill] sm:$0xff] }
 0x20e   : > { %v1936_v60 = vmul.f32 1.442695, %v1847_v30  ;;  %v1848_v25 = vmul.f32 %v1784_v28, %v5148_v7  ;;  %v1247_v17 = vadd.f32 -1.4531521, %v1183_v27  ;;  %v1652_v33 = vadd.f32 0.2548296, %v1588_v57 }
 0x20f   : > { %v1589_v36 = vmul.f32 %v5143_v26, %v1525_v11  ;;  %v1463_v41 = vmul.f32 %v5188_v3, %v1399_v14  ;;  %v5254_v2 = vmul.f32 0.5, %v5138_v15  ;;  %v2290_v43 = vsel %vm2162_vm2, %v2226_v1, %v2098_v46 }
 0x210   : > { %v1785_v54 = vsub.f32 0.0, %v5168_v6  ;;  %v1249_v20 = vadd.f32 -1.4531521, %v1185_v63  ;;  %v5261_v30 = vadd.f32 %v6632_v38, %v4474_v5  ;;  %v1526_v7 = vadd.f32 -0.28449672, %v1462_v58 }
 0x211   : > { %v1400_v28 = vadd.f32 1.4214138, %v1336_v10  ;;  %v1337_v27 = vmul.f32 %v5232_v59, %v1273_v51  ;;  %v1311_v57 = vmul.f32 %v6628_v55, %v1247_v17  ;;  %v2099_v14 = vsub.f32 1.0, %v2035_v4 }
 0x212   : > { %v3832_v11 = vpop.eup %3831  ;;  %vm2163_vm3 = vcmp.lt.f32.partialorder %v4995_v44, 0.0  ;;  %3837 = vpow2.f32 %v1936_v60  ;;  %v1938_v42 = vmul.f32 1.442695, %v1848_v25  ;;  %v1313_v15 = vmul.f32 %v6630_v53, %v1249_v20 }
 0x213   : > { %v5267_v46 = vpop.eup %3833  ;;  %v1716_v9 = vmul.f32 %v5118_v19, %v1652_v33  ;;  %v1653_v1 = vadd.f32 0.2548296, %v1589_v36  ;;  %v1527_v63 = vadd.f32 -0.28449672, %v1463_v41  ;;  %v1375_v58 = vadd.f32 1.4214138, %v1311_v57 }
 0x214   : > { %v2354_v10 = vadd.f32 1.0, %v2290_v43  ;;  %v1849_v51 = vmul.f32 %v1785_v54, %v5168_v6  ;;  %v1377_v38 = vadd.f32 1.4214138, %v1313_v15  ;;  %v5272_v17 = vmul.f32 0.70710677, %v5261_v30  ;;  %v5283_v6 = vpop.f32.mrb[48].mxu0 }
 0x215   : > { %v1590_v4 = vmul.f32 %v5163_v39, %v1526_v7  ;;  %v1464_v60 = vmul.f32 %v5215_v37, %v1400_v28  ;;  %v1401_v25 = vadd.f32 1.4214138, %v1337_v27  ;;  %v1439_v20 = vmul.f32 %v6628_v55, %v1375_v58  ;;  %6633 = vst [vmem:[#allocation36_spill] sm:$0xff] %v5283_v6  ;;  %v6637_v6 = vld [vmem:[#allocation15_spill] sm:$0xff] }
 0x216   : > { %v5277_v0 = vpop.eup %3835  ;;  %v2227_v19 = vsub.f32 0.0, %v2099_v14  ;;  %3839 = vpow2.f32 %v1938_v42  ;;  %v1441_v41 = vmul.f32 %v6630_v53, %v1377_v38  ;;  %v5281_v33 = vand.u32 2147483647, %v5272_v17 }
 0x217   : > { %v2036_v36 = vmul.f32 %v3830_v49, %v1716_v9  ;;  %v1717_v43 = vmul.f32 %v5143_v26, %v1653_v1  ;;  %v1591_v54 = vmul.f32 %v5188_v3, %v1527_v63  ;;  %v1210_v7 = vmul.f32 1.0614054, %v5277_v0 }
 0x218   : > { %v5289_v28 = vmul.f32 %v2354_v10, %v5085_v12  ;;  %v1940_v27 = vmul.f32 1.442695, %v1849_v51  ;;  %v1503_v57 = vadd.f32 -0.28449672, %v1439_v20  ;;  %v1505_v42 = vadd.f32 -0.28449672, %v1441_v41 }
 0x219   : > { %v1654_v15 = vadd.f32 0.2548296, %v1590_v4  ;;  %v1528_v58 = vadd.f32 -0.28449672, %v1464_v60  ;;  %v1465_v38 = vmul.f32 %v5232_v59, %v1401_v25  ;;  %v1019_v47 = vmul.f32 0.3275911, %v5281_v33 }
 0x21a   : > { %6634 = vst [vmem:[#allocation52_spill] sm:$0xff] %v5289_v28  ;;  %vm2164_vm4 = vcmp.lt.f32.partialorder %v5025_v22, 0.0  ;;  %v5295_v26 = vmul.f32 0.5, %v5194_v13  ;;  %v1274_v49 = vadd.f32 -1.4531521, %v1210_v7  ;;  %v1567_v9 = vmul.f32 %v6628_v55, %v1503_v57  ;;  %v5303_v4 = vpop.f32.mrb[49].mxu0 }
 0x21b   : > { %v1569_v12 = vmul.f32 %v6630_v53, %v1505_v42  ;;  %v2291_v1 = vsel %vm2163_vm3, %v2227_v19, %v2099_v14  ;;  %v2100_v63 = vsub.f32 1.0, %v2036_v36  ;;  %v5301_v10 = vmul.f32 %v3832_v11, %v1717_v43  ;;  %v6635_v13 = vld [vmem:[#allocation34_spill] sm:$0xff]  ;;  %v6636_v28 = vld [vmem:[#allocation35_spill] sm:$0xff]  ;;  %v6638_v57 = vld [vmem:[#allocation17_spill] sm:$0xff] }
 0x21c   : > { %v1655_v51 = vadd.f32 0.2548296, %v1591_v54  ;;  %v3838_v60 = vpop.eup %3837  ;;  %v1631_v25 = vadd.f32 0.2548296, %v1567_v9  ;;  %v1083_v41 = vadd.f32 1.0, %v1019_v47  ;;  %vm2143_vm5 = vcmp.lt.f32.partialorder %v6637_v6, 0.0 }
 0x21d   : > { %v1633_v20 = vadd.f32 0.2548296, %v1569_v12  ;;  %vm2145_vm6 = vcmp.lt.f32.partialorder %v6638_v57, 0.0  ;;  %v1718_v44 = vmul.f32 %v5163_v39, %v1654_v15  ;;  %v1592_v14 = vmul.f32 %v5215_v37, %v1528_v58  ;;  %v6639_v9 = vld [vmem:[#allocation37_spill] sm:$0xff] }
 0x21e   : > { %v1529_v11 = vadd.f32 -0.28449672, %v1465_v38  ;;  %3841 = vpow2.f32 %v1940_v27  ;;  %v1338_v19 = vmul.f32 %v5277_v0, %v1274_v49  ;;  %v1695_v36 = vmul.f32 %v6628_v55, %v1631_v25  ;;  %v6640_v38 = vld [vmem:[#allocation31_spill] sm:$0xff]  ;;  %v6641_v49 = vld [vmem:[#allocation33_spill] sm:$0xff] }
 0x21f   : > { %v1697_v43 = vmul.f32 %v6630_v53, %v1633_v20  ;;  %3843 = vrcp.f32 %v1083_v41  ;;  %v2355_v47 = vadd.f32 1.0, %v2291_v1  ;;  %v2228_v54 = vsub.f32 0.0, %v2100_v63 }
 0x220   : > { %v2101_v42 = vsub.f32 1.0, %v5301_v10  ;;  %vm2165_vm7 = vcmp.lt.f32.partialorder %v5050_v32, 0.0  ;;  %v5318_v39 = vadd.f32 %v6639_v9, %v4449_v48  ;;  %v3840_v15 = vpop.eup %3839  ;;  %v1719_v27 = vmul.f32 %v5188_v3, %v1655_v51  ;;  %v6642_v3 = vld [vmem:[#allocation38_spill] sm:$0xff] }
 0x221   : > { %v1786_v58 = vsub.f32 0.0, %v5224_v16  ;;  %v2015_v55 = vmul.f32 %v6640_v38, %v1695_v36  ;;  %v2017_v53 = vmul.f32 %v6641_v49, %v1697_v43  ;;  %v5325_v12 = vmul.f32 %v5267_v46, %v1718_v44 }
 0x222   : > { %v1656_v1 = vadd.f32 0.2548296, %v1592_v14  ;;  %v1593_v10 = vmul.f32 %v5232_v59, %v1529_v11  ;;  %v5329_v25 = vmul.f32 0.70710677, %v5318_v39  ;;  %v1402_v20 = vadd.f32 1.4214138, %v1338_v19 }
 0x223   : > { %v2079_v41 = vsub.f32 1.0, %v2015_v55  ;;  %v2081_v9 = vsub.f32 1.0, %v2017_v53  ;;  %v5333_v51 = vadd.f32 %v6642_v3, %v4474_v5  ;;  %v5336_v36 = vmul.f32 %v2355_v47, %v5123_v24  ;;  %v5347_v47 = vpop.f32.mrb[50].mxu0 }
 0x224   : > { %v2292_v46 = vsel %vm2164_vm4, %v2228_v54, %v2100_v63  ;;  %v2229_v44 = vsub.f32 0.0, %v2101_v42  ;;  %v5341_v14 = vand.u32 2147483647, %v5329_v25  ;;  %v2039_v11 = vmul.f32 %v3838_v60, %v1719_v27  ;;  %6643 = vst [vmem:[#allocation34_spill] sm:$0xff] %v5347_v47  ;;  %v5358_v54 = vpop.f32.mrb[51].mxu0 }
 0x225   : > { %v1850_v43 = vmul.f32 %v1786_v58, %v5224_v16  ;;  %v2207_v19 = vsub.f32 0.0, %v2079_v41  ;;  %v2209_v38 = vsub.f32 0.0, %v2081_v9  ;;  %v2102_v55 = vsub.f32 1.0, %v5325_v12  ;;  %6644 = vst [vmem:[#allocation35_spill] sm:$0xff] %v5358_v54 }
 0x226   : > { %v1720_v49 = vmul.f32 %v5215_v37, %v1656_v1  ;;  %v1657_v53 = vadd.f32 0.2548296, %v1593_v10  ;;  %v1020_v24 = vmul.f32 0.3275911, %v5341_v14  ;;  %vm2166_vm8 = vcmp.lt.f32.partialorder %v5066_v18, 0.0  ;;  %v6645_v1 = vld [vmem:[#allocation39_spill] sm:$0xff] }
 0x227   : > { %v1466_v22 = vmul.f32 %v5277_v0, %v1402_v20  ;;  %v2271_v63 = vsel %vm2143_vm5, %v2207_v19, %v2079_v41  ;;  %v2273_v16 = vsel %vm2145_vm6, %v2209_v38, %v2081_v9  ;;  %v5356_v60 = vmul.f32 0.70710677, %v5333_v51  ;;  %v6646_v19 = vld [vmem:[#allocation19_spill] sm:$0xff] }
 0x228   : > { %v3842_v37 = vpop.eup %3841  ;;  %vm2167_vm9 = vcmp.lt.f32.partialorder %v5101_v56, 0.0  ;;  %v2335_v27 = vadd.f32 1.0, %v2271_v63  ;;  %v2337_v58 = vadd.f32 1.0, %v2273_v16  ;;  %v1084_v12 = vadd.f32 1.0, %v1020_v24  ;;  %v6647_v63 = vld [vmem:[#allocation21_spill] sm:$0xff] }
 0x229   : > { %v5363_v10 = vadd.f32 %v6645_v1, %v4449_v48  ;;  %v5365_v6 = vpop.eup %3843  ;;  %v2293_v57 = vsel %vm2165_vm7, %v2229_v44, %v2101_v42  ;;  %v2103_v20 = vsub.f32 1.0, %v2039_v11  ;;  %v1942_v41 = vmul.f32 1.442695, %v1850_v43  ;;  %v5382_v43 = vpop.f32.mrb[52].mxu0 }
 0x22a   : > { %v5370_v9 = vand.u32 2147483647, %v5356_v60  ;;  %v1721_v3 = vmul.f32 %v5232_v59, %v1657_v53  ;;  %v2399_v38 = vmul.f32 %v2335_v27, %v6646_v19  ;;  %v2401_v24 = vmul.f32 %v2337_v58, %v6647_v63  ;;  %6648 = vst [vmem:[#allocation15_spill] sm:$0xff] %v5382_v43  ;;  %v6649_v58 = vld [vmem:[#allocation40_spill] sm:$0xff] }
 0x22b   : > { %v1211_v16 = vmul.f32 1.0614054, %v5365_v6  ;;  %v2230_v1 = vsub.f32 0.0, %v2102_v55  ;;  %v1530_v7 = vadd.f32 -0.28449672, %v1466_v22  ;;  %3845 = vrcp.f32 %v1084_v12  ;;  %v6650_v19 = vld [vmem:[#allocation44_spill] sm:$0xff] }
 0x22c   : > { %v1021_v54 = vmul.f32 0.3275911, %v5370_v9  ;;  %v5377_v32 = vmul.f32 %v3840_v15, %v1720_v49  ;;  %v2495_v42 = vpack.c.bf16 %v2401_v24, %v2399_v38  ;;  %v5380_v11 = vmul.f32 0.70710677, %v5363_v10  ;;  %v6652_v24 = vld [vmem:[#allocation18_spill] sm:$0xff] }
 0x22d   : > { %v1275_v44 = vadd.f32 -1.4531521, %v1211_v16  ;;  %v2231_v59 = vsub.f32 0.0, %v2103_v20  ;;  %v1787_v53 = vsub.f32 0.0, %v5281_v33  ;;  %v2497_v63 = vpack.c.bf16 %v6650_v19, %v6649_v58  ;;  %v6653_v16 = vld [vmem:[#allocation14_spill] sm:$0xff] }
 0x22e   : > { %v1085_v27 = vadd.f32 1.0, %v1021_v54  ;;  %v2356_v22 = vadd.f32 1.0, %v2292_v46  ;;  %v2357_v12 = vadd.f32 1.0, %v2293_v57  ;;  %v2041_v47 = vmul.f32 %v3842_v37, %v1721_v3  ;;  %2686 = vmatprep.mubr.bf16.mxu1 %v2495_v42  ;;  %v6654_v58 = vld [vmem:[#allocation42_spill] sm:$0xff] }
 0x22f   : > { %v5388_v15 = vand.u32 2147483647, %v5380_v11  ;;  %v1339_v49 = vmul.f32 %v5365_v6, %v1275_v44  ;;  %v6651_v38 = vpack.c.bf16 %v6636_v28, %v6635_v13  ;;  %v5396_v54 = vadd.f32 %v6652_v24, %v4474_v5 }
 0x230   : > { %3847 = vrcp.f32 %v1085_v27  ;;  %v2496_v46 = vpack.c.bf16 %v6654_v58, %v6653_v16  ;;  %v2294_v37 = vsel %vm2166_vm8, %v2230_v1, %v2102_v55  ;;  %v2104_v57 = vsub.f32 1.0, %v5377_v32 }
 0x231   : > { %2687 = vmatmul.mubr.bf16.vlgmr.msra.gmra.mrb[0].mxu1 %v6651_v38  ;;  %vm2168_vm10 = vcmp.lt.f32.partialorder %v5134_v61, 0.0  ;;  %v1594_v3 = vmul.f32 %v5277_v0, %v1530_v7  ;;  %v1022_v28 = vmul.f32 0.3275911, %v5388_v15  ;;  %v2295_v13 = vsel %vm2167_vm9, %v2231_v59, %v2103_v20  ;;  %v6655_v7 = vld [vmem:[#allocation20_spill] sm:$0xff] }
 0x232   : > { %2694 = vmatprep.mubr.bf16.mxu1 %v2497_v63  ;;  %3849 = vpow2.f32 %v1942_v41  ;;  %v1851_v42 = vmul.f32 %v1787_v53, %v5281_v33  ;;  %v5410_v44 = vmul.f32 0.70710677, %v5396_v54  ;;  %v5413_v18 = vmul.f32 %v2356_v22, %v5178_v52  ;;  %v6656_v33 = vld [vmem:[#allocation41_spill] sm:$0xff] }
 0x233   : > { %v2105_v55 = vsub.f32 1.0, %v2041_v47  ;;  %vm2169_vm11 = vcmp.lt.f32.partialorder %v5158_v40, 0.0  ;;  %v1086_v1 = vadd.f32 1.0, %v1022_v28  ;;  %v5418_v32 = vadd.f32 %v6655_v7, %v4449_v48  ;;  %v5427_v47 = vpop.f32.mrb[53].mxu0 }
 0x234   : > { %v2358_v27 = vadd.f32 1.0, %v2294_v37  ;;  %v1403_v56 = vadd.f32 1.4214138, %v1339_v49  ;;  %v5421_v20 = vand.u32 2147483647, %v5410_v44  ;;  %v5425_v41 = vadd.f32 %v6656_v33, %v4474_v5  ;;  %6657 = vst [vmem:[#allocation17_spill] sm:$0xff] %v5427_v47 }
 0x235   : > { %v2359_v59 = vadd.f32 1.0, %v2295_v13  ;;  %v2232_v52 = vsub.f32 0.0, %v2104_v57  ;;  %v1658_v53 = vadd.f32 0.2548296, %v1594_v3  ;;  %3851 = vrcp.f32 %v1086_v1  ;;  %v5429_v19 = vpop.eup %3845  ;;  %v5471_v61 = vpop.f32.mrb[54].mxu0  ;;  %v6661_v47 = vld [vmem:[#allocation45_spill] sm:$0xff] }
 0x236   : > { %v5432_v63 = vmul.f32 %v2357_v12, %v5197_v29  ;;  %v1944_v22 = vmul.f32 1.442695, %v1851_v42  ;;  %v1023_v49 = vmul.f32 0.3275911, %v5421_v20  ;;  %v5436_v38 = vmul.f32 0.70710677, %v5418_v32 }
 0x237   : > { %v2233_v24 = vsub.f32 0.0, %v2105_v55  ;;  %v5439_v16 = vmul.f32 0.5, %v5261_v30  ;;  %v1212_v58 = vmul.f32 1.0614054, %v5429_v19  ;;  %v5443_v37 = vmul.f32 0.70710677, %v5425_v41 }
 0x238   : > { %v1467_v3 = vmul.f32 %v5365_v6, %v1403_v56  ;;  %v1788_v29 = vsub.f32 0.0, %v5341_v14  ;;  %v1087_v12 = vadd.f32 1.0, %v1023_v49  ;;  %v5448_v28 = vand.u32 2147483647, %v5436_v38  ;;  %6660 = vst [vmem:[#allocation33_spill] sm:$0xff] %v5471_v61  ;;  %v5480_v40 = vpop.f32.mrb[55].mxu0 }
 0x239   : > { %2695 = vmatmul.mubr.bf16.gmra.mrb[4].mxu1 %v2496_v46  ;;  %v5451_v13 = vmul.f32 %v2358_v27, %v5206_v34  ;;  %v1722_v30 = vmul.f32 %v5277_v0, %v1658_v53  ;;  %v1276_v42 = vadd.f32 -1.4531521, %v1212_v58  ;;  %v5455_v1 = vand.u32 2147483647, %v5443_v37  ;;  %6662 = vst [vmem:[#allocation38_spill] sm:$0xff] %v5480_v40 }
 0x23a   : > { %v5457_v7 = vpop.eup %3847  ;;  %v5460_v56 = vmul.f32 %v2359_v59, %v5221_v21  ;;  %v2296_v46 = vsel %vm2168_vm10, %v2232_v52, %v2104_v57  ;;  %3853 = vrcp.f32 %v1087_v12  ;;  %v1024_v33 = vmul.f32 0.3275911, %v5448_v28 }
 0x23b   : > { %6658 = vst [vmem:[#allocation37_spill] sm:$0xff] %v5451_v13  ;;  %3855 = vpow2.f32 %v1944_v22  ;;  %v1340_v34 = vmul.f32 %v5429_v19, %v1276_v42  ;;  %v1213_v0 = vmul.f32 1.0614054, %v5457_v7  ;;  %v1025_v27 = vmul.f32 0.3275911, %v5455_v1 }
 0x23c   : > { %6659 = vst [vmem:[#allocation31_spill] sm:$0xff] %v5460_v56  ;;  %v3850_v53 = vpop.eup %3849  ;;  %v2297_v49 = vsel %vm2169_vm11, %v2233_v24, %v2105_v55  ;;  %v1531_v58 = vadd.f32 -0.28449672, %v1467_v3  ;;  %v1852_v21 = vmul.f32 %v1788_v29, %v5341_v14  ;;  %v1088_v59 = vadd.f32 1.0, %v1024_v33 }
 0x23d   : > { %v5473_v57 = vmul.f32 %v3850_v53, %v1722_v30  ;;  %v1404_v52 = vadd.f32 1.4214138, %v1340_v34  ;;  %v1277_v22 = vadd.f32 -1.4531521, %v1213_v0  ;;  %v1089_v12 = vadd.f32 1.0, %v1025_v27 }
 0x23e   : > { %v2360_v42 = vadd.f32 1.0, %v2296_v46  ;;  %v1789_v13 = vsub.f32 0.0, %v5370_v9  ;;  %3857 = vrcp.f32 %v1088_v59  ;;  %v5478_v56 = vadd.f32 %v6661_v47, %v4449_v48 }
 0x23f   : > { %v5482_v55 = vpop.eup %3851  ;;  %v1468_v14 = vmul.f32 %v5429_v19, %v1404_v52  ;;  %v1341_v24 = vmul.f32 %v5457_v7, %v1277_v22  ;;  %v1790_v3 = vsub.f32 0.0, %v5388_v15  ;;  %3859 = vrcp.f32 %v1089_v12  ;;  %v6664_v12 = vld [vmem:[#allocation22_spill] sm:$0xff] }
 0x240   : > { %v5487_v29 = vadd.f32 1.0, %v2297_v49  ;;  %v5490_v30 = vmul.f32 0.5, %v5318_v39  ;;  %v1946_v46 = vmul.f32 1.442695, %v1852_v21  ;;  %v1214_v47 = vmul.f32 1.0614054, %v5482_v55 }
 0x241   : > { %v2106_v33 = vsub.f32 1.0, %v5473_v57  ;;  %v1595_v34 = vmul.f32 %v5365_v6, %v1531_v58  ;;  %v1405_v0 = vadd.f32 1.4214138, %v1341_v24  ;;  %v2499_v27 = vpack.c.bf16 %v5069_v45, %v4937_v8 }
 0x242   : > { %v5498_v53 = vmul.f32 %v2360_v42, %v5245_v31  ;;  %v1532_v59 = vadd.f32 -0.28449672, %v1468_v14  ;;  %v1278_v49 = vadd.f32 -1.4531521, %v1214_v47  ;;  %v5501_v52 = vmul.f32 0.70710677, %v5478_v56 }
 0x243   : > { %vm2170_vm12 = vcmp.lt.f32.partialorder %v5209_v62, 0.0  ;;  %v1469_v39 = vmul.f32 %v5457_v7, %v1405_v0  ;;  %v1853_v21 = vmul.f32 %v1789_v13, %v5370_v9  ;;  %v1854_v58 = vmul.f32 %v1790_v3, %v5388_v15  ;;  %2702 = vmatprep.mubr.bf16.mxu1 %v2499_v27 }
 0x244   : > { %6663 = vst [vmem:[#allocation39_spill] sm:$0xff] %v5498_v53  ;;  %v2498_v8 = vpack.c.bf16 %v4969_v50, %v4922_v35  ;;  %v5509_v45 = vpop.eup %3853  ;;  %v1342_v31 = vmul.f32 %v5482_v55, %v1278_v49  ;;  %v1791_v57 = vsub.f32 0.0, %v5421_v20  ;;  %v5514_v22 = vand.u32 2147483647, %v5501_v52 }
 0x245   : > { %v5518_v42 = vadd.f32 %v6664_v12, %v4474_v5  ;;  %v3856_v9 = vpop.eup %3855  ;;  %v2234_v13 = vsub.f32 0.0, %v2106_v33  ;;  %v1659_v15 = vadd.f32 0.2548296, %v1595_v34  ;;  %v5521_v14 = vmul.f32 0.5, %v5333_v51 }
 0x246   : > { %v1215_v35 = vmul.f32 1.0614054, %v5509_v45  ;;  %2703 = vmatmul.mubr.bf16.gmra.mrb[8].mxu1 %v2498_v8  ;;  %v1596_v50 = vmul.f32 %v5429_v19, %v1532_v59  ;;  %v1533_v24 = vadd.f32 -0.28449672, %v1469_v39  ;;  %v1406_v3 = vadd.f32 1.4214138, %v1342_v31 }
 0x247   : > { %v1026_v47 = vmul.f32 0.3275911, %v5514_v22  ;;  %3861 = vpow2.f32 %v1946_v46  ;;  %v1948_v0 = vmul.f32 1.442695, %v1853_v21  ;;  %v1950_v27 = vmul.f32 1.442695, %v1854_v58 }
 0x248   : > { %v1279_v49 = vadd.f32 -1.4531521, %v1215_v35  ;;  %v5526_v12 = vpop.eup %3857  ;;  %v1470_v34 = vmul.f32 %v5482_v55, %v1406_v3  ;;  %v1855_v51 = vmul.f32 %v1791_v57, %v5421_v20  ;;  %v5531_v61 = vmul.f32 0.70710677, %v5518_v42 }
 0x249   : > { %v1090_v40 = vadd.f32 1.0, %v1026_v47  ;;  %v5533_v8 = vpop.eup %3859  ;;  %v1723_v59 = vmul.f32 %v5365_v6, %v1659_v15  ;;  %v1216_v46 = vmul.f32 1.0614054, %v5526_v12  ;;  %v1792_v21 = vsub.f32 0.0, %v5448_v28  ;;  %v5542_v47 = vpop.f32.mrb[56].mxu0 }
 0x24a   : > { %v1343_v39 = vmul.f32 %v5509_v45, %v1279_v49  ;;  %v1660_v58 = vadd.f32 0.2548296, %v1596_v50  ;;  %v1597_v31 = vmul.f32 %v5457_v7, %v1533_v24  ;;  %v1217_v35 = vmul.f32 1.0614054, %v5533_v8  ;;  %6665 = vst [vmem:[#allocation19_spill] sm:$0xff] %v5542_v47 }
 0x24b   : > { %3863 = vrcp.f32 %v1090_v40  ;;  %v1280_v57 = vadd.f32 -1.4531521, %v1216_v46  ;;  %v1793_v3 = vsub.f32 0.0, %v5455_v1  ;;  %v2298_v6 = vsel %vm2170_vm12, %v2234_v13, %v2106_v33 }
 0x24c   : > { %3865 = vpow2.f32 %v1948_v0  ;;  %v1407_v20 = vadd.f32 1.4214138, %v1343_v39  ;;  %v1534_v15 = vadd.f32 -0.28449672, %v1470_v34  ;;  %v1281_v49 = vadd.f32 -1.4531521, %v1217_v35 }
 0x24d   : > { %v5547_v53 = vand.u32 2147483647, %v5531_v61  ;;  %3867 = vpow2.f32 %v1950_v27  ;;  %v1952_v24 = vmul.f32 1.442695, %v1855_v51  ;;  %v1344_v40 = vmul.f32 %v5526_v12, %v1280_v57 }
 0x24e   : > { %v1471_v50 = vmul.f32 %v5509_v45, %v1407_v20  ;;  %v2043_v0 = vmul.f32 %v3856_v9, %v1723_v59  ;;  %v1661_v39 = vadd.f32 0.2548296, %v1597_v31  ;;  %v1345_v46 = vmul.f32 %v5533_v8, %v1281_v49 }
 0x24f   : > { %v1027_v47 = vmul.f32 0.3275911, %v5547_v53  ;;  %v1408_v62 = vadd.f32 1.4214138, %v1344_v40  ;;  %v1856_v33 = vmul.f32 %v1792_v21, %v5448_v28  ;;  %v1857_v13 = vmul.f32 %v1793_v3, %v5455_v1 }
 0x250   : > { %v1535_v43 = vadd.f32 -0.28449672, %v1471_v50  ;;  %v1724_v34 = vmul.f32 %v5429_v19, %v1660_v58  ;;  %v1598_v27 = vmul.f32 %v5482_v55, %v1534_v15  ;;  %v1409_v35 = vadd.f32 1.4214138, %v1345_v46 }
 0x251   : > { %v1091_v51 = vadd.f32 1.0, %v1027_v47  ;;  %v3862_v20 = vpop.eup %3861  ;;  %v2362_v57 = vadd.f32 1.0, %v2298_v6  ;;  %vm2171_vm13 = vcmp.lt.f32.partialorder %v5272_v17, 0.0  ;;  %3869 = vpow2.f32 %v1952_v24  ;;  %v5582_v24 = vpop.f32.mrb[57].mxu0 }
 0x252   : > { %v1599_v9 = vmul.f32 %v5509_v45, %v1535_v43  ;;  %v1472_v59 = vmul.f32 %v5526_v12, %v1408_v62  ;;  %v2107_v31 = vsub.f32 1.0, %v2043_v0  ;;  %v1725_v28 = vmul.f32 %v5457_v7, %v1661_v39 }
 0x253   : > { %v1473_v1 = vmul.f32 %v5533_v8, %v1409_v35  ;;  %3871 = vrcp.f32 %v1091_v51  ;;  %v5564_v19 = vmul.f32 %v5487_v29, %v5254_v2  ;;  %v5567_v21 = vmul.f32 0.5, %v5363_v10  ;;  %v6667_v51 = vld [vmem:[#allocation23_spill] sm:$0xff] }
 0x254   : > { %v1536_v58 = vadd.f32 -0.28449672, %v1472_v59  ;;  %v5571_v43 = vadd.f32 %v4950_v23, %v4449_v48  ;;  %v2044_v47 = vmul.f32 %v3862_v20, %v1724_v34  ;;  %v1662_v6 = vadd.f32 0.2548296, %v1598_v27 }
 0x255   : > { %v5573_v3 = vpop.eup %3863  ;;  %v1954_v7 = vmul.f32 1.442695, %v1856_v33  ;;  %v1956_v15 = vmul.f32 1.442695, %v1857_v13  ;;  %v5576_v50 = vmul.f32 %v2362_v57, %v5295_v26  ;;  %v5579_v2 = vmul.f32 0.5, %v5396_v54 }
 0x256   : > { %v3866_v49 = vpop.eup %3865  ;;  %v1663_v10 = vadd.f32 0.2548296, %v1599_v9  ;;  %v1218_v29 = vmul.f32 1.0614054, %v5573_v3  ;;  %v2235_v23 = vsub.f32 0.0, %v2107_v31  ;;  %v5585_v0 = vmul.f32 0.5, %v5418_v32 }
 0x257   : > { %6666 = vst [vmem:[#allocation21_spill] sm:$0xff] %v5576_v50  ;;  %v2045_v40 = vmul.f32 %v3866_v49, %v1725_v28  ;;  %v1537_v39 = vadd.f32 -0.28449672, %v1473_v1  ;;  %v3868_v46 = vpop.eup %3867  ;;  %vm2172_vm14 = vcmp.lt.f32.partialorder %v5329_v25, 0.0  ;;  %v1600_v26 = vmul.f32 %v5526_v12, %v1536_v58 }
 0x258   : > { %v1282_v62 = vadd.f32 -1.4531521, %v1218_v29  ;;  %v1794_v54 = vsub.f32 0.0, %v5514_v22  ;;  %v5591_v33 = vmul.f32 0.70710677, %v5571_v43  ;;  %v2108_v13 = vsub.f32 1.0, %v2044_v47 }
 0x259   : > { %v1726_v34 = vmul.f32 %v5482_v55, %v1662_v6  ;;  %3873 = vpow2.f32 %v1954_v7  ;;  %v5595_v27 = vmul.f32 0.5, %v5425_v41  ;;  %vm2173_vm15 = vcmp.lt.f32.partialorder %v5356_v60, 0.0 }
 0x25a   : > { %v1727_v32 = vmul.f32 %v5509_v45, %v1663_v10  ;;  %3875 = vpow2.f32 %v1956_v15  ;;  %v1346_v35 = vmul.f32 %v5573_v3, %v1282_v62  ;;  %v5602_v20 = vadd.f32 %v6667_v51, %v4474_v5  ;;  %v5637_v51 = vpop.f32.mrb[58].mxu0 }
 0x25b   : > { %v2299_v57 = vsel %vm2171_vm13, %v2235_v23, %v2107_v31  ;;  %v2109_v9 = vsub.f32 1.0, %v2045_v40  ;;  %v1601_v55 = vmul.f32 %v5533_v8, %v1537_v39  ;;  %v5608_v41 = vand.u32 2147483647, %v5591_v33  ;;  %v3870_v59 = vpop.eup %3869  ;;  %6669 = vst [vmem:[#allocation40_spill] sm:$0xff] %v5637_v51 }
 0x25c   : > { %v1664_v28 = vadd.f32 0.2548296, %v1600_v26  ;;  %v1410_v1 = vadd.f32 1.4214138, %v1346_v35  ;;  %v1858_v45 = vmul.f32 %v1794_v54, %v5514_v22  ;;  %v1795_v58 = vsub.f32 0.0, %v5547_v53 }
 0x25d   : > { %v5612_v47 = vpop.eup %3871  ;;  %v2236_v6 = vsub.f32 0.0, %v2108_v13  ;;  %v5614_v7 = vmul.f32 %v3868_v46, %v1726_v34  ;;  %v5617_v17 = vmul.f32 0.5, %v5478_v56  ;;  %v1028_v31 = vmul.f32 0.3275911, %v5608_v41 }
 0x25e   : > { %v5620_v15 = vmul.f32 %v3870_v59, %v1727_v32  ;;  %v1474_v49 = vmul.f32 %v5573_v3, %v1410_v1  ;;  %v1219_v10 = vmul.f32 1.0614054, %v5612_v47  ;;  %v5625_v22 = vmul.f32 0.70710677, %v5602_v20  ;;  %v6668_v32 = vld [vmem:[#allocation24_spill] sm:$0xff] }
 0x25f   : > { %v2363_v29 = vadd.f32 1.0, %v2299_v57  ;;  %v2237_v23 = vsub.f32 0.0, %v2109_v9  ;;  %v1665_v40 = vadd.f32 0.2548296, %v1601_v55  ;;  %v1092_v39 = vadd.f32 1.0, %v1028_v31 }
 0x260   : > { %v1728_v46 = vmul.f32 %v5526_v12, %v1664_v28  ;;  %v1958_v26 = vmul.f32 1.442695, %v1858_v45  ;;  %v1283_v56 = vadd.f32 -1.4531521, %v1219_v10  ;;  %v1859_v62 = vmul.f32 %v1795_v58, %v5547_v53 }
 0x261   : > { %v2300_v54 = vsel %vm2172_vm14, %v2236_v6, %v2108_v13  ;;  %v2110_v34 = vsub.f32 1.0, %v5614_v7  ;;  %vm2174_vm0 = vcmp.lt.f32.partialorder %v5380_v11, 0.0  ;;  %3877 = vrcp.f32 %v1092_v39  ;;  %v5645_v13 = vpop.f32.mrb[59].mxu0 }
 0x262   : > { %v5635_v35 = vadd.f32 %v6668_v32, %v4449_v48  ;;  %v2111_v12 = vsub.f32 1.0, %v5620_v15  ;;  %vm2175_vm1 = vcmp.lt.f32.partialorder %v5410_v44, 0.0  ;;  %v1538_v57 = vadd.f32 -0.28449672, %v1474_v49  ;;  %6670 = vst [vmem:[#allocation44_spill] sm:$0xff] %v5645_v13  ;;  %v6674_v32 = vld [vmem:[#allocation46_spill] sm:$0xff] }
 0x263   : > { %v1347_v53 = vmul.f32 %v5612_v47, %v1283_v56  ;;  %v5643_v25 = vand.u32 2147483647, %v5625_v22  ;;  %v3874_v55 = vpop.eup %3873  ;;  %v5648_v59 = vmul.f32 %v2363_v29, %v5439_v16  ;;  %v2301_v28 = vsel %vm2173_vm15, %v2237_v23, %v2109_v9  ;;  %v6671_v16 = vld [vmem:[#allocation26_spill] sm:$0xff]  ;;  %v6672_v29 = vld [vmem:[#allocation28_spill] sm:$0xff] }
 0x264   : > { %v1729_v1 = vmul.f32 %v5533_v8, %v1665_v40  ;;  %v5654_v45 = vmul.f32 0.5, %v5518_v42  ;;  %v3876_v58 = vpop.eup %3875  ;;  %v2364_v6 = vadd.f32 1.0, %v2300_v54  ;;  %v2048_v7 = vmul.f32 %v3874_v55, %v1728_v46 }
 0x265   : > { %3879 = vpow2.f32 %v1958_v26  ;;  %v1960_v31 = vmul.f32 1.442695, %v1859_v62  ;;  %v1411_v15 = vadd.f32 1.4214138, %v1347_v53  ;;  %v1029_v49 = vmul.f32 0.3275911, %v5643_v25 }
 0x266   : > { %v5658_v10 = vmul.f32 0.70710677, %v5635_v35  ;;  %v2501_v60 = vpack.c.bf16 %v6672_v29, %v6671_v16  ;;  %v2365_v9 = vadd.f32 1.0, %v2301_v28  ;;  %v2238_v23 = vsub.f32 0.0, %v2110_v34  ;;  %v6673_v26 = vld [vmem:[#allocation25_spill] sm:$0xff] }
 0x267   : > { %v2239_v8 = vsub.f32 0.0, %v2111_v12  ;;  %v1602_v42 = vmul.f32 %v5573_v3, %v1538_v57  ;;  %vm2176_vm2 = vcmp.lt.f32.partialorder %v5436_v38, 0.0  ;;  %v2049_v40 = vmul.f32 %v3876_v58, %v1729_v1  ;;  %v6675_v53 = vld [vmem:[#allocation49_spill] sm:$0xff]  ;;  %v5674_v57 = vpop.f32.mrb[60].mxu0 }
 0x268   : > { %v1093_v39 = vadd.f32 1.0, %v1029_v49  ;;  %v5665_v46 = vand.u32 2147483647, %v5658_v10  ;;  %2710 = vmatprep.mubr.bf16.mxu1 %v2501_v60  ;;  %v5669_v56 = vadd.f32 %v6673_v26, %v4474_v5  ;;  %v2112_v62 = vsub.f32 1.0, %v2048_v7  ;;  %6676 = vst [vmem:[#allocation18_spill] sm:$0xff] %v5674_v57  ;;  %v6687_v57 = vld [vmem:[#allocation43_spill] sm:$0xff] }
 0x269   : > { %3881 = vpow2.f32 %v1960_v31  ;;  %v1796_v54 = vsub.f32 0.0, %v5608_v41  ;;  %v2500_v55 = vpack.c.bf16 %v6675_v53, %v6674_v32  ;;  %v5677_v28 = vmul.f32 %v2364_v6, %v5490_v30 }
 0x26a   : > { %v1475_v1 = vmul.f32 %v5612_v47, %v1411_v15  ;;  %3883 = vrcp.f32 %v1093_v39  ;;  %v1030_v58 = vmul.f32 0.3275911, %v5665_v46  ;;  %v5682_v49 = vmul.f32 %v2365_v9, %v5521_v14  ;;  %v6678_v14 = vld [vmem:[#allocation47_spill] sm:$0xff] }
 0x26b   : > { %6677 = vst [vmem:[#allocation14_spill] sm:$0xff] %v5677_v28  ;;  %v2302_v7 = vsel %vm2174_vm0, %v2238_v23, %v2110_v34  ;;  %vm2177_vm3 = vcmp.lt.f32.partialorder %v5443_v37, 0.0  ;;  %v1666_v31 = vadd.f32 0.2548296, %v1602_v42  ;;  %v5688_v16 = vmul.f32 0.70710677, %v5669_v56  ;;  %2711 = vmatmul.mubr.bf16.gmra.mrb[12].mxu1 %v2500_v55  ;;  %v5690_v30 = vpop.eup %3877 }
 0x26c   : > { %v2303_v6 = vsel %vm2175_vm1, %v2239_v8, %v2111_v12  ;;  %v2113_v15 = vsub.f32 1.0, %v2049_v40  ;;  %v1094_v29 = vadd.f32 1.0, %v1030_v58  ;;  %v5696_v60 = vadd.f32 %v6678_v14, %v4449_v48 }
 0x26d   : > { %v2240_v11 = vsub.f32 0.0, %v2112_v62  ;;  %v5699_v34 = vmul.f32 0.5, %v5571_v43  ;;  %v1220_v9 = vmul.f32 1.0614054, %v5690_v30  ;;  %v1860_v23 = vmul.f32 %v1796_v54, %v5608_v41  ;;  %v5710_v43 = vpop.f32.mrb[61].mxu0  ;;  %v6680_v54 = vld [vmem:[#allocation48_spill] sm:$0xff] }
 0x26e   : > { %v2366_v42 = vadd.f32 1.0, %v2302_v7  ;;  %v1539_v39 = vadd.f32 -0.28449672, %v1475_v1  ;;  %3885 = vrcp.f32 %v1094_v29  ;;  %v5704_v44 = vand.u32 2147483647, %v5688_v16  ;;  %6679 = vst [vmem:[#allocation42_spill] sm:$0xff] %v5710_v43 }
 0x26f   : > { %v3880_v12 = vpop.eup %3879  ;;  %v2367_v8 = vadd.f32 1.0, %v2303_v6  ;;  %v1730_v40 = vmul.f32 %v5573_v3, %v1666_v31  ;;  %v1284_v26 = vadd.f32 -1.4531521, %v1220_v9  ;;  %v5708_v32 = vmul.f32 0.70710677, %v5696_v60 }
 0x270   : > { %v2241_v53 = vsub.f32 0.0, %v2113_v15  ;;  %v5713_v55 = vmul.f32 0.5, %v5602_v20  ;;  %v1031_v41 = vmul.f32 0.3275911, %v5704_v44  ;;  %v5718_v1 = vadd.f32 %v6680_v54, %v4474_v5 }
 0x271   : > { %v2304_v58 = vsel %vm2176_vm2, %v2240_v11, %v2112_v62  ;;  %v1348_v3 = vmul.f32 %v5690_v30, %v1284_v26  ;;  %v1962_v7 = vmul.f32 1.442695, %v1860_v23  ;;  %v5724_v31 = vand.u32 2147483647, %v5708_v32 }
 0x272   : > { %v5727_v6 = vmul.f32 %v2366_v42, %v5567_v21  ;;  %v1603_v20 = vmul.f32 %v5612_v47, %v1539_v39  ;;  %v1797_v29 = vsub.f32 0.0, %v5643_v25  ;;  %v1095_v14 = vadd.f32 1.0, %v1031_v41 }
 0x273   : > { %v3882_v9 = vpop.eup %3881  ;;  %v5732_v54 = vmul.f32 %v2367_v8, %v5579_v2  ;;  %v2050_v38 = vmul.f32 %v3880_v12, %v1730_v40  ;;  %v1412_v62 = vadd.f32 1.4214138, %v1348_v3  ;;  %v1032_v11 = vmul.f32 0.3275911, %v5724_v31  ;;  %v5750_v3 = vpop.f32.mrb[62].mxu0 }
 0x274   : > { %6681 = vst [vmem:[#allocation20_spill] sm:$0xff] %v5727_v6  ;;  %v5735_v23 = vpop.eup %3883  ;;  %v2368_v26 = vadd.f32 1.0, %v2304_v58  ;;  %v2305_v21 = vsel %vm2177_vm3, %v2241_v53, %v2113_v15  ;;  %3887 = vrcp.f32 %v1095_v14  ;;  %v5740_v42 = vmul.f32 0.70710677, %v5718_v1  ;;  %6683 = vst [vmem:[#allocation45_spill] sm:$0xff] %v5750_v3 }
 0x275   : > { %6682 = vst [vmem:[#allocation41_spill] sm:$0xff] %v5732_v54  ;;  %v1476_v39 = vmul.f32 %v5690_v30, %v1412_v62  ;;  %3889 = vpow2.f32 %v1962_v7  ;;  %v1221_v2 = vmul.f32 1.0614054, %v5735_v23  ;;  %v1096_v8 = vadd.f32 1.0, %v1032_v11 }
 0x276   : > { %v1667_v12 = vadd.f32 0.2548296, %v1603_v20  ;;  %v1861_v40 = vmul.f32 %v1797_v29, %v5643_v25  ;;  %v1798_v41 = vsub.f32 0.0, %v5665_v46  ;;  %v5747_v58 = vand.u32 2147483647, %v5740_v42  ;;  %v6684_v29 = vld [vmem:[#allocation27_spill] sm:$0xff] }
 0x277   : > { %v2114_v37 = vsub.f32 1.0, %v2050_v38  ;;  %vm2178_vm4 = vcmp.lt.f32.partialorder %v5501_v52, 0.0  ;;  %v1540_v15 = vadd.f32 -0.28449672, %v1476_v39  ;;  %v1285_v53 = vadd.f32 -1.4531521, %v1221_v2 }
 0x278   : > { %3891 = vrcp.f32 %v1096_v8  ;;  %v5752_v7 = vpop.eup %3885  ;;  %v5754_v14 = vadd.f32 1.0, %v2305_v21  ;;  %v5757_v20 = vmul.f32 0.5, %v5635_v35  ;;  %v1033_v25 = vmul.f32 0.3275911, %v5747_v58  ;;  %v5770_v21 = vpop.f32.mrb[63].mxu0 }
 0x279   : > { %v5762_v62 = vadd.f32 %v6684_v29, %v4449_v48  ;;  %v5765_v38 = vmul.f32 %v2368_v26, %v5585_v0  ;;  %v1604_v11 = vmul.f32 %v5690_v30, %v1540_v15  ;;  %v1349_v39 = vmul.f32 %v5735_v23, %v1285_v53  ;;  %6686 = vst [vmem:[#allocation23_spill] sm:$0xff] %v5770_v21  ;;  %v6688_v0 = vld [vmem:[#allocation29_spill] sm:$0xff]  ;;  %v6689_v53 = vld [vmem:[#allocation50_spill] sm:$0xff] }
 0x27a   : > { %v1222_v2 = vmul.f32 1.0614054, %v5752_v7  ;;  %v1731_v35 = vmul.f32 %v5612_v47, %v1667_v12  ;;  %v1964_v8 = vmul.f32 1.442695, %v1861_v40  ;;  %v1862_v3 = vmul.f32 %v1798_v41, %v5665_v46  ;;  %v6690_v40 = vld [vmem:[#allocation16_spill] sm:$0xff]  ;;  %v6691_v41 = vld [vmem:[#allocation51_spill] sm:$0xff] }
 0x27b   : > { %6685 = vst [vmem:[#allocation22_spill] sm:$0xff] %v5765_v38  ;;  %v1097_v6 = vadd.f32 1.0, %v1033_v25  ;;  %v2242_v43 = vsub.f32 0.0, %v2114_v37  ;;  %v1413_v29 = vadd.f32 1.4214138, %v1349_v39  ;;  %v2503_v26 = vpack.c.bf16 %v6688_v0, %v6687_v57 }
 0x27c   : > { %v1286_v54 = vadd.f32 -1.4531521, %v1222_v2  ;;  %v1668_v38 = vadd.f32 0.2548296, %v1604_v11  ;;  %v5777_v15 = vmul.f32 0.70710677, %v5762_v62  ;;  %v5781_v21 = vadd.f32 %v6689_v53, %v4474_v5 }
 0x27d   : > { %3893 = vrcp.f32 %v1097_v6  ;;  %v1477_v47 = vmul.f32 %v5735_v23, %v1413_v29  ;;  %v1799_v12 = vsub.f32 0.0, %v5704_v44  ;;  %2718 = vmatprep.mubr.bf16.mxu1 %v2503_v26  ;;  %v2502_v25 = vpack.c.bf16 %v6691_v41, %v6690_v40 }
 0x27e   : > { %v1350_v46 = vmul.f32 %v5752_v7, %v1286_v54  ;;  %v5788_v57 = vpop.eup %3887  ;;  %v2051_v6 = vmul.f32 %v3882_v9, %v1731_v35  ;;  %v1966_v11 = vmul.f32 1.442695, %v1862_v3  ;;  %v5791_v39 = vmul.f32 0.5, %v5669_v56 }
 0x27f   : > { %v5794_v2 = vand.u32 2147483647, %v5777_v15  ;;  %v3890_v0 = vpop.eup %3889  ;;  %3895 = vpow2.f32 %v1964_v8  ;;  %v1223_v54 = vmul.f32 1.0614054, %v5788_v57  ;;  %v1800_v26 = vsub.f32 0.0, %v5724_v31  ;;  %2719 = vmatmul.mubr.bf16.gmra.mrb[16].mxu1 %v2502_v25 }
 0x280   : > { %v1414_v29 = vadd.f32 1.4214138, %v1350_v46  ;;  %v2306_v53 = vsel %vm2178_vm4, %v2242_v43, %v2114_v37  ;;  %v1732_v9 = vmul.f32 %v5690_v30, %v1668_v38  ;;  %v5803_v56 = vmul.f32 0.70710677, %v5781_v21 }
 0x281   : > { %v1034_v3 = vmul.f32 0.3275911, %v5794_v2  ;;  %v1541_v40 = vadd.f32 -0.28449672, %v1477_v47  ;;  %v1287_v46 = vadd.f32 -1.4531521, %v1223_v54  ;;  %v1863_v41 = vmul.f32 %v1799_v12, %v5704_v44 }
 0x282   : > { %v5805_v35 = vpop.eup %3891  ;;  %v1478_v8 = vmul.f32 %v5752_v7, %v1414_v29  ;;  %v2115_v13 = vsub.f32 1.0, %v2051_v6  ;;  %vm2179_vm5 = vcmp.lt.f32.partialorder %v5531_v61, 0.0  ;;  %v5812_v30 = vand.u32 2147483647, %v5803_v56 }
 0x283   : > { %v1224_v52 = vmul.f32 1.0614054, %v5805_v35  ;;  %v1098_v43 = vadd.f32 1.0, %v1034_v3  ;;  %v1351_v38 = vmul.f32 %v5788_v57, %v1287_v46  ;;  %v1864_v25 = vmul.f32 %v1800_v26, %v5724_v31 }
 0x284   : > { %v1542_v37 = vadd.f32 -0.28449672, %v1478_v8  ;;  %v1801_v47 = vsub.f32 0.0, %v5747_v58  ;;  %v2052_v29 = vmul.f32 %v3890_v0, %v1732_v9  ;;  %v1035_v44 = vmul.f32 0.3275911, %v5812_v30 }
 0x285   : > { %v1288_v54 = vadd.f32 -1.4531521, %v1224_v52  ;;  %3897 = vrcp.f32 %v1098_v43  ;;  %v1605_v12 = vmul.f32 %v5735_v23, %v1541_v40  ;;  %v1415_v6 = vadd.f32 1.4214138, %v1351_v38  ;;  %v6692_v40 = vld [vmem:[#allocation30_spill] sm:$0xff] }
 0x286   : > { %3899 = vpow2.f32 %v1966_v11  ;;  %v1968_v3 = vmul.f32 1.442695, %v1863_v41  ;;  %v2243_v28 = vsub.f32 0.0, %v2115_v13  ;;  %v1606_v8 = vmul.f32 %v5752_v7, %v1542_v37 }
 0x287   : > { %v5819_v51 = vpop.eup %3893  ;;  %v1352_v46 = vmul.f32 %v5805_v35, %v1288_v54  ;;  %v1099_v31 = vadd.f32 1.0, %v1035_v44  ;;  %v1479_v26 = vmul.f32 %v5788_v57, %v1415_v6  ;;  %v1970_v0 = vmul.f32 1.442695, %v1864_v25 }
 0x288   : > { %v1225_v9 = vmul.f32 1.0614054, %v5819_v51  ;;  %v1865_v52 = vmul.f32 %v1801_v47, %v5747_v58  ;;  %v2116_v43 = vsub.f32 1.0, %v2052_v29  ;;  %vm2180_vm6 = vcmp.lt.f32.partialorder %v5591_v33, 0.0 }
 0x289   : > { %v1416_v11 = vadd.f32 1.4214138, %v1352_v46  ;;  %3901 = vrcp.f32 %v1099_v31  ;;  %v5829_v41 = vadd.f32 %v6692_v40, %v4449_v48  ;;  %v3896_v37 = vpop.eup %3895  ;;  %v5833_v38 = vmul.f32 %v5754_v14, %v5595_v27 }
 0x28a   : > { %v1669_v54 = vadd.f32 0.2548296, %v1605_v12  ;;  %v1543_v25 = vadd.f32 -0.28449672, %v1479_v26  ;;  %v1289_v44 = vadd.f32 -1.4531521, %v1225_v9  ;;  %3903 = vpow2.f32 %v1968_v3 }
 0x28b   : > { %v2370_v6 = vadd.f32 1.0, %v2306_v53  ;;  %v1670_v50 = vadd.f32 0.2548296, %v1606_v8  ;;  %v1480_v58 = vmul.f32 %v5805_v35, %v1416_v11  ;;  %v2307_v47 = vsel %vm2179_vm5, %v2243_v28, %v2115_v13 }
 0x28c   : > { %v1607_v29 = vmul.f32 %v5788_v57, %v1543_v25  ;;  %v1353_v46 = vmul.f32 %v5819_v51, %v1289_v44  ;;  %v1972_v31 = vmul.f32 1.442695, %v1865_v52  ;;  %3905 = vpow2.f32 %v1970_v0 }
 0x28d   : > { %v1544_v40 = vadd.f32 -0.28449672, %v1480_v58  ;;  %v1802_v27 = vsub.f32 0.0, %v5794_v2  ;;  %v5842_v14 = vmul.f32 0.70710677, %v5829_v41  ;;  %v2244_v53 = vsub.f32 0.0, %v2116_v43 }
 0x28e   : > { %v1733_v12 = vmul.f32 %v5735_v23, %v1669_v54  ;;  %v5846_v3 = vmul.f32 0.5, %v5696_v60  ;;  %v1417_v61 = vadd.f32 1.4214138, %v1353_v46  ;;  %v1734_v28 = vmul.f32 %v5752_v7, %v1670_v50 }
 0x28f   : > { %v5848_v13 = vpop.eup %3897  ;;  %v1671_v8 = vadd.f32 0.2548296, %v1607_v29  ;;  %v1608_v26 = vmul.f32 %v5805_v35, %v1544_v40  ;;  %v5853_v0 = vand.u32 2147483647, %v5842_v14  ;;  %v5856_v52 = vmul.f32 %v2370_v6, %v5617_v17  ;;  %v6693_v40 = vld [vmem:[#allocation32_spill] sm:$0xff] }
 0x290   : > { %v3900_v9 = vpop.eup %3899  ;;  %v2371_v11 = vadd.f32 1.0, %v2307_v47  ;;  %v1481_v23 = vmul.f32 %v5819_v51, %v1417_v61  ;;  %v1226_v60 = vmul.f32 1.0614054, %v5848_v13  ;;  %3907 = vpow2.f32 %v1972_v31 }
 0x291   : > { %v1672_v54 = vadd.f32 0.2548296, %v1608_v26  ;;  %v1866_v25 = vmul.f32 %v1802_v27, %v5794_v2  ;;  %v1036_v50 = vmul.f32 0.3275911, %v5853_v0  ;;  %v2308_v7 = vsel %vm2180_vm6, %v2244_v53, %v2116_v43 }
 0x292   : > { %v2053_v44 = vmul.f32 %v3896_v37, %v1733_v12  ;;  %v1545_v58 = vadd.f32 -0.28449672, %v1481_v23  ;;  %v1290_v29 = vadd.f32 -1.4531521, %v1226_v60  ;;  %v2054_v17 = vmul.f32 %v3900_v9, %v1734_v28 }
 0x293   : > { %v5864_v46 = vpop.eup %3901  ;;  %v1735_v6 = vmul.f32 %v5788_v57, %v1671_v8  ;;  %v1100_v47 = vadd.f32 1.0, %v1036_v50  ;;  %v5869_v61 = vadd.f32 %v6693_v40, %v4474_v5  ;;  %v1736_v2 = vmul.f32 %v5805_v35, %v1672_v54 }
 0x294   : > { %v1609_v31 = vmul.f32 %v5819_v51, %v1545_v58  ;;  %v1354_v33 = vmul.f32 %v5848_v13, %v1290_v29  ;;  %v1227_v43 = vmul.f32 1.0614054, %v5864_v46  ;;  %v3904_v37 = vpop.eup %3903  ;;  %vm2181_vm7 = vcmp.lt.f32.partialorder %v5625_v22, 0.0  ;;  %v6694_v29 = vld [vmem:[#allocation36_spill] sm:$0xff] }
 0x295   : > { %v5877_v27 = vmul.f32 0.5, %v5718_v1  ;;  %v5880_v57 = vmul.f32 0.5, %v5762_v62  ;;  %v1803_v53 = vsub.f32 0.0, %v5812_v30  ;;  %3909 = vrcp.f32 %v1100_v47 }
 0x296   : > { %v5884_v35 = vmul.f32 %v2371_v11, %v5654_v45  ;;  %v2117_v12 = vsub.f32 1.0, %v2053_v44  ;;  %vm2182_vm8 = vcmp.lt.f32.partialorder %v5658_v10, 0.0  ;;  %v1673_v28 = vadd.f32 0.2548296, %v1609_v31  ;;  %v3906_v26 = vpop.eup %3905 }
 0x297   : > { %v1418_v8 = vadd.f32 1.4214138, %v1354_v33  ;;  %v2372_v9 = vadd.f32 1.0, %v2308_v7  ;;  %v2118_v23 = vsub.f32 1.0, %v2054_v17  ;;  %v1974_v60 = vmul.f32 1.442695, %v1866_v25 }
 0x298   : > { %v1291_v1 = vadd.f32 -1.4531521, %v1227_v43  ;;  %v2055_v54 = vmul.f32 %v3904_v37, %v1735_v6  ;;  %v2056_v50 = vmul.f32 %v3906_v26, %v1736_v2  ;;  %v5889_v58 = vmul.f32 0.70710677, %v5869_v61 }
 0x299   : > { %v1482_v62 = vmul.f32 %v5848_v13, %v1418_v8  ;;  %v5892_v45 = vmul.f32 0.5, %v5781_v21  ;;  %v1867_v44 = vmul.f32 %v1803_v53, %v5812_v30  ;;  %v5898_v7 = vadd.f32 %v6694_v29, %v4449_v48 }
 0x29a   : > { %v1355_v11 = vmul.f32 %v5864_v46, %v1291_v1  ;;  %v2245_v25 = vsub.f32 0.0, %v2117_v12  ;;  %v1737_v17 = vmul.f32 %v5819_v51, %v1673_v28  ;;  %v5902_v47 = vand.u32 2147483647, %v5889_v58  ;;  %v3908_v40 = vpop.eup %3907 }
 0x29b   : > { %v1546_v6 = vadd.f32 -0.28449672, %v1482_v62  ;;  %v2246_v2 = vsub.f32 0.0, %v2118_v23  ;;  %vm2183_vm9 = vcmp.lt.f32.partialorder %v5688_v16, 0.0  ;;  %vm2184_vm10 = vcmp.lt.f32.partialorder %v5708_v32, 0.0  ;;  %v6696_v32 = vld [vmem:[#allocation34_spill] sm:$0xff] }
 0x29c   : > { %3911 = vpow2.f32 %v1974_v60  ;;  %v1419_v21 = vadd.f32 1.4214138, %v1355_v11  ;;  %v1804_v30 = vsub.f32 0.0, %v5853_v0  ;;  %v5908_v31 = vmul.f32 %v2372_v9, %v5699_v34 }
 0x29d   : > { %v2119_v33 = vsub.f32 1.0, %v2055_v54  ;;  %v2120_v43 = vsub.f32 1.0, %v2056_v50  ;;  %v1037_v51 = vmul.f32 0.3275911, %v5902_v47  ;;  %v1976_v53 = vmul.f32 1.442695, %v1867_v44 }
 0x29e   : > { %v1483_v37 = vmul.f32 %v5864_v46, %v1419_v21  ;;  %v5913_v28 = vmul.f32 0.70710677, %v5898_v7  ;;  %v2505_v8 = vpack.c.bf16 %v5432_v63, %v5336_v36  ;;  %v2309_v26 = vsel %vm2181_vm7, %v2245_v25, %v2117_v12 }
 0x29f   : > { %v2057_v60 = vmul.f32 %v3908_v40, %v1737_v17  ;;  %v1610_v34 = vmul.f32 %v5848_v13, %v1546_v6  ;;  %v1101_v9 = vadd.f32 1.0, %v1037_v51  ;;  %v5920_v1 = vpop.eup %3909  ;;  %v2310_v54 = vsel %vm2182_vm8, %v2246_v2, %v2118_v23 }
 0x2a0   : > { %v1547_v50 = vadd.f32 -0.28449672, %v1483_v37  ;;  %v1868_v62 = vmul.f32 %v1804_v30, %v5853_v0  ;;  %v974_v11 = vand.u32 2147483647, %v5913_v28  ;;  %2726 = vmatprep.mubr.bf16.mxu1 %v2505_v8  ;;  %v2247_v44 = vsub.f32 0.0, %v2119_v33  ;;  %v6695_v8 = vld [vmem:[#allocation52_spill] sm:$0xff] }
 0x2a1   : > { %v2248_v36 = vsub.f32 0.0, %v2120_v43  ;;  %v1228_v63 = vmul.f32 1.0614054, %v5920_v1  ;;  %3913 = vrcp.f32 %v1101_v9  ;;  %vm2185_vm11 = vcmp.lt.f32.partialorder %v5740_v42, 0.0 }
 0x2a2   : > { %v1611_v22 = vmul.f32 %v5864_v46, %v1547_v50  ;;  %3915 = vpow2.f32 %v1976_v53  ;;  %v5930_v12 = vmul.f32 0.5, %v5829_v41  ;;  %v1038_v10 = vmul.f32 0.3275911, %v974_v11 }
 0x2a3   : > { %v2121_v23 = vsub.f32 1.0, %v2057_v60  ;;  %v1674_v29 = vadd.f32 0.2548296, %v1610_v34  ;;  %v1292_v0 = vadd.f32 -1.4531521, %v1228_v63  ;;  %v5934_v25 = vadd.f32 %v5303_v4, %v4474_v5  ;;  %v6697_v63 = vld [vmem:[#allocation35_spill] sm:$0xff] }
 0x2a4   : > { %v2373_v17 = vadd.f32 1.0, %v2309_v26  ;;  %v2374_v6 = vadd.f32 1.0, %v2310_v54  ;;  %v1978_v40 = vmul.f32 1.442695, %v1868_v62  ;;  %v1102_v2 = vadd.f32 1.0, %v1038_v10 }
 0x2a5   : > { %v2311_v21 = vsel %vm2183_vm9, %v2247_v44, %v2119_v33  ;;  %v2312_v30 = vsel %vm2184_vm10, %v2248_v36, %v2120_v43  ;;  %v1675_v41 = vadd.f32 0.2548296, %v1611_v22  ;;  %v1356_v51 = vmul.f32 %v5920_v1, %v1292_v0 }
 0x2a6   : > { %v3912_v37 = vpop.eup %3911  ;;  %v1805_v53 = vsub.f32 0.0, %v5902_v47  ;;  %3917 = vrcp.f32 %v1102_v2  ;;  %v5943_v4 = vmul.f32 0.70710677, %v5934_v25  ;;  %v2504_v26 = vpack.c.bf16 %v5413_v18, %v6695_v8 }
 0x2a7   : > { %v2249_v60 = vsub.f32 0.0, %v2121_v23  ;;  %v1738_v16 = vmul.f32 %v5848_v13, %v1674_v29  ;;  %v1420_v33 = vadd.f32 1.4214138, %v1356_v51  ;;  %v5950_v43 = vadd.f32 %v6696_v32, %v4449_v48 }
 0x2a8   : > { %v5953_v34 = vmul.f32 %v2373_v17, %v5713_v55  ;;  %v5956_v9 = vmul.f32 %v2374_v6, %v5757_v20  ;;  %v2375_v54 = vadd.f32 1.0, %v2311_v21  ;;  %v5959_v50 = vand.u32 2147483647, %v5943_v4  ;;  %2727 = vmatmul.mubr.bf16.gmra.mrb[20].mxu1 %v2504_v26 }
 0x2a9   : > { %v1739_v18 = vmul.f32 %v5864_v46, %v1675_v41  ;;  %v1484_v13 = vmul.f32 %v5920_v1, %v1420_v33  ;;  %3919 = vpow2.f32 %v1978_v40  ;;  %v1806_v62 = vsub.f32 0.0, %v974_v11 }
 0x2aa   : > { %v2376_v44 = vadd.f32 1.0, %v2312_v30  ;;  %v1869_v36 = vmul.f32 %v1805_v53, %v5902_v47  ;;  %v1039_v55 = vmul.f32 0.3275911, %v5959_v50  ;;  %v5967_v20 = vadd.f32 %v6697_v63, %v4474_v5 }
 0x2ab   : > { %v5969_v22 = vpop.eup %3913  ;;  %v2313_v10 = vsel %vm2185_vm11, %v2249_v60, %v2121_v23  ;;  %v2058_v29 = vmul.f32 %v3912_v37, %v1738_v16  ;;  %v1548_v46 = vadd.f32 -0.28449672, %v1484_v13  ;;  %v5974_v0 = vmul.f32 0.70710677, %v5950_v43 }
 0x2ac   : > { %v3916_v17 = vpop.eup %3915  ;;  %v5977_v6 = vmul.f32 %v2375_v54, %v5791_v39  ;;  %v5980_v47 = vmul.f32 0.5, %v5869_v61  ;;  %v1229_v40 = vmul.f32 1.0614054, %v5969_v22  ;;  %v1103_v2 = vadd.f32 1.0, %v1039_v55 }
 0x2ad   : > { %v2059_v21 = vmul.f32 %v3916_v17, %v1739_v18  ;;  %v1612_v30 = vmul.f32 %v5920_v1, %v1548_v46  ;;  %v1870_v42 = vmul.f32 %v1806_v62, %v974_v11  ;;  %v976_v23 = vand.u32 2147483647, %v5974_v0  ;;  %v6698_v18 = vld [vmem:[#allocation15_spill] sm:$0xff] }
 0x2ae   : > { %v2377_v41 = vadd.f32 1.0, %v2313_v10  ;;  %vm2186_vm12 = vcmp.lt.f32.partialorder %v5777_v15, 0.0  ;;  %v1293_v51 = vadd.f32 -1.4531521, %v1229_v40  ;;  %3921 = vrcp.f32 %v1103_v2 }
 0x2af   : > { %v5987_v39 = vmul.f32 0.70710677, %v5967_v20  ;;  %v5990_v61 = vmul.f32 %v2376_v44, %v5846_v3  ;;  %v2122_v37 = vsub.f32 1.0, %v2058_v29  ;;  %v1980_v53 = vmul.f32 1.442695, %v1869_v36 }
 0x2b0   : > { %v5993_v8 = vmul.f32 0.5, %v5898_v7  ;;  %v5995_v26 = vpop.eup %3917  ;;  %vm2187_vm13 = vcmp.lt.f32.partialorder %v5803_v56, 0.0  ;;  %v1676_v11 = vadd.f32 0.2548296, %v1612_v30  ;;  %v1357_v60 = vmul.f32 %v5969_v22, %v1293_v51  ;;  %v6699_v51 = vld [vmem:[#allocation31_spill] sm:$0xff]  ;;  %v6701_v56 = vld [vmem:[#allocation37_spill] sm:$0xff] }
 0x2b1   : > { %v1040_v16 = vmul.f32 0.3275911, %v976_v23  ;;  %v6000_v33 = vand.u32 2147483647, %v5987_v39  ;;  %v2123_v32 = vsub.f32 1.0, %v2059_v21  ;;  %v6005_v13 = vadd.f32 %v6698_v18, %v4449_v48 }
 0x2b2   : > { %v1230_v3 = vmul.f32 1.0614054, %v5995_v26  ;;  %v1982_v54 = vmul.f32 1.442695, %v1870_v42  ;;  %v6008_v7 = vmul.f32 %v2377_v41, %v5877_v27  ;;  %v1421_v62 = vadd.f32 1.4214138, %v1357_v60 }
 0x2b3   : > { %v1104_v44 = vadd.f32 1.0, %v1040_v16  ;;  %v1041_v36 = vmul.f32 0.3275911, %v6000_v33  ;;  %v3920_v55 = vpop.eup %3919  ;;  %v2250_v63 = vsub.f32 0.0, %v2122_v37  ;;  %3923 = vpow2.f32 %v1980_v53  ;;  %v6700_v60 = vld [vmem:[#allocation17_spill] sm:$0xff] }
 0x2b4   : > { %v1294_v10 = vadd.f32 -1.4531521, %v1230_v3  ;;  %v1807_v29 = vsub.f32 0.0, %v5959_v50  ;;  %v1740_v46 = vmul.f32 %v5920_v1, %v1676_v11  ;;  %v1485_v17 = vmul.f32 %v5969_v22, %v1421_v62 }
 0x2b5   : > { %3925 = vrcp.f32 %v1104_v44  ;;  %v1105_v40 = vadd.f32 1.0, %v1041_v36  ;;  %v2251_v2 = vsub.f32 0.0, %v2123_v32  ;;  %v6016_v21 = vmul.f32 0.5, %v5934_v25 }
 0x2b6   : > { %v1358_v27 = vmul.f32 %v5995_v26, %v1294_v10  ;;  %v6019_v30 = vmul.f32 0.70710677, %v6005_v13  ;;  %v1549_v42 = vadd.f32 -0.28449672, %v1485_v17  ;;  %3927 = vpow2.f32 %v1982_v54 }
 0x2b7   : > { %v1808_v41 = vsub.f32 0.0, %v976_v23  ;;  %v2507_v53 = vpack.c.bf16 %v5564_v19, %v6699_v51  ;;  %v2314_v1 = vsel %vm2186_vm12, %v2250_v63, %v2122_v37  ;;  %3929 = vrcp.f32 %v1105_v40 }
 0x2b8   : > { %v1422_v11 = vadd.f32 1.4214138, %v1358_v27  ;;  %v6027_v16 = vadd.f32 %v6700_v60, %v4474_v5  ;;  %v6029_v25 = vpop.eup %3921  ;;  %v2060_v3 = vmul.f32 %v3920_v55, %v1740_v46  ;;  %v1613_v18 = vmul.f32 %v5969_v22, %v1549_v42 }
 0x2b9   : > { %v1871_v54 = vmul.f32 %v1807_v29, %v5959_v50  ;;  %v6034_v62 = vand.u32 2147483647, %v6019_v30  ;;  %2734 = vmatprep.mubr.bf16.mxu1 %v2507_v53  ;;  %v2315_v19 = vsel %vm2187_vm13, %v2251_v2, %v2123_v32  ;;  %v1231_v37 = vmul.f32 1.0614054, %v6029_v25  ;;  %v6702_v32 = vld [vmem:[#allocation39_spill] sm:$0xff] }
 0x2ba   : > { %v1486_v15 = vmul.f32 %v5995_v26, %v1422_v11  ;;  %v6041_v44 = vmul.f32 0.5, %v5950_v43  ;;  %v2378_v36 = vadd.f32 1.0, %v2314_v1  ;;  %v1677_v55 = vadd.f32 0.2548296, %v1613_v18 }
 0x2bb   : > { %v1872_v63 = vmul.f32 %v1808_v41, %v976_v23  ;;  %v1042_v10 = vmul.f32 0.3275911, %v6034_v62  ;;  %vm2188_vm14 = vcmp.lt.f32.partialorder %v5842_v14, 0.0  ;;  %v1295_v29 = vadd.f32 -1.4531521, %v1231_v37 }
 0x2bc   : > { %v1550_v50 = vadd.f32 -0.28449672, %v1486_v15  ;;  %v6046_v46 = vmul.f32 0.70710677, %v6027_v16  ;;  %v2506_v17 = vpack.c.bf16 %v6702_v32, %v6701_v56  ;;  %v2379_v40 = vadd.f32 1.0, %v2315_v19  ;;  %v6704_v15 = vld [vmem:[#allocation33_spill] sm:$0xff] }
 0x2bd   : > { %v2124_v2 = vsub.f32 1.0, %v2060_v3  ;;  %v1984_v27 = vmul.f32 1.442695, %v1871_v54  ;;  %v1106_v43 = vadd.f32 1.0, %v1042_v10  ;;  %v3924_v42 = vpop.eup %3923  ;;  %v1359_v23 = vmul.f32 %v6029_v25, %v1295_v29 }
 0x2be   : > { %v1614_v51 = vmul.f32 %v5995_v26, %v1550_v50  ;;  %v1809_v41 = vsub.f32 0.0, %v6000_v33  ;;  %v979_v53 = vand.u32 2147483647, %v6046_v46  ;;  %2735 = vmatmul.mubr.bf16.gmra.mrb[24].mxu1 %v2506_v17  ;;  %v6057_v11 = vmul.f32 %v2378_v36, %v5880_v57 }
 0x2bf   : > { %v6054_v1 = vpop.eup %3925  ;;  %v1741_v60 = vmul.f32 %v5969_v22, %v1677_v55  ;;  %v6061_v3 = vmul.f32 0.5, %v5967_v20  ;;  %3931 = vrcp.f32 %v1106_v43  ;;  %v1423_v18 = vadd.f32 1.4214138, %v1359_v23 }
 0x2c0   : > { %6703 = vst [vmem:[#allocation24_spill] sm:$0xff] %v6057_v11  ;;  %v1232_v54 = vmul.f32 1.0614054, %v6054_v1  ;;  %v1986_v19 = vmul.f32 1.442695, %v1872_v63  ;;  %v6066_v37 = vadd.f32 %v6704_v15, %v4449_v48  ;;  %v3928_v10 = vpop.eup %3927  ;;  %v6069_v50 = vmul.f32 %v2379_v40, %v5892_v45 }
 0x2c1   : > { %v2252_v57 = vsub.f32 0.0, %v2124_v2  ;;  %3933 = vpow2.f32 %v1984_v27  ;;  %v1043_v36 = vmul.f32 0.3275911, %v979_v53  ;;  %v6071_v22 = vpop.eup %3929  ;;  %v1678_v20 = vadd.f32 0.2548296, %v1614_v51 }
 0x2c2   : > { %v1487_v55 = vmul.f32 %v6029_v25, %v1423_v18  ;;  %v1296_v29 = vadd.f32 -1.4531521, %v1232_v54  ;;  %v1873_v56 = vmul.f32 %v1809_v41, %v6000_v33  ;;  %v2061_v63 = vmul.f32 %v3924_v42, %v1741_v60 }
 0x2c3   : > { %v1233_v32 = vmul.f32 1.0614054, %v6071_v22  ;;  %v6077_v17 = vmul.f32 0.5, %v6005_v13  ;;  %v1107_v43 = vadd.f32 1.0, %v1043_v36  ;;  %3935 = vpow2.f32 %v1986_v19  ;;  %v6705_v36 = vld [vmem:[#allocation38_spill] sm:$0xff] }
 0x2c4   : > { %v1551_v45 = vadd.f32 -0.28449672, %v1487_v55  ;;  %v1360_v40 = vmul.f32 %v6054_v1, %v1296_v29  ;;  %v6081_v27 = vmul.f32 0.70710677, %v6066_v37  ;;  %v2316_v51 = vsel %vm2188_vm14, %v2252_v57, %v2124_v2 }
 0x2c5   : > { %v1297_v23 = vadd.f32 -1.4531521, %v1233_v32  ;;  %v1810_v33 = vsub.f32 0.0, %v6034_v62  ;;  %3937 = vrcp.f32 %v1107_v43  ;;  %vm2189_vm15 = vcmp.lt.f32.partialorder %v5889_v58, 0.0 }
 0x2c6   : > { %v1742_v13 = vmul.f32 %v5995_v26, %v1678_v20  ;;  %v1615_v42 = vmul.f32 %v6029_v25, %v1551_v45  ;;  %v1424_v41 = vadd.f32 1.4214138, %v1360_v40  ;;  %v1988_v60 = vmul.f32 1.442695, %v1873_v56 }
 0x2c7   : > { %v2125_v18 = vsub.f32 1.0, %v2061_v63  ;;  %v1361_v54 = vmul.f32 %v6071_v22, %v1297_v23  ;;  %v1811_v19 = vsub.f32 0.0, %v979_v53  ;;  %v980_v15 = vand.u32 2147483647, %v6081_v27 }
 0x2c8   : > { %v2380_v14 = vadd.f32 1.0, %v2316_v51  ;;  %v1488_v2 = vmul.f32 %v6054_v1, %v1424_v41  ;;  %v6093_v57 = vmul.f32 0.5, %v6027_v16  ;;  %v6097_v55 = vadd.f32 %v6705_v36, %v4474_v5 }
 0x2c9   : > { %v6099_v26 = vpop.eup %3931  ;;  %v1679_v20 = vadd.f32 0.2548296, %v1615_v42  ;;  %v1425_v29 = vadd.f32 1.4214138, %v1361_v54  ;;  %v1874_v56 = vmul.f32 %v1810_v33, %v6034_v62  ;;  %v1044_v63 = vmul.f32 0.3275911, %v980_v15 }
 0x2ca   : > { %v2062_v32 = vmul.f32 %v3928_v10, %v1742_v13  ;;  %v1552_v43 = vadd.f32 -0.28449672, %v1488_v2  ;;  %3939 = vpow2.f32 %v1988_v60  ;;  %v1234_v45 = vmul.f32 1.0614054, %v6099_v26 }
 0x2cb   : > { %v3934_v40 = vpop.eup %3933  ;;  %v2253_v51 = vsub.f32 0.0, %v2125_v18  ;;  %v1489_v16 = vmul.f32 %v6071_v22, %v1425_v29  ;;  %v1875_v23 = vmul.f32 %v1811_v19, %v979_v53  ;;  %v1108_v41 = vadd.f32 1.0, %v1044_v63 }
 0x2cc   : > { %v6105_v36 = vmul.f32 %v2380_v14, %v5930_v12  ;;  %v1616_v42 = vmul.f32 %v6054_v1, %v1552_v43  ;;  %v1298_v54 = vadd.f32 -1.4531521, %v1234_v45  ;;  %v6109_v62 = vmul.f32 0.70710677, %v6097_v55 }
 0x2cd   : > { %vm2190_vm0 = vcmp.lt.f32.partialorder %v5913_v28, 0.0  ;;  %v1743_v10 = vmul.f32 %v6029_v25, %v1679_v20  ;;  %v1553_v33 = vadd.f32 -0.28449672, %v1489_v16  ;;  %v1990_v13 = vmul.f32 1.442695, %v1874_v56  ;;  %v3936_v60 = vpop.eup %3935 }
 0x2ce   : > { %6706 = vst [vmem:[#allocation26_spill] sm:$0xff] %v6105_v36  ;;  %3941 = vrcp.f32 %v1108_v41  ;;  %v2126_v2 = vsub.f32 1.0, %v2062_v32  ;;  %v1680_v53 = vadd.f32 0.2548296, %v1616_v42  ;;  %v1362_v19 = vmul.f32 %v6099_v26, %v1298_v54  ;;  %v6707_v32 = vld [vmem:[#allocation19_spill] sm:$0xff] }
 0x2cf   : > { %v981_v12 = vand.u32 2147483647, %v6109_v62  ;;  %v6115_v14 = vpop.eup %3937  ;;  %v2317_v29 = vsel %vm2189_vm15, %v2253_v51, %v2125_v18  ;;  %v1617_v63 = vmul.f32 %v6071_v22, %v1553_v33  ;;  %v1992_v43 = vmul.f32 1.442695, %v1875_v23 }
 0x2d0   : > { %v1812_v45 = vsub.f32 0.0, %v980_v15  ;;  %v1744_v25 = vmul.f32 %v6054_v1, %v1680_v53  ;;  %v1426_v20 = vadd.f32 1.4214138, %v1362_v19  ;;  %v1235_v56 = vmul.f32 1.0614054, %v6115_v14 }
 0x2d1   : > { %v6124_v16 = vadd.f32 %v6707_v32, %v4449_v48  ;;  %v6126_v41 = vmul.f32 %v3934_v40, %v1743_v10  ;;  %v1681_v42 = vadd.f32 0.2548296, %v1617_v63  ;;  %3943 = vpow2.f32 %v1990_v13 }
 0x2d2   : > { %v1045_v54 = vmul.f32 0.3275911, %v981_v12  ;;  %v2381_v58 = vadd.f32 1.0, %v2317_v29  ;;  %v2254_v18 = vsub.f32 0.0, %v2126_v2  ;;  %v1490_v51 = vmul.f32 %v6099_v26, %v1426_v20 }
 0x2d3   : > { %v1299_v23 = vadd.f32 -1.4531521, %v1235_v56  ;;  %v1745_v33 = vmul.f32 %v6071_v22, %v1681_v42  ;;  %3945 = vpow2.f32 %v1992_v43  ;;  %v1876_v1 = vmul.f32 %v1812_v45, %v980_v15 }
 0x2d4   : > { %v1109_v53 = vadd.f32 1.0, %v1045_v54  ;;  %v3940_v19 = vpop.eup %3939  ;;  %v2064_v36 = vmul.f32 %v3936_v60, %v1744_v25  ;;  %v1554_v11 = vadd.f32 -0.28449672, %v1490_v51  ;;  %v6132_v40 = vmul.f32 0.70710677, %v6124_v16 }
 0x2d5   : > { %v1363_v32 = vmul.f32 %v6115_v14, %v1299_v23  ;;  %v2127_v10 = vsub.f32 1.0, %v6126_v41  ;;  %vm2191_vm1 = vcmp.lt.f32.partialorder %v5943_v4, 0.0  ;;  %v2065_v13 = vmul.f32 %v3940_v19, %v1745_v33 }
 0x2d6   : > { %v6137_v29 = vmul.f32 0.5, %v6066_v37  ;;  %3947 = vrcp.f32 %v1109_v53  ;;  %v2318_v22 = vsel %vm2190_vm0, %v2254_v18, %v2126_v2  ;;  %v1618_v15 = vmul.f32 %v6099_v26, %v1554_v11 }
 0x2d7   : > { %v1427_v60 = vadd.f32 1.4214138, %v1363_v32  ;;  %v982_v63 = vand.u32 2147483647, %v6132_v40  ;;  %v6146_v45 = vmul.f32 %v2381_v58, %v5980_v47  ;;  %vm2192_vm2 = vcmp.lt.f32.partialorder %v5974_v0, 0.0 }
 0x2d8   : > { %v6143_v43 = vpop.eup %3941  ;;  %v1994_v25 = vmul.f32 1.442695, %v1876_v1  ;;  %v1813_v20 = vsub.f32 0.0, %v981_v12  ;;  %v2509_v37 = vpack.c.bf16 %v5682_v49, %v5648_v59  ;;  %v2128_v56 = vsub.f32 1.0, %v2064_v36 }
 0x2d9   : > { %vm2193_vm3 = vcmp.lt.f32.partialorder %v5987_v39, 0.0  ;;  %v1682_v28 = vadd.f32 0.2548296, %v1618_v15  ;;  %v1491_v11 = vmul.f32 %v6115_v14, %v1427_v60  ;;  %v1236_v2 = vmul.f32 1.0614054, %v6143_v43 }
 0x2da   : > { %v2382_v41 = vadd.f32 1.0, %v2318_v22  ;;  %v2255_v42 = vsub.f32 0.0, %v2127_v10  ;;  %v2129_v54 = vsub.f32 1.0, %v2065_v13  ;;  %v1046_v47 = vmul.f32 0.3275911, %v982_v63  ;;  %2742 = vmatprep.mubr.bf16.mxu1 %v2509_v37 }
 0x2db   : > { %v1746_v58 = vmul.f32 %v6099_v26, %v1682_v28  ;;  %v1555_v18 = vadd.f32 -0.28449672, %v1491_v11  ;;  %v1300_v51 = vadd.f32 -1.4531521, %v1236_v2  ;;  %v6157_v59 = vadd.f32 %v5582_v24, %v4474_v5  ;;  %v3944_v49 = vpop.eup %3943  ;;  %v6708_v28 = vld [vmem:[#allocation21_spill] sm:$0xff]  ;;  %v6709_v11 = vld [vmem:[#allocation14_spill] sm:$0xff] }
 0x2dc   : > { %3949 = vpow2.f32 %v1994_v25  ;;  %v6160_v36 = vmul.f32 0.5, %v6097_v55  ;;  %v1877_v23 = vmul.f32 %v1813_v20, %v981_v12  ;;  %v1110_v33 = vadd.f32 1.0, %v1046_v47 }
 0x2dd   : > { %v2256_v1 = vsub.f32 0.0, %v2128_v56  ;;  %v2066_v53 = vmul.f32 %v3944_v49, %v1746_v58  ;;  %v1619_v19 = vmul.f32 %v6115_v14, %v1555_v18  ;;  %v1364_v32 = vmul.f32 %v6143_v43, %v1300_v51  ;;  %v3946_v26 = vpop.eup %3945  ;;  %v6710_v51 = vld [vmem:[#allocation40_spill] sm:$0xff] }
 0x2de   : > { %v6165_v13 = vmul.f32 %v2382_v41, %v5993_v8  ;;  %v2257_v22 = vsub.f32 0.0, %v2129_v54  ;;  %vm2194_vm4 = vcmp.lt.f32.partialorder %v6019_v30, 0.0  ;;  %3951 = vrcp.f32 %v1110_v33 }
 0x2df   : > { %v6169_v24 = vmul.f32 0.70710677, %v6157_v59  ;;  %v2319_v55 = vsel %vm2191_vm1, %v2255_v42, %v2127_v10  ;;  %v2130_v12 = vsub.f32 1.0, %v2066_v53  ;;  %v1683_v15 = vadd.f32 0.2548296, %v1619_v19  ;;  %v6711_v19 = vld [vmem:[#allocation44_spill] sm:$0xff] }
 0x2e0   : > { %v1428_v60 = vadd.f32 1.4214138, %v1364_v32  ;;  %v6173_v25 = vpop.eup %3947  ;;  %v1996_v20 = vmul.f32 1.442695, %v1877_v23  ;;  %v1814_v37 = vsub.f32 0.0, %v982_v63  ;;  %v2508_v2 = vpack.c.bf16 %v6709_v11, %v6708_v28 }
 0x2e1   : > { %v983_v8 = vand.u32 2147483647, %v6169_v24  ;;  %v2320_v41 = vsel %vm2192_vm2, %v2256_v1, %v2128_v56  ;;  %v1747_v47 = vmul.f32 %v6115_v14, %v1683_v15  ;;  %v1237_v10 = vmul.f32 1.0614054, %v6173_v25 }
 0x2e2   : > { %v1492_v4 = vmul.f32 %v6143_v43, %v1428_v60  ;;  %v2383_v42 = vadd.f32 1.0, %v2319_v55  ;;  %v2321_v58 = vsel %vm2193_vm3, %v2257_v22, %v2129_v54  ;;  %2743 = vmatmul.mubr.bf16.gmra.mrb[28].mxu1 %v2508_v2  ;;  %v784_v49 = vadd.f32 %v6710_v51, %v4449_v48 }
 0x2e3   : > { %v1047_v18 = vmul.f32 0.3275911, %v983_v8  ;;  %v2258_v23 = vsub.f32 0.0, %v2130_v12  ;;  %v2067_v33 = vmul.f32 %v3946_v26, %v1747_v47  ;;  %v1301_v0 = vadd.f32 -1.4531521, %v1237_v10 }
 0x2e4   : > { %v1556_v53 = vadd.f32 -0.28449672, %v1492_v4  ;;  %v2384_v56 = vadd.f32 1.0, %v2320_v41  ;;  %v1878_v1 = vmul.f32 %v1814_v37, %v982_v63  ;;  %v6189_v32 = vadd.f32 %v6711_v19, %v4474_v5 }
 0x2e5   : > { %v1111_v14 = vadd.f32 1.0, %v1047_v18  ;;  %v1365_v39 = vmul.f32 %v6173_v25, %v1301_v0  ;;  %3953 = vpow2.f32 %v1996_v20  ;;  %v6193_v54 = vmul.f32 0.70710677, %v784_v49 }
 0x2e6   : > { %v1620_v55 = vmul.f32 %v6143_v43, %v1556_v53  ;;  %v3950_v22 = vpop.eup %3949  ;;  %v6196_v15 = vmul.f32 %v2383_v42, %v6016_v21  ;;  %v2385_v26 = vadd.f32 1.0, %v2321_v58  ;;  %v6199_v60 = vmul.f32 0.5, %v6124_v16 }
 0x2e7   : > { %3955 = vrcp.f32 %v1111_v14  ;;  %v2322_v63 = vsel %vm2194_vm4, %v2258_v23, %v2130_v12  ;;  %v2131_v37 = vsub.f32 1.0, %v2067_v33  ;;  %vm2195_vm5 = vcmp.lt.f32.partialorder %v6046_v46, 0.0  ;;  %v6714_v46 = vld [vmem:[#allocation42_spill] sm:$0xff] }
 0x2e8   : > { %v1684_v28 = vadd.f32 0.2548296, %v1620_v55  ;;  %v1429_v11 = vadd.f32 1.4214138, %v1365_v39  ;;  %v6204_v20 = vpop.eup %3951  ;;  %v6207_v2 = vmul.f32 %v2384_v56, %v6041_v44  ;;  %v1998_v21 = vmul.f32 1.442695, %v1878_v1 }
 0x2e9   : > { %v984_v41 = vand.u32 2147483647, %v6193_v54  ;;  %v6211_v16 = vmul.f32 0.70710677, %v6189_v32  ;;  %v1238_v12 = vmul.f32 1.0614054, %v6204_v20  ;;  %v6228_v55 = vmul.f32 %v2385_v26, %v6061_v3 }
 0x2ea   : > { %v1748_v47 = vmul.f32 %v6143_v43, %v1684_v28  ;;  %v1493_v30 = vmul.f32 %v6173_v25, %v1429_v11  ;;  %v6217_v4 = vmul.f32 0.5, %v6157_v59  ;;  %v2386_v10 = vadd.f32 1.0, %v2322_v63  ;;  %v6712_v56 = vld [vmem:[#allocation18_spill] sm:$0xff] }
 0x2eb   : > { %v1815_v42 = vsub.f32 0.0, %v983_v8  ;;  %v1048_v58 = vmul.f32 0.3275911, %v984_v41  ;;  %v985_v44 = vand.u32 2147483647, %v6211_v16  ;;  %v2259_v18 = vsub.f32 0.0, %v2131_v37 }
 0x2ec   : > { %v2068_v51 = vmul.f32 %v3950_v22, %v1748_v47  ;;  %v1557_v23 = vadd.f32 -0.28449672, %v1493_v30  ;;  %v1302_v33 = vadd.f32 -1.4531521, %v1238_v12  ;;  %vm2196_vm6 = vcmp.lt.f32.partialorder %v6081_v27, 0.0 }
 0x2ed   : > { %v1112_v53 = vadd.f32 1.0, %v1048_v58  ;;  %v1816_v43 = vsub.f32 0.0, %v984_v41  ;;  %v1049_v0 = vmul.f32 0.3275911, %v985_v44  ;;  %v6223_v1 = vadd.f32 %v6712_v56, %v4449_v48 }
 0x2ee   : > { %v2132_v59 = vsub.f32 1.0, %v2068_v51  ;;  %v1621_v14 = vmul.f32 %v6173_v25, %v1557_v23  ;;  %v1366_v19 = vmul.f32 %v6204_v20, %v1302_v33  ;;  %3957 = vpow2.f32 %v1998_v21 }
 0x2ef   : > { %v1879_v39 = vmul.f32 %v1815_v42, %v983_v8  ;;  %3959 = vrcp.f32 %v1112_v53  ;;  %v1113_v22 = vadd.f32 1.0, %v1049_v0  ;;  %v3954_v63 = vpop.eup %3953  ;;  %v6231_v28 = vmul.f32 %v2386_v10, %v6077_v17  ;;  %v6713_v8 = vld [vmem:[#allocation41_spill] sm:$0xff] }
 0x2f0   : > { %v1685_v11 = vadd.f32 0.2548296, %v1621_v14  ;;  %v1430_v47 = vadd.f32 1.4214138, %v1366_v19  ;;  %v6233_v30 = vmul.f32 0.5, %v784_v49  ;;  %v2323_v58 = vsel %vm2195_vm5, %v2259_v18, %v2131_v37 }
 0x2f1   : > { %v6235_v12 = vpop.eup %3955  ;;  %v1880_v21 = vmul.f32 %v1816_v43, %v984_v41  ;;  %v6240_v3 = vmul.f32 0.70710677, %v6223_v1  ;;  %v2511_v26 = vpack.c.bf16 %v5833_v38, %v6713_v8  ;;  %v2260_v42 = vsub.f32 0.0, %v2132_v59 }
 0x2f2   : > { %v1749_v17 = vmul.f32 %v6173_v25, %v1685_v11  ;;  %v1494_v10 = vmul.f32 %v6204_v20, %v1430_v47  ;;  %v1239_v49 = vmul.f32 1.0614054, %v6235_v12  ;;  %v2000_v51 = vmul.f32 1.442695, %v1879_v39  ;;  %v6715_v47 = vld [vmem:[#allocation20_spill] sm:$0xff] }
 0x2f3   : > { %3961 = vrcp.f32 %v1113_v22  ;;  %v986_v23 = vand.u32 2147483647, %v6240_v3  ;;  %2750 = vmatprep.mubr.bf16.mxu1 %v2511_v26  ;;  %v6250_v37 = vadd.f32 %v6714_v46, %v4474_v5  ;;  %v1817_v38 = vsub.f32 0.0, %v985_v44 }
 0x2f4   : > { %v2069_v41 = vmul.f32 %v3954_v63, %v1749_v17  ;;  %v1558_v18 = vadd.f32 -0.28449672, %v1494_v10  ;;  %v1303_v33 = vadd.f32 -1.4531521, %v1239_v49  ;;  %v2387_v53 = vadd.f32 1.0, %v2323_v58  ;;  %v6716_v58 = vld [vmem:[#allocation22_spill] sm:$0xff] }
 0x2f5   : > { %v2002_v43 = vmul.f32 1.442695, %v1880_v21  ;;  %v6253_v25 = vmul.f32 0.5, %v6189_v32  ;;  %v1050_v0 = vmul.f32 0.3275911, %v986_v23  ;;  %v2324_v56 = vsel %vm2196_vm6, %v2260_v42, %v2132_v59  ;;  %v6717_v10 = vld [vmem:[#allocation45_spill] sm:$0xff] }
 0x2f6   : > { %vm2197_vm7 = vcmp.lt.f32.partialorder %v6109_v62, 0.0  ;;  %v1622_v14 = vmul.f32 %v6204_v20, %v1558_v18  ;;  %v1367_v19 = vmul.f32 %v6235_v12, %v1303_v33  ;;  %v1818_v39 = vsub.f32 0.0, %v986_v23 }
 0x2f7   : > { %v2133_v22 = vsub.f32 1.0, %v2069_v41  ;;  %v1114_v63 = vadd.f32 1.0, %v1050_v0  ;;  %v6261_v11 = vmul.f32 0.70710677, %v6250_v37  ;;  %v2510_v32 = vpack.c.bf16 %v6716_v58, %v6715_v47 }
 0x2f8   : > { %v3958_v21 = vpop.eup %3957  ;;  %v1686_v8 = vadd.f32 0.2548296, %v1622_v14  ;;  %v1431_v26 = vadd.f32 1.4214138, %v1367_v19  ;;  %3963 = vpow2.f32 %v2000_v51  ;;  %v1881_v27 = vmul.f32 %v1817_v38, %v985_v44 }
 0x2f9   : > { %v6265_v59 = vpop.eup %3959  ;;  %v2388_v42 = vadd.f32 1.0, %v2324_v56  ;;  %3965 = vrcp.f32 %v1114_v63  ;;  %v987_v17 = vand.u32 2147483647, %v6261_v11  ;;  %2751 = vmatmul.mubr.bf16.gmra.mrb[32].mxu1 %v2510_v32  ;;  %v6270_v49 = vadd.f32 %v6717_v10, %v4449_v48 }
 0x2fa   : > { %v6273_v46 = vmul.f32 %v2387_v53, %v6093_v57  ;;  %v1750_v41 = vmul.f32 %v6204_v20, %v1686_v8  ;;  %v1495_v18 = vmul.f32 %v6235_v12, %v1431_v26  ;;  %v1240_v44 = vmul.f32 1.0614054, %v6265_v59 }
 0x2fb   : > { %v2261_v51 = vsub.f32 0.0, %v2133_v22  ;;  %3967 = vpow2.f32 %v2002_v43  ;;  %v1882_v33 = vmul.f32 %v1818_v39, %v986_v23  ;;  %v1051_v38 = vmul.f32 0.3275911, %v987_v17 }
 0x2fc   : > { %v2070_v0 = vmul.f32 %v3958_v21, %v1750_v41  ;;  %vm2198_vm8 = vcmp.lt.f32.partialorder %v6132_v40, 0.0  ;;  %v1559_v56 = vadd.f32 -0.28449672, %v1495_v18  ;;  %v1304_v14 = vadd.f32 -1.4531521, %v1240_v44 }
 0x2fd   : > { %v1819_v48 = vsub.f32 0.0, %v987_v17  ;;  %v6279_v19 = vpop.eup %3961  ;;  %v6282_v57 = vmul.f32 %v2388_v42, %v6137_v29  ;;  %v2004_v20 = vmul.f32 1.442695, %v1881_v27  ;;  %v1115_v53 = vadd.f32 1.0, %v1051_v38  ;;  %v6718_v27 = vld [vmem:[#allocation23_spill] sm:$0xff] }
 0x2fe   : > { %v6285_v63 = vmul.f32 0.70710677, %v6270_v49  ;;  %v2134_v47 = vsub.f32 1.0, %v2070_v0  ;;  %v1623_v23 = vmul.f32 %v6235_v12, %v1559_v56  ;;  %v1368_v43 = vmul.f32 %v6265_v59, %v1304_v14 }
 0x2ff   : > { %v1241_v39 = vmul.f32 1.0614054, %v6279_v19  ;;  %v2325_v58 = vsel %vm2197_vm7, %v2261_v51, %v2133_v22  ;;  %v2006_v32 = vmul.f32 1.442695, %v1882_v33  ;;  %3969 = vrcp.f32 %v1115_v53 }
 0x300   : > { %v988_v29 = vand.u32 2147483647, %v6285_v63  ;;  %v1687_v21 = vadd.f32 0.2548296, %v1623_v23  ;;  %v1432_v8 = vadd.f32 1.4214138, %v1368_v43  ;;  %v1883_v26 = vmul.f32 %v1819_v48, %v987_v17 }
 0x301   : > { %v6295_v42 = vadd.f32 %v6718_v27, %v4474_v5  ;;  %v2262_v10 = vsub.f32 0.0, %v2134_v47  ;;  %v1305_v41 = vadd.f32 -1.4531521, %v1241_v39  ;;  %v2389_v0 = vadd.f32 1.0, %v2325_v58 }
 0x302   : > { %v1052_v18 = vmul.f32 0.3275911, %v988_v29  ;;  %v1820_v44 = vsub.f32 0.0, %v988_v29  ;;  %v3964_v38 = vpop.eup %3963  ;;  %v1751_v62 = vmul.f32 %v6235_v12, %v1687_v21  ;;  %vm2199_vm9 = vcmp.lt.f32.partialorder %v6169_v24, 0.0 }
 0x303   : > { %v1496_v22 = vmul.f32 %v6265_v59, %v1432_v8  ;;  %3971 = vpow2.f32 %v2004_v20  ;;  %v6300_v51 = vpop.eup %3965  ;;  %v1369_v17 = vmul.f32 %v6279_v19, %v1305_v41  ;;  %v6305_v53 = vmul.f32 0.70710677, %v6295_v42 }
 0x304   : > { %3973 = vpow2.f32 %v2006_v32  ;;  %v1116_v5 = vadd.f32 1.0, %v1052_v18  ;;  %v1884_v33 = vmul.f32 %v1820_v44, %v988_v29  ;;  %v2071_v56 = vmul.f32 %v3964_v38, %v1751_v62 }
 0x305   : > { %v1560_v14 = vadd.f32 -0.28449672, %v1496_v22  ;;  %v1242_v48 = vmul.f32 1.0614054, %v6300_v51  ;;  %v3968_v12 = vpop.eup %3967  ;;  %v2326_v23 = vsel %vm2198_vm8, %v2262_v10, %v2134_v47  ;;  %v1433_v43 = vadd.f32 1.4214138, %v1369_v17 }
 0x306   : > { %v2008_v20 = vmul.f32 1.442695, %v1883_v26  ;;  %3975 = vrcp.f32 %v1116_v5  ;;  %v2135_v39 = vsub.f32 1.0, %v2071_v56  ;;  %v6311_v29 = vand.u32 2147483647, %v6305_v53  ;;  %v3487_v22 = vpop.f32.mrb[0].mxu1 }
 0x307   : > { %v1624_v58 = vmul.f32 %v6265_v59, %v1560_v14  ;;  %v1306_v32 = vadd.f32 -1.4531521, %v1242_v48  ;;  %v6314_v21 = vmul.f32 %v2389_v0, %v6160_v36  ;;  %v1497_v8 = vmul.f32 %v6279_v19, %v1433_v43  ;;  %v3488_v56 = vpop.f32.mrb[1].mxu1 }
 0x308   : > { %v2010_v27 = vmul.f32 1.442695, %v1884_v33  ;;  %v2513_v40 = vpack.c.bf16 %v5953_v34, %v5884_v35  ;;  %v2263_v47 = vsub.f32 0.0, %v2135_v39  ;;  %v1053_v41 = vmul.f32 0.3275911, %v6311_v29  ;;  %v3490_v14 = vpop.f32.mrb[2].mxu1 }
 0x309   : > { %v1688_v10 = vadd.f32 0.2548296, %v1624_v58  ;;  %v1370_v26 = vmul.f32 %v6300_v51, %v1306_v32  ;;  %v6321_v18 = vpop.eup %3969  ;;  %v2390_v44 = vadd.f32 1.0, %v2326_v23  ;;  %vm2200_vm10 = vcmp.lt.f32.partialorder %v6193_v54, 0.0 }
 0x30a   : > { %v1561_v38 = vadd.f32 -0.28449672, %v1497_v8  ;;  %2758 = vmatprep.mubr.bf16.mxu1 %v2513_v40  ;;  %v2512_v36 = vpack.c.bf16 %v5908_v31, %v5856_v52  ;;  %v2515_v0 = vpack.c.bf16 %v6008_v7, %v5977_v6  ;;  %v1243_v62 = vmul.f32 1.0614054, %v6321_v18  ;;  %v6719_v8 = vld [vmem:[#allocation24_spill] sm:$0xff] }
 0x30b   : > { %v1752_v35 = vmul.f32 %v6265_v59, %v1688_v10  ;;  %v1434_v34 = vadd.f32 1.4214138, %v1370_v26  ;;  %3977 = vpow2.f32 %v2008_v20  ;;  %v2327_v17 = vsel %vm2199_vm9, %v2263_v47, %v2135_v39  ;;  %v3491_v20 = vpop.f32.mrb[3].mxu1  ;;  %v2914_v10 = vld [vmem:[%s6524_s4] sm:$0x1] }
 0x30c   : > { %v1625_v5 = vmul.f32 %v6279_v19, %v1561_v38  ;;  %3979 = vpow2.f32 %v2010_v27  ;;  %v1117_v33 = vadd.f32 1.0, %v1053_v41  ;;  %2759 = vmatmul.mubr.bf16.gmra.mrb[36].mxu1 %v2512_v36  ;;  %v1307_v7 = vadd.f32 -1.4531521, %v1243_v62  ;;  %v6720_v27 = vld [vmem:[#allocation26_spill] sm:$0xff] }
 0x30d   : > { %v3972_v52 = vpop.eup %3971  ;;  %v2072_v31 = vmul.f32 %v3968_v12, %v1752_v35  ;;  %v1498_v6 = vmul.f32 %v6300_v51, %v1434_v34  ;;  %2766 = vmatprep.mubr.bf16.mxu1 %v2515_v0  ;;  %v2514_v59 = vpack.c.bf16 %v5990_v61, %v5956_v9  ;;  %v6337_v24 = vmul.f32 %v2390_v44, %v6199_v60  ;;  %v3493_v34 = vpop.f32.mrb[4].mxu1 }
 0x30e   : > { %v3974_v48 = vpop.eup %3973  ;;  %v1689_v23 = vadd.f32 0.2548296, %v1625_v5  ;;  %3981 = vrcp.f32 %v1117_v33  ;;  %v1821_v43 = vsub.f32 0.0, %v6311_v29  ;;  %vm2201_vm11 = vcmp.lt.f32.partialorder %v6211_v16, 0.0 }
 0x30f   : > { %v2136_v39 = vsub.f32 1.0, %v2072_v31  ;;  %v1562_v12 = vadd.f32 -0.28449672, %v1498_v6  ;;  %v1371_v58 = vmul.f32 %v6321_v18, %v1307_v7  ;;  %v2517_v32 = vpack.c.bf16 %v6146_v45, %v6069_v50 }
 0x310   : > { %v6344_v9 = vpop.eup %3975  ;;  %v2391_v61 = vadd.f32 1.0, %v2327_v17  ;;  %v1753_v60 = vmul.f32 %v6279_v19, %v1689_v23  ;;  %v2516_v40 = vpack.c.bf16 %v6720_v27, %v6719_v8  ;;  %v2519_v47 = vpack.c.bf16 %v6228_v55, %v6196_v15  ;;  %v6721_v8 = vld [vmem:[#allocation13_spill] sm:$0xff] }
 0x311   : > { %v2264_v26 = vsub.f32 0.0, %v2136_v39  ;;  %v1626_v41 = vmul.f32 %v6300_v51, %v1562_v12  ;;  %v1435_v44 = vadd.f32 1.4214138, %v1371_v58  ;;  %v1244_v50 = vmul.f32 1.0614054, %v6344_v9 }
 0x312   : > { %v2073_v45 = vmul.f32 %v3972_v52, %v1753_v60  ;;  %v2518_v19 = vpack.c.bf16 %v6207_v2, %v6165_v13  ;;  %v2521_v38 = vpack.c.bf16 %v6314_v21, %v6273_v46  ;;  %v2520_v15 = vpack.c.bf16 %v6282_v57, %v6231_v28  ;;  %v3494_v52 = vpop.f32.mrb[5].mxu1 }
 0x313   : > { %v2328_v55 = vsel %vm2200_vm10, %v2264_v26, %v2136_v39  ;;  %v1690_v36 = vadd.f32 0.2548296, %v1626_v41  ;;  %v1499_v0 = vmul.f32 %v6321_v18, %v1435_v44  ;;  %v1308_v35 = vadd.f32 -1.4531521, %v1244_v50  ;;  %v3496_v39 = vpop.f32.mrb[6].mxu1 }
 0x314   : > { %v2392_v62 = vadd.f32 1.0, %v2328_v55  ;;  %v2137_v17 = vsub.f32 1.0, %v2073_v45  ;;  %2767 = vmatmul.mubr.bf16.gmra.mrb[40].mxu1 %v2514_v59  ;;  %v3489_v5 = vadd.f32 %v3488_v56, %v3487_v22  ;;  %v2915_v33 = vunpack.c.l.bf16 %v2914_v10  ;;  %v3497_v56 = vpop.f32.mrb[7].mxu1 }
 0x315   : > { %v3978_v31 = vpop.eup %3977  ;;  %v1754_v6 = vmul.f32 %v6300_v51, %v1690_v36  ;;  %v1563_v7 = vadd.f32 -0.28449672, %v1499_v0  ;;  %v1372_v23 = vmul.f32 %v6344_v9, %v1308_v35  ;;  %2774 = vmatprep.mubr.bf16.mxu1 %v2517_v32  ;;  %v3492_v54 = vadd.f32 %v3491_v20, %v3490_v14 }
 0x316   : > { %v3980_v12 = vpop.eup %3979  ;;  %v6368_v58 = vmul.f32 %v2392_v62, %v6233_v30  ;;  %v2265_v60 = vsub.f32 0.0, %v2137_v17  ;;  %v6371_v27 = vrot.slane %v2915_v33, %v6721_v8  ;;  %v3495_v22 = vadd.f32 %v3494_v52, %v3493_v34 }
 0x317   : > { %v1627_v59 = vmul.f32 %v6321_v18, %v1563_v7  ;;  %v1436_v10 = vadd.f32 1.4214138, %v1372_v23  ;;  %v1885_v51 = vmul.f32 %v1821_v43, %v6311_v29  ;;  %v3498_v26 = vadd.f32 %v3497_v56, %v3496_v39 }
 0x318   : > { %v6375_v41 = vpop.eup %3981  ;;  %v2329_v14 = vsel %vm2201_vm11, %v2265_v60, %v2137_v17  ;;  %v2522_v30 = vpack.c.bf16 %v6368_v58, %v6337_v24  ;;  %v2920_v20 = vadd.f32 %v3489_v5, %v6371_v27  ;;  %v2921_v32 = vadd.f32 %v3492_v54, %v6371_v27 }
 0x319   : > { %v2393_v44 = vadd.f32 1.0, %v2329_v14  ;;  %v2074_v50 = vmul.f32 %v3974_v48, %v1754_v6  ;;  %v1691_v45 = vadd.f32 0.2548296, %v1627_v59  ;;  %v1500_v55 = vmul.f32 %v6344_v9, %v1436_v10  ;;  %v3499_v6 = vpop.f32.mrb[8].mxu1 }
 0x31a   : > { %v1245_v29 = vmul.f32 1.0614054, %v6375_v41  ;;  %v3379_v43 = vpack.c.bf16 %v2921_v32, %v2920_v20  ;;  %v2922_v36 = vadd.f32 %v3495_v22, %v6371_v27  ;;  %v2923_v16 = vadd.f32 %v3498_v26, %v6371_v27  ;;  %v3500_v54 = vpop.f32.mrb[9].mxu1 }
 0x31b   : > { %v2455_v0 = vmul.f32 %v2391_v61, %v6217_v4  ;;  %v2457_v35 = vmul.f32 %v2393_v44, %v6253_v25  ;;  %v1564_v34 = vadd.f32 -0.28449672, %v1500_v55  ;;  %v2138_v17 = vsub.f32 1.0, %v2074_v50  ;;  %v3502_v22 = vpop.f32.mrb[10].mxu1 }
 0x31c   : > { %v1309_v62 = vadd.f32 -1.4531521, %v1245_v29  ;;  %2775 = vmatmul.mubr.bf16.gmra.mrb[44].mxu1 %v2516_v40  ;;  %3380 = vst [vmem:[%s6391_s9] sm:$0xff] %v3379_v43   ;;  %v3384_v48 = vpack.c.bf16 %v2923_v16, %v2922_v36  ;;  %v2012_v33 = vmul.f32 1.442695, %v1885_v51  ;;  %v1755_v4 = vmul.f32 %v6321_v18, %v1691_v45  ;;  %v3503_v56 = vpop.f32.mrb[11].mxu1 }
 0x31d   : > { %v1628_v5 = vmul.f32 %v6344_v9, %v1564_v34  ;;  %2782 = vmatprep.mubr.bf16.mxu1 %v2519_v47  ;;  %v2523_v52 = vpack.c.bf16 %v2457_v35, %v2455_v0  ;;  %v2266_v7 = vsub.f32 0.0, %v2138_v17  ;;  %v3501_v8 = vadd.f32 %v3500_v54, %v3499_v6 }
 0x31e   : > { %v1373_v25 = vmul.f32 %v6375_v41, %v1309_v62  ;;  %3456 = vst [vmem:[%s6391_s9 + $0x8] sm:$0xff] %v3384_v48   ;;  %3983 = vpow2.f32 %v2012_v33  ;;  %v2075_v39 = vmul.f32 %v3978_v31, %v1755_v4  ;;  %vm2202_vm12 = vcmp.lt.f32.partialorder %v6240_v3, 0.0 }
 0x31f   : > { %v1692_v61 = vadd.f32 0.2548296, %v1628_v5  ;;  %v3504_v59 = vadd.f32 %v3503_v56, %v3502_v22  ;;  %v2330_v10 = vsel %vm2202_vm12, %v2266_v7, %v2138_v17  ;;  %vm2204_vm13 = vcmp.lt.f32.partialorder %v6285_v63, 0.0 }
 0x320   : > { %v1437_v40 = vadd.f32 1.4214138, %v1373_v25  ;;  %v2394_v14 = vadd.f32 1.0, %v2330_v10  ;;  %v860_v46 = vmul.f32 0.5, %v6270_v49  ;;  %vm2203_vm14 = vcmp.lt.f32.partialorder %v6261_v11, 0.0 }
 0x321   : > { %v1756_v23 = vmul.f32 %v6344_v9, %v1692_v61  ;;  %v2139_v9 = vsub.f32 1.0, %v2075_v39  ;;  %v2925_v3 = vadd.f32 %v3504_v59, %v6371_v27  ;;  %vm2205_vm15 = vcmp.lt.f32.partialorder %v6305_v53, 0.0 }
 0x322   : > { %v1501_v60 = vmul.f32 %v6375_v41, %v1437_v40  ;;  %v859_v36 = vmul.f32 0.5, %v6250_v37  ;;  %v861_v16 = vmul.f32 0.5, %v6295_v42 }
 0x323   : > { %v2076_v47 = vmul.f32 %v3980_v12, %v1756_v23  ;;  %v2924_v12 = vadd.f32 %v3501_v8, %v6371_v27  ;;  %v2267_v32 = vsub.f32 0.0, %v2139_v9 }
 0x324   : > { %v1565_v18 = vadd.f32 -0.28449672, %v1501_v60  ;;  %2783 = vmatmul.mubr.bf16.gmra.mrb[48].mxu1 %v2518_v19  ;;  %v858_v19 = vmul.f32 0.5, %v6223_v1 }
 0x325   : > { %v2140_v51 = vsub.f32 1.0, %v2076_v47  ;;  %2790 = vmatprep.mubr.bf16.mxu1 %v2521_v38  ;;  %v3389_v2 = vpack.c.bf16 %v2925_v3, %v2924_v12  ;;  %v2331_v1 = vsel %vm2203_vm14, %v2267_v32, %v2139_v9 }
 0x326   : > { %v1629_v31 = vmul.f32 %v6375_v41, %v1565_v18  ;;  %v2458_v50 = vmul.f32 %v2394_v14, %v858_v19  ;;  %v2395_v49 = vadd.f32 1.0, %v2331_v1 }
 0x327   : > { %v2268_v26 = vsub.f32 0.0, %v2140_v51  ;;  %3457 = vst [vmem:[%s6391_s9 + $0x10] sm:$0xff] %v3389_v2  }
 0x328   : > { %v1693_v13 = vadd.f32 0.2548296, %v1629_v31  ;;  %v3984_v44 = vpop.eup %3983  ;;  %v2459_v28 = vmul.f32 %v2395_v49, %v859_v36 }
 0x329   : > { %v2332_v20 = vsel %vm2204_vm13, %v2268_v26, %v2140_v51 }
 0x32a   : > { %v2396_v21 = vadd.f32 1.0, %v2332_v20  ;;  %v1757_v38 = vmul.f32 %v6375_v41, %v1693_v13 }
 0x32c   : > { %v2460_v45 = vmul.f32 %v2396_v21, %v860_v46  ;;  %v2077_v55 = vmul.f32 %v3984_v44, %v1757_v38  ;;  %2791 = vmatmul.mubr.bf16.gmra.mrb[52].mxu1 %v2520_v15 }
 0x32d   : > { %2798 = vmatprep.mubr.bf16.mxu1 %v2523_v52 }
 0x32e   : > { %v2141_v63 = vsub.f32 1.0, %v2077_v55  ;;  %v2524_v29 = vpack.c.bf16 %v2460_v45, %v2458_v50 }
 0x330   : > { %v2269_v43 = vsub.f32 0.0, %v2141_v63 }
 0x332   : > { %v2333_v41 = vsel %vm2205_vm15, %v2269_v43, %v2141_v63 }
 0x333   : > { %v2397_v0 = vadd.f32 1.0, %v2333_v41 }
 0x334   : > { %2799 = vmatmul.mubr.bf16.gmra.mrb[56].mxu1 %v2522_v30 }
 0x335   : > { %v2461_v11 = vmul.f32 %v2397_v0, %v861_v16 }
 0x337   : > { %v2525_v57 = vpack.c.bf16 %v2461_v11, %v2459_v28 }
 0x339   : > { %2806 = vmatprep.mubr.bf16.mxu1 %v2525_v57 }
 0x33c   : > { %2807 = vmatmul.mubr.bf16.gmra.mrb[60].mxu1 %v2524_v29 }
 0x33e   : > { %v3505_v15 = vpop.f32.mrb[12].mxu1 }
 0x33f   : > { %v3506_v35 = vpop.f32.mrb[13].mxu1 }
 0x340   : > { %v3507_v34 = vadd.f32 %v3506_v35, %v3505_v15  ;;  %v3508_v53 = vpop.f32.mrb[14].mxu1 }
 0x341   : > { %v3509_v62 = vpop.f32.mrb[15].mxu1 }
 0x342   : > { %v3510_v37 = vadd.f32 %v3509_v62, %v3508_v53  ;;  %v2926_v42 = vadd.f32 %v3507_v34, %v6371_v27 }
 0x344   : > { %v2927_v48 = vadd.f32 %v3510_v37, %v6371_v27 }
 0x346   : > { %v3394_v17 = vpack.c.bf16 %v2927_v48, %v2926_v42 }
 0x348   : > { %3458 = vst [vmem:[%s6391_s9 + $0x18] sm:$0xff] %v3394_v17  }
 0x352   : > { %v3511_v24 = vpop.f32.mrb[16].mxu1 }
 0x353   : > { %v3512_v58 = vpop.f32.mrb[17].mxu1 }
 0x354   : > { %v3513_v30 = vadd.f32 %v3512_v58, %v3511_v24  ;;  %v3514_v5 = vpop.f32.mrb[18].mxu1 }
 0x355   : > { %v3515_v33 = vpop.f32.mrb[19].mxu1 }
 0x356   : > { %v3516_v52 = vadd.f32 %v3515_v33, %v3514_v5  ;;  %v2928_v4 = vadd.f32 %v3513_v30, %v6371_v27 }
 0x358   : > { %v2929_v25 = vadd.f32 %v3516_v52, %v6371_v27 }
 0x35a   : > { %v3399_v61 = vpack.c.bf16 %v2929_v25, %v2928_v4 }
 0x35c   : > { %3459 = vst [vmem:[%s6391_s9 + $0x20] sm:$0xff] %v3399_v61  }
 0x37b   : > { %v3517_v40 = vpop.f32.mrb[20].mxu1 }
 0x37c   : > { %v3518_v6 = vpop.f32.mrb[21].mxu1 }
 0x37d   : > { %v3519_v7 = vadd.f32 %v3518_v6, %v3517_v40  ;;  %v3520_v23 = vpop.f32.mrb[22].mxu1 }
 0x37e   : > { %v3521_v54 = vpop.f32.mrb[23].mxu1 }
 0x37f   : > { %v3522_v39 = vadd.f32 %v3521_v54, %v3520_v23  ;;  %v2930_v60 = vadd.f32 %v3519_v7, %v6371_v27 }
 0x381   : > { %v2931_v8 = vadd.f32 %v3522_v39, %v6371_v27 }
 0x383   : > { %v3404_v22 = vpack.c.bf16 %v2931_v8, %v2930_v60 }
 0x385   : > { %3460 = vst [vmem:[%s6391_s9 + $0x28] sm:$0xff] %v3404_v22  }
 0x391   : > { %v3523_v47 = vpop.f32.mrb[24].mxu1 }
 0x392   : > { %v3524_v56 = vpop.f32.mrb[25].mxu1 }
 0x393   : > { %v3525_v18 = vadd.f32 %v3524_v56, %v3523_v47  ;;  %v3526_v59 = vpop.f32.mrb[26].mxu1 }
 0x394   : > { %v3527_v10 = vpop.f32.mrb[27].mxu1 }
 0x395   : > { %v3528_v51 = vadd.f32 %v3527_v10, %v3526_v59  ;;  %v2932_v9 = vadd.f32 %v3525_v18, %v6371_v27 }
 0x397   : > { %v2933_v31 = vadd.f32 %v3528_v51, %v6371_v27 }
 0x399   : > { %v3409_v12 = vpack.c.bf16 %v2933_v31, %v2932_v9 }
 0x39b   : > { %3461 = vst [vmem:[%s6391_s9 + $0x30] sm:$0xff] %v3409_v12  }
 0x3b5   : > { %v3529_v3 = vpop.f32.mrb[28].mxu1 }
 0x3b6   : > { %v3530_v26 = vpop.f32.mrb[29].mxu1 }
 0x3b7   : > { %v3531_v14 = vadd.f32 %v3530_v26, %v3529_v3  ;;  %v3532_v13 = vpop.f32.mrb[30].mxu1 }
 0x3b8   : > { %v3533_v2 = vpop.f32.mrb[31].mxu1 }
 0x3b9   : > { %v3534_v19 = vadd.f32 %v3533_v2, %v3532_v13  ;;  %v2934_v20 = vadd.f32 %v3531_v14, %v6371_v27 }
 0x3bb   : > { %v2935_v32 = vadd.f32 %v3534_v19, %v6371_v27 }
 0x3bd   : > { %v3414_v46 = vpack.c.bf16 %v2935_v32, %v2934_v20 }
 0x3bf   : > { %3462 = vst [vmem:[%s6391_s9 + $0x38] sm:$0xff] %v3414_v46  }
 0x3cc   : > { %v3535_v21 = vpop.f32.mrb[32].mxu1 }
 0x3cd   : > { %v3536_v38 = vpop.f32.mrb[33].mxu1 }
 0x3ce   : > { %v3537_v44 = vadd.f32 %v3536_v38, %v3535_v21  ;;  %v3538_v50 = vpop.f32.mrb[34].mxu1 }
 0x3cf   : > { %v3539_v45 = vpop.f32.mrb[35].mxu1 }
 0x3d0   : > { %v3540_v55 = vadd.f32 %v3539_v45, %v3538_v50  ;;  %v2936_v1 = vadd.f32 %v3537_v44, %v6371_v27 }
 0x3d2   : > { %v2937_v63 = vadd.f32 %v3540_v55, %v6371_v27 }
 0x3d4   : > { %v3419_v29 = vpack.c.bf16 %v2937_v63, %v2936_v1 }
 0x3d6   : > { %3463 = vst [vmem:[%s6391_s9 + $0x40] sm:$0xff] %v3419_v29  }
 0x3df   : > { %v3541_v43 = vpop.f32.mrb[36].mxu1 }
 0x3e0   : > { %v3542_v49 = vpop.f32.mrb[37].mxu1 }
 0x3e1   : > { %v3543_v41 = vadd.f32 %v3542_v49, %v3541_v43  ;;  %v3544_v36 = vpop.f32.mrb[38].mxu1 }
 0x3e2   : > { %v3545_v16 = vpop.f32.mrb[39].mxu1 }
 0x3e3   : > { %v3546_v0 = vadd.f32 %v3545_v16, %v3544_v36  ;;  %v2938_v28 = vadd.f32 %v3543_v41, %v6371_v27 }
 0x3e5   : > { %v2939_v11 = vadd.f32 %v3546_v0, %v6371_v27 }
 0x3e7   : > { %v3424_v57 = vpack.c.bf16 %v2939_v11, %v2938_v28  ;;  %v3547_v15 = vpop.f32.mrb[40].mxu1 }
 0x3e8   : > { %v3548_v35 = vpop.f32.mrb[41].mxu1 }
 0x3e9   : > { %3464 = vst [vmem:[%s6391_s9 + $0x48] sm:$0xff] %v3424_v57   ;;  %v3549_v34 = vadd.f32 %v3548_v35, %v3547_v15  ;;  %v3550_v53 = vpop.f32.mrb[42].mxu1 }
 0x3ea   : > { %v3551_v62 = vpop.f32.mrb[43].mxu1 }
 0x3eb   : > { %v3552_v37 = vadd.f32 %v3551_v62, %v3550_v53  ;;  %v2940_v42 = vadd.f32 %v3549_v34, %v6371_v27 }
 0x3ed   : > { %v2941_v48 = vadd.f32 %v3552_v37, %v6371_v27 }
 0x3ef   : > { %v3429_v17 = vpack.c.bf16 %v2941_v48, %v2940_v42  ;;  %v3553_v24 = vpop.f32.mrb[44].mxu1 }
 0x3f0   : > { %v3554_v58 = vpop.f32.mrb[45].mxu1 }
 0x3f1   : > { %3465 = vst [vmem:[%s6391_s9 + $0x50] sm:$0xff] %v3429_v17   ;;  %v3555_v30 = vadd.f32 %v3554_v58, %v3553_v24  ;;  %v3556_v5 = vpop.f32.mrb[46].mxu1 }
 0x3f2   : > { %v3557_v33 = vpop.f32.mrb[47].mxu1 }
 0x3f3   : > { %v3558_v52 = vadd.f32 %v3557_v33, %v3556_v5  ;;  %v2942_v4 = vadd.f32 %v3555_v30, %v6371_v27 }
 0x3f5   : > { %v2943_v25 = vadd.f32 %v3558_v52, %v6371_v27 }
 0x3f7   : > { %v3434_v61 = vpack.c.bf16 %v2943_v25, %v2942_v4  ;;  %v3559_v40 = vpop.f32.mrb[48].mxu1 }
 0x3f8   : > { %v3560_v6 = vpop.f32.mrb[49].mxu1 }
 0x3f9   : > { %3466 = vst [vmem:[%s6391_s9 + $0x58] sm:$0xff] %v3434_v61   ;;  %v3561_v7 = vadd.f32 %v3560_v6, %v3559_v40  ;;  %v3562_v23 = vpop.f32.mrb[50].mxu1 }
 0x3fa   : > { %v3563_v54 = vpop.f32.mrb[51].mxu1 }
 0x3fb   : > { %v3564_v39 = vadd.f32 %v3563_v54, %v3562_v23  ;;  %v2944_v60 = vadd.f32 %v3561_v7, %v6371_v27 }
 0x3fd   : > { %v2945_v8 = vadd.f32 %v3564_v39, %v6371_v27 }
 0x3ff   : > { %v3439_v22 = vpack.c.bf16 %v2945_v8, %v2944_v60  ;;  %v3565_v47 = vpop.f32.mrb[52].mxu1 }
 0x400   : > { %v3566_v56 = vpop.f32.mrb[53].mxu1 }
 0x401   : > { %3467 = vst [vmem:[%s6391_s9 + $0x60] sm:$0xff] %v3439_v22   ;;  %v3567_v18 = vadd.f32 %v3566_v56, %v3565_v47  ;;  %v3568_v59 = vpop.f32.mrb[54].mxu1 }
 0x402   : > { %v3569_v10 = vpop.f32.mrb[55].mxu1 }
 0x403   : > { %v3570_v51 = vadd.f32 %v3569_v10, %v3568_v59  ;;  %v2946_v9 = vadd.f32 %v3567_v18, %v6371_v27 }
 0x405   : > { %v2947_v31 = vadd.f32 %v3570_v51, %v6371_v27 }
 0x407   : > { %v3444_v12 = vpack.c.bf16 %v2947_v31, %v2946_v9  ;;  %v3571_v3 = vpop.f32.mrb[56].mxu1 }
 0x408   : > { %v3572_v26 = vpop.f32.mrb[57].mxu1 }
 0x409   : > { %3468 = vst [vmem:[%s6391_s9 + $0x68] sm:$0xff] %v3444_v12   ;;  %v3573_v14 = vadd.f32 %v3572_v26, %v3571_v3  ;;  %v3574_v13 = vpop.f32.mrb[58].mxu1 }
 0x40a   : > { %v3575_v2 = vpop.f32.mrb[59].mxu1 }
 0x40b   : > { %v3576_v19 = vadd.f32 %v3575_v2, %v3574_v13  ;;  %v2948_v20 = vadd.f32 %v3573_v14, %v6371_v27 }
 0x40d   : > { %v2949_v32 = vadd.f32 %v3576_v19, %v6371_v27 }
 0x40f   : > { %v3449_v46 = vpack.c.bf16 %v2949_v32, %v2948_v20  ;;  %v3577_v21 = vpop.f32.mrb[60].mxu1 }
 0x410   : > { %v3578_v38 = vpop.f32.mrb[61].mxu1 }
 0x411   : > { %3469 = vst [vmem:[%s6391_s9 + $0x70] sm:$0xff] %v3449_v46   ;;  %v3579_v44 = vadd.f32 %v3578_v38, %v3577_v21  ;;  %v3580_v50 = vpop.f32.mrb[62].mxu1 }
 0x412   : > { %v3581_v45 = vpop.f32.mrb[63].mxu1 }
 0x413   : > { %v3582_v55 = vadd.f32 %v3581_v45, %v3580_v50  ;;  %v2950_v1 = vadd.f32 %v3579_v44, %v6371_v27 }
 0x415   : > { %v2951_v63 = vadd.f32 %v3582_v55, %v6371_v27 }
 0x417   : > { %v3454_v29 = vpack.c.bf16 %v2951_v63, %v2950_v1 }
 0x419   : > { %3470 = vst [vmem:[%s6391_s9 + $0x78] sm:$0xff] %v3454_v29  }
 0x41a   : > { %4084 = shalt.err (!%p4081_p11)
}
 0x41b   : > { %s4085_s26 = scalar_lea.hbm %s6468_s7, 2048  ;;  %s4089_s6 = scalar_lea.hbm %s6525_s5, 4096 }
 0x41c   : > { %p4086_p0 = scmp.ne.s32.totalorder %s6468_s7, %s4085_s26  ;;  %p4090_p6 = scmp.lt.u32.totalorder %s6468_s7, %s6525_s5 }
 0x41d   : > { %p4091_p7 = scmp.lt.u32.totalorder %s4089_s6, %s4085_s26  ;;  %p4093_p8 = scmp.lt.u32.totalorder %s4085_s26, %s6468_s7 }
 0x41e   : > { %p4087_p4 = pnand %p4086_p0, %p6722_p12 }
 0x41f   : > { %p4092_p2 = por %p4091_p7, %p4090_p6 }
 0x420   : > { %p4088_p13 = pneg %p4087_p4 }
 0x421   : > { %p4094_p1 = por %p4093_p8, %p4092_p2 }
 0x423   : > { %p4095_p10 = pnand %p4094_p1, %p4088_p13 }
 0x425   : > { %4098 = shalt.err (!%p4095_p10)
}
 0x426   : > { %s4168_s10 = smov 64   ;;  %s4169_s16 = smov 4  }
 0x427   : > { %3593 = dma.vmem_to_hbm [thread:$0]  (%p6722_p12), %s6470_s13, 2048, %s6468_s7, %s3113_s14, %s4168_s10, %s4168_s10, %s4169_s16  }
 0x428 PF: > { %s3141_s27 = sand.u32 1, %s4137_s18   ;;  %p6723_p3 = scmp.ne.s32.totalorder %s6553_s29, 0 }
 0x429   : > { %p6724_p5 = scmp.ge.s32.totalorder %s4157_s23, 2  ;;  %s3142_s21 = scalar_lea.sflag [#allocation5], %s3141_s27 }
 0x42b   : > { %p3607_p9 = pnand %p6724_p5, %p6723_p3 }
 0x42d   : > { %4132 = dma.done.wait (!%p3607_p9), %s3142_s21, 2048  }
 0x42e   : > { %4134 = vsyncadd (!%p3607_p9), %s3142_s21, 4294965248  ;;  %s22_s23 = sadd.s32 1, %s4157_s23   ;;  %s6725_s18 = smov %s4141_s19 }
 0x42f   : > { %p19_p11 = scmp.ge.s32.totalorder %s22_s23, 4   ;;  %s6726_s19 = smov %s4145_s20 }
 0x430   : > { %s6727_s20 = smov %s4345_s17  ;;  %s6728_s21 = smov %s4153_s22 }
 0x431   : > { %s6729_s22 = smov %s6731_s12  ;;  %21 = sbr.rel (!%p19_p11) target bundleno = 7 (0x7), region = 106 }
 0x438   :  { %3147 = vsyncpa [#allocation4], 1 }
 0x439   :  { %3149 = vsyncpa [#allocation4 + $0x1], 1 }
 0x43a   :  { %3150 = vsyncpa [#allocation7], 1 }
 0x43b   :  { %3151 = vsyncpa [#allocation5], 1 }
 0x43c   :  { %3153 = vsyncpa [#allocation5 + $0x1], 1 }

// kernel: feedforward.1
= control target key start
LH: loop header
LB: loop body
LE: loop exit
PB: predicated region body
PF: predicated region fallthrough
CT: control target
= control target key end

     0   :  { %10 = vsyncpa [#allocation4], 0  ;;  %s6520_s0 = inlined_call_operand.hbm [shape: bf16[512,128], index: 0, kind: input, shape index: {}]   ;;  %s6521_s1 = inlined_call_operand.hbm [shape: bf16[128,256], index: 1, kind: input, shape index: {}]   ;;  %s6522_s2 = inlined_call_operand.vmem [shape: bf16[1,256], index: 2, kind: input, shape index: {}]   ;;  %s6523_s3 = inlined_call_operand.hbm [shape: bf16[256,128], index: 3, kind: input, shape index: {}]   ;;  %s6524_s4 = inlined_call_operand.vmem [shape: bf16[1,128], index: 4, kind: input, shape index: {}]   ;;  %s6525_s5 = inlined_call_operand.hbm [shape: bf16[512,128], index: 5, kind: output, shape index: {}]  }
   0x1   :  { %12 = vsyncpa [#allocation4 + $0x1], 0 }
   0x2   :  { %13 = vsyncpa [#allocation7], 0 }
   0x3   :  { %14 = vsyncpa [#allocation5], 0 }
   0x4   :  { %16 = vsyncpa [#allocation5 + $0x1], 0  ;;  %s4200_s18 = smov 0   ;;  %s4202_s19 = smov 0  }
   0x5   :  { %s4204_s20 = smov 0   ;;  %s4206_s21 = smov 0  }
   0x6   :  { %s4208_s22 = smov 0   ;;  %s4210_s23 = smov 0  }
   0x7 LB: > { %s3242_s24 = sadd.s32 4294967295, %s4157_s23   ;;  %s3243_s25 = sadd.s32 4294967294, %s4157_s23   ;;  %s4157_s23 = sphi %s4210_s23, %s22_s23   ;;  %s4153_s22 = sphi %s4208_s22, %s6729_s22   ;;  %s4149_s21 = sphi %s4206_s21, %s6728_s21   ;;  %s4145_s20 = sphi %s4204_s20, %s6727_s20   ;;  %s4141_s19 = sphi %s4202_s19, %s6726_s19   ;;  %s4137_s18 = sphi %s4200_s18, %s6725_s18  }
   0x8   : > { %p54_p0 = scmp.ne.s32.totalorder %s4141_s19, %s4137_s18  ;;  %p4234_p1 = scmp.eq.s32.totalorder %s3242_s24, 0 }
   0x9   : > { %p4238_p2 = scmp.eq.s32.totalorder %s3242_s24, 1  ;;  %p183_p3 = scmp.eq.s32.totalorder %s3243_s25, 1 }
   0xa   : > { %s6550_s26 = scalar_select %p4234_p1, 1, 0 }
   0xb   : > { %p4244_p4 = por %p4234_p1, %p54_p0  ;;  %p3244_p5 = scmp.ge.s32.totalorder %s4157_s23, 1 }
   0xc   : > { %p4249_p6 = por %p183_p3, %p54_p0  ;;  %p190_p7 = scmp.lt.s32.totalorder %s4157_s23, 3 }
   0xd   : > { %s6552_s28 = scalar_select %p4244_p4, 1, 0 }
   0xe   : > { %s6553_s29 = scalar_select %p4249_p6, 1, 0 }
   0xf   : > { %p4254_p8 = pnand %p3244_p5, %p190_p7  ;;  %s4159_s6 = smov [#allocation6]  }
  0x10   : > { %s205_s7 = sshll.u32 %s4159_s6, 4  ;;  %s4160_s9 = smov [#allocation8]   ;;  %s4258_s7 = int_to_ptr.vmem [resolvable:$true] %s205_s7 }
  0x11   : > { %p3595_p9 = pneg %p4254_p8  ;;  %s229_s10 = sshll.u32 %s4160_s9, 4  ;;  %s4269_s10 = int_to_ptr.vmem [resolvable:$true] %s229_s10 }
  0x12   : > { %s3985_s13 = scalar_lea.hbm %s6521_s1, 2048 }
  0x13   : > { %p4265_p11 = pnand %p3595_p9, %p4234_p1  ;;  %p3986_p12 = scmp.ne.s32.totalorder %s6521_s1, %s3985_s13 }
  0x14   : > { %p3992_p5 = scmp.lt.u32.totalorder %s3985_s13, %s6521_s1 }
  0x15   : > { %p3987_p13 = pneg %p4265_p11 }
  0x17   : > { %p3988_p0 = pnand %p3987_p13, %p3986_p12 }
  0x19   : > { %p3989_p3 = pneg %p3988_p0 }
  0x1b   : > { %p3994_p7 = pnand %p3992_p5, %p3989_p3 }
  0x1d   : > { %3997 = shalt.err (!%p3994_p7)
}
  0x1e   : > { %s3998_s24 = scalar_lea.vmem %s4258_s7, 2048  ;;  %p4006_p1 = scmp.lt.s32.totalorder %s4258_s7, %s4258_s7 }
  0x1f   : > { %p3999_p9 = scmp.ne.s32.totalorder %s4258_s7, %s3998_s24  ;;  %p4007_p12 = scmp.lt.s32.totalorder %s3998_s24, %s3998_s24 }
  0x21   : > { %p4001_p10 = pnand %p3999_p9, %p3987_p13  ;;  %p4008_p0 = por %p4007_p12, %p4006_p1 }
  0x23   : > { %p4002_p6 = pneg %p4001_p10 }
  0x25   : > { %p4009_p4 = pnand %p4008_p0, %p4002_p6 }
  0x27   : > { %4012 = shalt.err (!%p4009_p4)
}
  0x28   : > { %s4161_s25 = smov 128   ;;  %s4162_s6 = smov 8  }
  0x29   : > { %3598 = dma.hbm_to_vmem [thread:$0]  (!%p4265_p11), %s6521_s1, 2048, %s4258_s7, [#allocation7], %s4161_s25, %s4161_s25, %s4162_s6  }
  0x2a   : > { %s4013_s14 = scalar_lea.hbm %s6523_s3, 2048 }
  0x2b   : > { %p4014_p1 = scmp.ne.s32.totalorder %s6523_s3, %s4013_s14  ;;  %p4020_p10 = scmp.lt.u32.totalorder %s4013_s14, %s6523_s3 }
  0x2d   : > { %p4016_p4 = pnand %p4014_p1, %p3987_p13 }
  0x2f   : > { %p4017_p6 = pneg %p4016_p4 }
  0x31   : > { %p4022_p3 = pnand %p4020_p10, %p4017_p6 }
  0x33   : > { %4025 = shalt.err (!%p4022_p3)
}
  0x34   : > { %s4026_s7 = scalar_lea.vmem %s4269_s10, 2048  ;;  %p4034_p12 = scmp.lt.s32.totalorder %s4269_s10, %s4269_s10 }
  0x35   : > { %p4027_p5 = scmp.ne.s32.totalorder %s4269_s10, %s4026_s7  ;;  %p4035_p0 = scmp.lt.s32.totalorder %s4026_s7, %s4026_s7 }
  0x37   : > { %p4029_p7 = pnand %p4027_p5, %p3987_p13  ;;  %p4036_p1 = por %p4035_p0, %p4034_p12 }
  0x39   : > { %p4030_p9 = pneg %p4029_p7 }
  0x3b   : > { %p4037_p4 = pnand %p4036_p1, %p4030_p9 }
  0x3d   : > { %4040 = shalt.err (!%p4037_p4)
}
  0x3e   : > { %s6529_s25 = smov 64   ;;  %s4164_s6 = smov 4  }
  0x3f   : > { %3601 = dma.hbm_to_vmem [thread:$0]  (!%p4265_p11), %s6523_s3, 2048, %s4269_s10, [#allocation7], %s6529_s25, %s6529_s25, %s4164_s6  }
  0x40   : > { %s34_s12 = sadd.s32 1, %s4153_s22  ;;  %s41_s13 = sadd.s32 1, %s4145_s20 }
  0x41   : > { %p36_p13 = scmp.ge.s32.totalorder %s34_s12, 2  ;;  %p48_p6 = scmp.ne.s32.totalorder %s4145_s20, %s4141_s19 }
  0x42   : > { %p49_p10 = scmp.eq.s32.totalorder %s4157_s23, 0  ;;  %p3612_p3 = scmp.lt.s32.totalorder %s4157_s23, 2 }
  0x43   : > { %s6731_s12 = smov (%p36_p13, %s34_s12), 0  ;;  %p4336_p7 = por %p4238_p2, %p48_p6 }
  0x44   : > { %p50_p5 = por %p49_p10, %p48_p6  ;;  %s38_s14 = ssub.s32 %s4153_s22, %s6731_s12 }
  0x45   : > { %s6556_s8 = scalar_select %p4336_p7, 1, 0 }
  0x46   : > { %s246_s15 = sand.u32 1, %s4145_s20   ;;  %p39_p9 = scmp.eq.s32.totalorder %s38_s14, 0 }
  0x47   : > { %s3249_s10 = sshll.u32 %s246_s15, 7  ;;  %s3342_s16 = sshll.u32 %s4153_s22, 11 }
  0x48   : > { %s4345_s17 = scalar_select %p39_p9, %s4145_s20, %s41_s13  }
  0x49   : > { %s4350_s9 = scalar_lea.hbm %s6520_s0, %s3342_s16  ;;  %s250_s27 = scalar_lea.vmem [#allocation3], %s3249_s10 }
  0x4a   : > { %s257_s11 = sshll.u32 %s250_s27, 4  ;;  %p4354_p2 = pnand %p3612_p3, %p50_p5  ;;  %s4358_s11 = int_to_ptr.vmem [resolvable:$true] %s257_s11 }
  0x4b   : > { %s4360_s13 = scalar_lea.sflag [#allocation4], %s246_s15  ;;  %s4041_s14 = scalar_lea.hbm %s4350_s9, 2048 }
  0x4c   : > { %p4042_p11 = scmp.ne.s32.totalorder %s4350_s9, %s4041_s14  ;;  %p4043_p12 = pneg %p4354_p2 }
  0x4d   : > { %s4046_s24 = scalar_lea.hbm %s6520_s0, 4096  ;;  %p4047_p4 = scmp.lt.u32.totalorder %s4350_s9, %s6520_s0 }
  0x4e   : > { %p4044_p0 = pnand %p4043_p12, %p4042_p11  ;;  %p4048_p13 = scmp.lt.u32.totalorder %s4046_s24, %s4041_s14 }
  0x4f   : > { %p4050_p10 = scmp.lt.u32.totalorder %s4041_s14, %s4350_s9 }
  0x50   : > { %p4045_p1 = pneg %p4044_p0  ;;  %p4049_p6 = por %p4048_p13, %p4047_p4 }
  0x52   : > { %p4051_p3 = por %p4050_p10, %p4049_p6 }
  0x54   : > { %p4052_p5 = pnand %p4051_p3, %p4045_p1 }
  0x56   : > { %4055 = shalt.err (!%p4052_p5)
}
  0x57   : > { %s4056_s15 = scalar_lea.vmem %s4358_s11, 2048  ;;  %s4165_s10 = smov [#allocation3]  }
  0x58   : > { %p4057_p9 = scmp.ne.s32.totalorder %s4358_s11, %s4056_s15  ;;  %s4061_s16 = sshll.u32 %s4165_s10, 4  ;;  %s4062_s16 = int_to_ptr.vmem [resolvable:$false] %s4061_s16 }
  0x59   : > { %s4063_s7 = scalar_lea.vmem %s4062_s16, 4096  ;;  %p4064_p7 = scmp.lt.s32.totalorder %s4358_s11, %s4062_s16 }
  0x5a   : > { %p4059_p11 = pnand %p4057_p9, %p4043_p12  ;;  %p4065_p4 = scmp.lt.s32.totalorder %s4063_s7, %s4056_s15 }
  0x5c   : > { %p4060_p0 = pneg %p4059_p11  ;;  %p4066_p13 = por %p4065_p4, %p4064_p7 }
  0x5e   : > { %p4067_p6 = pnand %p4066_p13, %p4060_p0 }
  0x60   : > { %4070 = shalt.err (!%p4067_p6)
}
  0x61   : > { %s6558_s14 = smov 64   ;;  %269 = sbr.rel (%p4254_p8) target bundleno = 1064 (0x428), region = 40 }
  0x62   : > { %3605 = dma.hbm_to_vmem [thread:$0]  (!%p4354_p2), %s4350_s9, 2048, %s4358_s11, %s4360_s13, %s6558_s14, %s6558_s14, %s4164_s6  }
  0x68   : > { %s4394_s24 = sand.u32 1, %s4141_s19   ;;  %p6559_p7 = scmp.ne.s32.totalorder %s6552_s28, 0 }
  0x69   : > { %s3253_s27 = sshll.u32 %s4394_s24, 7  ;;  %s272_s15 = scalar_lea.sflag [#allocation4], %s4394_s24 }
  0x6a   : > { %s4400_s25 = scalar_lea.vmem [#allocation3], %s3253_s27 }
  0x6b   : > { %4124 = dma.done.wait (%p6559_p7), %s272_s15, 2048  }
  0x6c   : > { %4126 = vsyncadd (%p6559_p7), %s272_s15, 4294965248  ;;  %p6560_p2 = scmp.ne.s32.totalorder %s6550_s26, 0 }
  0x6e   : > { %4128 = dma.done.wait (%p6560_p2), [#allocation7], 4096  }
  0x6f   : > { %4130 = vsyncadd (%p6560_p2), [#allocation7], 4294963200  ;;  %v4166_v0 = vmov 0   ;;  %v3673_v1 = vld [vmem:[#allocation6 + $0x4] ss:$8 sps:$4 sm:$0xff]   ;;  %v3699_v19 = vld [vmem:[%s4400_s25 + $0x10] sm:$0xff]   ;;  %v411_v40 = vlaneseq }
  0x70   : > { %637 = vmatprep.mubr.bf16.mxu0 %v4166_v0  ;;  %v3675_v2 = vld [vmem:[#allocation6] ss:$8 sps:$4 sm:$0xff]   ;;  %605 = vmatprep.subr.bf16.mxu0 %v3673_v1  ;;  %v3676_v3 = vld [vmem:[#allocation6 + $0x14] ss:$8 sps:$4 sm:$0xff]   ;;  %v3678_v4 = vld [vmem:[#allocation6 + $0x10] ss:$8 sps:$4 sm:$0xff]  }
  0x71   : > { %606 = vmatpush1.bf16.msra.mxu0 %v3675_v2  ;;  %v3679_v5 = vld [vmem:[#allocation6 + $0x24] ss:$8 sps:$4 sm:$0xff]   ;;  %v3681_v6 = vld [vmem:[#allocation6 + $0x20] ss:$8 sps:$4 sm:$0xff]   ;;  %v3682_v7 = vld [vmem:[#allocation6 + $0x34] ss:$8 sps:$4 sm:$0xff]  }
  0x72   : > { %607 = vmatprep.subr.bf16.mxu0 %v3676_v3  ;;  %v3684_v8 = vld [vmem:[#allocation6 + $0x30] ss:$8 sps:$4 sm:$0xff]   ;;  %v3685_v9 = vld [vmem:[#allocation6 + $0x44] ss:$8 sps:$4 sm:$0xff]   ;;  %v3687_v10 = vld [vmem:[#allocation6 + $0x40] ss:$8 sps:$4 sm:$0xff]  }
  0x73   : > { %v3688_v11 = vld [vmem:[#allocation6 + $0x54] ss:$8 sps:$4 sm:$0xff]   ;;  %v3690_v12 = vld [vmem:[#allocation6 + $0x50] ss:$8 sps:$4 sm:$0xff]   ;;  %v3691_v13 = vld [vmem:[#allocation6 + $0x64] ss:$8 sps:$4 sm:$0xff]  }
  0x74   : > { %v3693_v14 = vld [vmem:[#allocation6 + $0x60] ss:$8 sps:$4 sm:$0xff]   ;;  %v3694_v15 = vld [vmem:[#allocation6 + $0x74] ss:$8 sps:$4 sm:$0xff]   ;;  %v3696_v16 = vld [vmem:[#allocation6 + $0x70] ss:$8 sps:$4 sm:$0xff]  }
  0x75   : > { %608 = vmatpush1.bf16.msra.mxu0 %v3678_v4  ;;  %v3697_v17 = vld [vmem:[%s4400_s25] sm:$0xff]   ;;  %v3698_v18 = vld [vmem:[%s4400_s25 + $0x8] sm:$0xff]   ;;  %v3700_v20 = vld [vmem:[%s4400_s25 + $0x18] sm:$0xff]   ;;  %v412_v42 = vshrl.u32 %v411_v40, 7  ;;  %s6391_s9 = scalar_lea.vmem [#allocation9], %s3253_s27  ;;  %s3375_s11 = sshll.u32 %s4149_s21, 11 }
  0x76   : > { %609 = vmatprep.subr.bf16.mxu0 %v3679_v5  ;;  %v3701_v21 = vld [vmem:[%s4400_s25 + $0x20] sm:$0xff]   ;;  %v3702_v22 = vld [vmem:[%s4400_s25 + $0x28] sm:$0xff]   ;;  %v3703_v23 = vld [vmem:[%s4400_s25 + $0x30] sm:$0xff]   ;;  %s3126_s13 = sshll.u32 %s6391_s9, 4  ;;  %s6468_s7 = scalar_lea.hbm %s6525_s5, %s3375_s11  ;;  %s6470_s13 = int_to_ptr.vmem [resolvable:$true] %s3126_s13 }
  0x77   : > { %v3704_v24 = vld [vmem:[%s4400_s25 + $0x38] sm:$0xff]   ;;  %v3705_v25 = vld [vmem:[%s4400_s25 + $0x40] sm:$0xff]   ;;  %v3706_v26 = vld [vmem:[%s4400_s25 + $0x48] sm:$0xff]   ;;  %v4445_v45 = vsub.s32 0, %v412_v42  ;;  %v417_v55 = vsub.s32 2, %v412_v42  ;;  %s3113_s14 = scalar_lea.sflag [#allocation5], %s4394_s24 }
  0x78   : > { %v3707_v27 = vld [vmem:[%s4400_s25 + $0x50] sm:$0xff]   ;;  %v3708_v28 = vld [vmem:[%s4400_s25 + $0x58] sm:$0xff]   ;;  %v3709_v29 = vld [vmem:[%s4400_s25 + $0x60] sm:$0xff]   ;;  %s4071_s27 = scalar_lea.vmem %s6470_s13, 2048  ;;  %p6722_p12 = scmp.ne.s32.totalorder %s6556_s8, 0 }
  0x79   : > { %610 = vmatpush1.bf16.msra.mxu0 %v3681_v6  ;;  %v3710_v30 = vld [vmem:[%s4400_s25 + $0x68] sm:$0xff]   ;;  %v3711_v31 = vld [vmem:[%s4400_s25 + $0x70] sm:$0xff]   ;;  %v3712_v32 = vld [vmem:[%s4400_s25 + $0x78] sm:$0xff]   ;;  %6561 = vst [vmem:[#allocation13_spill] sm:$0xff] %v4445_v45  ;;  %p4072_p8 = scmp.ne.s32.totalorder %s6470_s13, %s4071_s27  ;;  %s4167_s21 = smov [#allocation9]  }
  0x7a   : > { %611 = vmatprep.subr.bf16.mxu0 %v3682_v7  ;;  %v3713_v33 = vld [vmem:[#allocation8 + $0x40] sm:$0xff]   ;;  %v3715_v35 = vld [vmem:[#allocation8 + $0x48] sm:$0xff]   ;;  %v3717_v37 = vld [vmem:[#allocation8 + $0x50] sm:$0xff]   ;;  %s4075_s15 = sshll.u32 %s4167_s21, 4  ;;  %s4076_s15 = int_to_ptr.vmem [resolvable:$false] %s4075_s15 }
  0x7b   : > { %3471 = vmatprep.subr.bf16.mxu1 %v3713_v33  ;;  %v3714_v34 = vld [vmem:[#allocation8] sm:$0xff]   ;;  %v3716_v36 = vld [vmem:[#allocation8 + $0x8] sm:$0xff]   ;;  %v3718_v38 = vld [vmem:[#allocation8 + $0x10] sm:$0xff]   ;;  %p4073_p1 = pnand %p4072_p8, %p6722_p12  ;;  %s4077_s25 = scalar_lea.vmem %s4076_s15, 4096 }
  0x7c   : > { %3472 = vmatpush3.bf16.msra.mxu1 %v3714_v34  ;;  %v3719_v39 = vld [vmem:[#allocation8 + $0x58] sm:$0xff]   ;;  %v408_v43 = vld [vmem:[%s6522_s2] sm:$0x3]  ;;  %v3723_v2 = vld [vmem:[#allocation8 + $0x68] sm:$0xff]   ;;  %p4078_p3 = scmp.lt.s32.totalorder %s6470_s13, %s4076_s15  ;;  %p4079_p5 = scmp.lt.s32.totalorder %s4077_s25, %s4071_s27 }
  0x7d   : > { %612 = vmatpush1.bf16.msra.mxu0 %v3684_v8  ;;  %3473 = vmatprep.subr.bf16.mxu1 %v3715_v35  ;;  %v3720_v41 = vld [vmem:[#allocation8 + $0x18] sm:$0xff]   ;;  %v409_v44 = vunpack.c.l.bf16 %v408_v43  ;;  %v3721_v47 = vld [vmem:[#allocation8 + $0x60] sm:$0xff]   ;;  %v3724_v4 = vld [vmem:[#allocation8 + $0x28] sm:$0xff]   ;;  %p4074_p10 = pneg %p4073_p1 }
  0x7e   : > { %613 = vmatprep.subr.bf16.mxu0 %v3685_v9  ;;  %v3722_v49 = vld [vmem:[#allocation8 + $0x20] sm:$0xff]   ;;  %p4080_p9 = por %p4079_p5, %p4078_p3 }
  0x7f   : > { %v414_v46 = vrot.slane %v409_v44, %v4445_v45  ;;  %v418_v61 = vrot.slane %v409_v44, %v417_v55 }
  0x80   : > { %3474 = vmatpush3.bf16.msra.mxu1 %v3716_v36  ;;  %p4081_p11 = pnand %p4080_p9, %p4074_p10 }
  0x81   : > { %614 = vmatpush1.bf16.msra.mxu0 %v3687_v10  ;;  %3475 = vmatprep.subr.bf16.mxu1 %v3717_v37  ;;  %v4449_v48 = vrot.slane %v414_v46, %v4445_v45  ;;  %v4474_v5 = vrot.slane %v418_v61, %v4445_v45  ;;  %v3728_v61 = vld [vmem:[#allocation8 + $0x38] sm:$0xff]  }
  0x82   : > { %615 = vmatprep.subr.bf16.mxu0 %v3688_v11  ;;  %v3725_v11 = vld [vmem:[#allocation8 + $0x70] sm:$0xff]  }
  0x84   : > { %3476 = vmatpush3.bf16.msra.mxu1 %v3718_v38 }
  0x85   : > { %616 = vmatpush1.bf16.msra.mxu0 %v3690_v12  ;;  %3477 = vmatprep.subr.bf16.mxu1 %v3719_v39 }
  0x86   : > { %617 = vmatprep.subr.bf16.mxu0 %v3691_v13 }
  0x88   : > { %3478 = vmatpush3.bf16.msra.mxu1 %v3720_v41 }
  0x89   : > { %618 = vmatpush1.bf16.msra.mxu0 %v3693_v14  ;;  %3479 = vmatprep.subr.bf16.mxu1 %v3721_v47 }
  0x8a   : > { %619 = vmatprep.subr.bf16.mxu0 %v3694_v15 }
  0x8c   : > { %3480 = vmatpush3.bf16.msra.mxu1 %v3722_v49 }
  0x8d   : > { %620 = vmatpush1.bf16.msra.mxu0 %v3696_v16  ;;  %3481 = vmatprep.subr.bf16.mxu1 %v3723_v2 }
  0x90   : > { %638 = vmatmul.mubr.bf16.vlgmr.msra.gmra.mrb[0].mxu0 %v3697_v17  ;;  %3482 = vmatpush3.bf16.msra.mxu1 %v3724_v4 }
  0x91   : > { %647 = vmatprep.mubr.bf16.mxu0 %v4166_v0  ;;  %3483 = vmatprep.subr.bf16.mxu1 %v3725_v11 }
  0x98   : > { %648 = vmatmul.mubr.bf16.gmra.mrb[4].mxu0 %v3698_v18 }
  0x99   : > { %657 = vmatprep.mubr.bf16.mxu0 %v4166_v0 }
  0xa0   : > { %658 = vmatmul.mubr.bf16.gmra.mrb[8].mxu0 %v3699_v19 }
  0xa1   : > { %667 = vmatprep.mubr.bf16.mxu0 %v4166_v0 }
  0xa8   : > { %668 = vmatmul.mubr.bf16.gmra.mrb[12].mxu0 %v3700_v20 }
  0xa9   : > { %677 = vmatprep.mubr.bf16.mxu0 %v4166_v0 }
  0xb0   : > { %678 = vmatmul.mubr.bf16.gmra.mrb[16].mxu0 %v3701_v21 }
  0xb1   : > { %687 = vmatprep.mubr.bf16.mxu0 %v4166_v0 }
  0xb8   : > { %688 = vmatmul.mubr.bf16.gmra.mrb[20].mxu0 %v3702_v22 }
  0xb9   : > { %697 = vmatprep.mubr.bf16.mxu0 %v4166_v0 }
  0xc0   : > { %698 = vmatmul.mubr.bf16.gmra.mrb[24].mxu0 %v3703_v23 }
  0xc1   : > { %707 = vmatprep.mubr.bf16.mxu0 %v4166_v0 }
  0xc8   : > { %708 = vmatmul.mubr.bf16.gmra.mrb[28].mxu0 %v3704_v24 }
  0xc9   : > { %717 = vmatprep.mubr.bf16.mxu0 %v4166_v0 }
  0xd0   : > { %718 = vmatmul.mubr.bf16.gmra.mrb[32].mxu0 %v3705_v25 }
  0xd1   : > { %727 = vmatprep.mubr.bf16.mxu0 %v4166_v0 }
  0xd8   : > { %728 = vmatmul.mubr.bf16.gmra.mrb[36].mxu0 %v3706_v26 }
  0xd9   : > { %737 = vmatprep.mubr.bf16.mxu0 %v4166_v0 }
  0xe0   : > { %738 = vmatmul.mubr.bf16.gmra.mrb[40].mxu0 %v3707_v27 }
  0xe1   : > { %747 = vmatprep.mubr.bf16.mxu0 %v4166_v0 }
  0xe8   : > { %748 = vmatmul.mubr.bf16.gmra.mrb[44].mxu0 %v3708_v28 }
  0xe9   : > { %757 = vmatprep.mubr.bf16.mxu0 %v4166_v0 }
  0xf0   : > { %758 = vmatmul.mubr.bf16.gmra.mrb[48].mxu0 %v3709_v29 }
  0xf1   : > { %767 = vmatprep.mubr.bf16.mxu0 %v4166_v0 }
  0xf8   : > { %768 = vmatmul.mubr.bf16.gmra.mrb[52].mxu0 %v3710_v30 }
  0xf9   : > { %777 = vmatprep.mubr.bf16.mxu0 %v4166_v0 }
 0x100   : > { %778 = vmatmul.mubr.bf16.gmra.mrb[56].mxu0 %v3711_v31  ;;  %v3726_v31 = vld [vmem:[#allocation8 + $0x30] sm:$0xff]  }
 0x101   : > { %787 = vmatprep.mubr.bf16.mxu0 %v4166_v0  ;;  %3484 = vmatpush3.bf16.msra.mxu1 %v3726_v31 }
 0x108   : > { %788 = vmatmul.mubr.bf16.gmra.mrb[60].mxu0 %v3712_v32 }
 0x163   : > { %v639_v50 = vpop.f32.mrb[0].mxu0 }
 0x164   : > { %v4452_v51 = vadd.f32 %v639_v50, %v4449_v48  ;;  %v641_v52 = vpop.f32.mrb[1].mxu0  ;;  %v3727_v50 = vld [vmem:[#allocation8 + $0x78] sm:$0xff]  }
 0x165   : > { %v643_v53 = vpop.f32.mrb[2].mxu0  ;;  %v642_v36 = vadd.f32 %v641_v52, %v4474_v5  ;;  %3485 = vmatprep.subr.bf16.mxu1 %v3727_v50 }
 0x166   : > { %v4455_v54 = vmul.f32 0.70710677, %v4452_v51  ;;  %v4458_v56 = vadd.f32 %v643_v53, %v4449_v48  ;;  %v4460_v57 = vpop.f32.mrb[3].mxu0  ;;  %3486 = vmatpush3.bf16.msra.mxu1 %v3728_v61 }
 0x167   : > { %v4542_v52 = vmul.f32 0.70710677, %v642_v36  ;;  %v4585_v50 = vmul.f32 0.5, %v642_v36 }
 0x168   : > { %v4463_v58 = vand.u32 2147483647, %v4455_v54  ;;  %v4466_v59 = vmul.f32 0.70710677, %v4458_v56  ;;  %vm2142_vm0 = vcmp.lt.f32.partialorder %v4455_v54, 0.0 }
 0x169   : > { %6563 = vst [vmem:[#allocation15_spill] sm:$0xff] %v4542_v52  ;;  %6567 = vst [vmem:[#allocation19_spill] sm:$0xff] %v4585_v50 }
 0x16a   : > { %v990_v60 = vmul.f32 0.3275911, %v4463_v58  ;;  %v4470_v62 = vand.u32 2147483647, %v4466_v59  ;;  %vm2144_vm1 = vcmp.lt.f32.partialorder %v4466_v59, 0.0 }
 0x16b   : > { %v649_v1 = vpop.f32.mrb[4].mxu0 }
 0x16c   : > { %v1054_v63 = vadd.f32 1.0, %v990_v60  ;;  %v992_v0 = vmul.f32 0.3275911, %v4470_v62  ;;  %v651_v3 = vpop.f32.mrb[5].mxu0  ;;  %v4477_v9 = vadd.f32 %v649_v1, %v4449_v48 }
 0x16d   : > { %v653_v7 = vpop.f32.mrb[6].mxu0  ;;  %v4480_v10 = vadd.f32 %v651_v3, %v4474_v5  ;;  %v927_v3 = vand.u32 2147483647, %v4542_v52 }
 0x16e   : > { %3729 = vrcp.f32 %v1054_v63  ;;  %v1056_v6 = vadd.f32 1.0, %v992_v0  ;;  %v655_v8 = vpop.f32.mrb[7].mxu0  ;;  %v4483_v12 = vadd.f32 %v653_v7, %v4449_v48  ;;  %v4486_v13 = vmul.f32 0.70710677, %v4477_v9 }
 0x16f   : > { %v4489_v14 = vadd.f32 %v655_v8, %v4474_v5  ;;  %v4492_v15 = vmul.f32 0.70710677, %v4480_v10  ;;  %v646_v0 = vadd.f32 %v4460_v57, %v4474_v5  ;;  %v1758_v57 = vsub.f32 0.0, %v4463_v58 }
 0x170   : > { %3731 = vrcp.f32 %v1056_v6  ;;  %v4495_v16 = vmul.f32 0.70710677, %v4483_v12  ;;  %v4498_v18 = vand.u32 2147483647, %v4486_v13  ;;  %vm2146_vm2 = vcmp.lt.f32.partialorder %v4486_v13, 0.0 }
 0x171   : > { %v4501_v20 = vand.u32 2147483647, %v4492_v15  ;;  %v4508_v24 = vmul.f32 0.70710677, %v4489_v14  ;;  %v4593_v61 = vmul.f32 0.5, %v646_v0  ;;  %vm2147_vm3 = vcmp.lt.f32.partialorder %v4492_v15, 0.0 }
 0x172   : > { %v4504_v21 = vand.u32 2147483647, %v4495_v16  ;;  %v994_v23 = vmul.f32 0.3275911, %v4498_v18  ;;  %vm2148_vm4 = vcmp.lt.f32.partialorder %v4495_v16, 0.0 }
 0x173   : > { %v659_v17 = vpop.f32.mrb[8].mxu0  ;;  %v995_v25 = vmul.f32 0.3275911, %v4501_v20  ;;  %v4515_v29 = vand.u32 2147483647, %v4508_v24  ;;  %6569 = vst [vmem:[#allocation21_spill] sm:$0xff] %v4593_v61 }
 0x174   : > { %v661_v19 = vpop.f32.mrb[9].mxu0  ;;  %v996_v26 = vmul.f32 0.3275911, %v4504_v21  ;;  %v1058_v28 = vadd.f32 1.0, %v994_v23  ;;  %v4527_v41 = vadd.f32 %v659_v17, %v4449_v48  ;;  %v4566_v23 = vmul.f32 0.70710677, %v646_v0 }
 0x175   : > { %v663_v22 = vpop.f32.mrb[10].mxu0  ;;  %v1059_v33 = vadd.f32 1.0, %v995_v25  ;;  %v997_v35 = vmul.f32 0.3275911, %v4515_v29  ;;  %v4538_v47 = vadd.f32 %v661_v19, %v4474_v5  ;;  %vm2149_vm5 = vcmp.lt.f32.partialorder %v4508_v24, 0.0 }
 0x176   : > { %v4517_v30 = vpop.f32.mrb[11].mxu0  ;;  %3733 = vrcp.f32 %v1058_v28  ;;  %v1060_v34 = vadd.f32 1.0, %v996_v26  ;;  %v4535_v46 = vmul.f32 0.70710677, %v4527_v41  ;;  %6565 = vst [vmem:[#allocation17_spill] sm:$0xff] %v4566_v23  ;;  %v4573_v31 = vadd.f32 %v663_v22, %v4449_v48 }
 0x177   : > { %3735 = vrcp.f32 %v1059_v33  ;;  %v1061_v40 = vadd.f32 1.0, %v997_v35  ;;  %v4552_v1 = vmul.f32 0.70710677, %v4538_v47  ;;  %v4578_v33 = vmul.f32 0.5, %v4452_v51 }
 0x178   : > { %v4512_v27 = vpop.eup %3729  ;;  %3737 = vrcp.f32 %v1060_v34  ;;  %6562 = vst [vmem:[#allocation14_spill] sm:$0xff] %v4535_v46  ;;  %v4546_v60 = vand.u32 2147483647, %v4535_v46  ;;  %v991_v34 = vmul.f32 0.3275911, %v927_v3  ;;  %v1760_v35 = vsub.f32 0.0, %v4470_v62 }
 0x179   : > { %v1182_v32 = vmul.f32 1.0614054, %v4512_v27  ;;  %3739 = vrcp.f32 %v1061_v40  ;;  %6564 = vst [vmem:[#allocation16_spill] sm:$0xff] %v4552_v1  ;;  %v4557_v4 = vand.u32 2147483647, %v4552_v1  ;;  %v1822_v51 = vmul.f32 %v1758_v57, %v4463_v58 }
 0x17a   : > { %v4524_v38 = vpop.eup %3731  ;;  %v998_v2 = vmul.f32 0.3275911, %v4546_v60  ;;  %v4600_v50 = vmul.f32 0.70710677, %v4573_v31 }
 0x17b   : > { %v4522_v37 = vpop.f32.mrb[12].mxu0  ;;  %v1246_v39 = vadd.f32 -1.4531521, %v1182_v32  ;;  %v1184_v43 = vmul.f32 1.0614054, %v4524_v38 }
 0x17c   : > { %v4529_v42 = vpop.f32.mrb[13].mxu0  ;;  %v1062_v8 = vadd.f32 1.0, %v998_v2  ;;  %v999_v28 = vmul.f32 0.3275911, %v4557_v4  ;;  %6570 = vst [vmem:[#allocation22_spill] sm:$0xff] %v4600_v50 }
 0x17d   : > { %v4532_v44 = vpop.f32.mrb[14].mxu0  ;;  %v1248_v53 = vadd.f32 -1.4531521, %v1184_v43  ;;  %v1310_v55 = vmul.f32 %v4512_v27, %v1246_v39  ;;  %v4606_v61 = vand.u32 2147483647, %v4600_v50 }
 0x17e   : > { %v4540_v49 = vpop.f32.mrb[15].mxu0  ;;  %3741 = vrcp.f32 %v1062_v8  ;;  %v1063_v36 = vadd.f32 1.0, %v999_v28  ;;  %v1824_v8 = vmul.f32 %v1760_v35, %v4470_v62 }
 0x17f   : > { %v1312_v63 = vmul.f32 %v4524_v38, %v1248_v53  ;;  %v1374_v7 = vadd.f32 1.4214138, %v1310_v55  ;;  %v4588_v53 = vmul.f32 0.5, %v4458_v56  ;;  %v1759_v55 = vsub.f32 0.0, %v927_v3 }
 0x180   : > { %v4559_v6 = vpop.eup %3733  ;;  %v1055_v56 = vadd.f32 1.0, %v991_v34  ;;  %3743 = vrcp.f32 %v1063_v36  ;;  %v1000_v62 = vmul.f32 0.3275911, %v4606_v61 }
 0x181   : > { %v4563_v17 = vpop.eup %3735  ;;  %v1376_v19 = vadd.f32 1.4214138, %v1312_v63  ;;  %v1186_v26 = vmul.f32 1.0614054, %v4559_v6  ;;  %v1438_v43 = vmul.f32 %v4512_v27, %v1374_v7  ;;  %v929_v63 = vand.u32 2147483647, %v4566_v23 }
 0x182   : > { %v1187_v39 = vmul.f32 1.0614054, %v4563_v17  ;;  %v4582_v40 = vpop.eup %3737  ;;  %v1886_v23 = vmul.f32 1.442695, %v1822_v51  ;;  %v1823_v1 = vmul.f32 %v1759_v55, %v927_v3  ;;  %3745 = vrcp.f32 %v1055_v56 }
 0x183   : > { %v4561_v11 = vpop.f32.mrb[16].mxu0  ;;  %v4596_v2 = vpop.eup %3739  ;;  %v1440_v45 = vmul.f32 %v4524_v38, %v1376_v19  ;;  %v1250_v7 = vadd.f32 -1.4531521, %v1186_v26  ;;  %v1188_v58 = vmul.f32 1.0614054, %v4582_v40  ;;  %v1761_v26 = vsub.f32 0.0, %v929_v63 }
 0x184   : > { %v4568_v25 = vpop.f32.mrb[17].mxu0  ;;  %v1251_v52 = vadd.f32 -1.4531521, %v1187_v39  ;;  %v1502_v57 = vadd.f32 -0.28449672, %v1438_v43  ;;  %v1762_v43 = vsub.f32 0.0, %v4498_v18  ;;  %3747 = vpow2.f32 %v1886_v23 }
 0x185   : > { %v4575_v32 = vpop.f32.mrb[18].mxu0  ;;  %v1189_v0 = vmul.f32 1.0614054, %v4596_v2  ;;  %v993_v19 = vmul.f32 0.3275911, %v929_v63  ;;  %v1314_v34 = vmul.f32 %v4559_v6, %v1250_v7  ;;  %v1825_v36 = vmul.f32 %v1761_v26, %v929_v63 }
 0x186   : > { %6566 = vst [vmem:[#allocation18_spill] sm:$0xff] %v4575_v32  ;;  %v4590_v22 = vpop.f32.mrb[19].mxu0  ;;  %v1890_v39 = vmul.f32 1.442695, %v1824_v8  ;;  %v1315_v50 = vmul.f32 %v4563_v17, %v1251_v52  ;;  %v1252_v32 = vadd.f32 -1.4531521, %v1188_v58  ;;  %v1566_v3 = vmul.f32 %v4512_v27, %v1502_v57 }
 0x187   : > { %6568 = vst [vmem:[#allocation20_spill] sm:$0xff] %v4590_v22  ;;  %v1504_v22 = vadd.f32 -0.28449672, %v1440_v45  ;;  %v1253_v55 = vadd.f32 -1.4531521, %v1189_v0  ;;  %v1064_v45 = vadd.f32 1.0, %v1000_v62  ;;  %v1826_v56 = vmul.f32 %v1762_v43, %v4498_v18 }
 0x188   : > { %v1888_v7 = vmul.f32 1.442695, %v1823_v1  ;;  %v4622_v8 = vpop.eup %3741  ;;  %v1057_v52 = vadd.f32 1.0, %v993_v19  ;;  %v1378_v58 = vadd.f32 1.4214138, %v1314_v34  ;;  %3749 = vpow2.f32 %v1890_v39 }
 0x189   : > { %v1568_v46 = vmul.f32 %v4524_v38, %v1504_v22  ;;  %v1379_v57 = vadd.f32 1.4214138, %v1315_v50  ;;  %v1316_v0 = vmul.f32 %v4582_v40, %v1252_v32  ;;  %v1630_v1 = vadd.f32 0.2548296, %v1566_v3 }
 0x18a   : > { %v1317_v23 = vmul.f32 %v4596_v2, %v1253_v55  ;;  %v1765_v63 = vsub.f32 0.0, %v4515_v29  ;;  %3751 = vrcp.f32 %v1064_v45  ;;  %v1892_v22 = vmul.f32 1.442695, %v1825_v36 }
 0x18b   : > { %v4608_v28 = vpop.f32.mrb[20].mxu0  ;;  %3753 = vpow2.f32 %v1888_v7  ;;  %v1190_v34 = vmul.f32 1.0614054, %v4622_v8  ;;  %v1632_v50 = vadd.f32 0.2548296, %v1568_v46  ;;  %v4639_v32 = vmul.f32 0.5, %v4477_v9  ;;  %v4649_v7 = vpop.eup %3743 }
 0x18c   : > { %6571 = vst [vmem:[#allocation23_spill] sm:$0xff] %v4608_v28  ;;  %v4612_v35 = vpop.f32.mrb[21].mxu0  ;;  %v1442_v39 = vmul.f32 %v4559_v6, %v1378_v58  ;;  %v1894_v55 = vmul.f32 1.442695, %v1826_v56  ;;  %v4646_v45 = vmul.f32 0.5, %v4480_v10  ;;  %v1694_v46 = vmul.f32 %v4512_v27, %v1630_v1  ;;  %v4660_v56 = vpop.eup %3745 }
 0x18d   : > { %6572 = vst [vmem:[#allocation24_spill] sm:$0xff] %v4612_v35  ;;  %v4616_v51 = vpop.f32.mrb[22].mxu0  ;;  %v1763_v35 = vsub.f32 0.0, %v4501_v20  ;;  %v1381_v36 = vadd.f32 1.4214138, %v1317_v23  ;;  %v1829_v9 = vmul.f32 %v1765_v63, %v4515_v29  ;;  %v4655_v58 = vadd.f32 %v4517_v30, %v4474_v5  ;;  %6577 = vst [vmem:[#allocation29_spill] sm:$0xff] %v4660_v56 }
 0x18e   : > { %6573 = vst [vmem:[#allocation25_spill] sm:$0xff] %v4616_v51  ;;  %v4619_v28 = vpop.f32.mrb[23].mxu0  ;;  %v1764_v51 = vsub.f32 0.0, %v4504_v21  ;;  %3755 = vrcp.f32 %v1057_v52  ;;  %v1254_v10 = vadd.f32 -1.4531521, %v1190_v34  ;;  %v3748_v1 = vpop.eup %3747 }
 0x18f   : > { %v1827_v19 = vmul.f32 %v1763_v35, %v4501_v20  ;;  %v1443_v20 = vmul.f32 %v4563_v17, %v1379_v57  ;;  %v1380_v35 = vadd.f32 1.4214138, %v1316_v0  ;;  %v1696_v57 = vmul.f32 %v4524_v38, %v1632_v50 }
 0x190   : > { %v1828_v43 = vmul.f32 %v1764_v51, %v4504_v21  ;;  %v4658_v51 = vmul.f32 0.5, %v4483_v12  ;;  %3757 = vpow2.f32 %v1892_v22  ;;  %v1506_v0 = vadd.f32 -0.28449672, %v1442_v39 }
 0x191   : > { %v1896_v21 = vmul.f32 1.442695, %v1827_v19  ;;  %3759 = vpow2.f32 %v1894_v55  ;;  %v1507_v29 = vadd.f32 -0.28449672, %v1443_v20  ;;  %v1444_v23 = vmul.f32 %v4582_v40, %v1380_v35 }
 0x192   : > { %v1898_v27 = vmul.f32 1.442695, %v1828_v43  ;;  %v1191_v30 = vmul.f32 1.0614054, %v4649_v7  ;;  %v2014_v63 = vmul.f32 %v3748_v1, %v1694_v46  ;;  %v1445_v12 = vmul.f32 %v4596_v2, %v1381_v36  ;;  %v3750_v38 = vpop.eup %3749 }
 0x193   : > { %v4628_v62 = vpop.f32.mrb[24].mxu0  ;;  %v1900_v19 = vmul.f32 1.442695, %v1829_v9  ;;  %v4669_v34 = vmul.f32 0.70710677, %v4655_v58  ;;  %3761 = vpow2.f32 %v1896_v21  ;;  %v4672_v22 = vmul.f32 0.5, %v4489_v14 }
 0x194   : > { %v4632_v26 = vpop.f32.mrb[25].mxu0  ;;  %v4675_v50 = vmul.f32 0.5, %v4527_v41  ;;  %v1318_v39 = vmul.f32 %v4622_v8, %v1254_v10  ;;  %v4678_v43 = vpop.eup %3751  ;;  %v2016_v55 = vmul.f32 %v3750_v38, %v1696_v57  ;;  %v1570_v20 = vmul.f32 %v4559_v6, %v1506_v0 }
 0x195   : > { %6574 = vst [vmem:[#allocation26_spill] sm:$0xff] %v4632_v26  ;;  %v4636_v18 = vpop.f32.mrb[26].mxu0  ;;  %3763 = vpow2.f32 %v1898_v27  ;;  %v1766_v35 = vsub.f32 0.0, %v4546_v60  ;;  %v4682_v46 = vpop.eup %3753  ;;  %v1571_v14 = vmul.f32 %v4563_v17, %v1507_v29  ;;  %v1508_v36 = vadd.f32 -0.28449672, %v1444_v23 }
 0x196   : > { %6575 = vst [vmem:[#allocation27_spill] sm:$0xff] %v4636_v18  ;;  %v4643_v3 = vpop.f32.mrb[27].mxu0  ;;  %6579 = vst [vmem:[#allocation31_spill] sm:$0xff] %v4682_v46  ;;  %v4687_v41 = vmul.f32 0.5, %v4538_v47  ;;  %v1255_v9 = vadd.f32 -1.4531521, %v1191_v30  ;;  %3765 = vpow2.f32 %v1900_v19  ;;  %v4697_v29 = vadd.f32 %v4522_v37, %v4449_v48 }
 0x197   : > { %6576 = vst [vmem:[#allocation28_spill] sm:$0xff] %v4643_v3  ;;  %v2078_v21 = vsub.f32 1.0, %v2014_v63  ;;  %v1509_v10 = vadd.f32 -0.28449672, %v1445_v12  ;;  %v4690_v57 = vand.u32 2147483647, %v4669_v34  ;;  %v1830_v30 = vmul.f32 %v1766_v35, %v4546_v60 }
 0x198   : > { %v1382_v0 = vadd.f32 1.4214138, %v1318_v39  ;;  %v1767_v27 = vsub.f32 0.0, %v4557_v4  ;;  %v1192_v1 = vmul.f32 1.0614054, %v4678_v43  ;;  %v2080_v47 = vsub.f32 1.0, %v2016_v55  ;;  %v4701_v12 = vpop.eup %3755 }
 0x199   : > { %v1634_v23 = vadd.f32 0.2548296, %v1570_v20  ;;  %v1001_v63 = vmul.f32 0.3275911, %v4690_v57  ;;  %6580 = vst [vmem:[#allocation32_spill] sm:$0xff] %v4701_v12  ;;  %v1572_v38 = vmul.f32 %v4582_v40, %v1508_v36  ;;  %v1319_v39 = vmul.f32 %v4649_v7, %v1255_v9 }
 0x19a   : > { %v1635_v19 = vadd.f32 0.2548296, %v1571_v14  ;;  %v4706_v46 = vmul.f32 0.5, %v4573_v31  ;;  %v4708_v56 = vpop.eup %3757  ;;  %v2206_v37 = vsub.f32 0.0, %v2078_v21  ;;  %v1573_v55 = vmul.f32 %v4596_v2, %v1509_v10 }
 0x19b   : > { %v4665_v52 = vpop.f32.mrb[28].mxu0  ;;  %6581 = vst [vmem:[#allocation33_spill] sm:$0xff] %v4708_v56  ;;  %v1065_v20 = vadd.f32 1.0, %v1001_v63  ;;  %v4713_v60 = vadd.f32 %v4529_v42, %v4474_v5  ;;  %v3760_v35 = vpop.eup %3759  ;;  %v1446_v14 = vmul.f32 %v4622_v8, %v1382_v0  ;;  %v1831_v36 = vmul.f32 %v1767_v27, %v4557_v4 }
 0x19c   : > { %6578 = vst [vmem:[#allocation30_spill] sm:$0xff] %v4665_v52  ;;  %v1256_v12 = vadd.f32 -1.4531521, %v1192_v1  ;;  %v1768_v9 = vsub.f32 0.0, %v4606_v61  ;;  %v2208_v31 = vsub.f32 0.0, %v2080_v47  ;;  %v1698_v52 = vmul.f32 %v4559_v6, %v1634_v23 }
 0x19d   : > { %3767 = vrcp.f32 %v1065_v20  ;;  %v4720_v56 = vmul.f32 0.70710677, %v4697_v29  ;;  %v3762_v10 = vpop.eup %3761  ;;  %v1699_v63 = vmul.f32 %v4563_v17, %v1635_v19  ;;  %v1636_v42 = vadd.f32 0.2548296, %v1572_v38 }
 0x19e   : > { %v1902_v3 = vmul.f32 1.442695, %v1830_v30  ;;  %v1383_v18 = vadd.f32 1.4214138, %v1319_v39  ;;  %v2270_v4 = vsel %vm2142_vm0, %v2206_v37, %v2078_v21  ;;  %v1637_v0 = vadd.f32 0.2548296, %v1573_v55 }
 0x19f   : > { %v3764_v26 = vpop.eup %3763  ;;  %v4726_v27 = vand.u32 2147483647, %v4720_v56  ;;  %v4729_v6 = vmul.f32 0.70710677, %v4713_v60  ;;  %v1510_v1 = vadd.f32 -0.28449672, %v1446_v14  ;;  %v1320_v20 = vmul.f32 %v4678_v43, %v1256_v12 }
 0x1a0   : > { %v1904_v23 = vmul.f32 1.442695, %v1831_v36  ;;  %v1832_v17 = vmul.f32 %v1768_v9, %v4606_v61  ;;  %v3766_v19 = vpop.eup %3765  ;;  %v2272_v30 = vsel %vm2144_vm1, %v2208_v31, %v2080_v47  ;;  %v2018_v38 = vmul.f32 %v3760_v35, %v1698_v52 }
 0x1a1   : > { %v1002_v54 = vmul.f32 0.3275911, %v4726_v27  ;;  %v4737_v21 = vand.u32 2147483647, %v4729_v6  ;;  %v2334_v39 = vadd.f32 1.0, %v2270_v4  ;;  %v2019_v37 = vmul.f32 %v3762_v10, %v1699_v63 }
 0x1a2   : > { %v1447_v55 = vmul.f32 %v4649_v7, %v1383_v18  ;;  %v4742_v14 = vadd.f32 %v4532_v44, %v4449_v48  ;;  %v1700_v61 = vmul.f32 %v4582_v40, %v1636_v42  ;;  %v1701_v12 = vmul.f32 %v4596_v2, %v1637_v0 }
 0x1a3   : > { %v1066_v59 = vadd.f32 1.0, %v1002_v54  ;;  %v1003_v52 = vmul.f32 0.3275911, %v4737_v21  ;;  %v2336_v47 = vadd.f32 1.0, %v2272_v30  ;;  %v1574_v35 = vmul.f32 %v4622_v8, %v1510_v1 }
 0x1a4   : > { %3769 = vpow2.f32 %v1902_v3  ;;  %v1384_v36 = vadd.f32 1.4214138, %v1320_v20  ;;  %v2082_v9 = vsub.f32 1.0, %v2018_v38  ;;  %v1906_v18 = vmul.f32 1.442695, %v1832_v17 }
 0x1a5   : > { %3771 = vrcp.f32 %v1066_v59  ;;  %v1067_v44 = vadd.f32 1.0, %v1003_v52  ;;  %v2083_v31 = vsub.f32 1.0, %v2019_v37  ;;  %v1511_v40 = vadd.f32 -0.28449672, %v1447_v55 }
 0x1a6   : > { %v4751_v2 = vmul.f32 0.70710677, %v4742_v14  ;;  %v4755_v10 = vadd.f32 %v4540_v49, %v4474_v5  ;;  %v4760_v3 = vmul.f32 %v2334_v39, %v4578_v33  ;;  %v2020_v42 = vmul.f32 %v3764_v26, %v1700_v61 }
 0x1a7   : > { %v4757_v63 = vpop.eup %3767  ;;  %v2021_v4 = vmul.f32 %v3766_v19, %v1701_v12  ;;  %3773 = vpow2.f32 %v1904_v23  ;;  %v1638_v0 = vadd.f32 0.2548296, %v1574_v35  ;;  %v1448_v1 = vmul.f32 %v4678_v43, %v1384_v36  ;;  %v4796_v35 = vpop.f32.mrb[29].mxu0 }
 0x1a8   : > { %6582 = vst [vmem:[#allocation34_spill] sm:$0xff] %v4760_v3  ;;  %3775 = vrcp.f32 %v1067_v44  ;;  %v4765_v20 = vadd.f32 %v4561_v11, %v4449_v48  ;;  %v4768_v17 = vmul.f32 %v2336_v47, %v4588_v53  ;;  %v1193_v49 = vmul.f32 1.0614054, %v4757_v63  ;;  %6584 = vst [vmem:[#allocation36_spill] sm:$0xff] %v4796_v35 }
 0x1a9   : > { %v4772_v30 = vand.u32 2147483647, %v4751_v2  ;;  %v4775_v33 = vmul.f32 0.70710677, %v4755_v10  ;;  %v2210_v26 = vsub.f32 0.0, %v2082_v9  ;;  %v2211_v23 = vsub.f32 0.0, %v2083_v31 }
 0x1aa   : > { %6583 = vst [vmem:[#allocation35_spill] sm:$0xff] %v4768_v17  ;;  %v1575_v19 = vmul.f32 %v4649_v7, %v1511_v40  ;;  %3777 = vpow2.f32 %v1906_v18  ;;  %v2084_v11 = vsub.f32 1.0, %v2020_v42  ;;  %v2085_v38 = vsub.f32 1.0, %v2021_v4  ;;  %v4805_v40 = vpop.f32.mrb[30].mxu0 }
 0x1ab   : > { %v1004_v53 = vmul.f32 0.3275911, %v4772_v30  ;;  %v4782_v54 = vand.u32 2147483647, %v4775_v33  ;;  %v1702_v39 = vmul.f32 %v4622_v8, %v1638_v0  ;;  %v1512_v37 = vadd.f32 -0.28449672, %v1448_v1 }
 0x1ac   : > { %v4786_v55 = vmul.f32 0.5, %v4655_v58  ;;  %v4789_v61 = vmul.f32 0.70710677, %v4765_v20  ;;  %v1257_v12 = vadd.f32 -1.4531521, %v1193_v49  ;;  %v4794_v47 = vadd.f32 %v4568_v25, %v4474_v5  ;;  %6585 = vst [vmem:[#allocation37_spill] sm:$0xff] %v4805_v40 }
 0x1ad   : > { %v1068_v59 = vadd.f32 1.0, %v1004_v53  ;;  %v1005_v52 = vmul.f32 0.3275911, %v4782_v54  ;;  %v2274_v8 = vsel %vm2146_vm2, %v2210_v26, %v2082_v9  ;;  %v2275_v58 = vsel %vm2147_vm3, %v2211_v23, %v2083_v31  ;;  %v4809_v1 = vpop.f32.mrb[31].mxu0 }
 0x1ae   : > { %v3770_v36 = vpop.eup %3769  ;;  %v1639_v18 = vadd.f32 0.2548296, %v1575_v19  ;;  %v4803_v44 = vand.u32 2147483647, %v4789_v61  ;;  %v2212_v4 = vsub.f32 0.0, %v2084_v11  ;;  %v2213_v25 = vsub.f32 0.0, %v2085_v38 }
 0x1af   : > { %v4807_v42 = vpop.eup %3771  ;;  %3779 = vrcp.f32 %v1068_v59  ;;  %v1069_v0 = vadd.f32 1.0, %v1005_v52  ;;  %6586 = vst [vmem:[#allocation38_spill] sm:$0xff] %v4809_v1  ;;  %v4811_v49 = vmul.f32 %v3770_v36, %v1702_v39  ;;  %v1576_v13 = vmul.f32 %v4678_v43, %v1512_v37 }
 0x1b0   : > { %v1194_v15 = vmul.f32 1.0614054, %v4807_v42  ;;  %v1006_v9 = vmul.f32 0.3275911, %v4803_v44  ;;  %v2338_v26 = vadd.f32 1.0, %v2274_v8  ;;  %v1321_v23 = vmul.f32 %v4757_v63, %v1257_v12 }
 0x1b1   : > { %v3774_v31 = vpop.eup %3773  ;;  %v4818_v19 = vmul.f32 0.5, %v4697_v29  ;;  %v4821_v53 = vmul.f32 0.70710677, %v4794_v47  ;;  %v2339_v39 = vadd.f32 1.0, %v2275_v58  ;;  %v1703_v52 = vmul.f32 %v4649_v7, %v1639_v18  ;;  %v4836_v18 = vpop.f32.mrb[32].mxu0 }
 0x1b2   : > { %v4823_v59 = vpop.eup %3775  ;;  %v1258_v37 = vadd.f32 -1.4531521, %v1194_v15  ;;  %3781 = vrcp.f32 %v1069_v0  ;;  %v2276_v36 = vsel %vm2148_vm4, %v2212_v4, %v2084_v11  ;;  %v1070_v1 = vadd.f32 1.0, %v1006_v9  ;;  %6587 = vst [vmem:[#allocation39_spill] sm:$0xff] %v4836_v18  ;;  %v6588_v0 = vld [vmem:[#allocation14_spill] sm:$0xff] }
 0x1b3   : > { %v1195_v8 = vmul.f32 1.0614054, %v4823_v59  ;;  %v4830_v12 = vand.u32 2147483647, %v4821_v53  ;;  %v2277_v40 = vsel %vm2149_vm5, %v2213_v25, %v2085_v38  ;;  %v2086_v17 = vsub.f32 1.0, %v4811_v49  ;;  %v6590_v25 = vld [vmem:[#allocation18_spill] sm:$0xff] }
 0x1b4   : > { %v3778_v29 = vpop.eup %3777  ;;  %v1640_v58 = vadd.f32 0.2548296, %v1576_v13  ;;  %v1769_v7 = vsub.f32 0.0, %v4690_v57  ;;  %vm2150_vm6 = vcmp.lt.f32.partialorder %v6588_v0, 0.0  ;;  %v1385_v16 = vadd.f32 1.4214138, %v1321_v23 }
 0x1b5   : > { %v1322_v11 = vmul.f32 %v4807_v42, %v1258_v37  ;;  %3783 = vrcp.f32 %v1070_v1  ;;  %v1007_v4 = vmul.f32 0.3275911, %v4830_v12  ;;  %v4842_v15 = vmul.f32 %v2338_v26, %v4639_v32  ;;  %v4848_v13 = vpop.f32.mrb[33].mxu0  ;;  %v6593_v1 = vld [vmem:[#allocation20_spill] sm:$0xff] }
 0x1b6   : > { %v2023_v24 = vmul.f32 %v3774_v31, %v1703_v52  ;;  %v1259_v38 = vadd.f32 -1.4531521, %v1195_v8  ;;  %v4846_v49 = vadd.f32 %v6590_v25, %v4449_v48  ;;  %6591 = vst [vmem:[#allocation18_spill] sm:$0xff] %v4848_v13  ;;  %v4851_v9 = vmul.f32 %v2339_v39, %v4646_v45  ;;  %v4857_v3 = vpop.f32.mrb[34].mxu0  ;;  %v6596_v45 = vld [vmem:[#allocation16_spill] sm:$0xff] }
 0x1b7   : > { %6589 = vst [vmem:[#allocation14_spill] sm:$0xff] %v4842_v15  ;;  %v2340_v23 = vadd.f32 1.0, %v2276_v36  ;;  %v1071_v18 = vadd.f32 1.0, %v1007_v4  ;;  %v4855_v37 = vadd.f32 %v6593_v1, %v4474_v5  ;;  %6594 = vst [vmem:[#allocation20_spill] sm:$0xff] %v4857_v3  ;;  %v2341_v32 = vadd.f32 1.0, %v2277_v40  ;;  %v4861_v8 = vpop.f32.mrb[35].mxu0 }
 0x1b8   : > { %6592 = vst [vmem:[#allocation40_spill] sm:$0xff] %v4851_v9  ;;  %v2214_v31 = vsub.f32 0.0, %v2086_v17  ;;  %v1704_v26 = vmul.f32 %v4678_v43, %v1640_v58  ;;  %v1833_v52 = vmul.f32 %v1769_v7, %v4690_v57  ;;  %6595 = vst [vmem:[#allocation41_spill] sm:$0xff] %v4861_v8  ;;  %vm2151_vm7 = vcmp.lt.f32.partialorder %v6596_v45, 0.0  ;;  %v4890_v15 = vpop.f32.mrb[36].mxu0 }
 0x1b9   : > { %v4863_v25 = vpop.eup %3779  ;;  %v1449_v39 = vmul.f32 %v4757_v63, %v1385_v16  ;;  %v1386_v36 = vadd.f32 1.4214138, %v1322_v11  ;;  %3785 = vrcp.f32 %v1071_v18  ;;  %v4868_v4 = vmul.f32 0.70710677, %v4846_v49  ;;  %6601 = vst [vmem:[#allocation45_spill] sm:$0xff] %v4890_v15 }
 0x1ba   : > { %v2087_v1 = vsub.f32 1.0, %v2023_v24  ;;  %v1770_v40 = vsub.f32 0.0, %v4726_v27  ;;  %v1323_v43 = vmul.f32 %v4823_v59, %v1259_v38  ;;  %v1196_v57 = vmul.f32 1.0614054, %v4863_v25 }
 0x1bb   : > { %6597 = vst [vmem:[#allocation16_spill] sm:$0xff] %v4868_v4  ;;  %v4874_v58 = vmul.f32 %v2340_v23, %v4658_v51  ;;  %v4877_v7 = vmul.f32 0.5, %v4713_v60  ;;  %v4880_v16 = vand.u32 2147483647, %v4868_v4  ;;  %v4883_v18 = vmul.f32 0.70710677, %v4855_v37 }
 0x1bc   : > { %v4885_v11 = vpop.eup %3781  ;;  %v4888_v24 = vmul.f32 %v2341_v32, %v4672_v22  ;;  %v2024_v38 = vmul.f32 %v3778_v29, %v1704_v26  ;;  %v1908_v8 = vmul.f32 1.442695, %v1833_v52  ;;  %v1260_v3 = vadd.f32 -1.4531521, %v1196_v57  ;;  %v6602_v29 = vld [vmem:[#allocation22_spill] sm:$0xff]  ;;  %v4906_v57 = vpop.f32.mrb[37].mxu0 }
 0x1bd   : > { %6598 = vst [vmem:[#allocation42_spill] sm:$0xff] %v4874_v58  ;;  %6599 = vst [vmem:[#allocation43_spill] sm:$0xff] %v4883_v18  ;;  %v1513_v51 = vadd.f32 -0.28449672, %v1449_v39  ;;  %v1450_v60 = vmul.f32 %v4807_v42, %v1386_v36  ;;  %v1197_v23 = vmul.f32 1.0614054, %v4885_v11  ;;  %v2278_v13 = vsel %vm2150_vm6, %v2214_v31, %v2086_v17 }
 0x1be   : > { %6600 = vst [vmem:[#allocation44_spill] sm:$0xff] %v4888_v24  ;;  %v1008_v58 = vmul.f32 0.3275911, %v4880_v16  ;;  %v2215_v9 = vsub.f32 0.0, %v2087_v1  ;;  %v1834_v35 = vmul.f32 %v1770_v40, %v4726_v27  ;;  %v1387_v22 = vadd.f32 1.4214138, %v1323_v43 }
 0x1bf   : > { %v4898_v32 = vpop.eup %3783  ;;  %vm2152_vm8 = vcmp.lt.f32.partialorder %v6602_v29, 0.0  ;;  %v1771_v26 = vsub.f32 0.0, %v4737_v21  ;;  %v1324_v52 = vmul.f32 %v4863_v25, %v1260_v3  ;;  %v4904_v36 = vand.u32 2147483647, %v4883_v18  ;;  %6603 = vst [vmem:[#allocation22_spill] sm:$0xff] %v4906_v57 }
 0x1c0   : > { %v1072_v39 = vadd.f32 1.0, %v1008_v58  ;;  %v2088_v0 = vsub.f32 1.0, %v2024_v38  ;;  %3787 = vpow2.f32 %v1908_v8  ;;  %v1261_v17 = vadd.f32 -1.4531521, %v1197_v23 }
 0x1c1   : > { %v1198_v27 = vmul.f32 1.0614054, %v4898_v32  ;;  %v2342_v31 = vadd.f32 1.0, %v2278_v13  ;;  %v1577_v40 = vmul.f32 %v4757_v63, %v1513_v51  ;;  %v1514_v43 = vadd.f32 -0.28449672, %v1450_v60 }
 0x1c2   : > { %3789 = vrcp.f32 %v1072_v39  ;;  %v2279_v15 = vsel %vm2151_vm7, %v2215_v9, %v2087_v1  ;;  %v1910_v3 = vmul.f32 1.442695, %v1834_v35  ;;  %v1451_v58 = vmul.f32 %v4823_v59, %v1387_v22 }
 0x1c3   : > { %v1772_v24 = vsub.f32 0.0, %v4772_v30  ;;  %v4914_v18 = vpop.eup %3785  ;;  %v1835_v8 = vmul.f32 %v1771_v26, %v4737_v21  ;;  %v1388_v38 = vadd.f32 1.4214138, %v1324_v52  ;;  %v1262_v23 = vadd.f32 -1.4531521, %v1198_v27 }
 0x1c4   : > { %v1009_v13 = vmul.f32 0.3275911, %v4904_v36  ;;  %v2216_v57 = vsub.f32 0.0, %v2088_v0  ;;  %v1325_v51 = vmul.f32 %v4885_v11, %v1261_v17  ;;  %v1773_v60 = vsub.f32 0.0, %v4782_v54 }
 0x1c5   : > { %v1199_v9 = vmul.f32 1.0614054, %v4914_v18  ;;  %v4922_v35 = vmul.f32 %v2342_v31, %v4675_v50  ;;  %v1641_v45 = vadd.f32 0.2548296, %v1577_v40  ;;  %v1578_v1 = vmul.f32 %v4807_v42, %v1514_v43 }
 0x1c6   : > { %v1073_v22 = vadd.f32 1.0, %v1009_v13  ;;  %v2343_v39 = vadd.f32 1.0, %v2279_v15  ;;  %3791 = vpow2.f32 %v1910_v3  ;;  %v1515_v21 = vadd.f32 -0.28449672, %v1451_v58 }
 0x1c7   : > { %v1263_v26 = vadd.f32 -1.4531521, %v1199_v9  ;;  %v1912_v52 = vmul.f32 1.442695, %v1835_v8  ;;  %v4926_v27 = vmul.f32 0.5, %v4742_v14  ;;  %v1452_v17 = vmul.f32 %v4863_v25, %v1388_v38 }
 0x1c8   : > { %v1326_v4 = vmul.f32 %v4898_v32, %v1262_v23  ;;  %v2280_v50 = vsel %vm2152_vm8, %v2216_v57, %v2088_v0  ;;  %v1836_v31 = vmul.f32 %v1772_v24, %v4772_v30  ;;  %v1389_v40 = vadd.f32 1.4214138, %v1325_v51  ;;  %v6604_v57 = vld [vmem:[#allocation23_spill] sm:$0xff]  ;;  %v4950_v23 = vpop.f32.mrb[38].mxu0 }
 0x1c9   : > { %v1837_v43 = vmul.f32 %v1773_v60, %v4782_v54  ;;  %v1705_v15 = vmul.f32 %v4757_v63, %v1641_v45  ;;  %v1642_v3 = vadd.f32 0.2548296, %v1578_v1  ;;  %v1774_v58 = vsub.f32 0.0, %v4803_v44 }
 0x1ca   : > { %3793 = vrcp.f32 %v1073_v22  ;;  %v3788_v14 = vpop.eup %3787  ;;  %v4937_v8 = vmul.f32 %v2343_v39, %v4687_v41  ;;  %v1579_v38 = vmul.f32 %v4823_v59, %v1515_v21  ;;  %v4941_v29 = vmul.f32 0.5, %v4755_v10 }
 0x1cb   : > { %v1327_v30 = vmul.f32 %v4914_v18, %v1263_v26  ;;  %3795 = vpow2.f32 %v1912_v52  ;;  %v1516_v54 = vadd.f32 -0.28449672, %v1452_v17  ;;  %v1390_v63 = vadd.f32 1.4214138, %v1326_v4 }
 0x1cc   : > { %v4944_v24 = vpop.eup %3789  ;;  %v4948_v0 = vadd.f32 %v6604_v57, %v4449_v48  ;;  %v2344_v41 = vadd.f32 1.0, %v2280_v50  ;;  %v1914_v13 = vmul.f32 1.442695, %v1836_v31  ;;  %v1453_v51 = vmul.f32 %v4885_v11, %v1389_v40  ;;  %v6606_v57 = vld [vmem:[#allocation24_spill] sm:$0xff] }
 0x1cd   : > { %v1916_v60 = vmul.f32 1.442695, %v1837_v43  ;;  %v2025_v10 = vmul.f32 %v3788_v14, %v1705_v15  ;;  %v1706_v9 = vmul.f32 %v4807_v42, %v1642_v3  ;;  %v1838_v45 = vmul.f32 %v1774_v58, %v4803_v44 }
 0x1ce   : > { %v1200_v1 = vmul.f32 1.0614054, %v4944_v24  ;;  %v1643_v22 = vadd.f32 0.2548296, %v1579_v38  ;;  %v4957_v4 = vmul.f32 0.5, %v4765_v20  ;;  %v1775_v21 = vsub.f32 0.0, %v4830_v12 }
 0x1cf   : > { %v1391_v39 = vadd.f32 1.4214138, %v1327_v30  ;;  %v1580_v26 = vmul.f32 %v4863_v25, %v1516_v54  ;;  %v1454_v52 = vmul.f32 %v4898_v32, %v1390_v63  ;;  %v4963_v17 = vmul.f32 0.5, %v4794_v47  ;;  %v4975_v47 = vpop.f32.mrb[39].mxu0 }
 0x1d0   : > { %v4966_v42 = vmul.f32 0.70710677, %v4948_v0  ;;  %v3792_v44 = vpop.eup %3791  ;;  %v4969_v50 = vmul.f32 %v2344_v41, %v4706_v46  ;;  %vm2153_vm9 = vcmp.lt.f32.partialorder %v4669_v34, 0.0  ;;  %3797 = vpow2.f32 %v1914_v13  ;;  %6605 = vst [vmem:[#allocation23_spill] sm:$0xff] %v4975_v47 }
 0x1d1   : > { %v1517_v20 = vadd.f32 -0.28449672, %v1453_v51  ;;  %v1264_v31 = vadd.f32 -1.4531521, %v1200_v1  ;;  %v2089_v40 = vsub.f32 1.0, %v2025_v10  ;;  %v2026_v43 = vmul.f32 %v3792_v44, %v1706_v9 }
 0x1d2   : > { %v1918_v15 = vmul.f32 1.442695, %v1838_v45  ;;  %v4973_v3 = vand.u32 2147483647, %v4966_v42  ;;  %v1707_v58 = vmul.f32 %v4823_v59, %v1643_v22  ;;  %3799 = vpow2.f32 %v1916_v60 }
 0x1d3   : > { %v1455_v14 = vmul.f32 %v4914_v18, %v1391_v39  ;;  %v1839_v46 = vmul.f32 %v1775_v21, %v4830_v12  ;;  %v1644_v30 = vadd.f32 0.2548296, %v1580_v26  ;;  %v1518_v54 = vadd.f32 -0.28449672, %v1454_v52 }
 0x1d4   : > { %v4980_v38 = vpop.eup %3793  ;;  %v1010_v63 = vmul.f32 0.3275911, %v4973_v3  ;;  %v4985_v41 = vadd.f32 %v6606_v57, %v4474_v5  ;;  %vm2154_vm10 = vcmp.lt.f32.partialorder %v4720_v56, 0.0  ;;  %v1581_v13 = vmul.f32 %v4885_v11, %v1517_v20 }
 0x1d5   : > { %v1328_v59 = vmul.f32 %v4944_v24, %v1264_v31  ;;  %v1776_v51 = vsub.f32 0.0, %v4880_v16  ;;  %v1201_v12 = vmul.f32 1.0614054, %v4980_v38  ;;  %v3796_v60 = vpop.eup %3795  ;;  %v2217_v10 = vsub.f32 0.0, %v2089_v40 }
 0x1d6   : > { %v2090_v9 = vsub.f32 1.0, %v2026_v43  ;;  %3801 = vpow2.f32 %v1918_v15  ;;  %v1074_v45 = vadd.f32 1.0, %v1010_v63  ;;  %v2027_v1 = vmul.f32 %v3796_v60, %v1707_v58 }
 0x1d7   : > { %v1519_v22 = vadd.f32 -0.28449672, %v1455_v14  ;;  %v1920_v39 = vmul.f32 1.442695, %v1839_v46  ;;  %v1265_v21 = vadd.f32 -1.4531521, %v1201_v12  ;;  %v1708_v26 = vmul.f32 %v4863_v25, %v1644_v30 }
 0x1d8   : > { %v1582_v52 = vmul.f32 %v4898_v32, %v1518_v54  ;;  %3803 = vrcp.f32 %v1074_v45  ;;  %v4995_v44 = vmul.f32 0.70710677, %v4985_v41  ;;  %v1645_v20 = vadd.f32 0.2548296, %v1581_v13 }
 0x1d9   : > { %v4998_v31 = vmul.f32 0.5, %v4846_v49  ;;  %v1392_v57 = vadd.f32 1.4214138, %v1328_v59  ;;  %v1840_v43 = vmul.f32 %v1776_v51, %v4880_v16  ;;  %v2281_v15 = vsel %vm2153_vm9, %v2217_v10, %v2089_v40  ;;  %v6607_v16 = vld [vmem:[#allocation25_spill] sm:$0xff] }
 0x1da   : > { %v2218_v58 = vsub.f32 0.0, %v2090_v9  ;;  %vm2155_vm11 = vcmp.lt.f32.partialorder %v4729_v6, 0.0  ;;  %v5005_v25 = vmul.f32 0.5, %v4855_v37  ;;  %v5008_v14 = vand.u32 2147483647, %v4995_v44  ;;  %v3798_v46 = vpop.eup %3797 }
 0x1db   : > { %v2091_v30 = vsub.f32 1.0, %v2027_v1  ;;  %v1583_v49 = vmul.f32 %v4914_v18, %v1519_v22  ;;  %v1329_v54 = vmul.f32 %v4980_v38, %v1265_v21  ;;  %v5014_v63 = vadd.f32 %v6607_v16, %v4449_v48  ;;  %v5027_v21 = vpop.f32.mrb[40].mxu0 }
 0x1dc   : > { %v5016_v34 = vmul.f32 %v3798_v46, %v1708_v26  ;;  %v1646_v40 = vadd.f32 0.2548296, %v1582_v52  ;;  %3805 = vpow2.f32 %v1920_v39  ;;  %v1011_v37 = vmul.f32 0.3275911, %v5008_v14  ;;  %v3800_v13 = vpop.eup %3799  ;;  %6608 = vst [vmem:[#allocation24_spill] sm:$0xff] %v5027_v21 }
 0x1dd   : > { %v2345_v59 = vadd.f32 1.0, %v2281_v15  ;;  %v1709_v51 = vmul.f32 %v4885_v11, %v1645_v20  ;;  %v1456_v12 = vmul.f32 %v4944_v24, %v1392_v57  ;;  %v1922_v60 = vmul.f32 1.442695, %v1840_v43 }
 0x1de   : > { %v2282_v10 = vsel %vm2154_vm10, %v2218_v58, %v2090_v9  ;;  %v1777_v45 = vsub.f32 0.0, %v4904_v36  ;;  %v1075_v1 = vadd.f32 1.0, %v1011_v37  ;;  %v5025_v22 = vmul.f32 0.70710677, %v5014_v63  ;;  %v5057_v37 = vpop.f32.mrb[41].mxu0 }
 0x1df   : > { %v2219_v39 = vsub.f32 0.0, %v2091_v30  ;;  %v1647_v26 = vadd.f32 0.2548296, %v1583_v49  ;;  %v1393_v52 = vadd.f32 1.4214138, %v1329_v54  ;;  %v5031_v11 = vadd.f32 %v4619_v28, %v4474_v5  ;;  %6609 = vst [vmem:[#allocation25_spill] sm:$0xff] %v5057_v37 }
 0x1e0   : > { %v3802_v20 = vpop.eup %3801  ;;  %v2092_v57 = vsub.f32 1.0, %v5016_v34  ;;  %vm2156_vm12 = vcmp.lt.f32.partialorder %v4751_v2, 0.0  ;;  %v1710_v56 = vmul.f32 %v4898_v32, %v1646_v40  ;;  %3807 = vrcp.f32 %v1075_v1 }
 0x1e1   : > { %v5037_v9 = vand.u32 2147483647, %v5025_v22  ;;  %v5039_v43 = vmul.f32 %v3800_v13, %v1709_v51  ;;  %v1520_v15 = vadd.f32 -0.28449672, %v1456_v12  ;;  %3809 = vpow2.f32 %v1922_v60 }
 0x1e2   : > { %v5043_v58 = vadd.f32 %v4628_v62, %v4449_v48  ;;  %v5045_v28 = vpop.eup %3803  ;;  %v2346_v46 = vadd.f32 1.0, %v2282_v10  ;;  %v1841_v49 = vmul.f32 %v1777_v45, %v4904_v36  ;;  %v5050_v32 = vmul.f32 0.70710677, %v5031_v11 }
 0x1e3   : > { %v1012_v54 = vmul.f32 0.3275911, %v5037_v9  ;;  %v2283_v16 = vsel %vm2155_vm11, %v2219_v39, %v2091_v30  ;;  %v1711_v34 = vmul.f32 %v4914_v18, %v1647_v26  ;;  %v1457_v40 = vmul.f32 %v4980_v38, %v1393_v52 }
 0x1e4   : > { %v1202_v62 = vmul.f32 1.0614054, %v5045_v28  ;;  %v2220_v13 = vsub.f32 0.0, %v2092_v57  ;;  %v2030_v51 = vmul.f32 %v3802_v20, %v1710_v56  ;;  %v5060_v36 = vand.u32 2147483647, %v5050_v32 }
 0x1e5   : > { %v1076_v12 = vadd.f32 1.0, %v1012_v54  ;;  %v2093_v60 = vsub.f32 1.0, %v5039_v43  ;;  %vm2157_vm13 = vcmp.lt.f32.partialorder %v4775_v33, 0.0  ;;  %v1584_v6 = vmul.f32 %v4944_v24, %v1520_v15 }
 0x1e6   : > { %v1266_v30 = vadd.f32 -1.4531521, %v1202_v62  ;;  %v5066_v18 = vmul.f32 0.70710677, %v5043_v58  ;;  %v3806_v10 = vpop.eup %3805  ;;  %v5069_v45 = vmul.f32 %v2345_v59, %v4786_v55  ;;  %v5072_v1 = vmul.f32 %v2346_v46, %v4818_v19  ;;  %v5080_v55 = vpop.f32.mrb[42].mxu0 }
 0x1e7   : > { %3811 = vrcp.f32 %v1076_v12  ;;  %v1013_v39 = vmul.f32 0.3275911, %v5060_v36  ;;  %vm2158_vm14 = vcmp.lt.f32.partialorder %v4789_v61, 0.0  ;;  %v2031_v26 = vmul.f32 %v3806_v10, %v1711_v34  ;;  %6611 = vst [vmem:[#allocation47_spill] sm:$0xff] %v5080_v55  ;;  %v5087_v34 = vpop.f32.mrb[43].mxu0 }
 0x1e8   : > { %6610 = vst [vmem:[#allocation46_spill] sm:$0xff] %v5072_v1  ;;  %v1521_v52 = vadd.f32 -0.28449672, %v1457_v40  ;;  %v1924_v20 = vmul.f32 1.442695, %v1841_v49  ;;  %v1330_v56 = vmul.f32 %v5045_v28, %v1266_v30  ;;  %v2347_v43 = vadd.f32 1.0, %v2283_v16 }
 0x1e9   : > { %v2094_v15 = vsub.f32 1.0, %v2030_v51  ;;  %v1077_v54 = vadd.f32 1.0, %v1013_v39  ;;  %v5078_v62 = vand.u32 2147483647, %v5066_v18  ;;  %v2284_v19 = vsel %vm2156_vm12, %v2220_v13, %v2092_v57  ;;  %6612 = vst [vmem:[#allocation48_spill] sm:$0xff] %v5087_v34  ;;  %v6613_v51 = vld [vmem:[#allocation26_spill] sm:$0xff] }
 0x1ea   : > { %v2221_v59 = vsub.f32 0.0, %v2093_v60  ;;  %v1648_v46 = vadd.f32 0.2548296, %v1584_v6  ;;  %v5085_v12 = vmul.f32 0.5, %v4948_v0  ;;  %v5089_v49 = vpop.eup %3807  ;;  %vm2159_vm15 = vcmp.lt.f32.partialorder %v4821_v53, 0.0 }
 0x1eb   : > { %v1394_v16 = vadd.f32 1.4214138, %v1330_v56  ;;  %3813 = vrcp.f32 %v1077_v54  ;;  %v1014_v40 = vmul.f32 0.3275911, %v5078_v62  ;;  %v5095_v30 = vadd.f32 %v6613_v51, %v4474_v5  ;;  %v3810_v2 = vpop.eup %3809 }
 0x1ec   : > { %v2095_v57 = vsub.f32 1.0, %v2031_v26  ;;  %v1585_v13 = vmul.f32 %v4980_v38, %v1521_v52  ;;  %v1778_v0 = vsub.f32 0.0, %v4973_v3  ;;  %v1203_v6 = vmul.f32 1.0614054, %v5089_v49 }
 0x1ed   : > { %v2222_v10 = vsub.f32 0.0, %v2094_v15  ;;  %3815 = vpow2.f32 %v1924_v20  ;;  %v1078_v39 = vadd.f32 1.0, %v1014_v40  ;;  %v5101_v56 = vmul.f32 0.70710677, %v5095_v30 }
 0x1ee   : > { %v5104_v54 = vmul.f32 %v2347_v43, %v4877_v7  ;;  %v2348_v34 = vadd.f32 1.0, %v2284_v19  ;;  %v1712_v51 = vmul.f32 %v4944_v24, %v1648_v46  ;;  %v1267_v55 = vadd.f32 -1.4531521, %v1203_v6  ;;  %v6615_v7 = vld [vmem:[#allocation27_spill] sm:$0xff]  ;;  %v5127_v46 = vpop.f32.mrb[44].mxu0 }
 0x1ef   : > { %v2285_v26 = vsel %vm2157_vm13, %v2221_v59, %v2093_v60  ;;  %v1458_v52 = vmul.f32 %v5045_v28, %v1394_v16  ;;  %3817 = vrcp.f32 %v1078_v39  ;;  %v5111_v1 = vand.u32 2147483647, %v5101_v56  ;;  %6616 = vst [vmem:[#allocation27_spill] sm:$0xff] %v5127_v46 }
 0x1f0   : > { %6614 = vst [vmem:[#allocation26_spill] sm:$0xff] %v5104_v54  ;;  %v2223_v20 = vsub.f32 0.0, %v2095_v57  ;;  %v1649_v40 = vadd.f32 0.2548296, %v1585_v13  ;;  %v1842_v37 = vmul.f32 %v1778_v0, %v4973_v3  ;;  %v5116_v43 = vadd.f32 %v6615_v7, %v4449_v48 }
 0x1f1   : > { %v5118_v19 = vpop.eup %3811  ;;  %v2286_v33 = vsel %vm2158_vm14, %v2222_v10, %v2094_v15  ;;  %v5123_v24 = vmul.f32 0.5, %v4985_v41  ;;  %v1331_v60 = vmul.f32 %v5089_v49, %v1267_v55  ;;  %v1015_v59 = vmul.f32 0.3275911, %v5111_v1  ;;  %v6618_v41 = vld [vmem:[#allocation28_spill] sm:$0xff] }
 0x1f2   : > { %v5130_v3 = vmul.f32 %v2348_v34, %v4926_v27  ;;  %v2349_v16 = vadd.f32 1.0, %v2285_v26  ;;  %v2032_v13 = vmul.f32 %v3810_v2, %v1712_v51  ;;  %v1204_v0 = vmul.f32 1.0614054, %v5118_v19  ;;  %v6619_v2 = vld [vmem:[#allocation16_spill] sm:$0xff] }
 0x1f3   : > { %v1522_v6 = vadd.f32 -0.28449672, %v1458_v52  ;;  %v1079_v39 = vadd.f32 1.0, %v1015_v59  ;;  %v5134_v61 = vmul.f32 0.70710677, %v5116_v43  ;;  %v5138_v15 = vadd.f32 %v6618_v41, %v4474_v5 }
 0x1f4   : > { %6617 = vst [vmem:[#allocation49_spill] sm:$0xff] %v5130_v3  ;;  %v2350_v55 = vadd.f32 1.0, %v2286_v33  ;;  %v2287_v10 = vsel %vm2159_vm15, %v2223_v20, %v2095_v57  ;;  %v1713_v27 = vmul.f32 %v4980_v38, %v1649_v40  ;;  %v1926_v34 = vmul.f32 1.442695, %v1842_v37  ;;  %v5170_v3 = vpop.f32.mrb[45].mxu0 }
 0x1f5   : > { %v5143_v26 = vpop.eup %3813  ;;  %vm2160_vm0 = vcmp.lt.f32.partialorder %v6619_v2, 0.0  ;;  %v1395_v51 = vadd.f32 1.4214138, %v1331_v60  ;;  %v1779_v52 = vsub.f32 0.0, %v5008_v14  ;;  %3819 = vrcp.f32 %v1079_v39  ;;  %6622 = vst [vmem:[#allocation50_spill] sm:$0xff] %v5170_v3 }
 0x1f6   : > { %v5148_v7 = vand.u32 2147483647, %v5134_v61  ;;  %v2096_v59 = vsub.f32 1.0, %v2032_v13  ;;  %v1268_v41 = vadd.f32 -1.4531521, %v1204_v0  ;;  %v1780_v33 = vsub.f32 0.0, %v5037_v9 }
 0x1f7   : > { %v1205_v53 = vmul.f32 1.0614054, %v5143_v26  ;;  %v3816_v57 = vpop.eup %3815  ;;  %v5153_v38 = vmul.f32 %v2349_v16, %v4941_v29  ;;  %v1586_v37 = vmul.f32 %v5045_v28, %v1522_v6  ;;  %v5158_v40 = vmul.f32 0.70710677, %v5138_v15 }
 0x1f8   : > { %v1016_v20 = vmul.f32 0.3275911, %v5148_v7  ;;  %v5161_v60 = vmul.f32 %v2350_v55, %v4957_v4  ;;  %v2351_v13 = vadd.f32 1.0, %v2287_v10  ;;  %v2033_v0 = vmul.f32 %v3816_v57, %v1713_v27  ;;  %v6623_v10 = vld [vmem:[#allocation43_spill] sm:$0xff] }
 0x1f9   : > { %6620 = vst [vmem:[#allocation28_spill] sm:$0xff] %v5153_v38  ;;  %3821 = vpow2.f32 %v1926_v34  ;;  %v5163_v39 = vpop.eup %3817  ;;  %v1459_v46 = vmul.f32 %v5089_v49, %v1395_v51  ;;  %v1843_v29 = vmul.f32 %v1779_v52, %v5008_v14  ;;  %v5168_v6 = vand.u32 2147483647, %v5158_v40 }
 0x1fa   : > { %6621 = vst [vmem:[#allocation16_spill] sm:$0xff] %v5161_v60  ;;  %v1080_v16 = vadd.f32 1.0, %v1016_v20  ;;  %v2224_v38 = vsub.f32 0.0, %v2096_v59  ;;  %v1332_v54 = vmul.f32 %v5118_v19, %v1268_v41  ;;  %v1844_v4 = vmul.f32 %v1780_v33, %v5037_v9 }
 0x1fb   : > { %v1269_v55 = vadd.f32 -1.4531521, %v1205_v53  ;;  %vm2161_vm1 = vcmp.lt.f32.partialorder %v6623_v10, 0.0  ;;  %v1650_v27 = vadd.f32 0.2548296, %v1586_v37  ;;  %v1781_v34 = vsub.f32 0.0, %v5060_v36 }
 0x1fc   : > { %3823 = vrcp.f32 %v1080_v16  ;;  %v1017_v14 = vmul.f32 0.3275911, %v5168_v6  ;;  %v2097_v51 = vsub.f32 1.0, %v2033_v0  ;;  %v5178_v52 = vmul.f32 0.5, %v5014_v63 }
 0x1fd   : > { %v1206_v57 = vmul.f32 1.0614054, %v5163_v39  ;;  %v1782_v20 = vsub.f32 0.0, %v5078_v62  ;;  %v5183_v41 = vmul.f32 %v2351_v13, %v4963_v17  ;;  %v1523_v9 = vadd.f32 -0.28449672, %v1459_v46  ;;  %v6625_v17 = vld [vmem:[#allocation30_spill] sm:$0xff] }
 0x1fe   : > { %v1928_v33 = vmul.f32 1.442695, %v1843_v29  ;;  %v1081_v53 = vadd.f32 1.0, %v1017_v14  ;;  %v2288_v37 = vsel %vm2160_vm0, %v2224_v38, %v2096_v59  ;;  %v1396_v16 = vadd.f32 1.4214138, %v1332_v54 }
 0x1ff   : > { %6624 = vst [vmem:[#allocation43_spill] sm:$0xff] %v5183_v41  ;;  %v1930_v60 = vmul.f32 1.442695, %v1844_v4  ;;  %v1333_v0 = vmul.f32 %v5143_v26, %v1269_v55  ;;  %v5188_v3 = vpop.eup %3819  ;;  %v1714_v63 = vmul.f32 %v5045_v28, %v1650_v27  ;;  %v1845_v21 = vmul.f32 %v1781_v34, %v5060_v36  ;;  %v5202_v4 = vpop.f32.mrb[46].mxu0 }
 0x200   : > { %3825 = vrcp.f32 %v1081_v53  ;;  %v5194_v13 = vadd.f32 %v6625_v17, %v4449_v48  ;;  %v2225_v46 = vsub.f32 0.0, %v2097_v51  ;;  %v5197_v29 = vmul.f32 0.5, %v5031_v11  ;;  %6626 = vst [vmem:[#allocation30_spill] sm:$0xff] %v5202_v4 }
 0x201   : > { %v1270_v2 = vadd.f32 -1.4531521, %v1206_v57  ;;  %v1846_v54 = vmul.f32 %v1782_v20, %v5078_v62  ;;  %v2352_v59 = vadd.f32 1.0, %v2288_v37  ;;  %v1587_v38 = vmul.f32 %v5089_v49, %v1523_v9 }
 0x202   : > { %3827 = vpow2.f32 %v1928_v33  ;;  %v1207_v28 = vmul.f32 1.0614054, %v5188_v3  ;;  %v1460_v55 = vmul.f32 %v5118_v19, %v1396_v16  ;;  %v1397_v27 = vadd.f32 1.4214138, %v1333_v0 }
 0x203   : > { %v3822_v36 = vpop.eup %3821  ;;  %3829 = vpow2.f32 %v1930_v60  ;;  %v5206_v34 = vmul.f32 0.5, %v5043_v58  ;;  %v1932_v14 = vmul.f32 1.442695, %v1845_v21  ;;  %v5209_v62 = vmul.f32 0.70710677, %v5194_v13 }
 0x204   : > { %v2034_v11 = vmul.f32 %v3822_v36, %v1714_v63  ;;  %v1271_v57 = vadd.f32 -1.4531521, %v1207_v28  ;;  %v2289_v20 = vsel %vm2161_vm1, %v2225_v46, %v2097_v51  ;;  %v1334_v9 = vmul.f32 %v5163_v39, %v1270_v2 }
 0x205   : > { %v1934_v33 = vmul.f32 1.442695, %v1846_v54  ;;  %v1783_v53 = vsub.f32 0.0, %v5111_v1  ;;  %v5218_v60 = vmul.f32 %v2352_v59, %v4998_v31  ;;  %v1651_v58 = vadd.f32 0.2548296, %v1587_v38 }
 0x206   : > { %v5215_v37 = vpop.eup %3823  ;;  %v5221_v21 = vmul.f32 0.5, %v5095_v30  ;;  %v5224_v16 = vand.u32 2147483647, %v5209_v62  ;;  %vm2162_vm2 = vcmp.lt.f32.partialorder %v4966_v42, 0.0  ;;  %v1524_v10 = vadd.f32 -0.28449672, %v1460_v55 }
 0x207   : > { %6627 = vst [vmem:[#allocation51_spill] sm:$0xff] %v5218_v60  ;;  %v1461_v51 = vmul.f32 %v5143_v26, %v1397_v27  ;;  %v1335_v0 = vmul.f32 %v5188_v3, %v1271_v57  ;;  %v1208_v63 = vmul.f32 1.0614054, %v5215_v37  ;;  %v2353_v17 = vadd.f32 1.0, %v2289_v20  ;;  %v6628_v55 = vld [vmem:[#allocation29_spill] sm:$0xff] }
 0x208   : > { %v2098_v46 = vsub.f32 1.0, %v2034_v11  ;;  %3831 = vpow2.f32 %v1932_v14  ;;  %v1018_v31 = vmul.f32 0.3275911, %v5224_v16  ;;  %v1398_v2 = vadd.f32 1.4214138, %v1334_v9 }
 0x209   : > { %3833 = vpow2.f32 %v1934_v33  ;;  %v1847_v30 = vmul.f32 %v1783_v53, %v5111_v1  ;;  %v1272_v54 = vadd.f32 -1.4531521, %v1208_v63  ;;  %v1715_v38 = vmul.f32 %v5089_v49, %v1651_v58  ;;  %v6630_v53 = vld [vmem:[#allocation32_spill] sm:$0xff] }
 0x20a   : > { %v5232_v59 = vpop.eup %3825  ;;  %v1784_v28 = vsub.f32 0.0, %v5148_v7  ;;  %v1082_v36 = vadd.f32 1.0, %v1018_v31  ;;  %v1183_v27 = vmul.f32 1.0614054, %v6628_v55  ;;  %v1588_v57 = vmul.f32 %v5118_v19, %v1524_v10 }
 0x20b   : > { %v1525_v11 = vadd.f32 -0.28449672, %v1461_v51  ;;  %v1399_v14 = vadd.f32 1.4214138, %v1335_v0  ;;  %v1209_v20 = vmul.f32 1.0614054, %v5232_v59  ;;  %v5240_v33 = vmul.f32 %v2353_v17, %v5005_v25 }
 0x20c   : > { %v3828_v9 = vpop.eup %3827  ;;  %v2226_v1 = vsub.f32 0.0, %v2098_v46  ;;  %3835 = vrcp.f32 %v1082_v36  ;;  %v1185_v63 = vmul.f32 1.0614054, %v6630_v53  ;;  %v1462_v58 = vmul.f32 %v5163_v39, %v1398_v2  ;;  %v5248_v0 = vpop.f32.mrb[47].mxu0 }
 0x20d   : > { %6629 = vst [vmem:[#allocation29_spill] sm:$0xff] %v5240_v33  ;;  %v3830_v49 = vpop.eup %3829  ;;  %v5245_v31 = vmul.f32 0.5, %v5116_v43  ;;  %v1336_v10 = vmul.f32 %v5215_v37, %v1272_v54  ;;  %v1273_v51 = vadd.f32 -1.4531521, %v1209_v20  ;;  %6631 = vst [vmem:[#allocation32_spill] sm:$0xff] %v5248_v0  ;;  %v2035_v4 = vmul.f32 %v3828_v9, %v1715_v38  ;;  %v6632_v38 = vld [vmem:[#allocation36_spill] sm:$0xff] }
 0x20e   : > { %v1936_v60 = vmul.f32 1.442695, %v1847_v30  ;;  %v1848_v25 = vmul.f32 %v1784_v28, %v5148_v7  ;;  %v1247_v17 = vadd.f32 -1.4531521, %v1183_v27  ;;  %v1652_v33 = vadd.f32 0.2548296, %v1588_v57 }
 0x20f   : > { %v1589_v36 = vmul.f32 %v5143_v26, %v1525_v11  ;;  %v1463_v41 = vmul.f32 %v5188_v3, %v1399_v14  ;;  %v5254_v2 = vmul.f32 0.5, %v5138_v15  ;;  %v2290_v43 = vsel %vm2162_vm2, %v2226_v1, %v2098_v46 }
 0x210   : > { %v1785_v54 = vsub.f32 0.0, %v5168_v6  ;;  %v1249_v20 = vadd.f32 -1.4531521, %v1185_v63  ;;  %v5261_v30 = vadd.f32 %v6632_v38, %v4474_v5  ;;  %v1526_v7 = vadd.f32 -0.28449672, %v1462_v58 }
 0x211   : > { %v1400_v28 = vadd.f32 1.4214138, %v1336_v10  ;;  %v1337_v27 = vmul.f32 %v5232_v59, %v1273_v51  ;;  %v1311_v57 = vmul.f32 %v6628_v55, %v1247_v17  ;;  %v2099_v14 = vsub.f32 1.0, %v2035_v4 }
 0x212   : > { %v3832_v11 = vpop.eup %3831  ;;  %vm2163_vm3 = vcmp.lt.f32.partialorder %v4995_v44, 0.0  ;;  %3837 = vpow2.f32 %v1936_v60  ;;  %v1938_v42 = vmul.f32 1.442695, %v1848_v25  ;;  %v1313_v15 = vmul.f32 %v6630_v53, %v1249_v20 }
 0x213   : > { %v5267_v46 = vpop.eup %3833  ;;  %v1716_v9 = vmul.f32 %v5118_v19, %v1652_v33  ;;  %v1653_v1 = vadd.f32 0.2548296, %v1589_v36  ;;  %v1527_v63 = vadd.f32 -0.28449672, %v1463_v41  ;;  %v1375_v58 = vadd.f32 1.4214138, %v1311_v57 }
 0x214   : > { %v2354_v10 = vadd.f32 1.0, %v2290_v43  ;;  %v1849_v51 = vmul.f32 %v1785_v54, %v5168_v6  ;;  %v1377_v38 = vadd.f32 1.4214138, %v1313_v15  ;;  %v5272_v17 = vmul.f32 0.70710677, %v5261_v30  ;;  %v5283_v6 = vpop.f32.mrb[48].mxu0 }
 0x215   : > { %v1590_v4 = vmul.f32 %v5163_v39, %v1526_v7  ;;  %v1464_v60 = vmul.f32 %v5215_v37, %v1400_v28  ;;  %v1401_v25 = vadd.f32 1.4214138, %v1337_v27  ;;  %v1439_v20 = vmul.f32 %v6628_v55, %v1375_v58  ;;  %6633 = vst [vmem:[#allocation36_spill] sm:$0xff] %v5283_v6  ;;  %v6637_v6 = vld [vmem:[#allocation15_spill] sm:$0xff] }
 0x216   : > { %v5277_v0 = vpop.eup %3835  ;;  %v2227_v19 = vsub.f32 0.0, %v2099_v14  ;;  %3839 = vpow2.f32 %v1938_v42  ;;  %v1441_v41 = vmul.f32 %v6630_v53, %v1377_v38  ;;  %v5281_v33 = vand.u32 2147483647, %v5272_v17 }
 0x217   : > { %v2036_v36 = vmul.f32 %v3830_v49, %v1716_v9  ;;  %v1717_v43 = vmul.f32 %v5143_v26, %v1653_v1  ;;  %v1591_v54 = vmul.f32 %v5188_v3, %v1527_v63  ;;  %v1210_v7 = vmul.f32 1.0614054, %v5277_v0 }
 0x218   : > { %v5289_v28 = vmul.f32 %v2354_v10, %v5085_v12  ;;  %v1940_v27 = vmul.f32 1.442695, %v1849_v51  ;;  %v1503_v57 = vadd.f32 -0.28449672, %v1439_v20  ;;  %v1505_v42 = vadd.f32 -0.28449672, %v1441_v41 }
 0x219   : > { %v1654_v15 = vadd.f32 0.2548296, %v1590_v4  ;;  %v1528_v58 = vadd.f32 -0.28449672, %v1464_v60  ;;  %v1465_v38 = vmul.f32 %v5232_v59, %v1401_v25  ;;  %v1019_v47 = vmul.f32 0.3275911, %v5281_v33 }
 0x21a   : > { %6634 = vst [vmem:[#allocation52_spill] sm:$0xff] %v5289_v28  ;;  %vm2164_vm4 = vcmp.lt.f32.partialorder %v5025_v22, 0.0  ;;  %v5295_v26 = vmul.f32 0.5, %v5194_v13  ;;  %v1274_v49 = vadd.f32 -1.4531521, %v1210_v7  ;;  %v1567_v9 = vmul.f32 %v6628_v55, %v1503_v57  ;;  %v5303_v4 = vpop.f32.mrb[49].mxu0 }
 0x21b   : > { %v1569_v12 = vmul.f32 %v6630_v53, %v1505_v42  ;;  %v2291_v1 = vsel %vm2163_vm3, %v2227_v19, %v2099_v14  ;;  %v2100_v63 = vsub.f32 1.0, %v2036_v36  ;;  %v5301_v10 = vmul.f32 %v3832_v11, %v1717_v43  ;;  %v6635_v13 = vld [vmem:[#allocation34_spill] sm:$0xff]  ;;  %v6636_v28 = vld [vmem:[#allocation35_spill] sm:$0xff]  ;;  %v6638_v57 = vld [vmem:[#allocation17_spill] sm:$0xff] }
 0x21c   : > { %v1655_v51 = vadd.f32 0.2548296, %v1591_v54  ;;  %v3838_v60 = vpop.eup %3837  ;;  %v1631_v25 = vadd.f32 0.2548296, %v1567_v9  ;;  %v1083_v41 = vadd.f32 1.0, %v1019_v47  ;;  %vm2143_vm5 = vcmp.lt.f32.partialorder %v6637_v6, 0.0 }
 0x21d   : > { %v1633_v20 = vadd.f32 0.2548296, %v1569_v12  ;;  %vm2145_vm6 = vcmp.lt.f32.partialorder %v6638_v57, 0.0  ;;  %v1718_v44 = vmul.f32 %v5163_v39, %v1654_v15  ;;  %v1592_v14 = vmul.f32 %v5215_v37, %v1528_v58  ;;  %v6639_v9 = vld [vmem:[#allocation37_spill] sm:$0xff] }
 0x21e   : > { %v1529_v11 = vadd.f32 -0.28449672, %v1465_v38  ;;  %3841 = vpow2.f32 %v1940_v27  ;;  %v1338_v19 = vmul.f32 %v5277_v0, %v1274_v49  ;;  %v1695_v36 = vmul.f32 %v6628_v55, %v1631_v25  ;;  %v6640_v38 = vld [vmem:[#allocation31_spill] sm:$0xff]  ;;  %v6641_v49 = vld [vmem:[#allocation33_spill] sm:$0xff] }
 0x21f   : > { %v1697_v43 = vmul.f32 %v6630_v53, %v1633_v20  ;;  %3843 = vrcp.f32 %v1083_v41  ;;  %v2355_v47 = vadd.f32 1.0, %v2291_v1  ;;  %v2228_v54 = vsub.f32 0.0, %v2100_v63 }
 0x220   : > { %v2101_v42 = vsub.f32 1.0, %v5301_v10  ;;  %vm2165_vm7 = vcmp.lt.f32.partialorder %v5050_v32, 0.0  ;;  %v5318_v39 = vadd.f32 %v6639_v9, %v4449_v48  ;;  %v3840_v15 = vpop.eup %3839  ;;  %v1719_v27 = vmul.f32 %v5188_v3, %v1655_v51  ;;  %v6642_v3 = vld [vmem:[#allocation38_spill] sm:$0xff] }
 0x221   : > { %v1786_v58 = vsub.f32 0.0, %v5224_v16  ;;  %v2015_v55 = vmul.f32 %v6640_v38, %v1695_v36  ;;  %v2017_v53 = vmul.f32 %v6641_v49, %v1697_v43  ;;  %v5325_v12 = vmul.f32 %v5267_v46, %v1718_v44 }
 0x222   : > { %v1656_v1 = vadd.f32 0.2548296, %v1592_v14  ;;  %v1593_v10 = vmul.f32 %v5232_v59, %v1529_v11  ;;  %v5329_v25 = vmul.f32 0.70710677, %v5318_v39  ;;  %v1402_v20 = vadd.f32 1.4214138, %v1338_v19 }
 0x223   : > { %v2079_v41 = vsub.f32 1.0, %v2015_v55  ;;  %v2081_v9 = vsub.f32 1.0, %v2017_v53  ;;  %v5333_v51 = vadd.f32 %v6642_v3, %v4474_v5  ;;  %v5336_v36 = vmul.f32 %v2355_v47, %v5123_v24  ;;  %v5347_v47 = vpop.f32.mrb[50].mxu0 }
 0x224   : > { %v2292_v46 = vsel %vm2164_vm4, %v2228_v54, %v2100_v63  ;;  %v2229_v44 = vsub.f32 0.0, %v2101_v42  ;;  %v5341_v14 = vand.u32 2147483647, %v5329_v25  ;;  %v2039_v11 = vmul.f32 %v3838_v60, %v1719_v27  ;;  %6643 = vst [vmem:[#allocation34_spill] sm:$0xff] %v5347_v47  ;;  %v5358_v54 = vpop.f32.mrb[51].mxu0 }
 0x225   : > { %v1850_v43 = vmul.f32 %v1786_v58, %v5224_v16  ;;  %v2207_v19 = vsub.f32 0.0, %v2079_v41  ;;  %v2209_v38 = vsub.f32 0.0, %v2081_v9  ;;  %v2102_v55 = vsub.f32 1.0, %v5325_v12  ;;  %6644 = vst [vmem:[#allocation35_spill] sm:$0xff] %v5358_v54 }
 0x226   : > { %v1720_v49 = vmul.f32 %v5215_v37, %v1656_v1  ;;  %v1657_v53 = vadd.f32 0.2548296, %v1593_v10  ;;  %v1020_v24 = vmul.f32 0.3275911, %v5341_v14  ;;  %vm2166_vm8 = vcmp.lt.f32.partialorder %v5066_v18, 0.0  ;;  %v6645_v1 = vld [vmem:[#allocation39_spill] sm:$0xff] }
 0x227   : > { %v1466_v22 = vmul.f32 %v5277_v0, %v1402_v20  ;;  %v2271_v63 = vsel %vm2143_vm5, %v2207_v19, %v2079_v41  ;;  %v2273_v16 = vsel %vm2145_vm6, %v2209_v38, %v2081_v9  ;;  %v5356_v60 = vmul.f32 0.70710677, %v5333_v51  ;;  %v6646_v19 = vld [vmem:[#allocation19_spill] sm:$0xff] }
 0x228   : > { %v3842_v37 = vpop.eup %3841  ;;  %vm2167_vm9 = vcmp.lt.f32.partialorder %v5101_v56, 0.0  ;;  %v2335_v27 = vadd.f32 1.0, %v2271_v63  ;;  %v2337_v58 = vadd.f32 1.0, %v2273_v16  ;;  %v1084_v12 = vadd.f32 1.0, %v1020_v24  ;;  %v6647_v63 = vld [vmem:[#allocation21_spill] sm:$0xff] }
 0x229   : > { %v5363_v10 = vadd.f32 %v6645_v1, %v4449_v48  ;;  %v5365_v6 = vpop.eup %3843  ;;  %v2293_v57 = vsel %vm2165_vm7, %v2229_v44, %v2101_v42  ;;  %v2103_v20 = vsub.f32 1.0, %v2039_v11  ;;  %v1942_v41 = vmul.f32 1.442695, %v1850_v43  ;;  %v5382_v43 = vpop.f32.mrb[52].mxu0 }
 0x22a   : > { %v5370_v9 = vand.u32 2147483647, %v5356_v60  ;;  %v1721_v3 = vmul.f32 %v5232_v59, %v1657_v53  ;;  %v2399_v38 = vmul.f32 %v2335_v27, %v6646_v19  ;;  %v2401_v24 = vmul.f32 %v2337_v58, %v6647_v63  ;;  %6648 = vst [vmem:[#allocation15_spill] sm:$0xff] %v5382_v43  ;;  %v6649_v58 = vld [vmem:[#allocation40_spill] sm:$0xff] }
 0x22b   : > { %v1211_v16 = vmul.f32 1.0614054, %v5365_v6  ;;  %v2230_v1 = vsub.f32 0.0, %v2102_v55  ;;  %v1530_v7 = vadd.f32 -0.28449672, %v1466_v22  ;;  %3845 = vrcp.f32 %v1084_v12  ;;  %v6650_v19 = vld [vmem:[#allocation44_spill] sm:$0xff] }
 0x22c   : > { %v1021_v54 = vmul.f32 0.3275911, %v5370_v9  ;;  %v5377_v32 = vmul.f32 %v3840_v15, %v1720_v49  ;;  %v2495_v42 = vpack.c.bf16 %v2401_v24, %v2399_v38  ;;  %v5380_v11 = vmul.f32 0.70710677, %v5363_v10  ;;  %v6652_v24 = vld [vmem:[#allocation18_spill] sm:$0xff] }
 0x22d   : > { %v1275_v44 = vadd.f32 -1.4531521, %v1211_v16  ;;  %v2231_v59 = vsub.f32 0.0, %v2103_v20  ;;  %v1787_v53 = vsub.f32 0.0, %v5281_v33  ;;  %v2497_v63 = vpack.c.bf16 %v6650_v19, %v6649_v58  ;;  %v6653_v16 = vld [vmem:[#allocation14_spill] sm:$0xff] }
 0x22e   : > { %v1085_v27 = vadd.f32 1.0, %v1021_v54  ;;  %v2356_v22 = vadd.f32 1.0, %v2292_v46  ;;  %v2357_v12 = vadd.f32 1.0, %v2293_v57  ;;  %v2041_v47 = vmul.f32 %v3842_v37, %v1721_v3  ;;  %2686 = vmatprep.mubr.bf16.mxu1 %v2495_v42  ;;  %v6654_v58 = vld [vmem:[#allocation42_spill] sm:$0xff] }
 0x22f   : > { %v5388_v15 = vand.u32 2147483647, %v5380_v11  ;;  %v1339_v49 = vmul.f32 %v5365_v6, %v1275_v44  ;;  %v6651_v38 = vpack.c.bf16 %v6636_v28, %v6635_v13  ;;  %v5396_v54 = vadd.f32 %v6652_v24, %v4474_v5 }
 0x230   : > { %3847 = vrcp.f32 %v1085_v27  ;;  %v2496_v46 = vpack.c.bf16 %v6654_v58, %v6653_v16  ;;  %v2294_v37 = vsel %vm2166_vm8, %v2230_v1, %v2102_v55  ;;  %v2104_v57 = vsub.f32 1.0, %v5377_v32 }
 0x231   : > { %2687 = vmatmul.mubr.bf16.vlgmr.msra.gmra.mrb[0].mxu1 %v6651_v38  ;;  %vm2168_vm10 = vcmp.lt.f32.partialorder %v5134_v61, 0.0  ;;  %v1594_v3 = vmul.f32 %v5277_v0, %v1530_v7  ;;  %v1022_v28 = vmul.f32 0.3275911, %v5388_v15  ;;  %v2295_v13 = vsel %vm2167_vm9, %v2231_v59, %v2103_v20  ;;  %v6655_v7 = vld [vmem:[#allocation20_spill] sm:$0xff] }
 0x232   : > { %2694 = vmatprep.mubr.bf16.mxu1 %v2497_v63  ;;  %3849 = vpow2.f32 %v1942_v41  ;;  %v1851_v42 = vmul.f32 %v1787_v53, %v5281_v33  ;;  %v5410_v44 = vmul.f32 0.70710677, %v5396_v54  ;;  %v5413_v18 = vmul.f32 %v2356_v22, %v5178_v52  ;;  %v6656_v33 = vld [vmem:[#allocation41_spill] sm:$0xff] }
 0x233   : > { %v2105_v55 = vsub.f32 1.0, %v2041_v47  ;;  %vm2169_vm11 = vcmp.lt.f32.partialorder %v5158_v40, 0.0  ;;  %v1086_v1 = vadd.f32 1.0, %v1022_v28  ;;  %v5418_v32 = vadd.f32 %v6655_v7, %v4449_v48  ;;  %v5427_v47 = vpop.f32.mrb[53].mxu0 }
 0x234   : > { %v2358_v27 = vadd.f32 1.0, %v2294_v37  ;;  %v1403_v56 = vadd.f32 1.4214138, %v1339_v49  ;;  %v5421_v20 = vand.u32 2147483647, %v5410_v44  ;;  %v5425_v41 = vadd.f32 %v6656_v33, %v4474_v5  ;;  %6657 = vst [vmem:[#allocation17_spill] sm:$0xff] %v5427_v47 }
 0x235   : > { %v2359_v59 = vadd.f32 1.0, %v2295_v13  ;;  %v2232_v52 = vsub.f32 0.0, %v2104_v57  ;;  %v1658_v53 = vadd.f32 0.2548296, %v1594_v3  ;;  %3851 = vrcp.f32 %v1086_v1  ;;  %v5429_v19 = vpop.eup %3845  ;;  %v5471_v61 = vpop.f32.mrb[54].mxu0  ;;  %v6661_v47 = vld [vmem:[#allocation45_spill] sm:$0xff] }
 0x236   : > { %v5432_v63 = vmul.f32 %v2357_v12, %v5197_v29  ;;  %v1944_v22 = vmul.f32 1.442695, %v1851_v42  ;;  %v1023_v49 = vmul.f32 0.3275911, %v5421_v20  ;;  %v5436_v38 = vmul.f32 0.70710677, %v5418_v32 }
 0x237   : > { %v2233_v24 = vsub.f32 0.0, %v2105_v55  ;;  %v5439_v16 = vmul.f32 0.5, %v5261_v30  ;;  %v1212_v58 = vmul.f32 1.0614054, %v5429_v19  ;;  %v5443_v37 = vmul.f32 0.70710677, %v5425_v41 }
 0x238   : > { %v1467_v3 = vmul.f32 %v5365_v6, %v1403_v56  ;;  %v1788_v29 = vsub.f32 0.0, %v5341_v14  ;;  %v1087_v12 = vadd.f32 1.0, %v1023_v49  ;;  %v5448_v28 = vand.u32 2147483647, %v5436_v38  ;;  %6660 = vst [vmem:[#allocation33_spill] sm:$0xff] %v5471_v61  ;;  %v5480_v40 = vpop.f32.mrb[55].mxu0 }
 0x239   : > { %2695 = vmatmul.mubr.bf16.gmra.mrb[4].mxu1 %v2496_v46  ;;  %v5451_v13 = vmul.f32 %v2358_v27, %v5206_v34  ;;  %v1722_v30 = vmul.f32 %v5277_v0, %v1658_v53  ;;  %v1276_v42 = vadd.f32 -1.4531521, %v1212_v58  ;;  %v5455_v1 = vand.u32 2147483647, %v5443_v37  ;;  %6662 = vst [vmem:[#allocation38_spill] sm:$0xff] %v5480_v40 }
 0x23a   : > { %v5457_v7 = vpop.eup %3847  ;;  %v5460_v56 = vmul.f32 %v2359_v59, %v5221_v21  ;;  %v2296_v46 = vsel %vm2168_vm10, %v2232_v52, %v2104_v57  ;;  %3853 = vrcp.f32 %v1087_v12  ;;  %v1024_v33 = vmul.f32 0.3275911, %v5448_v28 }
 0x23b   : > { %6658 = vst [vmem:[#allocation37_spill] sm:$0xff] %v5451_v13  ;;  %3855 = vpow2.f32 %v1944_v22  ;;  %v1340_v34 = vmul.f32 %v5429_v19, %v1276_v42  ;;  %v1213_v0 = vmul.f32 1.0614054, %v5457_v7  ;;  %v1025_v27 = vmul.f32 0.3275911, %v5455_v1 }
 0x23c   : > { %6659 = vst [vmem:[#allocation31_spill] sm:$0xff] %v5460_v56  ;;  %v3850_v53 = vpop.eup %3849  ;;  %v2297_v49 = vsel %vm2169_vm11, %v2233_v24, %v2105_v55  ;;  %v1531_v58 = vadd.f32 -0.28449672, %v1467_v3  ;;  %v1852_v21 = vmul.f32 %v1788_v29, %v5341_v14  ;;  %v1088_v59 = vadd.f32 1.0, %v1024_v33 }
 0x23d   : > { %v5473_v57 = vmul.f32 %v3850_v53, %v1722_v30  ;;  %v1404_v52 = vadd.f32 1.4214138, %v1340_v34  ;;  %v1277_v22 = vadd.f32 -1.4531521, %v1213_v0  ;;  %v1089_v12 = vadd.f32 1.0, %v1025_v27 }
 0x23e   : > { %v2360_v42 = vadd.f32 1.0, %v2296_v46  ;;  %v1789_v13 = vsub.f32 0.0, %v5370_v9  ;;  %3857 = vrcp.f32 %v1088_v59  ;;  %v5478_v56 = vadd.f32 %v6661_v47, %v4449_v48 }
 0x23f   : > { %v5482_v55 = vpop.eup %3851  ;;  %v1468_v14 = vmul.f32 %v5429_v19, %v1404_v52  ;;  %v1341_v24 = vmul.f32 %v5457_v7, %v1277_v22  ;;  %v1790_v3 = vsub.f32 0.0, %v5388_v15  ;;  %3859 = vrcp.f32 %v1089_v12  ;;  %v6664_v12 = vld [vmem:[#allocation22_spill] sm:$0xff] }
 0x240   : > { %v5487_v29 = vadd.f32 1.0, %v2297_v49  ;;  %v5490_v30 = vmul.f32 0.5, %v5318_v39  ;;  %v1946_v46 = vmul.f32 1.442695, %v1852_v21  ;;  %v1214_v47 = vmul.f32 1.0614054, %v5482_v55 }
 0x241   : > { %v2106_v33 = vsub.f32 1.0, %v5473_v57  ;;  %v1595_v34 = vmul.f32 %v5365_v6, %v1531_v58  ;;  %v1405_v0 = vadd.f32 1.4214138, %v1341_v24  ;;  %v2499_v27 = vpack.c.bf16 %v5069_v45, %v4937_v8 }
 0x242   : > { %v5498_v53 = vmul.f32 %v2360_v42, %v5245_v31  ;;  %v1532_v59 = vadd.f32 -0.28449672, %v1468_v14  ;;  %v1278_v49 = vadd.f32 -1.4531521, %v1214_v47  ;;  %v5501_v52 = vmul.f32 0.70710677, %v5478_v56 }
 0x243   : > { %vm2170_vm12 = vcmp.lt.f32.partialorder %v5209_v62, 0.0  ;;  %v1469_v39 = vmul.f32 %v5457_v7, %v1405_v0  ;;  %v1853_v21 = vmul.f32 %v1789_v13, %v5370_v9  ;;  %v1854_v58 = vmul.f32 %v1790_v3, %v5388_v15  ;;  %2702 = vmatprep.mubr.bf16.mxu1 %v2499_v27 }
 0x244   : > { %6663 = vst [vmem:[#allocation39_spill] sm:$0xff] %v5498_v53  ;;  %v2498_v8 = vpack.c.bf16 %v4969_v50, %v4922_v35  ;;  %v5509_v45 = vpop.eup %3853  ;;  %v1342_v31 = vmul.f32 %v5482_v55, %v1278_v49  ;;  %v1791_v57 = vsub.f32 0.0, %v5421_v20  ;;  %v5514_v22 = vand.u32 2147483647, %v5501_v52 }
 0x245   : > { %v5518_v42 = vadd.f32 %v6664_v12, %v4474_v5  ;;  %v3856_v9 = vpop.eup %3855  ;;  %v2234_v13 = vsub.f32 0.0, %v2106_v33  ;;  %v1659_v15 = vadd.f32 0.2548296, %v1595_v34  ;;  %v5521_v14 = vmul.f32 0.5, %v5333_v51 }
 0x246   : > { %v1215_v35 = vmul.f32 1.0614054, %v5509_v45  ;;  %2703 = vmatmul.mubr.bf16.gmra.mrb[8].mxu1 %v2498_v8  ;;  %v1596_v50 = vmul.f32 %v5429_v19, %v1532_v59  ;;  %v1533_v24 = vadd.f32 -0.28449672, %v1469_v39  ;;  %v1406_v3 = vadd.f32 1.4214138, %v1342_v31 }
 0x247   : > { %v1026_v47 = vmul.f32 0.3275911, %v5514_v22  ;;  %3861 = vpow2.f32 %v1946_v46  ;;  %v1948_v0 = vmul.f32 1.442695, %v1853_v21  ;;  %v1950_v27 = vmul.f32 1.442695, %v1854_v58 }
 0x248   : > { %v1279_v49 = vadd.f32 -1.4531521, %v1215_v35  ;;  %v5526_v12 = vpop.eup %3857  ;;  %v1470_v34 = vmul.f32 %v5482_v55, %v1406_v3  ;;  %v1855_v51 = vmul.f32 %v1791_v57, %v5421_v20  ;;  %v5531_v61 = vmul.f32 0.70710677, %v5518_v42 }
 0x249   : > { %v1090_v40 = vadd.f32 1.0, %v1026_v47  ;;  %v5533_v8 = vpop.eup %3859  ;;  %v1723_v59 = vmul.f32 %v5365_v6, %v1659_v15  ;;  %v1216_v46 = vmul.f32 1.0614054, %v5526_v12  ;;  %v1792_v21 = vsub.f32 0.0, %v5448_v28  ;;  %v5542_v47 = vpop.f32.mrb[56].mxu0 }
 0x24a   : > { %v1343_v39 = vmul.f32 %v5509_v45, %v1279_v49  ;;  %v1660_v58 = vadd.f32 0.2548296, %v1596_v50  ;;  %v1597_v31 = vmul.f32 %v5457_v7, %v1533_v24  ;;  %v1217_v35 = vmul.f32 1.0614054, %v5533_v8  ;;  %6665 = vst [vmem:[#allocation19_spill] sm:$0xff] %v5542_v47 }
 0x24b   : > { %3863 = vrcp.f32 %v1090_v40  ;;  %v1280_v57 = vadd.f32 -1.4531521, %v1216_v46  ;;  %v1793_v3 = vsub.f32 0.0, %v5455_v1  ;;  %v2298_v6 = vsel %vm2170_vm12, %v2234_v13, %v2106_v33 }
 0x24c   : > { %3865 = vpow2.f32 %v1948_v0  ;;  %v1407_v20 = vadd.f32 1.4214138, %v1343_v39  ;;  %v1534_v15 = vadd.f32 -0.28449672, %v1470_v34  ;;  %v1281_v49 = vadd.f32 -1.4531521, %v1217_v35 }
 0x24d   : > { %v5547_v53 = vand.u32 2147483647, %v5531_v61  ;;  %3867 = vpow2.f32 %v1950_v27  ;;  %v1952_v24 = vmul.f32 1.442695, %v1855_v51  ;;  %v1344_v40 = vmul.f32 %v5526_v12, %v1280_v57 }
 0x24e   : > { %v1471_v50 = vmul.f32 %v5509_v45, %v1407_v20  ;;  %v2043_v0 = vmul.f32 %v3856_v9, %v1723_v59  ;;  %v1661_v39 = vadd.f32 0.2548296, %v1597_v31  ;;  %v1345_v46 = vmul.f32 %v5533_v8, %v1281_v49 }
 0x24f   : > { %v1027_v47 = vmul.f32 0.3275911, %v5547_v53  ;;  %v1408_v62 = vadd.f32 1.4214138, %v1344_v40  ;;  %v1856_v33 = vmul.f32 %v1792_v21, %v5448_v28  ;;  %v1857_v13 = vmul.f32 %v1793_v3, %v5455_v1 }
 0x250   : > { %v1535_v43 = vadd.f32 -0.28449672, %v1471_v50  ;;  %v1724_v34 = vmul.f32 %v5429_v19, %v1660_v58  ;;  %v1598_v27 = vmul.f32 %v5482_v55, %v1534_v15  ;;  %v1409_v35 = vadd.f32 1.4214138, %v1345_v46 }
 0x251   : > { %v1091_v51 = vadd.f32 1.0, %v1027_v47  ;;  %v3862_v20 = vpop.eup %3861  ;;  %v2362_v57 = vadd.f32 1.0, %v2298_v6  ;;  %vm2171_vm13 = vcmp.lt.f32.partialorder %v5272_v17, 0.0  ;;  %3869 = vpow2.f32 %v1952_v24  ;;  %v5582_v24 = vpop.f32.mrb[57].mxu0 }
 0x252   : > { %v1599_v9 = vmul.f32 %v5509_v45, %v1535_v43  ;;  %v1472_v59 = vmul.f32 %v5526_v12, %v1408_v62  ;;  %v2107_v31 = vsub.f32 1.0, %v2043_v0  ;;  %v1725_v28 = vmul.f32 %v5457_v7, %v1661_v39 }
 0x253   : > { %v1473_v1 = vmul.f32 %v5533_v8, %v1409_v35  ;;  %3871 = vrcp.f32 %v1091_v51  ;;  %v5564_v19 = vmul.f32 %v5487_v29, %v5254_v2  ;;  %v5567_v21 = vmul.f32 0.5, %v5363_v10  ;;  %v6667_v51 = vld [vmem:[#allocation23_spill] sm:$0xff] }
 0x254   : > { %v1536_v58 = vadd.f32 -0.28449672, %v1472_v59  ;;  %v5571_v43 = vadd.f32 %v4950_v23, %v4449_v48  ;;  %v2044_v47 = vmul.f32 %v3862_v20, %v1724_v34  ;;  %v1662_v6 = vadd.f32 0.2548296, %v1598_v27 }
 0x255   : > { %v5573_v3 = vpop.eup %3863  ;;  %v1954_v7 = vmul.f32 1.442695, %v1856_v33  ;;  %v1956_v15 = vmul.f32 1.442695, %v1857_v13  ;;  %v5576_v50 = vmul.f32 %v2362_v57, %v5295_v26  ;;  %v5579_v2 = vmul.f32 0.5, %v5396_v54 }
 0x256   : > { %v3866_v49 = vpop.eup %3865  ;;  %v1663_v10 = vadd.f32 0.2548296, %v1599_v9  ;;  %v1218_v29 = vmul.f32 1.0614054, %v5573_v3  ;;  %v2235_v23 = vsub.f32 0.0, %v2107_v31  ;;  %v5585_v0 = vmul.f32 0.5, %v5418_v32 }
 0x257   : > { %6666 = vst [vmem:[#allocation21_spill] sm:$0xff] %v5576_v50  ;;  %v2045_v40 = vmul.f32 %v3866_v49, %v1725_v28  ;;  %v1537_v39 = vadd.f32 -0.28449672, %v1473_v1  ;;  %v3868_v46 = vpop.eup %3867  ;;  %vm2172_vm14 = vcmp.lt.f32.partialorder %v5329_v25, 0.0  ;;  %v1600_v26 = vmul.f32 %v5526_v12, %v1536_v58 }
 0x258   : > { %v1282_v62 = vadd.f32 -1.4531521, %v1218_v29  ;;  %v1794_v54 = vsub.f32 0.0, %v5514_v22  ;;  %v5591_v33 = vmul.f32 0.70710677, %v5571_v43  ;;  %v2108_v13 = vsub.f32 1.0, %v2044_v47 }
 0x259   : > { %v1726_v34 = vmul.f32 %v5482_v55, %v1662_v6  ;;  %3873 = vpow2.f32 %v1954_v7  ;;  %v5595_v27 = vmul.f32 0.5, %v5425_v41  ;;  %vm2173_vm15 = vcmp.lt.f32.partialorder %v5356_v60, 0.0 }
 0x25a   : > { %v1727_v32 = vmul.f32 %v5509_v45, %v1663_v10  ;;  %3875 = vpow2.f32 %v1956_v15  ;;  %v1346_v35 = vmul.f32 %v5573_v3, %v1282_v62  ;;  %v5602_v20 = vadd.f32 %v6667_v51, %v4474_v5  ;;  %v5637_v51 = vpop.f32.mrb[58].mxu0 }
 0x25b   : > { %v2299_v57 = vsel %vm2171_vm13, %v2235_v23, %v2107_v31  ;;  %v2109_v9 = vsub.f32 1.0, %v2045_v40  ;;  %v1601_v55 = vmul.f32 %v5533_v8, %v1537_v39  ;;  %v5608_v41 = vand.u32 2147483647, %v5591_v33  ;;  %v3870_v59 = vpop.eup %3869  ;;  %6669 = vst [vmem:[#allocation40_spill] sm:$0xff] %v5637_v51 }
 0x25c   : > { %v1664_v28 = vadd.f32 0.2548296, %v1600_v26  ;;  %v1410_v1 = vadd.f32 1.4214138, %v1346_v35  ;;  %v1858_v45 = vmul.f32 %v1794_v54, %v5514_v22  ;;  %v1795_v58 = vsub.f32 0.0, %v5547_v53 }
 0x25d   : > { %v5612_v47 = vpop.eup %3871  ;;  %v2236_v6 = vsub.f32 0.0, %v2108_v13  ;;  %v5614_v7 = vmul.f32 %v3868_v46, %v1726_v34  ;;  %v5617_v17 = vmul.f32 0.5, %v5478_v56  ;;  %v1028_v31 = vmul.f32 0.3275911, %v5608_v41 }
 0x25e   : > { %v5620_v15 = vmul.f32 %v3870_v59, %v1727_v32  ;;  %v1474_v49 = vmul.f32 %v5573_v3, %v1410_v1  ;;  %v1219_v10 = vmul.f32 1.0614054, %v5612_v47  ;;  %v5625_v22 = vmul.f32 0.70710677, %v5602_v20  ;;  %v6668_v32 = vld [vmem:[#allocation24_spill] sm:$0xff] }
 0x25f   : > { %v2363_v29 = vadd.f32 1.0, %v2299_v57  ;;  %v2237_v23 = vsub.f32 0.0, %v2109_v9  ;;  %v1665_v40 = vadd.f32 0.2548296, %v1601_v55  ;;  %v1092_v39 = vadd.f32 1.0, %v1028_v31 }
 0x260   : > { %v1728_v46 = vmul.f32 %v5526_v12, %v1664_v28  ;;  %v1958_v26 = vmul.f32 1.442695, %v1858_v45  ;;  %v1283_v56 = vadd.f32 -1.4531521, %v1219_v10  ;;  %v1859_v62 = vmul.f32 %v1795_v58, %v5547_v53 }
 0x261   : > { %v2300_v54 = vsel %vm2172_vm14, %v2236_v6, %v2108_v13  ;;  %v2110_v34 = vsub.f32 1.0, %v5614_v7  ;;  %vm2174_vm0 = vcmp.lt.f32.partialorder %v5380_v11, 0.0  ;;  %3877 = vrcp.f32 %v1092_v39  ;;  %v5645_v13 = vpop.f32.mrb[59].mxu0 }
 0x262   : > { %v5635_v35 = vadd.f32 %v6668_v32, %v4449_v48  ;;  %v2111_v12 = vsub.f32 1.0, %v5620_v15  ;;  %vm2175_vm1 = vcmp.lt.f32.partialorder %v5410_v44, 0.0  ;;  %v1538_v57 = vadd.f32 -0.28449672, %v1474_v49  ;;  %6670 = vst [vmem:[#allocation44_spill] sm:$0xff] %v5645_v13  ;;  %v6674_v32 = vld [vmem:[#allocation46_spill] sm:$0xff] }
 0x263   : > { %v1347_v53 = vmul.f32 %v5612_v47, %v1283_v56  ;;  %v5643_v25 = vand.u32 2147483647, %v5625_v22  ;;  %v3874_v55 = vpop.eup %3873  ;;  %v5648_v59 = vmul.f32 %v2363_v29, %v5439_v16  ;;  %v2301_v28 = vsel %vm2173_vm15, %v2237_v23, %v2109_v9  ;;  %v6671_v16 = vld [vmem:[#allocation26_spill] sm:$0xff]  ;;  %v6672_v29 = vld [vmem:[#allocation28_spill] sm:$0xff] }
 0x264   : > { %v1729_v1 = vmul.f32 %v5533_v8, %v1665_v40  ;;  %v5654_v45 = vmul.f32 0.5, %v5518_v42  ;;  %v3876_v58 = vpop.eup %3875  ;;  %v2364_v6 = vadd.f32 1.0, %v2300_v54  ;;  %v2048_v7 = vmul.f32 %v3874_v55, %v1728_v46 }
 0x265   : > { %3879 = vpow2.f32 %v1958_v26  ;;  %v1960_v31 = vmul.f32 1.442695, %v1859_v62  ;;  %v1411_v15 = vadd.f32 1.4214138, %v1347_v53  ;;  %v1029_v49 = vmul.f32 0.3275911, %v5643_v25 }
 0x266   : > { %v5658_v10 = vmul.f32 0.70710677, %v5635_v35  ;;  %v2501_v60 = vpack.c.bf16 %v6672_v29, %v6671_v16  ;;  %v2365_v9 = vadd.f32 1.0, %v2301_v28  ;;  %v2238_v23 = vsub.f32 0.0, %v2110_v34  ;;  %v6673_v26 = vld [vmem:[#allocation25_spill] sm:$0xff] }
 0x267   : > { %v2239_v8 = vsub.f32 0.0, %v2111_v12  ;;  %v1602_v42 = vmul.f32 %v5573_v3, %v1538_v57  ;;  %vm2176_vm2 = vcmp.lt.f32.partialorder %v5436_v38, 0.0  ;;  %v2049_v40 = vmul.f32 %v3876_v58, %v1729_v1  ;;  %v6675_v53 = vld [vmem:[#allocation49_spill] sm:$0xff]  ;;  %v5674_v57 = vpop.f32.mrb[60].mxu0 }
 0x268   : > { %v1093_v39 = vadd.f32 1.0, %v1029_v49  ;;  %v5665_v46 = vand.u32 2147483647, %v5658_v10  ;;  %2710 = vmatprep.mubr.bf16.mxu1 %v2501_v60  ;;  %v5669_v56 = vadd.f32 %v6673_v26, %v4474_v5  ;;  %v2112_v62 = vsub.f32 1.0, %v2048_v7  ;;  %6676 = vst [vmem:[#allocation18_spill] sm:$0xff] %v5674_v57  ;;  %v6687_v57 = vld [vmem:[#allocation43_spill] sm:$0xff] }
 0x269   : > { %3881 = vpow2.f32 %v1960_v31  ;;  %v1796_v54 = vsub.f32 0.0, %v5608_v41  ;;  %v2500_v55 = vpack.c.bf16 %v6675_v53, %v6674_v32  ;;  %v5677_v28 = vmul.f32 %v2364_v6, %v5490_v30 }
 0x26a   : > { %v1475_v1 = vmul.f32 %v5612_v47, %v1411_v15  ;;  %3883 = vrcp.f32 %v1093_v39  ;;  %v1030_v58 = vmul.f32 0.3275911, %v5665_v46  ;;  %v5682_v49 = vmul.f32 %v2365_v9, %v5521_v14  ;;  %v6678_v14 = vld [vmem:[#allocation47_spill] sm:$0xff] }
 0x26b   : > { %6677 = vst [vmem:[#allocation14_spill] sm:$0xff] %v5677_v28  ;;  %v2302_v7 = vsel %vm2174_vm0, %v2238_v23, %v2110_v34  ;;  %vm2177_vm3 = vcmp.lt.f32.partialorder %v5443_v37, 0.0  ;;  %v1666_v31 = vadd.f32 0.2548296, %v1602_v42  ;;  %v5688_v16 = vmul.f32 0.70710677, %v5669_v56  ;;  %2711 = vmatmul.mubr.bf16.gmra.mrb[12].mxu1 %v2500_v55  ;;  %v5690_v30 = vpop.eup %3877 }
 0x26c   : > { %v2303_v6 = vsel %vm2175_vm1, %v2239_v8, %v2111_v12  ;;  %v2113_v15 = vsub.f32 1.0, %v2049_v40  ;;  %v1094_v29 = vadd.f32 1.0, %v1030_v58  ;;  %v5696_v60 = vadd.f32 %v6678_v14, %v4449_v48 }
 0x26d   : > { %v2240_v11 = vsub.f32 0.0, %v2112_v62  ;;  %v5699_v34 = vmul.f32 0.5, %v5571_v43  ;;  %v1220_v9 = vmul.f32 1.0614054, %v5690_v30  ;;  %v1860_v23 = vmul.f32 %v1796_v54, %v5608_v41  ;;  %v5710_v43 = vpop.f32.mrb[61].mxu0  ;;  %v6680_v54 = vld [vmem:[#allocation48_spill] sm:$0xff] }
 0x26e   : > { %v2366_v42 = vadd.f32 1.0, %v2302_v7  ;;  %v1539_v39 = vadd.f32 -0.28449672, %v1475_v1  ;;  %3885 = vrcp.f32 %v1094_v29  ;;  %v5704_v44 = vand.u32 2147483647, %v5688_v16  ;;  %6679 = vst [vmem:[#allocation42_spill] sm:$0xff] %v5710_v43 }
 0x26f   : > { %v3880_v12 = vpop.eup %3879  ;;  %v2367_v8 = vadd.f32 1.0, %v2303_v6  ;;  %v1730_v40 = vmul.f32 %v5573_v3, %v1666_v31  ;;  %v1284_v26 = vadd.f32 -1.4531521, %v1220_v9  ;;  %v5708_v32 = vmul.f32 0.70710677, %v5696_v60 }
 0x270   : > { %v2241_v53 = vsub.f32 0.0, %v2113_v15  ;;  %v5713_v55 = vmul.f32 0.5, %v5602_v20  ;;  %v1031_v41 = vmul.f32 0.3275911, %v5704_v44  ;;  %v5718_v1 = vadd.f32 %v6680_v54, %v4474_v5 }
 0x271   : > { %v2304_v58 = vsel %vm2176_vm2, %v2240_v11, %v2112_v62  ;;  %v1348_v3 = vmul.f32 %v5690_v30, %v1284_v26  ;;  %v1962_v7 = vmul.f32 1.442695, %v1860_v23  ;;  %v5724_v31 = vand.u32 2147483647, %v5708_v32 }
 0x272   : > { %v5727_v6 = vmul.f32 %v2366_v42, %v5567_v21  ;;  %v1603_v20 = vmul.f32 %v5612_v47, %v1539_v39  ;;  %v1797_v29 = vsub.f32 0.0, %v5643_v25  ;;  %v1095_v14 = vadd.f32 1.0, %v1031_v41 }
 0x273   : > { %v3882_v9 = vpop.eup %3881  ;;  %v5732_v54 = vmul.f32 %v2367_v8, %v5579_v2  ;;  %v2050_v38 = vmul.f32 %v3880_v12, %v1730_v40  ;;  %v1412_v62 = vadd.f32 1.4214138, %v1348_v3  ;;  %v1032_v11 = vmul.f32 0.3275911, %v5724_v31  ;;  %v5750_v3 = vpop.f32.mrb[62].mxu0 }
 0x274   : > { %6681 = vst [vmem:[#allocation20_spill] sm:$0xff] %v5727_v6  ;;  %v5735_v23 = vpop.eup %3883  ;;  %v2368_v26 = vadd.f32 1.0, %v2304_v58  ;;  %v2305_v21 = vsel %vm2177_vm3, %v2241_v53, %v2113_v15  ;;  %3887 = vrcp.f32 %v1095_v14  ;;  %v5740_v42 = vmul.f32 0.70710677, %v5718_v1  ;;  %6683 = vst [vmem:[#allocation45_spill] sm:$0xff] %v5750_v3 }
 0x275   : > { %6682 = vst [vmem:[#allocation41_spill] sm:$0xff] %v5732_v54  ;;  %v1476_v39 = vmul.f32 %v5690_v30, %v1412_v62  ;;  %3889 = vpow2.f32 %v1962_v7  ;;  %v1221_v2 = vmul.f32 1.0614054, %v5735_v23  ;;  %v1096_v8 = vadd.f32 1.0, %v1032_v11 }
 0x276   : > { %v1667_v12 = vadd.f32 0.2548296, %v1603_v20  ;;  %v1861_v40 = vmul.f32 %v1797_v29, %v5643_v25  ;;  %v1798_v41 = vsub.f32 0.0, %v5665_v46  ;;  %v5747_v58 = vand.u32 2147483647, %v5740_v42  ;;  %v6684_v29 = vld [vmem:[#allocation27_spill] sm:$0xff] }
 0x277   : > { %v2114_v37 = vsub.f32 1.0, %v2050_v38  ;;  %vm2178_vm4 = vcmp.lt.f32.partialorder %v5501_v52, 0.0  ;;  %v1540_v15 = vadd.f32 -0.28449672, %v1476_v39  ;;  %v1285_v53 = vadd.f32 -1.4531521, %v1221_v2 }
 0x278   : > { %3891 = vrcp.f32 %v1096_v8  ;;  %v5752_v7 = vpop.eup %3885  ;;  %v5754_v14 = vadd.f32 1.0, %v2305_v21  ;;  %v5757_v20 = vmul.f32 0.5, %v5635_v35  ;;  %v1033_v25 = vmul.f32 0.3275911, %v5747_v58  ;;  %v5770_v21 = vpop.f32.mrb[63].mxu0 }
 0x279   : > { %v5762_v62 = vadd.f32 %v6684_v29, %v4449_v48  ;;  %v5765_v38 = vmul.f32 %v2368_v26, %v5585_v0  ;;  %v1604_v11 = vmul.f32 %v5690_v30, %v1540_v15  ;;  %v1349_v39 = vmul.f32 %v5735_v23, %v1285_v53  ;;  %6686 = vst [vmem:[#allocation23_spill] sm:$0xff] %v5770_v21  ;;  %v6688_v0 = vld [vmem:[#allocation29_spill] sm:$0xff]  ;;  %v6689_v53 = vld [vmem:[#allocation50_spill] sm:$0xff] }
 0x27a   : > { %v1222_v2 = vmul.f32 1.0614054, %v5752_v7  ;;  %v1731_v35 = vmul.f32 %v5612_v47, %v1667_v12  ;;  %v1964_v8 = vmul.f32 1.442695, %v1861_v40  ;;  %v1862_v3 = vmul.f32 %v1798_v41, %v5665_v46  ;;  %v6690_v40 = vld [vmem:[#allocation16_spill] sm:$0xff]  ;;  %v6691_v41 = vld [vmem:[#allocation51_spill] sm:$0xff] }
 0x27b   : > { %6685 = vst [vmem:[#allocation22_spill] sm:$0xff] %v5765_v38  ;;  %v1097_v6 = vadd.f32 1.0, %v1033_v25  ;;  %v2242_v43 = vsub.f32 0.0, %v2114_v37  ;;  %v1413_v29 = vadd.f32 1.4214138, %v1349_v39  ;;  %v2503_v26 = vpack.c.bf16 %v6688_v0, %v6687_v57 }
 0x27c   : > { %v1286_v54 = vadd.f32 -1.4531521, %v1222_v2  ;;  %v1668_v38 = vadd.f32 0.2548296, %v1604_v11  ;;  %v5777_v15 = vmul.f32 0.70710677, %v5762_v62  ;;  %v5781_v21 = vadd.f32 %v6689_v53, %v4474_v5 }
 0x27d   : > { %3893 = vrcp.f32 %v1097_v6  ;;  %v1477_v47 = vmul.f32 %v5735_v23, %v1413_v29  ;;  %v1799_v12 = vsub.f32 0.0, %v5704_v44  ;;  %2718 = vmatprep.mubr.bf16.mxu1 %v2503_v26  ;;  %v2502_v25 = vpack.c.bf16 %v6691_v41, %v6690_v40 }
 0x27e   : > { %v1350_v46 = vmul.f32 %v5752_v7, %v1286_v54  ;;  %v5788_v57 = vpop.eup %3887  ;;  %v2051_v6 = vmul.f32 %v3882_v9, %v1731_v35  ;;  %v1966_v11 = vmul.f32 1.442695, %v1862_v3  ;;  %v5791_v39 = vmul.f32 0.5, %v5669_v56 }
 0x27f   : > { %v5794_v2 = vand.u32 2147483647, %v5777_v15  ;;  %v3890_v0 = vpop.eup %3889  ;;  %3895 = vpow2.f32 %v1964_v8  ;;  %v1223_v54 = vmul.f32 1.0614054, %v5788_v57  ;;  %v1800_v26 = vsub.f32 0.0, %v5724_v31  ;;  %2719 = vmatmul.mubr.bf16.gmra.mrb[16].mxu1 %v2502_v25 }
 0x280   : > { %v1414_v29 = vadd.f32 1.4214138, %v1350_v46  ;;  %v2306_v53 = vsel %vm2178_vm4, %v2242_v43, %v2114_v37  ;;  %v1732_v9 = vmul.f32 %v5690_v30, %v1668_v38  ;;  %v5803_v56 = vmul.f32 0.70710677, %v5781_v21 }
 0x281   : > { %v1034_v3 = vmul.f32 0.3275911, %v5794_v2  ;;  %v1541_v40 = vadd.f32 -0.28449672, %v1477_v47  ;;  %v1287_v46 = vadd.f32 -1.4531521, %v1223_v54  ;;  %v1863_v41 = vmul.f32 %v1799_v12, %v5704_v44 }
 0x282   : > { %v5805_v35 = vpop.eup %3891  ;;  %v1478_v8 = vmul.f32 %v5752_v7, %v1414_v29  ;;  %v2115_v13 = vsub.f32 1.0, %v2051_v6  ;;  %vm2179_vm5 = vcmp.lt.f32.partialorder %v5531_v61, 0.0  ;;  %v5812_v30 = vand.u32 2147483647, %v5803_v56 }
 0x283   : > { %v1224_v52 = vmul.f32 1.0614054, %v5805_v35  ;;  %v1098_v43 = vadd.f32 1.0, %v1034_v3  ;;  %v1351_v38 = vmul.f32 %v5788_v57, %v1287_v46  ;;  %v1864_v25 = vmul.f32 %v1800_v26, %v5724_v31 }
 0x284   : > { %v1542_v37 = vadd.f32 -0.28449672, %v1478_v8  ;;  %v1801_v47 = vsub.f32 0.0, %v5747_v58  ;;  %v2052_v29 = vmul.f32 %v3890_v0, %v1732_v9  ;;  %v1035_v44 = vmul.f32 0.3275911, %v5812_v30 }
 0x285   : > { %v1288_v54 = vadd.f32 -1.4531521, %v1224_v52  ;;  %3897 = vrcp.f32 %v1098_v43  ;;  %v1605_v12 = vmul.f32 %v5735_v23, %v1541_v40  ;;  %v1415_v6 = vadd.f32 1.4214138, %v1351_v38  ;;  %v6692_v40 = vld [vmem:[#allocation30_spill] sm:$0xff] }
 0x286   : > { %3899 = vpow2.f32 %v1966_v11  ;;  %v1968_v3 = vmul.f32 1.442695, %v1863_v41  ;;  %v2243_v28 = vsub.f32 0.0, %v2115_v13  ;;  %v1606_v8 = vmul.f32 %v5752_v7, %v1542_v37 }
 0x287   : > { %v5819_v51 = vpop.eup %3893  ;;  %v1352_v46 = vmul.f32 %v5805_v35, %v1288_v54  ;;  %v1099_v31 = vadd.f32 1.0, %v1035_v44  ;;  %v1479_v26 = vmul.f32 %v5788_v57, %v1415_v6  ;;  %v1970_v0 = vmul.f32 1.442695, %v1864_v25 }
 0x288   : > { %v1225_v9 = vmul.f32 1.0614054, %v5819_v51  ;;  %v1865_v52 = vmul.f32 %v1801_v47, %v5747_v58  ;;  %v2116_v43 = vsub.f32 1.0, %v2052_v29  ;;  %vm2180_vm6 = vcmp.lt.f32.partialorder %v5591_v33, 0.0 }
 0x289   : > { %v1416_v11 = vadd.f32 1.4214138, %v1352_v46  ;;  %3901 = vrcp.f32 %v1099_v31  ;;  %v5829_v41 = vadd.f32 %v6692_v40, %v4449_v48  ;;  %v3896_v37 = vpop.eup %3895  ;;  %v5833_v38 = vmul.f32 %v5754_v14, %v5595_v27 }
 0x28a   : > { %v1669_v54 = vadd.f32 0.2548296, %v1605_v12  ;;  %v1543_v25 = vadd.f32 -0.28449672, %v1479_v26  ;;  %v1289_v44 = vadd.f32 -1.4531521, %v1225_v9  ;;  %3903 = vpow2.f32 %v1968_v3 }
 0x28b   : > { %v2370_v6 = vadd.f32 1.0, %v2306_v53  ;;  %v1670_v50 = vadd.f32 0.2548296, %v1606_v8  ;;  %v1480_v58 = vmul.f32 %v5805_v35, %v1416_v11  ;;  %v2307_v47 = vsel %vm2179_vm5, %v2243_v28, %v2115_v13 }
 0x28c   : > { %v1607_v29 = vmul.f32 %v5788_v57, %v1543_v25  ;;  %v1353_v46 = vmul.f32 %v5819_v51, %v1289_v44  ;;  %v1972_v31 = vmul.f32 1.442695, %v1865_v52  ;;  %3905 = vpow2.f32 %v1970_v0 }
 0x28d   : > { %v1544_v40 = vadd.f32 -0.28449672, %v1480_v58  ;;  %v1802_v27 = vsub.f32 0.0, %v5794_v2  ;;  %v5842_v14 = vmul.f32 0.70710677, %v5829_v41  ;;  %v2244_v53 = vsub.f32 0.0, %v2116_v43 }
 0x28e   : > { %v1733_v12 = vmul.f32 %v5735_v23, %v1669_v54  ;;  %v5846_v3 = vmul.f32 0.5, %v5696_v60  ;;  %v1417_v61 = vadd.f32 1.4214138, %v1353_v46  ;;  %v1734_v28 = vmul.f32 %v5752_v7, %v1670_v50 }
 0x28f   : > { %v5848_v13 = vpop.eup %3897  ;;  %v1671_v8 = vadd.f32 0.2548296, %v1607_v29  ;;  %v1608_v26 = vmul.f32 %v5805_v35, %v1544_v40  ;;  %v5853_v0 = vand.u32 2147483647, %v5842_v14  ;;  %v5856_v52 = vmul.f32 %v2370_v6, %v5617_v17  ;;  %v6693_v40 = vld [vmem:[#allocation32_spill] sm:$0xff] }
 0x290   : > { %v3900_v9 = vpop.eup %3899  ;;  %v2371_v11 = vadd.f32 1.0, %v2307_v47  ;;  %v1481_v23 = vmul.f32 %v5819_v51, %v1417_v61  ;;  %v1226_v60 = vmul.f32 1.0614054, %v5848_v13  ;;  %3907 = vpow2.f32 %v1972_v31 }
 0x291   : > { %v1672_v54 = vadd.f32 0.2548296, %v1608_v26  ;;  %v1866_v25 = vmul.f32 %v1802_v27, %v5794_v2  ;;  %v1036_v50 = vmul.f32 0.3275911, %v5853_v0  ;;  %v2308_v7 = vsel %vm2180_vm6, %v2244_v53, %v2116_v43 }
 0x292   : > { %v2053_v44 = vmul.f32 %v3896_v37, %v1733_v12  ;;  %v1545_v58 = vadd.f32 -0.28449672, %v1481_v23  ;;  %v1290_v29 = vadd.f32 -1.4531521, %v1226_v60  ;;  %v2054_v17 = vmul.f32 %v3900_v9, %v1734_v28 }
 0x293   : > { %v5864_v46 = vpop.eup %3901  ;;  %v1735_v6 = vmul.f32 %v5788_v57, %v1671_v8  ;;  %v1100_v47 = vadd.f32 1.0, %v1036_v50  ;;  %v5869_v61 = vadd.f32 %v6693_v40, %v4474_v5  ;;  %v1736_v2 = vmul.f32 %v5805_v35, %v1672_v54 }
 0x294   : > { %v1609_v31 = vmul.f32 %v5819_v51, %v1545_v58  ;;  %v1354_v33 = vmul.f32 %v5848_v13, %v1290_v29  ;;  %v1227_v43 = vmul.f32 1.0614054, %v5864_v46  ;;  %v3904_v37 = vpop.eup %3903  ;;  %vm2181_vm7 = vcmp.lt.f32.partialorder %v5625_v22, 0.0  ;;  %v6694_v29 = vld [vmem:[#allocation36_spill] sm:$0xff] }
 0x295   : > { %v5877_v27 = vmul.f32 0.5, %v5718_v1  ;;  %v5880_v57 = vmul.f32 0.5, %v5762_v62  ;;  %v1803_v53 = vsub.f32 0.0, %v5812_v30  ;;  %3909 = vrcp.f32 %v1100_v47 }
 0x296   : > { %v5884_v35 = vmul.f32 %v2371_v11, %v5654_v45  ;;  %v2117_v12 = vsub.f32 1.0, %v2053_v44  ;;  %vm2182_vm8 = vcmp.lt.f32.partialorder %v5658_v10, 0.0  ;;  %v1673_v28 = vadd.f32 0.2548296, %v1609_v31  ;;  %v3906_v26 = vpop.eup %3905 }
 0x297   : > { %v1418_v8 = vadd.f32 1.4214138, %v1354_v33  ;;  %v2372_v9 = vadd.f32 1.0, %v2308_v7  ;;  %v2118_v23 = vsub.f32 1.0, %v2054_v17  ;;  %v1974_v60 = vmul.f32 1.442695, %v1866_v25 }
 0x298   : > { %v1291_v1 = vadd.f32 -1.4531521, %v1227_v43  ;;  %v2055_v54 = vmul.f32 %v3904_v37, %v1735_v6  ;;  %v2056_v50 = vmul.f32 %v3906_v26, %v1736_v2  ;;  %v5889_v58 = vmul.f32 0.70710677, %v5869_v61 }
 0x299   : > { %v1482_v62 = vmul.f32 %v5848_v13, %v1418_v8  ;;  %v5892_v45 = vmul.f32 0.5, %v5781_v21  ;;  %v1867_v44 = vmul.f32 %v1803_v53, %v5812_v30  ;;  %v5898_v7 = vadd.f32 %v6694_v29, %v4449_v48 }
 0x29a   : > { %v1355_v11 = vmul.f32 %v5864_v46, %v1291_v1  ;;  %v2245_v25 = vsub.f32 0.0, %v2117_v12  ;;  %v1737_v17 = vmul.f32 %v5819_v51, %v1673_v28  ;;  %v5902_v47 = vand.u32 2147483647, %v5889_v58  ;;  %v3908_v40 = vpop.eup %3907 }
 0x29b   : > { %v1546_v6 = vadd.f32 -0.28449672, %v1482_v62  ;;  %v2246_v2 = vsub.f32 0.0, %v2118_v23  ;;  %vm2183_vm9 = vcmp.lt.f32.partialorder %v5688_v16, 0.0  ;;  %vm2184_vm10 = vcmp.lt.f32.partialorder %v5708_v32, 0.0  ;;  %v6696_v32 = vld [vmem:[#allocation34_spill] sm:$0xff] }
 0x29c   : > { %3911 = vpow2.f32 %v1974_v60  ;;  %v1419_v21 = vadd.f32 1.4214138, %v1355_v11  ;;  %v1804_v30 = vsub.f32 0.0, %v5853_v0  ;;  %v5908_v31 = vmul.f32 %v2372_v9, %v5699_v34 }
 0x29d   : > { %v2119_v33 = vsub.f32 1.0, %v2055_v54  ;;  %v2120_v43 = vsub.f32 1.0, %v2056_v50  ;;  %v1037_v51 = vmul.f32 0.3275911, %v5902_v47  ;;  %v1976_v53 = vmul.f32 1.442695, %v1867_v44 }
 0x29e   : > { %v1483_v37 = vmul.f32 %v5864_v46, %v1419_v21  ;;  %v5913_v28 = vmul.f32 0.70710677, %v5898_v7  ;;  %v2505_v8 = vpack.c.bf16 %v5432_v63, %v5336_v36  ;;  %v2309_v26 = vsel %vm2181_vm7, %v2245_v25, %v2117_v12 }
 0x29f   : > { %v2057_v60 = vmul.f32 %v3908_v40, %v1737_v17  ;;  %v1610_v34 = vmul.f32 %v5848_v13, %v1546_v6  ;;  %v1101_v9 = vadd.f32 1.0, %v1037_v51  ;;  %v5920_v1 = vpop.eup %3909  ;;  %v2310_v54 = vsel %vm2182_vm8, %v2246_v2, %v2118_v23 }
 0x2a0   : > { %v1547_v50 = vadd.f32 -0.28449672, %v1483_v37  ;;  %v1868_v62 = vmul.f32 %v1804_v30, %v5853_v0  ;;  %v974_v11 = vand.u32 2147483647, %v5913_v28  ;;  %2726 = vmatprep.mubr.bf16.mxu1 %v2505_v8  ;;  %v2247_v44 = vsub.f32 0.0, %v2119_v33  ;;  %v6695_v8 = vld [vmem:[#allocation52_spill] sm:$0xff] }
 0x2a1   : > { %v2248_v36 = vsub.f32 0.0, %v2120_v43  ;;  %v1228_v63 = vmul.f32 1.0614054, %v5920_v1  ;;  %3913 = vrcp.f32 %v1101_v9  ;;  %vm2185_vm11 = vcmp.lt.f32.partialorder %v5740_v42, 0.0 }
 0x2a2   : > { %v1611_v22 = vmul.f32 %v5864_v46, %v1547_v50  ;;  %3915 = vpow2.f32 %v1976_v53  ;;  %v5930_v12 = vmul.f32 0.5, %v5829_v41  ;;  %v1038_v10 = vmul.f32 0.3275911, %v974_v11 }
 0x2a3   : > { %v2121_v23 = vsub.f32 1.0, %v2057_v60  ;;  %v1674_v29 = vadd.f32 0.2548296, %v1610_v34  ;;  %v1292_v0 = vadd.f32 -1.4531521, %v1228_v63  ;;  %v5934_v25 = vadd.f32 %v5303_v4, %v4474_v5  ;;  %v6697_v63 = vld [vmem:[#allocation35_spill] sm:$0xff] }
 0x2a4   : > { %v2373_v17 = vadd.f32 1.0, %v2309_v26  ;;  %v2374_v6 = vadd.f32 1.0, %v2310_v54  ;;  %v1978_v40 = vmul.f32 1.442695, %v1868_v62  ;;  %v1102_v2 = vadd.f32 1.0, %v1038_v10 }
 0x2a5   : > { %v2311_v21 = vsel %vm2183_vm9, %v2247_v44, %v2119_v33  ;;  %v2312_v30 = vsel %vm2184_vm10, %v2248_v36, %v2120_v43  ;;  %v1675_v41 = vadd.f32 0.2548296, %v1611_v22  ;;  %v1356_v51 = vmul.f32 %v5920_v1, %v1292_v0 }
 0x2a6   : > { %v3912_v37 = vpop.eup %3911  ;;  %v1805_v53 = vsub.f32 0.0, %v5902_v47  ;;  %3917 = vrcp.f32 %v1102_v2  ;;  %v5943_v4 = vmul.f32 0.70710677, %v5934_v25  ;;  %v2504_v26 = vpack.c.bf16 %v5413_v18, %v6695_v8 }
 0x2a7   : > { %v2249_v60 = vsub.f32 0.0, %v2121_v23  ;;  %v1738_v16 = vmul.f32 %v5848_v13, %v1674_v29  ;;  %v1420_v33 = vadd.f32 1.4214138, %v1356_v51  ;;  %v5950_v43 = vadd.f32 %v6696_v32, %v4449_v48 }
 0x2a8   : > { %v5953_v34 = vmul.f32 %v2373_v17, %v5713_v55  ;;  %v5956_v9 = vmul.f32 %v2374_v6, %v5757_v20  ;;  %v2375_v54 = vadd.f32 1.0, %v2311_v21  ;;  %v5959_v50 = vand.u32 2147483647, %v5943_v4  ;;  %2727 = vmatmul.mubr.bf16.gmra.mrb[20].mxu1 %v2504_v26 }
 0x2a9   : > { %v1739_v18 = vmul.f32 %v5864_v46, %v1675_v41  ;;  %v1484_v13 = vmul.f32 %v5920_v1, %v1420_v33  ;;  %3919 = vpow2.f32 %v1978_v40  ;;  %v1806_v62 = vsub.f32 0.0, %v974_v11 }
 0x2aa   : > { %v2376_v44 = vadd.f32 1.0, %v2312_v30  ;;  %v1869_v36 = vmul.f32 %v1805_v53, %v5902_v47  ;;  %v1039_v55 = vmul.f32 0.3275911, %v5959_v50  ;;  %v5967_v20 = vadd.f32 %v6697_v63, %v4474_v5 }
 0x2ab   : > { %v5969_v22 = vpop.eup %3913  ;;  %v2313_v10 = vsel %vm2185_vm11, %v2249_v60, %v2121_v23  ;;  %v2058_v29 = vmul.f32 %v3912_v37, %v1738_v16  ;;  %v1548_v46 = vadd.f32 -0.28449672, %v1484_v13  ;;  %v5974_v0 = vmul.f32 0.70710677, %v5950_v43 }
 0x2ac   : > { %v3916_v17 = vpop.eup %3915  ;;  %v5977_v6 = vmul.f32 %v2375_v54, %v5791_v39  ;;  %v5980_v47 = vmul.f32 0.5, %v5869_v61  ;;  %v1229_v40 = vmul.f32 1.0614054, %v5969_v22  ;;  %v1103_v2 = vadd.f32 1.0, %v1039_v55 }
 0x2ad   : > { %v2059_v21 = vmul.f32 %v3916_v17, %v1739_v18  ;;  %v1612_v30 = vmul.f32 %v5920_v1, %v1548_v46  ;;  %v1870_v42 = vmul.f32 %v1806_v62, %v974_v11  ;;  %v976_v23 = vand.u32 2147483647, %v5974_v0  ;;  %v6698_v18 = vld [vmem:[#allocation15_spill] sm:$0xff] }
 0x2ae   : > { %v2377_v41 = vadd.f32 1.0, %v2313_v10  ;;  %vm2186_vm12 = vcmp.lt.f32.partialorder %v5777_v15, 0.0  ;;  %v1293_v51 = vadd.f32 -1.4531521, %v1229_v40  ;;  %3921 = vrcp.f32 %v1103_v2 }
 0x2af   : > { %v5987_v39 = vmul.f32 0.70710677, %v5967_v20  ;;  %v5990_v61 = vmul.f32 %v2376_v44, %v5846_v3  ;;  %v2122_v37 = vsub.f32 1.0, %v2058_v29  ;;  %v1980_v53 = vmul.f32 1.442695, %v1869_v36 }
 0x2b0   : > { %v5993_v8 = vmul.f32 0.5, %v5898_v7  ;;  %v5995_v26 = vpop.eup %3917  ;;  %vm2187_vm13 = vcmp.lt.f32.partialorder %v5803_v56, 0.0  ;;  %v1676_v11 = vadd.f32 0.2548296, %v1612_v30  ;;  %v1357_v60 = vmul.f32 %v5969_v22, %v1293_v51  ;;  %v6699_v51 = vld [vmem:[#allocation31_spill] sm:$0xff]  ;;  %v6701_v56 = vld [vmem:[#allocation37_spill] sm:$0xff] }
 0x2b1   : > { %v1040_v16 = vmul.f32 0.3275911, %v976_v23  ;;  %v6000_v33 = vand.u32 2147483647, %v5987_v39  ;;  %v2123_v32 = vsub.f32 1.0, %v2059_v21  ;;  %v6005_v13 = vadd.f32 %v6698_v18, %v4449_v48 }
 0x2b2   : > { %v1230_v3 = vmul.f32 1.0614054, %v5995_v26  ;;  %v1982_v54 = vmul.f32 1.442695, %v1870_v42  ;;  %v6008_v7 = vmul.f32 %v2377_v41, %v5877_v27  ;;  %v1421_v62 = vadd.f32 1.4214138, %v1357_v60 }
 0x2b3   : > { %v1104_v44 = vadd.f32 1.0, %v1040_v16  ;;  %v1041_v36 = vmul.f32 0.3275911, %v6000_v33  ;;  %v3920_v55 = vpop.eup %3919  ;;  %v2250_v63 = vsub.f32 0.0, %v2122_v37  ;;  %3923 = vpow2.f32 %v1980_v53  ;;  %v6700_v60 = vld [vmem:[#allocation17_spill] sm:$0xff] }
 0x2b4   : > { %v1294_v10 = vadd.f32 -1.4531521, %v1230_v3  ;;  %v1807_v29 = vsub.f32 0.0, %v5959_v50  ;;  %v1740_v46 = vmul.f32 %v5920_v1, %v1676_v11  ;;  %v1485_v17 = vmul.f32 %v5969_v22, %v1421_v62 }
 0x2b5   : > { %3925 = vrcp.f32 %v1104_v44  ;;  %v1105_v40 = vadd.f32 1.0, %v1041_v36  ;;  %v2251_v2 = vsub.f32 0.0, %v2123_v32  ;;  %v6016_v21 = vmul.f32 0.5, %v5934_v25 }
 0x2b6   : > { %v1358_v27 = vmul.f32 %v5995_v26, %v1294_v10  ;;  %v6019_v30 = vmul.f32 0.70710677, %v6005_v13  ;;  %v1549_v42 = vadd.f32 -0.28449672, %v1485_v17  ;;  %3927 = vpow2.f32 %v1982_v54 }
 0x2b7   : > { %v1808_v41 = vsub.f32 0.0, %v976_v23  ;;  %v2507_v53 = vpack.c.bf16 %v5564_v19, %v6699_v51  ;;  %v2314_v1 = vsel %vm2186_vm12, %v2250_v63, %v2122_v37  ;;  %3929 = vrcp.f32 %v1105_v40 }
 0x2b8   : > { %v1422_v11 = vadd.f32 1.4214138, %v1358_v27  ;;  %v6027_v16 = vadd.f32 %v6700_v60, %v4474_v5  ;;  %v6029_v25 = vpop.eup %3921  ;;  %v2060_v3 = vmul.f32 %v3920_v55, %v1740_v46  ;;  %v1613_v18 = vmul.f32 %v5969_v22, %v1549_v42 }
 0x2b9   : > { %v1871_v54 = vmul.f32 %v1807_v29, %v5959_v50  ;;  %v6034_v62 = vand.u32 2147483647, %v6019_v30  ;;  %2734 = vmatprep.mubr.bf16.mxu1 %v2507_v53  ;;  %v2315_v19 = vsel %vm2187_vm13, %v2251_v2, %v2123_v32  ;;  %v1231_v37 = vmul.f32 1.0614054, %v6029_v25  ;;  %v6702_v32 = vld [vmem:[#allocation39_spill] sm:$0xff] }
 0x2ba   : > { %v1486_v15 = vmul.f32 %v5995_v26, %v1422_v11  ;;  %v6041_v44 = vmul.f32 0.5, %v5950_v43  ;;  %v2378_v36 = vadd.f32 1.0, %v2314_v1  ;;  %v1677_v55 = vadd.f32 0.2548296, %v1613_v18 }
 0x2bb   : > { %v1872_v63 = vmul.f32 %v1808_v41, %v976_v23  ;;  %v1042_v10 = vmul.f32 0.3275911, %v6034_v62  ;;  %vm2188_vm14 = vcmp.lt.f32.partialorder %v5842_v14, 0.0  ;;  %v1295_v29 = vadd.f32 -1.4531521, %v1231_v37 }
 0x2bc   : > { %v1550_v50 = vadd.f32 -0.28449672, %v1486_v15  ;;  %v6046_v46 = vmul.f32 0.70710677, %v6027_v16  ;;  %v2506_v17 = vpack.c.bf16 %v6702_v32, %v6701_v56  ;;  %v2379_v40 = vadd.f32 1.0, %v2315_v19  ;;  %v6704_v15 = vld [vmem:[#allocation33_spill] sm:$0xff] }
 0x2bd   : > { %v2124_v2 = vsub.f32 1.0, %v2060_v3  ;;  %v1984_v27 = vmul.f32 1.442695, %v1871_v54  ;;  %v1106_v43 = vadd.f32 1.0, %v1042_v10  ;;  %v3924_v42 = vpop.eup %3923  ;;  %v1359_v23 = vmul.f32 %v6029_v25, %v1295_v29 }
 0x2be   : > { %v1614_v51 = vmul.f32 %v5995_v26, %v1550_v50  ;;  %v1809_v41 = vsub.f32 0.0, %v6000_v33  ;;  %v979_v53 = vand.u32 2147483647, %v6046_v46  ;;  %2735 = vmatmul.mubr.bf16.gmra.mrb[24].mxu1 %v2506_v17  ;;  %v6057_v11 = vmul.f32 %v2378_v36, %v5880_v57 }
 0x2bf   : > { %v6054_v1 = vpop.eup %3925  ;;  %v1741_v60 = vmul.f32 %v5969_v22, %v1677_v55  ;;  %v6061_v3 = vmul.f32 0.5, %v5967_v20  ;;  %3931 = vrcp.f32 %v1106_v43  ;;  %v1423_v18 = vadd.f32 1.4214138, %v1359_v23 }
 0x2c0   : > { %6703 = vst [vmem:[#allocation24_spill] sm:$0xff] %v6057_v11  ;;  %v1232_v54 = vmul.f32 1.0614054, %v6054_v1  ;;  %v1986_v19 = vmul.f32 1.442695, %v1872_v63  ;;  %v6066_v37 = vadd.f32 %v6704_v15, %v4449_v48  ;;  %v3928_v10 = vpop.eup %3927  ;;  %v6069_v50 = vmul.f32 %v2379_v40, %v5892_v45 }
 0x2c1   : > { %v2252_v57 = vsub.f32 0.0, %v2124_v2  ;;  %3933 = vpow2.f32 %v1984_v27  ;;  %v1043_v36 = vmul.f32 0.3275911, %v979_v53  ;;  %v6071_v22 = vpop.eup %3929  ;;  %v1678_v20 = vadd.f32 0.2548296, %v1614_v51 }
 0x2c2   : > { %v1487_v55 = vmul.f32 %v6029_v25, %v1423_v18  ;;  %v1296_v29 = vadd.f32 -1.4531521, %v1232_v54  ;;  %v1873_v56 = vmul.f32 %v1809_v41, %v6000_v33  ;;  %v2061_v63 = vmul.f32 %v3924_v42, %v1741_v60 }
 0x2c3   : > { %v1233_v32 = vmul.f32 1.0614054, %v6071_v22  ;;  %v6077_v17 = vmul.f32 0.5, %v6005_v13  ;;  %v1107_v43 = vadd.f32 1.0, %v1043_v36  ;;  %3935 = vpow2.f32 %v1986_v19  ;;  %v6705_v36 = vld [vmem:[#allocation38_spill] sm:$0xff] }
 0x2c4   : > { %v1551_v45 = vadd.f32 -0.28449672, %v1487_v55  ;;  %v1360_v40 = vmul.f32 %v6054_v1, %v1296_v29  ;;  %v6081_v27 = vmul.f32 0.70710677, %v6066_v37  ;;  %v2316_v51 = vsel %vm2188_vm14, %v2252_v57, %v2124_v2 }
 0x2c5   : > { %v1297_v23 = vadd.f32 -1.4531521, %v1233_v32  ;;  %v1810_v33 = vsub.f32 0.0, %v6034_v62  ;;  %3937 = vrcp.f32 %v1107_v43  ;;  %vm2189_vm15 = vcmp.lt.f32.partialorder %v5889_v58, 0.0 }
 0x2c6   : > { %v1742_v13 = vmul.f32 %v5995_v26, %v1678_v20  ;;  %v1615_v42 = vmul.f32 %v6029_v25, %v1551_v45  ;;  %v1424_v41 = vadd.f32 1.4214138, %v1360_v40  ;;  %v1988_v60 = vmul.f32 1.442695, %v1873_v56 }
 0x2c7   : > { %v2125_v18 = vsub.f32 1.0, %v2061_v63  ;;  %v1361_v54 = vmul.f32 %v6071_v22, %v1297_v23  ;;  %v1811_v19 = vsub.f32 0.0, %v979_v53  ;;  %v980_v15 = vand.u32 2147483647, %v6081_v27 }
 0x2c8   : > { %v2380_v14 = vadd.f32 1.0, %v2316_v51  ;;  %v1488_v2 = vmul.f32 %v6054_v1, %v1424_v41  ;;  %v6093_v57 = vmul.f32 0.5, %v6027_v16  ;;  %v6097_v55 = vadd.f32 %v6705_v36, %v4474_v5 }
 0x2c9   : > { %v6099_v26 = vpop.eup %3931  ;;  %v1679_v20 = vadd.f32 0.2548296, %v1615_v42  ;;  %v1425_v29 = vadd.f32 1.4214138, %v1361_v54  ;;  %v1874_v56 = vmul.f32 %v1810_v33, %v6034_v62  ;;  %v1044_v63 = vmul.f32 0.3275911, %v980_v15 }
 0x2ca   : > { %v2062_v32 = vmul.f32 %v3928_v10, %v1742_v13  ;;  %v1552_v43 = vadd.f32 -0.28449672, %v1488_v2  ;;  %3939 = vpow2.f32 %v1988_v60  ;;  %v1234_v45 = vmul.f32 1.0614054, %v6099_v26 }
 0x2cb   : > { %v3934_v40 = vpop.eup %3933  ;;  %v2253_v51 = vsub.f32 0.0, %v2125_v18  ;;  %v1489_v16 = vmul.f32 %v6071_v22, %v1425_v29  ;;  %v1875_v23 = vmul.f32 %v1811_v19, %v979_v53  ;;  %v1108_v41 = vadd.f32 1.0, %v1044_v63 }
 0x2cc   : > { %v6105_v36 = vmul.f32 %v2380_v14, %v5930_v12  ;;  %v1616_v42 = vmul.f32 %v6054_v1, %v1552_v43  ;;  %v1298_v54 = vadd.f32 -1.4531521, %v1234_v45  ;;  %v6109_v62 = vmul.f32 0.70710677, %v6097_v55 }
 0x2cd   : > { %vm2190_vm0 = vcmp.lt.f32.partialorder %v5913_v28, 0.0  ;;  %v1743_v10 = vmul.f32 %v6029_v25, %v1679_v20  ;;  %v1553_v33 = vadd.f32 -0.28449672, %v1489_v16  ;;  %v1990_v13 = vmul.f32 1.442695, %v1874_v56  ;;  %v3936_v60 = vpop.eup %3935 }
 0x2ce   : > { %6706 = vst [vmem:[#allocation26_spill] sm:$0xff] %v6105_v36  ;;  %3941 = vrcp.f32 %v1108_v41  ;;  %v2126_v2 = vsub.f32 1.0, %v2062_v32  ;;  %v1680_v53 = vadd.f32 0.2548296, %v1616_v42  ;;  %v1362_v19 = vmul.f32 %v6099_v26, %v1298_v54  ;;  %v6707_v32 = vld [vmem:[#allocation19_spill] sm:$0xff] }
 0x2cf   : > { %v981_v12 = vand.u32 2147483647, %v6109_v62  ;;  %v6115_v14 = vpop.eup %3937  ;;  %v2317_v29 = vsel %vm2189_vm15, %v2253_v51, %v2125_v18  ;;  %v1617_v63 = vmul.f32 %v6071_v22, %v1553_v33  ;;  %v1992_v43 = vmul.f32 1.442695, %v1875_v23 }
 0x2d0   : > { %v1812_v45 = vsub.f32 0.0, %v980_v15  ;;  %v1744_v25 = vmul.f32 %v6054_v1, %v1680_v53  ;;  %v1426_v20 = vadd.f32 1.4214138, %v1362_v19  ;;  %v1235_v56 = vmul.f32 1.0614054, %v6115_v14 }
 0x2d1   : > { %v6124_v16 = vadd.f32 %v6707_v32, %v4449_v48  ;;  %v6126_v41 = vmul.f32 %v3934_v40, %v1743_v10  ;;  %v1681_v42 = vadd.f32 0.2548296, %v1617_v63  ;;  %3943 = vpow2.f32 %v1990_v13 }
 0x2d2   : > { %v1045_v54 = vmul.f32 0.3275911, %v981_v12  ;;  %v2381_v58 = vadd.f32 1.0, %v2317_v29  ;;  %v2254_v18 = vsub.f32 0.0, %v2126_v2  ;;  %v1490_v51 = vmul.f32 %v6099_v26, %v1426_v20 }
 0x2d3   : > { %v1299_v23 = vadd.f32 -1.4531521, %v1235_v56  ;;  %v1745_v33 = vmul.f32 %v6071_v22, %v1681_v42  ;;  %3945 = vpow2.f32 %v1992_v43  ;;  %v1876_v1 = vmul.f32 %v1812_v45, %v980_v15 }
 0x2d4   : > { %v1109_v53 = vadd.f32 1.0, %v1045_v54  ;;  %v3940_v19 = vpop.eup %3939  ;;  %v2064_v36 = vmul.f32 %v3936_v60, %v1744_v25  ;;  %v1554_v11 = vadd.f32 -0.28449672, %v1490_v51  ;;  %v6132_v40 = vmul.f32 0.70710677, %v6124_v16 }
 0x2d5   : > { %v1363_v32 = vmul.f32 %v6115_v14, %v1299_v23  ;;  %v2127_v10 = vsub.f32 1.0, %v6126_v41  ;;  %vm2191_vm1 = vcmp.lt.f32.partialorder %v5943_v4, 0.0  ;;  %v2065_v13 = vmul.f32 %v3940_v19, %v1745_v33 }
 0x2d6   : > { %v6137_v29 = vmul.f32 0.5, %v6066_v37  ;;  %3947 = vrcp.f32 %v1109_v53  ;;  %v2318_v22 = vsel %vm2190_vm0, %v2254_v18, %v2126_v2  ;;  %v1618_v15 = vmul.f32 %v6099_v26, %v1554_v11 }
 0x2d7   : > { %v1427_v60 = vadd.f32 1.4214138, %v1363_v32  ;;  %v982_v63 = vand.u32 2147483647, %v6132_v40  ;;  %v6146_v45 = vmul.f32 %v2381_v58, %v5980_v47  ;;  %vm2192_vm2 = vcmp.lt.f32.partialorder %v5974_v0, 0.0 }
 0x2d8   : > { %v6143_v43 = vpop.eup %3941  ;;  %v1994_v25 = vmul.f32 1.442695, %v1876_v1  ;;  %v1813_v20 = vsub.f32 0.0, %v981_v12  ;;  %v2509_v37 = vpack.c.bf16 %v5682_v49, %v5648_v59  ;;  %v2128_v56 = vsub.f32 1.0, %v2064_v36 }
 0x2d9   : > { %vm2193_vm3 = vcmp.lt.f32.partialorder %v5987_v39, 0.0  ;;  %v1682_v28 = vadd.f32 0.2548296, %v1618_v15  ;;  %v1491_v11 = vmul.f32 %v6115_v14, %v1427_v60  ;;  %v1236_v2 = vmul.f32 1.0614054, %v6143_v43 }
 0x2da   : > { %v2382_v41 = vadd.f32 1.0, %v2318_v22  ;;  %v2255_v42 = vsub.f32 0.0, %v2127_v10  ;;  %v2129_v54 = vsub.f32 1.0, %v2065_v13  ;;  %v1046_v47 = vmul.f32 0.3275911, %v982_v63  ;;  %2742 = vmatprep.mubr.bf16.mxu1 %v2509_v37 }
 0x2db   : > { %v1746_v58 = vmul.f32 %v6099_v26, %v1682_v28  ;;  %v1555_v18 = vadd.f32 -0.28449672, %v1491_v11  ;;  %v1300_v51 = vadd.f32 -1.4531521, %v1236_v2  ;;  %v6157_v59 = vadd.f32 %v5582_v24, %v4474_v5  ;;  %v3944_v49 = vpop.eup %3943  ;;  %v6708_v28 = vld [vmem:[#allocation21_spill] sm:$0xff]  ;;  %v6709_v11 = vld [vmem:[#allocation14_spill] sm:$0xff] }
 0x2dc   : > { %3949 = vpow2.f32 %v1994_v25  ;;  %v6160_v36 = vmul.f32 0.5, %v6097_v55  ;;  %v1877_v23 = vmul.f32 %v1813_v20, %v981_v12  ;;  %v1110_v33 = vadd.f32 1.0, %v1046_v47 }
 0x2dd   : > { %v2256_v1 = vsub.f32 0.0, %v2128_v56  ;;  %v2066_v53 = vmul.f32 %v3944_v49, %v1746_v58  ;;  %v1619_v19 = vmul.f32 %v6115_v14, %v1555_v18  ;;  %v1364_v32 = vmul.f32 %v6143_v43, %v1300_v51  ;;  %v3946_v26 = vpop.eup %3945  ;;  %v6710_v51 = vld [vmem:[#allocation40_spill] sm:$0xff] }
 0x2de   : > { %v6165_v13 = vmul.f32 %v2382_v41, %v5993_v8  ;;  %v2257_v22 = vsub.f32 0.0, %v2129_v54  ;;  %vm2194_vm4 = vcmp.lt.f32.partialorder %v6019_v30, 0.0  ;;  %3951 = vrcp.f32 %v1110_v33 }
 0x2df   : > { %v6169_v24 = vmul.f32 0.70710677, %v6157_v59  ;;  %v2319_v55 = vsel %vm2191_vm1, %v2255_v42, %v2127_v10  ;;  %v2130_v12 = vsub.f32 1.0, %v2066_v53  ;;  %v1683_v15 = vadd.f32 0.2548296, %v1619_v19  ;;  %v6711_v19 = vld [vmem:[#allocation44_spill] sm:$0xff] }
 0x2e0   : > { %v1428_v60 = vadd.f32 1.4214138, %v1364_v32  ;;  %v6173_v25 = vpop.eup %3947  ;;  %v1996_v20 = vmul.f32 1.442695, %v1877_v23  ;;  %v1814_v37 = vsub.f32 0.0, %v982_v63  ;;  %v2508_v2 = vpack.c.bf16 %v6709_v11, %v6708_v28 }
 0x2e1   : > { %v983_v8 = vand.u32 2147483647, %v6169_v24  ;;  %v2320_v41 = vsel %vm2192_vm2, %v2256_v1, %v2128_v56  ;;  %v1747_v47 = vmul.f32 %v6115_v14, %v1683_v15  ;;  %v1237_v10 = vmul.f32 1.0614054, %v6173_v25 }
 0x2e2   : > { %v1492_v4 = vmul.f32 %v6143_v43, %v1428_v60  ;;  %v2383_v42 = vadd.f32 1.0, %v2319_v55  ;;  %v2321_v58 = vsel %vm2193_vm3, %v2257_v22, %v2129_v54  ;;  %2743 = vmatmul.mubr.bf16.gmra.mrb[28].mxu1 %v2508_v2  ;;  %v784_v49 = vadd.f32 %v6710_v51, %v4449_v48 }
 0x2e3   : > { %v1047_v18 = vmul.f32 0.3275911, %v983_v8  ;;  %v2258_v23 = vsub.f32 0.0, %v2130_v12  ;;  %v2067_v33 = vmul.f32 %v3946_v26, %v1747_v47  ;;  %v1301_v0 = vadd.f32 -1.4531521, %v1237_v10 }
 0x2e4   : > { %v1556_v53 = vadd.f32 -0.28449672, %v1492_v4  ;;  %v2384_v56 = vadd.f32 1.0, %v2320_v41  ;;  %v1878_v1 = vmul.f32 %v1814_v37, %v982_v63  ;;  %v6189_v32 = vadd.f32 %v6711_v19, %v4474_v5 }
 0x2e5   : > { %v1111_v14 = vadd.f32 1.0, %v1047_v18  ;;  %v1365_v39 = vmul.f32 %v6173_v25, %v1301_v0  ;;  %3953 = vpow2.f32 %v1996_v20  ;;  %v6193_v54 = vmul.f32 0.70710677, %v784_v49 }
 0x2e6   : > { %v1620_v55 = vmul.f32 %v6143_v43, %v1556_v53  ;;  %v3950_v22 = vpop.eup %3949  ;;  %v6196_v15 = vmul.f32 %v2383_v42, %v6016_v21  ;;  %v2385_v26 = vadd.f32 1.0, %v2321_v58  ;;  %v6199_v60 = vmul.f32 0.5, %v6124_v16 }
 0x2e7   : > { %3955 = vrcp.f32 %v1111_v14  ;;  %v2322_v63 = vsel %vm2194_vm4, %v2258_v23, %v2130_v12  ;;  %v2131_v37 = vsub.f32 1.0, %v2067_v33  ;;  %vm2195_vm5 = vcmp.lt.f32.partialorder %v6046_v46, 0.0  ;;  %v6714_v46 = vld [vmem:[#allocation42_spill] sm:$0xff] }
 0x2e8   : > { %v1684_v28 = vadd.f32 0.2548296, %v1620_v55  ;;  %v1429_v11 = vadd.f32 1.4214138, %v1365_v39  ;;  %v6204_v20 = vpop.eup %3951  ;;  %v6207_v2 = vmul.f32 %v2384_v56, %v6041_v44  ;;  %v1998_v21 = vmul.f32 1.442695, %v1878_v1 }
 0x2e9   : > { %v984_v41 = vand.u32 2147483647, %v6193_v54  ;;  %v6211_v16 = vmul.f32 0.70710677, %v6189_v32  ;;  %v1238_v12 = vmul.f32 1.0614054, %v6204_v20  ;;  %v6228_v55 = vmul.f32 %v2385_v26, %v6061_v3 }
 0x2ea   : > { %v1748_v47 = vmul.f32 %v6143_v43, %v1684_v28  ;;  %v1493_v30 = vmul.f32 %v6173_v25, %v1429_v11  ;;  %v6217_v4 = vmul.f32 0.5, %v6157_v59  ;;  %v2386_v10 = vadd.f32 1.0, %v2322_v63  ;;  %v6712_v56 = vld [vmem:[#allocation18_spill] sm:$0xff] }
 0x2eb   : > { %v1815_v42 = vsub.f32 0.0, %v983_v8  ;;  %v1048_v58 = vmul.f32 0.3275911, %v984_v41  ;;  %v985_v44 = vand.u32 2147483647, %v6211_v16  ;;  %v2259_v18 = vsub.f32 0.0, %v2131_v37 }
 0x2ec   : > { %v2068_v51 = vmul.f32 %v3950_v22, %v1748_v47  ;;  %v1557_v23 = vadd.f32 -0.28449672, %v1493_v30  ;;  %v1302_v33 = vadd.f32 -1.4531521, %v1238_v12  ;;  %vm2196_vm6 = vcmp.lt.f32.partialorder %v6081_v27, 0.0 }
 0x2ed   : > { %v1112_v53 = vadd.f32 1.0, %v1048_v58  ;;  %v1816_v43 = vsub.f32 0.0, %v984_v41  ;;  %v1049_v0 = vmul.f32 0.3275911, %v985_v44  ;;  %v6223_v1 = vadd.f32 %v6712_v56, %v4449_v48 }
 0x2ee   : > { %v2132_v59 = vsub.f32 1.0, %v2068_v51  ;;  %v1621_v14 = vmul.f32 %v6173_v25, %v1557_v23  ;;  %v1366_v19 = vmul.f32 %v6204_v20, %v1302_v33  ;;  %3957 = vpow2.f32 %v1998_v21 }
 0x2ef   : > { %v1879_v39 = vmul.f32 %v1815_v42, %v983_v8  ;;  %3959 = vrcp.f32 %v1112_v53  ;;  %v1113_v22 = vadd.f32 1.0, %v1049_v0  ;;  %v3954_v63 = vpop.eup %3953  ;;  %v6231_v28 = vmul.f32 %v2386_v10, %v6077_v17  ;;  %v6713_v8 = vld [vmem:[#allocation41_spill] sm:$0xff] }
 0x2f0   : > { %v1685_v11 = vadd.f32 0.2548296, %v1621_v14  ;;  %v1430_v47 = vadd.f32 1.4214138, %v1366_v19  ;;  %v6233_v30 = vmul.f32 0.5, %v784_v49  ;;  %v2323_v58 = vsel %vm2195_vm5, %v2259_v18, %v2131_v37 }
 0x2f1   : > { %v6235_v12 = vpop.eup %3955  ;;  %v1880_v21 = vmul.f32 %v1816_v43, %v984_v41  ;;  %v6240_v3 = vmul.f32 0.70710677, %v6223_v1  ;;  %v2511_v26 = vpack.c.bf16 %v5833_v38, %v6713_v8  ;;  %v2260_v42 = vsub.f32 0.0, %v2132_v59 }
 0x2f2   : > { %v1749_v17 = vmul.f32 %v6173_v25, %v1685_v11  ;;  %v1494_v10 = vmul.f32 %v6204_v20, %v1430_v47  ;;  %v1239_v49 = vmul.f32 1.0614054, %v6235_v12  ;;  %v2000_v51 = vmul.f32 1.442695, %v1879_v39  ;;  %v6715_v47 = vld [vmem:[#allocation20_spill] sm:$0xff] }
 0x2f3   : > { %3961 = vrcp.f32 %v1113_v22  ;;  %v986_v23 = vand.u32 2147483647, %v6240_v3  ;;  %2750 = vmatprep.mubr.bf16.mxu1 %v2511_v26  ;;  %v6250_v37 = vadd.f32 %v6714_v46, %v4474_v5  ;;  %v1817_v38 = vsub.f32 0.0, %v985_v44 }
 0x2f4   : > { %v2069_v41 = vmul.f32 %v3954_v63, %v1749_v17  ;;  %v1558_v18 = vadd.f32 -0.28449672, %v1494_v10  ;;  %v1303_v33 = vadd.f32 -1.4531521, %v1239_v49  ;;  %v2387_v53 = vadd.f32 1.0, %v2323_v58  ;;  %v6716_v58 = vld [vmem:[#allocation22_spill] sm:$0xff] }
 0x2f5   : > { %v2002_v43 = vmul.f32 1.442695, %v1880_v21  ;;  %v6253_v25 = vmul.f32 0.5, %v6189_v32  ;;  %v1050_v0 = vmul.f32 0.3275911, %v986_v23  ;;  %v2324_v56 = vsel %vm2196_vm6, %v2260_v42, %v2132_v59  ;;  %v6717_v10 = vld [vmem:[#allocation45_spill] sm:$0xff] }
 0x2f6   : > { %vm2197_vm7 = vcmp.lt.f32.partialorder %v6109_v62, 0.0  ;;  %v1622_v14 = vmul.f32 %v6204_v20, %v1558_v18  ;;  %v1367_v19 = vmul.f32 %v6235_v12, %v1303_v33  ;;  %v1818_v39 = vsub.f32 0.0, %v986_v23 }
 0x2f7   : > { %v2133_v22 = vsub.f32 1.0, %v2069_v41  ;;  %v1114_v63 = vadd.f32 1.0, %v1050_v0  ;;  %v6261_v11 = vmul.f32 0.70710677, %v6250_v37  ;;  %v2510_v32 = vpack.c.bf16 %v6716_v58, %v6715_v47 }
 0x2f8   : > { %v3958_v21 = vpop.eup %3957  ;;  %v1686_v8 = vadd.f32 0.2548296, %v1622_v14  ;;  %v1431_v26 = vadd.f32 1.4214138, %v1367_v19  ;;  %3963 = vpow2.f32 %v2000_v51  ;;  %v1881_v27 = vmul.f32 %v1817_v38, %v985_v44 }
 0x2f9   : > { %v6265_v59 = vpop.eup %3959  ;;  %v2388_v42 = vadd.f32 1.0, %v2324_v56  ;;  %3965 = vrcp.f32 %v1114_v63  ;;  %v987_v17 = vand.u32 2147483647, %v6261_v11  ;;  %2751 = vmatmul.mubr.bf16.gmra.mrb[32].mxu1 %v2510_v32  ;;  %v6270_v49 = vadd.f32 %v6717_v10, %v4449_v48 }
 0x2fa   : > { %v6273_v46 = vmul.f32 %v2387_v53, %v6093_v57  ;;  %v1750_v41 = vmul.f32 %v6204_v20, %v1686_v8  ;;  %v1495_v18 = vmul.f32 %v6235_v12, %v1431_v26  ;;  %v1240_v44 = vmul.f32 1.0614054, %v6265_v59 }
 0x2fb   : > { %v2261_v51 = vsub.f32 0.0, %v2133_v22  ;;  %3967 = vpow2.f32 %v2002_v43  ;;  %v1882_v33 = vmul.f32 %v1818_v39, %v986_v23  ;;  %v1051_v38 = vmul.f32 0.3275911, %v987_v17 }
 0x2fc   : > { %v2070_v0 = vmul.f32 %v3958_v21, %v1750_v41  ;;  %vm2198_vm8 = vcmp.lt.f32.partialorder %v6132_v40, 0.0  ;;  %v1559_v56 = vadd.f32 -0.28449672, %v1495_v18  ;;  %v1304_v14 = vadd.f32 -1.4531521, %v1240_v44 }
 0x2fd   : > { %v1819_v48 = vsub.f32 0.0, %v987_v17  ;;  %v6279_v19 = vpop.eup %3961  ;;  %v6282_v57 = vmul.f32 %v2388_v42, %v6137_v29  ;;  %v2004_v20 = vmul.f32 1.442695, %v1881_v27  ;;  %v1115_v53 = vadd.f32 1.0, %v1051_v38  ;;  %v6718_v27 = vld [vmem:[#allocation23_spill] sm:$0xff] }
 0x2fe   : > { %v6285_v63 = vmul.f32 0.70710677, %v6270_v49  ;;  %v2134_v47 = vsub.f32 1.0, %v2070_v0  ;;  %v1623_v23 = vmul.f32 %v6235_v12, %v1559_v56  ;;  %v1368_v43 = vmul.f32 %v6265_v59, %v1304_v14 }
 0x2ff   : > { %v1241_v39 = vmul.f32 1.0614054, %v6279_v19  ;;  %v2325_v58 = vsel %vm2197_vm7, %v2261_v51, %v2133_v22  ;;  %v2006_v32 = vmul.f32 1.442695, %v1882_v33  ;;  %3969 = vrcp.f32 %v1115_v53 }
 0x300   : > { %v988_v29 = vand.u32 2147483647, %v6285_v63  ;;  %v1687_v21 = vadd.f32 0.2548296, %v1623_v23  ;;  %v1432_v8 = vadd.f32 1.4214138, %v1368_v43  ;;  %v1883_v26 = vmul.f32 %v1819_v48, %v987_v17 }
 0x301   : > { %v6295_v42 = vadd.f32 %v6718_v27, %v4474_v5  ;;  %v2262_v10 = vsub.f32 0.0, %v2134_v47  ;;  %v1305_v41 = vadd.f32 -1.4531521, %v1241_v39  ;;  %v2389_v0 = vadd.f32 1.0, %v2325_v58 }
 0x302   : > { %v1052_v18 = vmul.f32 0.3275911, %v988_v29  ;;  %v1820_v44 = vsub.f32 0.0, %v988_v29  ;;  %v3964_v38 = vpop.eup %3963  ;;  %v1751_v62 = vmul.f32 %v6235_v12, %v1687_v21  ;;  %vm2199_vm9 = vcmp.lt.f32.partialorder %v6169_v24, 0.0 }
 0x303   : > { %v1496_v22 = vmul.f32 %v6265_v59, %v1432_v8  ;;  %3971 = vpow2.f32 %v2004_v20  ;;  %v6300_v51 = vpop.eup %3965  ;;  %v1369_v17 = vmul.f32 %v6279_v19, %v1305_v41  ;;  %v6305_v53 = vmul.f32 0.70710677, %v6295_v42 }
 0x304   : > { %3973 = vpow2.f32 %v2006_v32  ;;  %v1116_v5 = vadd.f32 1.0, %v1052_v18  ;;  %v1884_v33 = vmul.f32 %v1820_v44, %v988_v29  ;;  %v2071_v56 = vmul.f32 %v3964_v38, %v1751_v62 }
 0x305   : > { %v1560_v14 = vadd.f32 -0.28449672, %v1496_v22  ;;  %v1242_v48 = vmul.f32 1.0614054, %v6300_v51  ;;  %v3968_v12 = vpop.eup %3967  ;;  %v2326_v23 = vsel %vm2198_vm8, %v2262_v10, %v2134_v47  ;;  %v1433_v43 = vadd.f32 1.4214138, %v1369_v17 }
 0x306   : > { %v2008_v20 = vmul.f32 1.442695, %v1883_v26  ;;  %3975 = vrcp.f32 %v1116_v5  ;;  %v2135_v39 = vsub.f32 1.0, %v2071_v56  ;;  %v6311_v29 = vand.u32 2147483647, %v6305_v53  ;;  %v3487_v22 = vpop.f32.mrb[0].mxu1 }
 0x307   : > { %v1624_v58 = vmul.f32 %v6265_v59, %v1560_v14  ;;  %v1306_v32 = vadd.f32 -1.4531521, %v1242_v48  ;;  %v6314_v21 = vmul.f32 %v2389_v0, %v6160_v36  ;;  %v1497_v8 = vmul.f32 %v6279_v19, %v1433_v43  ;;  %v3488_v56 = vpop.f32.mrb[1].mxu1 }
 0x308   : > { %v2010_v27 = vmul.f32 1.442695, %v1884_v33  ;;  %v2513_v40 = vpack.c.bf16 %v5953_v34, %v5884_v35  ;;  %v2263_v47 = vsub.f32 0.0, %v2135_v39  ;;  %v1053_v41 = vmul.f32 0.3275911, %v6311_v29  ;;  %v3490_v14 = vpop.f32.mrb[2].mxu1 }
 0x309   : > { %v1688_v10 = vadd.f32 0.2548296, %v1624_v58  ;;  %v1370_v26 = vmul.f32 %v6300_v51, %v1306_v32  ;;  %v6321_v18 = vpop.eup %3969  ;;  %v2390_v44 = vadd.f32 1.0, %v2326_v23  ;;  %vm2200_vm10 = vcmp.lt.f32.partialorder %v6193_v54, 0.0 }
 0x30a   : > { %v1561_v38 = vadd.f32 -0.28449672, %v1497_v8  ;;  %2758 = vmatprep.mubr.bf16.mxu1 %v2513_v40  ;;  %v2512_v36 = vpack.c.bf16 %v5908_v31, %v5856_v52  ;;  %v2515_v0 = vpack.c.bf16 %v6008_v7, %v5977_v6  ;;  %v1243_v62 = vmul.f32 1.0614054, %v6321_v18  ;;  %v6719_v8 = vld [vmem:[#allocation24_spill] sm:$0xff] }
 0x30b   : > { %v1752_v35 = vmul.f32 %v6265_v59, %v1688_v10  ;;  %v1434_v34 = vadd.f32 1.4214138, %v1370_v26  ;;  %3977 = vpow2.f32 %v2008_v20  ;;  %v2327_v17 = vsel %vm2199_vm9, %v2263_v47, %v2135_v39  ;;  %v3491_v20 = vpop.f32.mrb[3].mxu1  ;;  %v2914_v10 = vld [vmem:[%s6524_s4] sm:$0x1] }
 0x30c   : > { %v1625_v5 = vmul.f32 %v6279_v19, %v1561_v38  ;;  %3979 = vpow2.f32 %v2010_v27  ;;  %v1117_v33 = vadd.f32 1.0, %v1053_v41  ;;  %2759 = vmatmul.mubr.bf16.gmra.mrb[36].mxu1 %v2512_v36  ;;  %v1307_v7 = vadd.f32 -1.4531521, %v1243_v62  ;;  %v6720_v27 = vld [vmem:[#allocation26_spill] sm:$0xff] }
 0x30d   : > { %v3972_v52 = vpop.eup %3971  ;;  %v2072_v31 = vmul.f32 %v3968_v12, %v1752_v35  ;;  %v1498_v6 = vmul.f32 %v6300_v51, %v1434_v34  ;;  %2766 = vmatprep.mubr.bf16.mxu1 %v2515_v0  ;;  %v2514_v59 = vpack.c.bf16 %v5990_v61, %v5956_v9  ;;  %v6337_v24 = vmul.f32 %v2390_v44, %v6199_v60  ;;  %v3493_v34 = vpop.f32.mrb[4].mxu1 }
 0x30e   : > { %v3974_v48 = vpop.eup %3973  ;;  %v1689_v23 = vadd.f32 0.2548296, %v1625_v5  ;;  %3981 = vrcp.f32 %v1117_v33  ;;  %v1821_v43 = vsub.f32 0.0, %v6311_v29  ;;  %vm2201_vm11 = vcmp.lt.f32.partialorder %v6211_v16, 0.0 }
 0x30f   : > { %v2136_v39 = vsub.f32 1.0, %v2072_v31  ;;  %v1562_v12 = vadd.f32 -0.28449672, %v1498_v6  ;;  %v1371_v58 = vmul.f32 %v6321_v18, %v1307_v7  ;;  %v2517_v32 = vpack.c.bf16 %v6146_v45, %v6069_v50 }
 0x310   : > { %v6344_v9 = vpop.eup %3975  ;;  %v2391_v61 = vadd.f32 1.0, %v2327_v17  ;;  %v1753_v60 = vmul.f32 %v6279_v19, %v1689_v23  ;;  %v2516_v40 = vpack.c.bf16 %v6720_v27, %v6719_v8  ;;  %v2519_v47 = vpack.c.bf16 %v6228_v55, %v6196_v15  ;;  %v6721_v8 = vld [vmem:[#allocation13_spill] sm:$0xff] }
 0x311   : > { %v2264_v26 = vsub.f32 0.0, %v2136_v39  ;;  %v1626_v41 = vmul.f32 %v6300_v51, %v1562_v12  ;;  %v1435_v44 = vadd.f32 1.4214138, %v1371_v58  ;;  %v1244_v50 = vmul.f32 1.0614054, %v6344_v9 }
 0x312   : > { %v2073_v45 = vmul.f32 %v3972_v52, %v1753_v60  ;;  %v2518_v19 = vpack.c.bf16 %v6207_v2, %v6165_v13  ;;  %v2521_v38 = vpack.c.bf16 %v6314_v21, %v6273_v46  ;;  %v2520_v15 = vpack.c.bf16 %v6282_v57, %v6231_v28  ;;  %v3494_v52 = vpop.f32.mrb[5].mxu1 }
 0x313   : > { %v2328_v55 = vsel %vm2200_vm10, %v2264_v26, %v2136_v39  ;;  %v1690_v36 = vadd.f32 0.2548296, %v1626_v41  ;;  %v1499_v0 = vmul.f32 %v6321_v18, %v1435_v44  ;;  %v1308_v35 = vadd.f32 -1.4531521, %v1244_v50  ;;  %v3496_v39 = vpop.f32.mrb[6].mxu1 }
 0x314   : > { %v2392_v62 = vadd.f32 1.0, %v2328_v55  ;;  %v2137_v17 = vsub.f32 1.0, %v2073_v45  ;;  %2767 = vmatmul.mubr.bf16.gmra.mrb[40].mxu1 %v2514_v59  ;;  %v3489_v5 = vadd.f32 %v3488_v56, %v3487_v22  ;;  %v2915_v33 = vunpack.c.l.bf16 %v2914_v10  ;;  %v3497_v56 = vpop.f32.mrb[7].mxu1 }
 0x315   : > { %v3978_v31 = vpop.eup %3977  ;;  %v1754_v6 = vmul.f32 %v6300_v51, %v1690_v36  ;;  %v1563_v7 = vadd.f32 -0.28449672, %v1499_v0  ;;  %v1372_v23 = vmul.f32 %v6344_v9, %v1308_v35  ;;  %2774 = vmatprep.mubr.bf16.mxu1 %v2517_v32  ;;  %v3492_v54 = vadd.f32 %v3491_v20, %v3490_v14 }
 0x316   : > { %v3980_v12 = vpop.eup %3979  ;;  %v6368_v58 = vmul.f32 %v2392_v62, %v6233_v30  ;;  %v2265_v60 = vsub.f32 0.0, %v2137_v17  ;;  %v6371_v27 = vrot.slane %v2915_v33, %v6721_v8  ;;  %v3495_v22 = vadd.f32 %v3494_v52, %v3493_v34 }
 0x317   : > { %v1627_v59 = vmul.f32 %v6321_v18, %v1563_v7  ;;  %v1436_v10 = vadd.f32 1.4214138, %v1372_v23  ;;  %v1885_v51 = vmul.f32 %v1821_v43, %v6311_v29  ;;  %v3498_v26 = vadd.f32 %v3497_v56, %v3496_v39 }
 0x318   : > { %v6375_v41 = vpop.eup %3981  ;;  %v2329_v14 = vsel %vm2201_vm11, %v2265_v60, %v2137_v17  ;;  %v2522_v30 = vpack.c.bf16 %v6368_v58, %v6337_v24  ;;  %v2920_v20 = vadd.f32 %v3489_v5, %v6371_v27  ;;  %v2921_v32 = vadd.f32 %v3492_v54, %v6371_v27 }
 0x319   : > { %v2393_v44 = vadd.f32 1.0, %v2329_v14  ;;  %v2074_v50 = vmul.f32 %v3974_v48, %v1754_v6  ;;  %v1691_v45 = vadd.f32 0.2548296, %v1627_v59  ;;  %v1500_v55 = vmul.f32 %v6344_v9, %v1436_v10  ;;  %v3499_v6 = vpop.f32.mrb[8].mxu1 }
 0x31a   : > { %v1245_v29 = vmul.f32 1.0614054, %v6375_v41  ;;  %v3379_v43 = vpack.c.bf16 %v2921_v32, %v2920_v20  ;;  %v2922_v36 = vadd.f32 %v3495_v22, %v6371_v27  ;;  %v2923_v16 = vadd.f32 %v3498_v26, %v6371_v27  ;;  %v3500_v54 = vpop.f32.mrb[9].mxu1 }
 0x31b   : > { %v2455_v0 = vmul.f32 %v2391_v61, %v6217_v4  ;;  %v2457_v35 = vmul.f32 %v2393_v44, %v6253_v25  ;;  %v1564_v34 = vadd.f32 -0.28449672, %v1500_v55  ;;  %v2138_v17 = vsub.f32 1.0, %v2074_v50  ;;  %v3502_v22 = vpop.f32.mrb[10].mxu1 }
 0x31c   : > { %v1309_v62 = vadd.f32 -1.4531521, %v1245_v29  ;;  %2775 = vmatmul.mubr.bf16.gmra.mrb[44].mxu1 %v2516_v40  ;;  %3380 = vst [vmem:[%s6391_s9] sm:$0xff] %v3379_v43   ;;  %v3384_v48 = vpack.c.bf16 %v2923_v16, %v2922_v36  ;;  %v2012_v33 = vmul.f32 1.442695, %v1885_v51  ;;  %v1755_v4 = vmul.f32 %v6321_v18, %v1691_v45  ;;  %v3503_v56 = vpop.f32.mrb[11].mxu1 }
 0x31d   : > { %v1628_v5 = vmul.f32 %v6344_v9, %v1564_v34  ;;  %2782 = vmatprep.mubr.bf16.mxu1 %v2519_v47  ;;  %v2523_v52 = vpack.c.bf16 %v2457_v35, %v2455_v0  ;;  %v2266_v7 = vsub.f32 0.0, %v2138_v17  ;;  %v3501_v8 = vadd.f32 %v3500_v54, %v3499_v6 }
 0x31e   : > { %v1373_v25 = vmul.f32 %v6375_v41, %v1309_v62  ;;  %3456 = vst [vmem:[%s6391_s9 + $0x8] sm:$0xff] %v3384_v48   ;;  %3983 = vpow2.f32 %v2012_v33  ;;  %v2075_v39 = vmul.f32 %v3978_v31, %v1755_v4  ;;  %vm2202_vm12 = vcmp.lt.f32.partialorder %v6240_v3, 0.0 }
 0x31f   : > { %v1692_v61 = vadd.f32 0.2548296, %v1628_v5  ;;  %v3504_v59 = vadd.f32 %v3503_v56, %v3502_v22  ;;  %v2330_v10 = vsel %vm2202_vm12, %v2266_v7, %v2138_v17  ;;  %vm2204_vm13 = vcmp.lt.f32.partialorder %v6285_v63, 0.0 }
 0x320   : > { %v1437_v40 = vadd.f32 1.4214138, %v1373_v25  ;;  %v2394_v14 = vadd.f32 1.0, %v2330_v10  ;;  %v860_v46 = vmul.f32 0.5, %v6270_v49  ;;  %vm2203_vm14 = vcmp.lt.f32.partialorder %v6261_v11, 0.0 }
 0x321   : > { %v1756_v23 = vmul.f32 %v6344_v9, %v1692_v61  ;;  %v2139_v9 = vsub.f32 1.0, %v2075_v39  ;;  %v2925_v3 = vadd.f32 %v3504_v59, %v6371_v27  ;;  %vm2205_vm15 = vcmp.lt.f32.partialorder %v6305_v53, 0.0 }
 0x322   : > { %v1501_v60 = vmul.f32 %v6375_v41, %v1437_v40  ;;  %v859_v36 = vmul.f32 0.5, %v6250_v37  ;;  %v861_v16 = vmul.f32 0.5, %v6295_v42 }
 0x323   : > { %v2076_v47 = vmul.f32 %v3980_v12, %v1756_v23  ;;  %v2924_v12 = vadd.f32 %v3501_v8, %v6371_v27  ;;  %v2267_v32 = vsub.f32 0.0, %v2139_v9 }
 0x324   : > { %v1565_v18 = vadd.f32 -0.28449672, %v1501_v60  ;;  %2783 = vmatmul.mubr.bf16.gmra.mrb[48].mxu1 %v2518_v19  ;;  %v858_v19 = vmul.f32 0.5, %v6223_v1 }
 0x325   : > { %v2140_v51 = vsub.f32 1.0, %v2076_v47  ;;  %2790 = vmatprep.mubr.bf16.mxu1 %v2521_v38  ;;  %v3389_v2 = vpack.c.bf16 %v2925_v3, %v2924_v12  ;;  %v2331_v1 = vsel %vm2203_vm14, %v2267_v32, %v2139_v9 }
 0x326   : > { %v1629_v31 = vmul.f32 %v6375_v41, %v1565_v18  ;;  %v2458_v50 = vmul.f32 %v2394_v14, %v858_v19  ;;  %v2395_v49 = vadd.f32 1.0, %v2331_v1 }
 0x327   : > { %v2268_v26 = vsub.f32 0.0, %v2140_v51  ;;  %3457 = vst [vmem:[%s6391_s9 + $0x10] sm:$0xff] %v3389_v2  }
 0x328   : > { %v1693_v13 = vadd.f32 0.2548296, %v1629_v31  ;;  %v3984_v44 = vpop.eup %3983  ;;  %v2459_v28 = vmul.f32 %v2395_v49, %v859_v36 }
 0x329   : > { %v2332_v20 = vsel %vm2204_vm13, %v2268_v26, %v2140_v51 }
 0x32a   : > { %v2396_v21 = vadd.f32 1.0, %v2332_v20  ;;  %v1757_v38 = vmul.f32 %v6375_v41, %v1693_v13 }
 0x32c   : > { %v2460_v45 = vmul.f32 %v2396_v21, %v860_v46  ;;  %v2077_v55 = vmul.f32 %v3984_v44, %v1757_v38  ;;  %2791 = vmatmul.mubr.bf16.gmra.mrb[52].mxu1 %v2520_v15 }
 0x32d   : > { %2798 = vmatprep.mubr.bf16.mxu1 %v2523_v52 }
 0x32e   : > { %v2141_v63 = vsub.f32 1.0, %v2077_v55  ;;  %v2524_v29 = vpack.c.bf16 %v2460_v45, %v2458_v50 }
 0x330   : > { %v2269_v43 = vsub.f32 0.0, %v2141_v63 }
 0x332   : > { %v2333_v41 = vsel %vm2205_vm15, %v2269_v43, %v2141_v63 }
 0x333   : > { %v2397_v0 = vadd.f32 1.0, %v2333_v41 }
 0x334   : > { %2799 = vmatmul.mubr.bf16.gmra.mrb[56].mxu1 %v2522_v30 }
 0x335   : > { %v2461_v11 = vmul.f32 %v2397_v0, %v861_v16 }
 0x337   : > { %v2525_v57 = vpack.c.bf16 %v2461_v11, %v2459_v28 }
 0x339   : > { %2806 = vmatprep.mubr.bf16.mxu1 %v2525_v57 }
 0x33c   : > { %2807 = vmatmul.mubr.bf16.gmra.mrb[60].mxu1 %v2524_v29 }
 0x33e   : > { %v3505_v15 = vpop.f32.mrb[12].mxu1 }
 0x33f   : > { %v3506_v35 = vpop.f32.mrb[13].mxu1 }
 0x340   : > { %v3507_v34 = vadd.f32 %v3506_v35, %v3505_v15  ;;  %v3508_v53 = vpop.f32.mrb[14].mxu1 }
 0x341   : > { %v3509_v62 = vpop.f32.mrb[15].mxu1 }
 0x342   : > { %v3510_v37 = vadd.f32 %v3509_v62, %v3508_v53  ;;  %v2926_v42 = vadd.f32 %v3507_v34, %v6371_v27 }
 0x344   : > { %v2927_v48 = vadd.f32 %v3510_v37, %v6371_v27 }
 0x346   : > { %v3394_v17 = vpack.c.bf16 %v2927_v48, %v2926_v42 }
 0x348   : > { %3458 = vst [vmem:[%s6391_s9 + $0x18] sm:$0xff] %v3394_v17  }
 0x352   : > { %v3511_v24 = vpop.f32.mrb[16].mxu1 }
 0x353   : > { %v3512_v58 = vpop.f32.mrb[17].mxu1 }
 0x354   : > { %v3513_v30 = vadd.f32 %v3512_v58, %v3511_v24  ;;  %v3514_v5 = vpop.f32.mrb[18].mxu1 }
 0x355   : > { %v3515_v33 = vpop.f32.mrb[19].mxu1 }
 0x356   : > { %v3516_v52 = vadd.f32 %v3515_v33, %v3514_v5  ;;  %v2928_v4 = vadd.f32 %v3513_v30, %v6371_v27 }
 0x358   : > { %v2929_v25 = vadd.f32 %v3516_v52, %v6371_v27 }
 0x35a   : > { %v3399_v61 = vpack.c.bf16 %v2929_v25, %v2928_v4 }
 0x35c   : > { %3459 = vst [vmem:[%s6391_s9 + $0x20] sm:$0xff] %v3399_v61  }
 0x37b   : > { %v3517_v40 = vpop.f32.mrb[20].mxu1 }
 0x37c   : > { %v3518_v6 = vpop.f32.mrb[21].mxu1 }
 0x37d   : > { %v3519_v7 = vadd.f32 %v3518_v6, %v3517_v40  ;;  %v3520_v23 = vpop.f32.mrb[22].mxu1 }
 0x37e   : > { %v3521_v54 = vpop.f32.mrb[23].mxu1 }
 0x37f   : > { %v3522_v39 = vadd.f32 %v3521_v54, %v3520_v23  ;;  %v2930_v60 = vadd.f32 %v3519_v7, %v6371_v27 }
 0x381   : > { %v2931_v8 = vadd.f32 %v3522_v39, %v6371_v27 }
 0x383   : > { %v3404_v22 = vpack.c.bf16 %v2931_v8, %v2930_v60 }
 0x385   : > { %3460 = vst [vmem:[%s6391_s9 + $0x28] sm:$0xff] %v3404_v22  }
 0x391   : > { %v3523_v47 = vpop.f32.mrb[24].mxu1 }
 0x392   : > { %v3524_v56 = vpop.f32.mrb[25].mxu1 }
 0x393   : > { %v3525_v18 = vadd.f32 %v3524_v56, %v3523_v47  ;;  %v3526_v59 = vpop.f32.mrb[26].mxu1 }
 0x394   : > { %v3527_v10 = vpop.f32.mrb[27].mxu1 }
 0x395   : > { %v3528_v51 = vadd.f32 %v3527_v10, %v3526_v59  ;;  %v2932_v9 = vadd.f32 %v3525_v18, %v6371_v27 }
 0x397   : > { %v2933_v31 = vadd.f32 %v3528_v51, %v6371_v27 }
 0x399   : > { %v3409_v12 = vpack.c.bf16 %v2933_v31, %v2932_v9 }
 0x39b   : > { %3461 = vst [vmem:[%s6391_s9 + $0x30] sm:$0xff] %v3409_v12  }
 0x3b5   : > { %v3529_v3 = vpop.f32.mrb[28].mxu1 }
 0x3b6   : > { %v3530_v26 = vpop.f32.mrb[29].mxu1 }
 0x3b7   : > { %v3531_v14 = vadd.f32 %v3530_v26, %v3529_v3  ;;  %v3532_v13 = vpop.f32.mrb[30].mxu1 }
 0x3b8   : > { %v3533_v2 = vpop.f32.mrb[31].mxu1 }
 0x3b9   : > { %v3534_v19 = vadd.f32 %v3533_v2, %v3532_v13  ;;  %v2934_v20 = vadd.f32 %v3531_v14, %v6371_v27 }
 0x3bb   : > { %v2935_v32 = vadd.f32 %v3534_v19, %v6371_v27 }
 0x3bd   : > { %v3414_v46 = vpack.c.bf16 %v2935_v32, %v2934_v20 }
 0x3bf   : > { %3462 = vst [vmem:[%s6391_s9 + $0x38] sm:$0xff] %v3414_v46  }
 0x3cc   : > { %v3535_v21 = vpop.f32.mrb[32].mxu1 }
 0x3cd   : > { %v3536_v38 = vpop.f32.mrb[33].mxu1 }
 0x3ce   : > { %v3537_v44 = vadd.f32 %v3536_v38, %v3535_v21  ;;  %v3538_v50 = vpop.f32.mrb[34].mxu1 }
 0x3cf   : > { %v3539_v45 = vpop.f32.mrb[35].mxu1 }
 0x3d0   : > { %v3540_v55 = vadd.f32 %v3539_v45, %v3538_v50  ;;  %v2936_v1 = vadd.f32 %v3537_v44, %v6371_v27 }
 0x3d2   : > { %v2937_v63 = vadd.f32 %v3540_v55, %v6371_v27 }
 0x3d4   : > { %v3419_v29 = vpack.c.bf16 %v2937_v63, %v2936_v1 }
 0x3d6   : > { %3463 = vst [vmem:[%s6391_s9 + $0x40] sm:$0xff] %v3419_v29  }
 0x3df   : > { %v3541_v43 = vpop.f32.mrb[36].mxu1 }
 0x3e0   : > { %v3542_v49 = vpop.f32.mrb[37].mxu1 }
 0x3e1   : > { %v3543_v41 = vadd.f32 %v3542_v49, %v3541_v43  ;;  %v3544_v36 = vpop.f32.mrb[38].mxu1 }
 0x3e2   : > { %v3545_v16 = vpop.f32.mrb[39].mxu1 }
 0x3e3   : > { %v3546_v0 = vadd.f32 %v3545_v16, %v3544_v36  ;;  %v2938_v28 = vadd.f32 %v3543_v41, %v6371_v27 }
 0x3e5   : > { %v2939_v11 = vadd.f32 %v3546_v0, %v6371_v27 }
 0x3e7   : > { %v3424_v57 = vpack.c.bf16 %v2939_v11, %v2938_v28  ;;  %v3547_v15 = vpop.f32.mrb[40].mxu1 }
 0x3e8   : > { %v3548_v35 = vpop.f32.mrb[41].mxu1 }
 0x3e9   : > { %3464 = vst [vmem:[%s6391_s9 + $0x48] sm:$0xff] %v3424_v57   ;;  %v3549_v34 = vadd.f32 %v3548_v35, %v3547_v15  ;;  %v3550_v53 = vpop.f32.mrb[42].mxu1 }
 0x3ea   : > { %v3551_v62 = vpop.f32.mrb[43].mxu1 }
 0x3eb   : > { %v3552_v37 = vadd.f32 %v3551_v62, %v3550_v53  ;;  %v2940_v42 = vadd.f32 %v3549_v34, %v6371_v27 }
 0x3ed   : > { %v2941_v48 = vadd.f32 %v3552_v37, %v6371_v27 }
 0x3ef   : > { %v3429_v17 = vpack.c.bf16 %v2941_v48, %v2940_v42  ;;  %v3553_v24 = vpop.f32.mrb[44].mxu1 }
 0x3f0   : > { %v3554_v58 = vpop.f32.mrb[45].mxu1 }
 0x3f1   : > { %3465 = vst [vmem:[%s6391_s9 + $0x50] sm:$0xff] %v3429_v17   ;;  %v3555_v30 = vadd.f32 %v3554_v58, %v3553_v24  ;;  %v3556_v5 = vpop.f32.mrb[46].mxu1 }
 0x3f2   : > { %v3557_v33 = vpop.f32.mrb[47].mxu1 }
 0x3f3   : > { %v3558_v52 = vadd.f32 %v3557_v33, %v3556_v5  ;;  %v2942_v4 = vadd.f32 %v3555_v30, %v6371_v27 }
 0x3f5   : > { %v2943_v25 = vadd.f32 %v3558_v52, %v6371_v27 }
 0x3f7   : > { %v3434_v61 = vpack.c.bf16 %v2943_v25, %v2942_v4  ;;  %v3559_v40 = vpop.f32.mrb[48].mxu1 }
 0x3f8   : > { %v3560_v6 = vpop.f32.mrb[49].mxu1 }
 0x3f9   : > { %3466 = vst [vmem:[%s6391_s9 + $0x58] sm:$0xff] %v3434_v61   ;;  %v3561_v7 = vadd.f32 %v3560_v6, %v3559_v40  ;;  %v3562_v23 = vpop.f32.mrb[50].mxu1 }
 0x3fa   : > { %v3563_v54 = vpop.f32.mrb[51].mxu1 }
 0x3fb   : > { %v3564_v39 = vadd.f32 %v3563_v54, %v3562_v23  ;;  %v2944_v60 = vadd.f32 %v3561_v7, %v6371_v27 }
 0x3fd   : > { %v2945_v8 = vadd.f32 %v3564_v39, %v6371_v27 }
 0x3ff   : > { %v3439_v22 = vpack.c.bf16 %v2945_v8, %v2944_v60  ;;  %v3565_v47 = vpop.f32.mrb[52].mxu1 }
 0x400   : > { %v3566_v56 = vpop.f32.mrb[53].mxu1 }
 0x401   : > { %3467 = vst [vmem:[%s6391_s9 + $0x60] sm:$0xff] %v3439_v22   ;;  %v3567_v18 = vadd.f32 %v3566_v56, %v3565_v47  ;;  %v3568_v59 = vpop.f32.mrb[54].mxu1 }
 0x402   : > { %v3569_v10 = vpop.f32.mrb[55].mxu1 }
 0x403   : > { %v3570_v51 = vadd.f32 %v3569_v10, %v3568_v59  ;;  %v2946_v9 = vadd.f32 %v3567_v18, %v6371_v27 }
 0x405   : > { %v2947_v31 = vadd.f32 %v3570_v51, %v6371_v27 }
 0x407   : > { %v3444_v12 = vpack.c.bf16 %v2947_v31, %v2946_v9  ;;  %v3571_v3 = vpop.f32.mrb[56].mxu1 }
 0x408   : > { %v3572_v26 = vpop.f32.mrb[57].mxu1 }
 0x409   : > { %3468 = vst [vmem:[%s6391_s9 + $0x68] sm:$0xff] %v3444_v12   ;;  %v3573_v14 = vadd.f32 %v3572_v26, %v3571_v3  ;;  %v3574_v13 = vpop.f32.mrb[58].mxu1 }
 0x40a   : > { %v3575_v2 = vpop.f32.mrb[59].mxu1 }
 0x40b   : > { %v3576_v19 = vadd.f32 %v3575_v2, %v3574_v13  ;;  %v2948_v20 = vadd.f32 %v3573_v14, %v6371_v27 }
 0x40d   : > { %v2949_v32 = vadd.f32 %v3576_v19, %v6371_v27 }
 0x40f   : > { %v3449_v46 = vpack.c.bf16 %v2949_v32, %v2948_v20  ;;  %v3577_v21 = vpop.f32.mrb[60].mxu1 }
 0x410   : > { %v3578_v38 = vpop.f32.mrb[61].mxu1 }
 0x411   : > { %3469 = vst [vmem:[%s6391_s9 + $0x70] sm:$0xff] %v3449_v46   ;;  %v3579_v44 = vadd.f32 %v3578_v38, %v3577_v21  ;;  %v3580_v50 = vpop.f32.mrb[62].mxu1 }
 0x412   : > { %v3581_v45 = vpop.f32.mrb[63].mxu1 }
 0x413   : > { %v3582_v55 = vadd.f32 %v3581_v45, %v3580_v50  ;;  %v2950_v1 = vadd.f32 %v3579_v44, %v6371_v27 }
 0x415   : > { %v2951_v63 = vadd.f32 %v3582_v55, %v6371_v27 }
 0x417   : > { %v3454_v29 = vpack.c.bf16 %v2951_v63, %v2950_v1 }
 0x419   : > { %3470 = vst [vmem:[%s6391_s9 + $0x78] sm:$0xff] %v3454_v29  }
 0x41a   : > { %4084 = shalt.err (!%p4081_p11)
}
 0x41b   : > { %s4085_s26 = scalar_lea.hbm %s6468_s7, 2048  ;;  %s4089_s6 = scalar_lea.hbm %s6525_s5, 4096 }
 0x41c   : > { %p4086_p0 = scmp.ne.s32.totalorder %s6468_s7, %s4085_s26  ;;  %p4090_p6 = scmp.lt.u32.totalorder %s6468_s7, %s6525_s5 }
 0x41d   : > { %p4091_p7 = scmp.lt.u32.totalorder %s4089_s6, %s4085_s26  ;;  %p4093_p8 = scmp.lt.u32.totalorder %s4085_s26, %s6468_s7 }
 0x41e   : > { %p4087_p4 = pnand %p4086_p0, %p6722_p12 }
 0x41f   : > { %p4092_p2 = por %p4091_p7, %p4090_p6 }
 0x420   : > { %p4088_p13 = pneg %p4087_p4 }
 0x421   : > { %p4094_p1 = por %p4093_p8, %p4092_p2 }
 0x423   : > { %p4095_p10 = pnand %p4094_p1, %p4088_p13 }
 0x425   : > { %4098 = shalt.err (!%p4095_p10)
}
 0x426   : > { %s4168_s10 = smov 64   ;;  %s4169_s16 = smov 4  }
 0x427   : > { %3593 = dma.vmem_to_hbm [thread:$0]  (%p6722_p12), %s6470_s13, 2048, %s6468_s7, %s3113_s14, %s4168_s10, %s4168_s10, %s4169_s16  }
 0x428 PF: > { %s3141_s27 = sand.u32 1, %s4137_s18   ;;  %p6723_p3 = scmp.ne.s32.totalorder %s6553_s29, 0 }
 0x429   : > { %p6724_p5 = scmp.ge.s32.totalorder %s4157_s23, 2  ;;  %s3142_s21 = scalar_lea.sflag [#allocation5], %s3141_s27 }
 0x42b   : > { %p3607_p9 = pnand %p6724_p5, %p6723_p3 }
 0x42d   : > { %4132 = dma.done.wait (!%p3607_p9), %s3142_s21, 2048  }
 0x42e   : > { %4134 = vsyncadd (!%p3607_p9), %s3142_s21, 4294965248  ;;  %s22_s23 = sadd.s32 1, %s4157_s23   ;;  %s6725_s18 = smov %s4141_s19 }
 0x42f   : > { %p19_p11 = scmp.ge.s32.totalorder %s22_s23, 4   ;;  %s6726_s19 = smov %s4145_s20 }
 0x430   : > { %s6727_s20 = smov %s4345_s17  ;;  %s6728_s21 = smov %s4153_s22 }
 0x431   : > { %s6729_s22 = smov %s6731_s12  ;;  %21 = sbr.rel (!%p19_p11) target bundleno = 7 (0x7), region = 106 }
 0x438   :  { %3147 = vsyncpa [#allocation4], 1 }
 0x439   :  { %3149 = vsyncpa [#allocation4 + $0x1], 1 }
 0x43a   :  { %3150 = vsyncpa [#allocation7], 1 }
 0x43b   :  { %3151 = vsyncpa [#allocation5], 1 }
 0x43c   :  { %3153 = vsyncpa [#allocation5 + $0x1], 1 }

</bundles_post_ra>
